<compile_context>
chip_gen: v6e
topology: v6e:2x2x1
jax: 0.10.0
libtpu: 0.0.40
codegen_flags: <defaults>
</compile_context>

<pallas_src>
import functools

import jax
import jax.numpy as jnp
from jax.experimental import pallas as pl
from jax.experimental.pallas import tpu as pltpu


_VMEM_LIMIT = 48 * 1024 * 1024   # explicit scoped-VMEM limit (safe on v5e/v6e/v7x)


def _round_up(x, m):
    return (x + m - 1) // m * m


def _pick_tile(p, pref):
    """Largest tile <= pref that divides p (p is a multiple of 128)."""
    if p <= pref:
        return p
    for t in (pref, 1024, 512, 256, 128):
        if t <= pref and p % t == 0:
            return t
    return 128


# ----------------------------------------------------------------------------
# Fused matmul + scale/shift (+ReLU) Pallas kernel  (conv-as-im2col / 1x1 conv)
# ----------------------------------------------------------------------------
def _fused_mm_kernel(x_ref, w_ref, scale_ref, shift_ref, o_ref, acc_ref, *, relu):
    k = pl.program_id(1)

    @pl.when(k == 0)
    def _():
        acc_ref[...] = jnp.zeros_like(acc_ref)

    acc_ref[...] += jnp.dot(x_ref[...], w_ref[...],
                            preferred_element_type=jnp.float32)

    @pl.when(k == pl.num_programs(1) - 1)
    def _():
        y = acc_ref[...] * scale_ref[...] + shift_ref[...]
        if relu:
            y = jnp.maximum(y, 0.0)
        o_ref[...] = y.astype(o_ref.dtype)


def fused_matmul(x, w, scale, shift, *, relu):
    """out = act((x @ w) * scale + shift).

    `w` is pre-padded to (Kp, Np) multiples of 128 and pre-cast to bf16;
    `scale`/`shift` are unpadded per-output-channel f32 vectors.
    """
    M, K = x.shape
    Kp, Np = w.shape
    N = scale.shape[-1]
    tm = _round_up(M, 16)                 # 16-row alignment for bf16 packing
    tk = _pick_tile(Kp, 2048)
    tn = _pick_tile(Np, 512)
    xp = jnp.pad(x, ((0, tm - M), (0, Kp - K))).astype(jnp.bfloat16)
    sp = jnp.pad(scale.reshape(1, N), ((0, 0), (0, Np - N)))
    bp = jnp.pad(shift.reshape(1, N), ((0, 0), (0, Np - N)))
    grid = (Np // tn, Kp // tk)

    out = pl.pallas_call(
        functools.partial(_fused_mm_kernel, relu=relu),
        out_shape=jax.ShapeDtypeStruct((tm, Np), jnp.float32),
        grid_spec=pltpu.PrefetchScalarGridSpec(
            num_scalar_prefetch=0,
            grid=grid,
            in_specs=[
                pl.BlockSpec((tm, tk), lambda j, k: (0, k)),
                pl.BlockSpec((tk, tn), lambda j, k: (k, j)),
                pl.BlockSpec((1, tn), lambda j, k: (0, j)),
                pl.BlockSpec((1, tn), lambda j, k: (0, j)),
            ],
            out_specs=pl.BlockSpec((tm, tn), lambda j, k: (0, j)),
            scratch_shapes=[pltpu.VMEM((tm, tn), jnp.float32)],
        ),
        compiler_params=pltpu.CompilerParams(
            dimension_semantics=("parallel", "arbitrary"),
            vmem_limit_bytes=_VMEM_LIMIT),
    )(xp, w, sp, bp)
    return out[:M, :N]


# ----------------------------------------------------------------------------
# Fused FC head: fc(256->4096) + ReLU, fc1(4096->4096) + ReLU, fc2(4096->nc)
# Single pallas_call; grid over 512-wide column blocks of fc1 (j kept parallel
# so v7x's two TensorCores split the dominant weight stream).  fc is recomputed
# per step (inputs stay VMEM-resident, M is tiny, so the recompute is cheaper
# than an extra kernel launch and keeps the grid embarrassingly parallel).
# ----------------------------------------------------------------------------
def _fc_head_kernel(feat_ref, wfc_ref, bfc_ref, wfc1_ref, bfc1_ref,
                    wfc2_ref, o_ref):
    h1 = jnp.dot(feat_ref[...], wfc_ref[...],
                 preferred_element_type=jnp.float32)
    h1 = jnp.maximum(h1 + bfc_ref[...], 0.0).astype(jnp.bfloat16)
    h2 = jnp.dot(h1, wfc1_ref[...], preferred_element_type=jnp.float32)
    h2 = jnp.maximum(h2 + bfc1_ref[...], 0.0).astype(jnp.bfloat16)
    # Partial logits contribution from this fc1 column block / fc2 row block.
    o_ref[...] = jnp.dot(h2, wfc2_ref[...], preferred_element_type=jnp.float32)


def fused_fc_head(feat, pfc, pfc1, pfc2, *, tn=512):
    B, K = feat.shape
    Kp, H = pfc["w"].shape        # (256, 4096)   padded bf16
    H1, H2 = pfc1["w"].shape      # (4096, 4096)  padded bf16
    K2, NCp = pfc2["w"].shape     # (4096, 128)   padded bf16
    assert H == H1 and H2 == K2
    nc = pfc2["b"].shape[-1]
    tm = _round_up(B, 16)
    assert H2 % tn == 0

    featp = jnp.pad(feat, ((0, tm - B), (0, Kp - K))).astype(jnp.bfloat16)
    bfc = jnp.pad(pfc["b"], (0, H - pfc["b"].shape[-1])).reshape(1, H)
    bfc1 = jnp.pad(pfc1["b"], (0, H2 - pfc1["b"].shape[-1])).reshape(1, H2)

    partial = pl.pallas_call(
        _fc_head_kernel,
        out_shape=jax.ShapeDtypeStruct((H2 // tn, tm, NCp), jnp.float32),
        grid_spec=pltpu.PrefetchScalarGridSpec(
            num_scalar_prefetch=0,
            grid=(H2 // tn,),
            in_specs=[
                pl.BlockSpec((tm, Kp), lambda j: (0, 0)),
                pl.BlockSpec((Kp, H), lambda j: (0, 0)),
                pl.BlockSpec((1, H), lambda j: (0, 0)),
                pl.BlockSpec((H1, tn), lambda j: (0, j)),
                pl.BlockSpec((1, tn), lambda j: (0, j)),
                pl.BlockSpec((tn, NCp), lambda j: (j, 0)),
            ],
            out_specs=pl.BlockSpec((None, tm, NCp), lambda j: (j, 0, 0)),
        ),
        compiler_params=pltpu.CompilerParams(
            dimension_semantics=("parallel",),
            vmem_limit_bytes=_VMEM_LIMIT),
    )(featp, pfc["w"], bfc, pfc1["w"], bfc1, pfc2["w"])

    logits = jnp.sum(partial, axis=0)[:B, :nc] + pfc2["b"]
    return logits


# ----------------------------------------------------------------------------
# MaxPool Pallas kernel (max over pre-extracted k*k windows)
# ----------------------------------------------------------------------------
def _maxpool_kernel(w_ref, o_ref):
    o_ref[...] = jnp.max(w_ref[...], axis=0)


def maxpool_windows(wins):
    # Whole-array block: fine at the tiny sizes used here (batch=2).
    KK, M, C = wins.shape
    return pl.pallas_call(
        _maxpool_kernel,
        out_shape=jax.ShapeDtypeStruct((M, C), wins.dtype),
    )(wins)


# ----------------------------------------------------------------------------
# Glue: patch / window extraction (trace-time python loops)
# ----------------------------------------------------------------------------
def im2col(x, k, stride, pad):
    N, H, W, C = x.shape
    xp = jnp.pad(x, ((0, 0), (pad, pad), (pad, pad), (0, 0)))
    OH = (H + 2 * pad - k) // stride + 1
    OW = (W + 2 * pad - k) // stride + 1
    cols = []
    for i in range(k):
        for j in range(k):
            cols.append(xp[:, i:i + stride * OH:stride,
                           j:j + stride * OW:stride, :])
    patches = jnp.stack(cols, axis=3)           # (N, OH, OW, k*k, C)
    return patches.reshape(N * OH * OW, k * k * C), (N, OH, OW)


def pool_windows(x, k, stride):
    N, H, W, C = x.shape
    OH = (H - k) // stride + 1
    OW = (W - k) // stride + 1
    wins = []
    for i in range(k):
        for j in range(k):
            wins.append(x[:, i:i + stride * OH:stride,
                          j:j + stride * OW:stride, :])
    w = jnp.stack(wins, axis=0)                 # (k*k, N, OH, OW, C)
    return w.reshape(k * k, N * OH * OW, C), (N, OH, OW)


# ----------------------------------------------------------------------------
# Parameters (deterministic, synthetic).  BN folded into per-channel scale/shift.
# Weights are pre-padded to tile-aligned shapes and pre-cast to bf16 here, once.
# ----------------------------------------------------------------------------
def make_params(key, num_classes=10):
    it = iter(jax.random.split(key, 40))

    def conv_bn(in_c, out_c, k, center_only=False):
        w = jax.random.normal(next(it), (out_c, in_c, k, k), jnp.float32)
        w = w * (1.0 / (in_c * k * k)) ** 0.5
        b = 0.1 * jax.random.normal(next(it), (out_c,), jnp.float32)
        gamma = 1.0 + 0.1 * jax.random.normal(next(it), (out_c,), jnp.float32)
        beta = 0.1 * jax.random.normal(next(it), (out_c,), jnp.float32)
        mean = 0.1 * jax.random.normal(next(it), (out_c,), jnp.float32)
        var = jax.random.uniform(next(it), (out_c,), jnp.float32, 0.5, 1.5)
        eps = 1e-5
        scale = gamma / jnp.sqrt(var + eps)      # folded eval-mode BN
        shift = beta + scale * (b - mean)
        if center_only:
            # 3x3/s1/p1 conv applied to a 1x1 spatial input: every tap except
            # the centre multiplies zero padding, so the layer is exactly a
            # plain matmul with the centre-tap weight.
            wmat = jnp.transpose(w[:, :, k // 2, k // 2], (1, 0))  # (inC,outC)
        else:
            # (outC,inC,kh,kw) -> (kh*kw*inC, outC) matching im2col ordering.
            wmat = jnp.transpose(w, (2, 3, 1, 0)).reshape(k * k * in_c, out_c)
        K, N = wmat.shape
        Kp, Np = _round_up(K, 128), _round_up(N, 128)
        wmat = jnp.pad(wmat, ((0, Kp - K), (0, Np - N))).astype(jnp.bfloat16)
        return {"w": wmat, "scale": scale, "shift": shift}

    def linear(in_f, out_f):
        w = jax.random.normal(next(it), (out_f, in_f), jnp.float32)
        w = w * (1.0 / in_f) ** 0.5
        b = 0.1 * jax.random.normal(next(it), (out_f,), jnp.float32)
        Kp, Np = _round_up(in_f, 128), _round_up(out_f, 128)
        wmat = jnp.pad(w.T, ((0, Kp - in_f), (0, Np - out_f))).astype(jnp.bfloat16)
        return {"w": wmat, "b": b}

    return {
        "l1": conv_bn(1, 64, 11),
        "l2": conv_bn(64, 192, 5),
        "l3": conv_bn(192, 384, 3, center_only=True),
        "l4": conv_bn(384, 256, 3, center_only=True),
        "l5": conv_bn(256, 256, 3, center_only=True),
        "fc": linear(256, 4096),
        "fc1": linear(4096, 4096),
        "fc2": linear(4096, num_classes),
    }


# ----------------------------------------------------------------------------
# Forward pass
# ----------------------------------------------------------------------------
def alexnet_forward(params, x_nchw):
    x = jnp.transpose(x_nchw, (0, 2, 3, 1))     # NCHW -> NHWC

    def conv_block(x, p, k, stride, pad, pool):
        patches, (N, OH, OW) = im2col(x, k, stride, pad)
        y = fused_matmul(patches, p["w"], p["scale"], p["shift"], relu=True)
        y = y.reshape(N, OH, OW, -1)
        if pool:
            wins, (N2, PH, PW) = pool_windows(y, 3, 2)
            y = maxpool_windows(wins).reshape(N2, PH, PW, -1)
        return y

    y = conv_block(x, params["l1"], 11, 4, 2, True)   # -> (N, 3, 3, 64)
    y = conv_block(y, params["l2"], 5, 1, 2, True)    # -> (N, 1, 1, 192)

    # Layers 3-5: spatial is 1x1, padding=1 -> only the centre tap contributes;
    # lowered to plain fused matmuls (numerically identical).
    assert y.shape[1] == 1 and y.shape[2] == 1
    f = y.reshape(y.shape[0], -1)                                     # (N, 192)
    f = fused_matmul(f, params["l3"]["w"], params["l3"]["scale"],
                     params["l3"]["shift"], relu=True)                # (N, 384)
    f = fused_matmul(f, params["l4"]["w"], params["l4"]["scale"],
                     params["l4"]["shift"], relu=True)                # (N, 256)
    feat = fused_matmul(f, params["l5"]["w"], params["l5"]["scale"],
                        params["l5"]["shift"], relu=True)             # (N, 256)

    # out.reshape(out.size(0), -1): final spatial is 1x1 so NHWC flatten
    # matches PyTorch's NCHW flatten exactly -> (N, 256).
    # Dropout layers are identity in eval mode.
    return fused_fc_head(feat, params["fc"], params["fc1"], params["fc2"])


if __name__ == "__main__":
    key = jax.random.PRNGKey(0)
    pkey, xkey = jax.random.split(key)
    num_classes = 10
    params = make_params(pkey, num_classes=num_classes)

    # MNIST-style input resized to 32x32 so the conv trunk ends at 1x1x256,
    # matching nn.Linear(256, 4096).  PyTorch layout: NCHW.
    x = jax.random.normal(xkey, (2, 1, 32, 32), jnp.float32)

    fwd = jax.jit(alexnet_forward)
    out = fwd(params, x)
    jax.block_until_ready(out)
    assert out.shape == (2, num_classes), out.shape
    assert bool(jnp.all(jnp.isfinite(out)))
    print("KERNEL_OK")
</pallas_src>

<mosaic_0001>
module attributes {stable_mosaic.version = 11 : i64} {
  func.func @_fused_mm_kernel(%arg0: i32, %arg1: i32, %arg2: memref<112x128xbf16, #tpu.memory_space<vmem>>, %arg3: memref<128x128xbf16, #tpu.memory_space<vmem>>, %arg4: memref<1x128xf32, #tpu.memory_space<vmem>>, %arg5: memref<1x128xf32, #tpu.memory_space<vmem>>, %arg6: memref<112x128xf32, #tpu.memory_space<vmem>>, %arg7: memref<112x128xf32, #tpu.memory_space<vmem>>) attributes {dimension_semantics = [#tpu.dimension_semantics<parallel>, #tpu.dimension_semantics<arbitrary>], iteration_bounds = array<i64: 1, 1>, scalar_prefetch = 0 : i64, scratch_operands = 1 : i64, tpu.core_type = #tpu.core_type<tc>, window_params = [{transform_indices = @transform_0, window_bounds = array<i64: 112, 128>}, {transform_indices = @transform_1, window_bounds = array<i64: 128, 128>}, {transform_indices = @transform_2, window_bounds = array<i64: 1, 128>}, {transform_indices = @transform_3, window_bounds = array<i64: 1, 128>}, {transform_indices = @transform_4, window_bounds = array<i64: 112, 128>}]} {
    %c0_i32 = arith.constant 0 : i32
    %0 = arith.cmpi eq, %arg1, %c0_i32 : i32
    %1 = arith.extui %0 : i1 to i32
    %c0_i32_0 = arith.constant 0 : i32
    %2 = arith.cmpi ne, %1, %c0_i32_0 : i32
    scf.if %2 {
      %cst_10 = arith.constant 0.000000e+00 : f32
      %12 = vector.broadcast %cst_10 : f32 to vector<112x128xf32>
      %c0_11 = arith.constant 0 : index
      %c0_12 = arith.constant 0 : index
      %13 = vector.load %arg7[%c0_11, %c0_12] : memref<112x128xf32, #tpu.memory_space<vmem>>, vector<112x128xf32>
      tpu.vector_store %arg7[%c0_11, %c0_12], %12 {strides = array<i32>} : memref<112x128xf32, #tpu.memory_space<vmem>>, vector<112x128xf32>,
    } else {
    }
    %c0 = arith.constant 0 : index
    %c0_1 = arith.constant 0 : index
    %3 = vector.load %arg7[%c0, %c0_1] : memref<112x128xf32, #tpu.memory_space<vmem>>, vector<112x128xf32>
    %c0_2 = arith.constant 0 : index
    %c0_3 = arith.constant 0 : index
    %4 = vector.load %arg2[%c0_2, %c0_3] : memref<112x128xbf16, #tpu.memory_space<vmem>>, vector<112x128xbf16>
    %c0_4 = arith.constant 0 : index
    %c0_5 = arith.constant 0 : index
    %5 = vector.load %arg3[%c0_4, %c0_5] : memref<128x128xbf16, #tpu.memory_space<vmem>>, vector<128x128xbf16>
    %cst = arith.constant dense<0.000000e+00> : vector<112x128xf32>
    %6 = tpu.matmul %4, %5, %cst {dimension_numbers = #tpu.dot_dimension_numbers<[1], [0], [0], [1], [0, 0, 1, 1], [], []>} : vector<112x128xbf16>, vector<128x128xbf16>, vector<112x128xf32> -> vector<112x128xf32>
    %7 = arith.addf %3, %6 : vector<112x128xf32>
    %c0_6 = arith.constant 0 : index
    %c0_7 = arith.constant 0 : index
    %8 = vector.load %arg7[%c0_6, %c0_7] : memref<112x128xf32, #tpu.memory_space<vmem>>, vector<112x128xf32>
    tpu.vector_store %arg7[%c0_6, %c0_7], %7 {strides = array<i32>} : memref<112x128xf32, #tpu.memory_space<vmem>>, vector<112x128xf32>,
    %c0_i32_8 = arith.constant 0 : i32
    %9 = arith.cmpi eq, %arg1, %c0_i32_8 : i32
    %10 = arith.extui %9 : i1 to i32
    %c0_i32_9 = arith.constant 0 : i32
    %11 = arith.cmpi ne, %10, %c0_i32_9 : i32
    scf.if %11 {
      %c0_10 = arith.constant 0 : index
      %c0_11 = arith.constant 0 : index
      %12 = vector.load %arg7[%c0_10, %c0_11] : memref<112x128xf32, #tpu.memory_space<vmem>>, vector<112x128xf32>
      %c0_12 = arith.constant 0 : index
      %c0_13 = arith.constant 0 : index
      %13 = vector.load %arg4[%c0_12, %c0_13] : memref<1x128xf32, #tpu.memory_space<vmem>>, vector<1x128xf32>
      %14 = vector.broadcast %13 : vector<1x128xf32> to vector<112x128xf32>
      %15 = arith.mulf %12, %14 : vector<112x128xf32>
      %c0_14 = arith.constant 0 : index
      %c0_15 = arith.constant 0 : index
      %16 = vector.load %arg5[%c0_14, %c0_15] : memref<1x128xf32, #tpu.memory_space<vmem>>, vector<1x128xf32>
      %17 = vector.broadcast %16 : vector<1x128xf32> to vector<112x128xf32>
      %18 = arith.addf %15, %17 : vector<112x128xf32>
      %cst_16 = arith.constant 0.000000e+00 : f32
      %19 = vector.broadcast %cst_16 : f32 to vector<112x128xf32>
      %20 = arith.maximumf %18, %19 : vector<112x128xf32>
      %c0_17 = arith.constant 0 : index
      %c0_18 = arith.constant 0 : index
      %21 = vector.load %arg6[%c0_17, %c0_18] : memref<112x128xf32, #tpu.memory_space<vmem>>, vector<112x128xf32>
      tpu.vector_store %arg6[%c0_17, %c0_18], %20 {strides = array<i32>} : memref<112x128xf32, #tpu.memory_space<vmem>>, vector<112x128xf32>,
    } else {
    }
    return
  }
  func.func @transform_0(%arg0: i32, %arg1: i32) -> (i32, i32) {
    %c0_i32 = arith.constant 0 : i32
    %c0_i32_0 = arith.constant 0 : i32
    return %c0_i32, %arg1 : i32, i32
  }
  func.func @transform_1(%arg0: i32, %arg1: i32) -> (i32, i32) {
    %c0_i32 = arith.constant 0 : i32
    return %arg1, %arg0 : i32, i32
  }
  func.func @transform_2(%arg0: i32, %arg1: i32) -> (i32, i32) {
    %c0_i32 = arith.constant 0 : i32
    %c0_i32_0 = arith.constant 0 : i32
    return %c0_i32, %arg0 : i32, i32
  }
  func.func @transform_3(%arg0: i32, %arg1: i32) -> (i32, i32) {
    %c0_i32 = arith.constant 0 : i32
    %c0_i32_0 = arith.constant 0 : i32
    return %c0_i32, %arg0 : i32, i32
  }
  func.func @transform_4(%arg0: i32, %arg1: i32) -> (i32, i32) {
    %c0_i32 = arith.constant 0 : i32
    %c0_i32_0 = arith.constant 0 : i32
    return %c0_i32, %arg0 : i32, i32
  }
}

module attributes {stable_mosaic.version = 11 : i64} {
  func.func @_maxpool_kernel(%arg0: memref<9x18x64xf32, #tpu.memory_space<vmem>>, %arg1: memref<18x64xf32, #tpu.memory_space<vmem>>) attributes {dimension_semantics = [], scalar_prefetch = 0 : i64, scratch_operands = 0 : i64, tpu.core_type = #tpu.core_type<tc>} {
    %c0 = arith.constant 0 : index
    %c0_0 = arith.constant 0 : index
    %c0_1 = arith.constant 0 : index
    %0 = vector.load %arg0[%c0, %c0_0, %c0_1] : memref<9x18x64xf32, #tpu.memory_space<vmem>>, vector<9x18x64xf32>
    %cst = arith.constant dense<0xFF800000> : vector<18x64xf32>
    %1 = vector.multi_reduction <maximumf>, %0, %cst [0] : vector<9x18x64xf32> to vector<18x64xf32>
    %c0_2 = arith.constant 0 : index
    %c0_3 = arith.constant 0 : index
    %2 = vector.load %arg1[%c0_2, %c0_3] : memref<18x64xf32, #tpu.memory_space<vmem>>, vector<18x64xf32>
    tpu.vector_store %arg1[%c0_2, %c0_3], %1 {strides = array<i32>} : memref<18x64xf32, #tpu.memory_space<vmem>>, vector<18x64xf32>,
    return
  }
}

module attributes {stable_mosaic.version = 11 : i64} {
  func.func @_fused_mm_kernel(%arg0: i32, %arg1: i32, %arg2: memref<32x1664xbf16, #tpu.memory_space<vmem>>, %arg3: memref<1664x256xbf16, #tpu.memory_space<vmem>>, %arg4: memref<1x256xf32, #tpu.memory_space<vmem>>, %arg5: memref<1x256xf32, #tpu.memory_space<vmem>>, %arg6: memref<32x256xf32, #tpu.memory_space<vmem>>, %arg7: memref<32x256xf32, #tpu.memory_space<vmem>>) attributes {dimension_semantics = [#tpu.dimension_semantics<parallel>, #tpu.dimension_semantics<arbitrary>], iteration_bounds = array<i64: 1, 1>, scalar_prefetch = 0 : i64, scratch_operands = 1 : i64, tpu.core_type = #tpu.core_type<tc>, window_params = [{transform_indices = @transform_0, window_bounds = array<i64: 32, 1664>}, {transform_indices = @transform_1, window_bounds = array<i64: 1664, 256>}, {transform_indices = @transform_2, window_bounds = array<i64: 1, 256>}, {transform_indices = @transform_3, window_bounds = array<i64: 1, 256>}, {transform_indices = @transform_4, window_bounds = array<i64: 32, 256>}]} {
    %c0_i32 = arith.constant 0 : i32
    %0 = arith.cmpi eq, %arg1, %c0_i32 : i32
    %1 = arith.extui %0 : i1 to i32
    %c0_i32_0 = arith.constant 0 : i32
    %2 = arith.cmpi ne, %1, %c0_i32_0 : i32
    scf.if %2 {
      %cst_10 = arith.constant 0.000000e+00 : f32
      %12 = vector.broadcast %cst_10 : f32 to vector<32x256xf32>
      %c0_11 = arith.constant 0 : index
      %c0_12 = arith.constant 0 : index
      %13 = vector.load %arg7[%c0_11, %c0_12] : memref<32x256xf32, #tpu.memory_space<vmem>>, vector<32x256xf32>
      tpu.vector_store %arg7[%c0_11, %c0_12], %12 {strides = array<i32>} : memref<32x256xf32, #tpu.memory_space<vmem>>, vector<32x256xf32>,
    } else {
    }
    %c0 = arith.constant 0 : index
    %c0_1 = arith.constant 0 : index
    %3 = vector.load %arg7[%c0, %c0_1] : memref<32x256xf32, #tpu.memory_space<vmem>>, vector<32x256xf32>
    %c0_2 = arith.constant 0 : index
    %c0_3 = arith.constant 0 : index
    %4 = vector.load %arg2[%c0_2, %c0_3] : memref<32x1664xbf16, #tpu.memory_space<vmem>>, vector<32x1664xbf16>
    %c0_4 = arith.constant 0 : index
    %c0_5 = arith.constant 0 : index
    %5 = vector.load %arg3[%c0_4, %c0_5] : memref<1664x256xbf16, #tpu.memory_space<vmem>>, vector<1664x256xbf16>
    %cst = arith.constant dense<0.000000e+00> : vector<32x256xf32>
    %6 = tpu.matmul %4, %5, %cst {dimension_numbers = #tpu.dot_dimension_numbers<[1], [0], [0], [1], [0, 0, 1, 1], [], []>} : vector<32x1664xbf16>, vector<1664x256xbf16>, vector<32x256xf32> -> vector<32x256xf32>
    %7 = arith.addf %3, %6 : vector<32x256xf32>
    %c0_6 = arith.constant 0 : index
    %c0_7 = arith.constant 0 : index
    %8 = vector.load %arg7[%c0_6, %c0_7] : memref<32x256xf32, #tpu.memory_space<vmem>>, vector<32x256xf32>
    tpu.vector_store %arg7[%c0_6, %c0_7], %7 {strides = array<i32>} : memref<32x256xf32, #tpu.memory_space<vmem>>, vector<32x256xf32>,
    %c0_i32_8 = arith.constant 0 : i32
    %9 = arith.cmpi eq, %arg1, %c0_i32_8 : i32
    %10 = arith.extui %9 : i1 to i32
    %c0_i32_9 = arith.constant 0 : i32
    %11 = arith.cmpi ne, %10, %c0_i32_9 : i32
    scf.if %11 {
      %c0_10 = arith.constant 0 : index
      %c0_11 = arith.constant 0 : index
      %12 = vector.load %arg7[%c0_10, %c0_11] : memref<32x256xf32, #tpu.memory_space<vmem>>, vector<32x256xf32>
      %c0_12 = arith.constant 0 : index
      %c0_13 = arith.constant 0 : index
      %13 = vector.load %arg4[%c0_12, %c0_13] : memref<1x256xf32, #tpu.memory_space<vmem>>, vector<1x256xf32>
      %14 = vector.broadcast %13 : vector<1x256xf32> to vector<32x256xf32>
      %15 = arith.mulf %12, %14 : vector<32x256xf32>
      %c0_14 = arith.constant 0 : index
      %c0_15 = arith.constant 0 : index
      %16 = vector.load %arg5[%c0_14, %c0_15] : memref<1x256xf32, #tpu.memory_space<vmem>>, vector<1x256xf32>
      %17 = vector.broadcast %16 : vector<1x256xf32> to vector<32x256xf32>
      %18 = arith.addf %15, %17 : vector<32x256xf32>
      %cst_16 = arith.constant 0.000000e+00 : f32
      %19 = vector.broadcast %cst_16 : f32 to vector<32x256xf32>
      %20 = arith.maximumf %18, %19 : vector<32x256xf32>
      %c0_17 = arith.constant 0 : index
      %c0_18 = arith.constant 0 : index
      %21 = vector.load %arg6[%c0_17, %c0_18] : memref<32x256xf32, #tpu.memory_space<vmem>>, vector<32x256xf32>
      tpu.vector_store %arg6[%c0_17, %c0_18], %20 {strides = array<i32>} : memref<32x256xf32, #tpu.memory_space<vmem>>, vector<32x256xf32>,
    } else {
    }
    return
  }
  func.func @transform_0(%arg0: i32, %arg1: i32) -> (i32, i32) {
    %c0_i32 = arith.constant 0 : i32
    %c0_i32_0 = arith.constant 0 : i32
    return %c0_i32, %arg1 : i32, i32
  }
  func.func @transform_1(%arg0: i32, %arg1: i32) -> (i32, i32) {
    %c0_i32 = arith.constant 0 : i32
    return %arg1, %arg0 : i32, i32
  }
  func.func @transform_2(%arg0: i32, %arg1: i32) -> (i32, i32) {
    %c0_i32 = arith.constant 0 : i32
    %c0_i32_0 = arith.constant 0 : i32
    return %c0_i32, %arg0 : i32, i32
  }
  func.func @transform_3(%arg0: i32, %arg1: i32) -> (i32, i32) {
    %c0_i32 = arith.constant 0 : i32
    %c0_i32_0 = arith.constant 0 : i32
    return %c0_i32, %arg0 : i32, i32
  }
  func.func @transform_4(%arg0: i32, %arg1: i32) -> (i32, i32) {
    %c0_i32 = arith.constant 0 : i32
    %c0_i32_0 = arith.constant 0 : i32
    return %c0_i32, %arg0 : i32, i32
  }
}

module attributes {stable_mosaic.version = 11 : i64} {
  func.func @_fused_mm_kernel(%arg0: i32, %arg1: i32, %arg2: memref<16x256xbf16, #tpu.memory_space<vmem>>, %arg3: memref<256x384xbf16, #tpu.memory_space<vmem>>, %arg4: memref<1x384xf32, #tpu.memory_space<vmem>>, %arg5: memref<1x384xf32, #tpu.memory_space<vmem>>, %arg6: memref<16x384xf32, #tpu.memory_space<vmem>>, %arg7: memref<16x384xf32, #tpu.memory_space<vmem>>) attributes {dimension_semantics = [#tpu.dimension_semantics<parallel>, #tpu.dimension_semantics<arbitrary>], iteration_bounds = array<i64: 1, 1>, scalar_prefetch = 0 : i64, scratch_operands = 1 : i64, tpu.core_type = #tpu.core_type<tc>, window_params = [{transform_indices = @transform_0, window_bounds = array<i64: 16, 256>}, {transform_indices = @transform_1, window_bounds = array<i64: 256, 384>}, {transform_indices = @transform_2, window_bounds = array<i64: 1, 384>}, {transform_indices = @transform_3, window_bounds = array<i64: 1, 384>}, {transform_indices = @transform_4, window_bounds = array<i64: 16, 384>}]} {
    %c0_i32 = arith.constant 0 : i32
    %0 = arith.cmpi eq, %arg1, %c0_i32 : i32
    %1 = arith.extui %0 : i1 to i32
    %c0_i32_0 = arith.constant 0 : i32
    %2 = arith.cmpi ne, %1, %c0_i32_0 : i32
    scf.if %2 {
      %cst_10 = arith.constant 0.000000e+00 : f32
      %12 = vector.broadcast %cst_10 : f32 to vector<16x384xf32>
      %c0_11 = arith.constant 0 : index
      %c0_12 = arith.constant 0 : index
      %13 = vector.load %arg7[%c0_11, %c0_12] : memref<16x384xf32, #tpu.memory_space<vmem>>, vector<16x384xf32>
      tpu.vector_store %arg7[%c0_11, %c0_12], %12 {strides = array<i32>} : memref<16x384xf32, #tpu.memory_space<vmem>>, vector<16x384xf32>,
    } else {
    }
    %c0 = arith.constant 0 : index
    %c0_1 = arith.constant 0 : index
    %3 = vector.load %arg7[%c0, %c0_1] : memref<16x384xf32, #tpu.memory_space<vmem>>, vector<16x384xf32>
    %c0_2 = arith.constant 0 : index
    %c0_3 = arith.constant 0 : index
    %4 = vector.load %arg2[%c0_2, %c0_3] : memref<16x256xbf16, #tpu.memory_space<vmem>>, vector<16x256xbf16>
    %c0_4 = arith.constant 0 : index
    %c0_5 = arith.constant 0 : index
    %5 = vector.load %arg3[%c0_4, %c0_5] : memref<256x384xbf16, #tpu.memory_space<vmem>>, vector<256x384xbf16>
    %cst = arith.constant dense<0.000000e+00> : vector<16x384xf32>
    %6 = tpu.matmul %4, %5, %cst {dimension_numbers = #tpu.dot_dimension_numbers<[1], [0], [0], [1], [0, 0, 1, 1], [], []>} : vector<16x256xbf16>, vector<256x384xbf16>, vector<16x384xf32> -> vector<16x384xf32>
    %7 = arith.addf %3, %6 : vector<16x384xf32>
    %c0_6 = arith.constant 0 : index
    %c0_7 = arith.constant 0 : index
    %8 = vector.load %arg7[%c0_6, %c0_7] : memref<16x384xf32, #tpu.memory_space<vmem>>, vector<16x384xf32>
    tpu.vector_store %arg7[%c0_6, %c0_7], %7 {strides = array<i32>} : memref<16x384xf32, #tpu.memory_space<vmem>>, vector<16x384xf32>,
    %c0_i32_8 = arith.constant 0 : i32
    %9 = arith.cmpi eq, %arg1, %c0_i32_8 : i32
    %10 = arith.extui %9 : i1 to i32
    %c0_i32_9 = arith.constant 0 : i32
    %11 = arith.cmpi ne, %10, %c0_i32_9 : i32
    scf.if %11 {
      %c0_10 = arith.constant 0 : index
      %c0_11 = arith.constant 0 : index
      %12 = vector.load %arg7[%c0_10, %c0_11] : memref<16x384xf32, #tpu.memory_space<vmem>>, vector<16x384xf32>
      %c0_12 = arith.constant 0 : index
      %c0_13 = arith.constant 0 : index
      %13 = vector.load %arg4[%c0_12, %c0_13] : memref<1x384xf32, #tpu.memory_space<vmem>>, vector<1x384xf32>
      %14 = vector.broadcast %13 : vector<1x384xf32> to vector<16x384xf32>
      %15 = arith.mulf %12, %14 : vector<16x384xf32>
      %c0_14 = arith.constant 0 : index
      %c0_15 = arith.constant 0 : index
      %16 = vector.load %arg5[%c0_14, %c0_15] : memref<1x384xf32, #tpu.memory_space<vmem>>, vector<1x384xf32>
      %17 = vector.broadcast %16 : vector<1x384xf32> to vector<16x384xf32>
      %18 = arith.addf %15, %17 : vector<16x384xf32>
      %cst_16 = arith.constant 0.000000e+00 : f32
      %19 = vector.broadcast %cst_16 : f32 to vector<16x384xf32>
      %20 = arith.maximumf %18, %19 : vector<16x384xf32>
      %c0_17 = arith.constant 0 : index
      %c0_18 = arith.constant 0 : index
      %21 = vector.load %arg6[%c0_17, %c0_18] : memref<16x384xf32, #tpu.memory_space<vmem>>, vector<16x384xf32>
      tpu.vector_store %arg6[%c0_17, %c0_18], %20 {strides = array<i32>} : memref<16x384xf32, #tpu.memory_space<vmem>>, vector<16x384xf32>,
    } else {
    }
    return
  }
  func.func @transform_0(%arg0: i32, %arg1: i32) -> (i32, i32) {
    %c0_i32 = arith.constant 0 : i32
    %c0_i32_0 = arith.constant 0 : i32
    return %c0_i32, %arg1 : i32, i32
  }
  func.func @transform_1(%arg0: i32, %arg1: i32) -> (i32, i32) {
    %c0_i32 = arith.constant 0 : i32
    return %arg1, %arg0 : i32, i32
  }
  func.func @transform_2(%arg0: i32, %arg1: i32) -> (i32, i32) {
    %c0_i32 = arith.constant 0 : i32
    %c0_i32_0 = arith.constant 0 : i32
    return %c0_i32, %arg0 : i32, i32
  }
  func.func @transform_3(%arg0: i32, %arg1: i32) -> (i32, i32) {
    %c0_i32 = arith.constant 0 : i32
    %c0_i32_0 = arith.constant 0 : i32
    return %c0_i32, %arg0 : i32, i32
  }
  func.func @transform_4(%arg0: i32, %arg1: i32) -> (i32, i32) {
    %c0_i32 = arith.constant 0 : i32
    %c0_i32_0 = arith.constant 0 : i32
    return %c0_i32, %arg0 : i32, i32
  }
}

module attributes {stable_mosaic.version = 11 : i64} {
  func.func @_maxpool_kernel(%arg0: memref<9x2x192xf32, #tpu.memory_space<vmem>>, %arg1: memref<2x192xf32, #tpu.memory_space<vmem>>) attributes {dimension_semantics = [], scalar_prefetch = 0 : i64, scratch_operands = 0 : i64, tpu.core_type = #tpu.core_type<tc>} {
    %c0 = arith.constant 0 : index
    %c0_0 = arith.constant 0 : index
    %c0_1 = arith.constant 0 : index
    %0 = vector.load %arg0[%c0, %c0_0, %c0_1] : memref<9x2x192xf32, #tpu.memory_space<vmem>>, vector<9x2x192xf32>
    %cst = arith.constant dense<0xFF800000> : vector<2x192xf32>
    %1 = vector.multi_reduction <maximumf>, %0, %cst [0] : vector<9x2x192xf32> to vector<2x192xf32>
    %c0_2 = arith.constant 0 : index
    %c0_3 = arith.constant 0 : index
    %2 = vector.load %arg1[%c0_2, %c0_3] : memref<2x192xf32, #tpu.memory_space<vmem>>, vector<2x192xf32>
    tpu.vector_store %arg1[%c0_2, %c0_3], %1 {strides = array<i32>} : memref<2x192xf32, #tpu.memory_space<vmem>>, vector<2x192xf32>,
    return
  }
}

module attributes {stable_mosaic.version = 11 : i64} {
  func.func @_fused_mm_kernel(%arg0: i32, %arg1: i32, %arg2: memref<16x384xbf16, #tpu.memory_space<vmem>>, %arg3: memref<384x256xbf16, #tpu.memory_space<vmem>>, %arg4: memref<1x256xf32, #tpu.memory_space<vmem>>, %arg5: memref<1x256xf32, #tpu.memory_space<vmem>>, %arg6: memref<16x256xf32, #tpu.memory_space<vmem>>, %arg7: memref<16x256xf32, #tpu.memory_space<vmem>>) attributes {dimension_semantics = [#tpu.dimension_semantics<parallel>, #tpu.dimension_semantics<arbitrary>], iteration_bounds = array<i64: 1, 1>, scalar_prefetch = 0 : i64, scratch_operands = 1 : i64, tpu.core_type = #tpu.core_type<tc>, window_params = [{transform_indices = @transform_0, window_bounds = array<i64: 16, 384>}, {transform_indices = @transform_1, window_bounds = array<i64: 384, 256>}, {transform_indices = @transform_2, window_bounds = array<i64: 1, 256>}, {transform_indices = @transform_3, window_bounds = array<i64: 1, 256>}, {transform_indices = @transform_4, window_bounds = array<i64: 16, 256>}]} {
    %c0_i32 = arith.constant 0 : i32
    %0 = arith.cmpi eq, %arg1, %c0_i32 : i32
    %1 = arith.extui %0 : i1 to i32
    %c0_i32_0 = arith.constant 0 : i32
    %2 = arith.cmpi ne, %1, %c0_i32_0 : i32
    scf.if %2 {
      %cst_10 = arith.constant 0.000000e+00 : f32
      %12 = vector.broadcast %cst_10 : f32 to vector<16x256xf32>
      %c0_11 = arith.constant 0 : index
      %c0_12 = arith.constant 0 : index
      %13 = vector.load %arg7[%c0_11, %c0_12] : memref<16x256xf32, #tpu.memory_space<vmem>>, vector<16x256xf32>
      tpu.vector_store %arg7[%c0_11, %c0_12], %12 {strides = array<i32>} : memref<16x256xf32, #tpu.memory_space<vmem>>, vector<16x256xf32>,
    } else {
    }
    %c0 = arith.constant 0 : index
    %c0_1 = arith.constant 0 : index
    %3 = vector.load %arg7[%c0, %c0_1] : memref<16x256xf32, #tpu.memory_space<vmem>>, vector<16x256xf32>
    %c0_2 = arith.constant 0 : index
    %c0_3 = arith.constant 0 : index
    %4 = vector.load %arg2[%c0_2, %c0_3] : memref<16x384xbf16, #tpu.memory_space<vmem>>, vector<16x384xbf16>
    %c0_4 = arith.constant 0 : index
    %c0_5 = arith.constant 0 : index
    %5 = vector.load %arg3[%c0_4, %c0_5] : memref<384x256xbf16, #tpu.memory_space<vmem>>, vector<384x256xbf16>
    %cst = arith.constant dense<0.000000e+00> : vector<16x256xf32>
    %6 = tpu.matmul %4, %5, %cst {dimension_numbers = #tpu.dot_dimension_numbers<[1], [0], [0], [1], [0, 0, 1, 1], [], []>} : vector<16x384xbf16>, vector<384x256xbf16>, vector<16x256xf32> -> vector<16x256xf32>
    %7 = arith.addf %3, %6 : vector<16x256xf32>
    %c0_6 = arith.constant 0 : index
    %c0_7 = arith.constant 0 : index
    %8 = vector.load %arg7[%c0_6, %c0_7] : memref<16x256xf32, #tpu.memory_space<vmem>>, vector<16x256xf32>
    tpu.vector_store %arg7[%c0_6, %c0_7], %7 {strides = array<i32>} : memref<16x256xf32, #tpu.memory_space<vmem>>, vector<16x256xf32>,
    %c0_i32_8 = arith.constant 0 : i32
    %9 = arith.cmpi eq, %arg1, %c0_i32_8 : i32
    %10 = arith.extui %9 : i1 to i32
    %c0_i32_9 = arith.constant 0 : i32
    %11 = arith.cmpi ne, %10, %c0_i32_9 : i32
    scf.if %11 {
      %c0_10 = arith.constant 0 : index
      %c0_11 = arith.constant 0 : index
      %12 = vector.load %arg7[%c0_10, %c0_11] : memref<16x256xf32, #tpu.memory_space<vmem>>, vector<16x256xf32>
      %c0_12 = arith.constant 0 : index
      %c0_13 = arith.constant 0 : index
      %13 = vector.load %arg4[%c0_12, %c0_13] : memref<1x256xf32, #tpu.memory_space<vmem>>, vector<1x256xf32>
      %14 = vector.broadcast %13 : vector<1x256xf32> to vector<16x256xf32>
      %15 = arith.mulf %12, %14 : vector<16x256xf32>
      %c0_14 = arith.constant 0 : index
      %c0_15 = arith.constant 0 : index
      %16 = vector.load %arg5[%c0_14, %c0_15] : memref<1x256xf32, #tpu.memory_space<vmem>>, vector<1x256xf32>
      %17 = vector.broadcast %16 : vector<1x256xf32> to vector<16x256xf32>
      %18 = arith.addf %15, %17 : vector<16x256xf32>
      %cst_16 = arith.constant 0.000000e+00 : f32
      %19 = vector.broadcast %cst_16 : f32 to vector<16x256xf32>
      %20 = arith.maximumf %18, %19 : vector<16x256xf32>
      %c0_17 = arith.constant 0 : index
      %c0_18 = arith.constant 0 : index
      %21 = vector.load %arg6[%c0_17, %c0_18] : memref<16x256xf32, #tpu.memory_space<vmem>>, vector<16x256xf32>
      tpu.vector_store %arg6[%c0_17, %c0_18], %20 {strides = array<i32>} : memref<16x256xf32, #tpu.memory_space<vmem>>, vector<16x256xf32>,
    } else {
    }
    return
  }
  func.func @transform_0(%arg0: i32, %arg1: i32) -> (i32, i32) {
    %c0_i32 = arith.constant 0 : i32
    %c0_i32_0 = arith.constant 0 : i32
    return %c0_i32, %arg1 : i32, i32
  }
  func.func @transform_1(%arg0: i32, %arg1: i32) -> (i32, i32) {
    %c0_i32 = arith.constant 0 : i32
    return %arg1, %arg0 : i32, i32
  }
  func.func @transform_2(%arg0: i32, %arg1: i32) -> (i32, i32) {
    %c0_i32 = arith.constant 0 : i32
    %c0_i32_0 = arith.constant 0 : i32
    return %c0_i32, %arg0 : i32, i32
  }
  func.func @transform_3(%arg0: i32, %arg1: i32) -> (i32, i32) {
    %c0_i32 = arith.constant 0 : i32
    %c0_i32_0 = arith.constant 0 : i32
    return %c0_i32, %arg0 : i32, i32
  }
  func.func @transform_4(%arg0: i32, %arg1: i32) -> (i32, i32) {
    %c0_i32 = arith.constant 0 : i32
    %c0_i32_0 = arith.constant 0 : i32
    return %c0_i32, %arg0 : i32, i32
  }
}

module attributes {stable_mosaic.version = 11 : i64} {
  func.func @_fc_head_kernel(%arg0: i32, %arg1: memref<16x256xbf16, #tpu.memory_space<vmem>>, %arg2: memref<256x4096xbf16, #tpu.memory_space<vmem>>, %arg3: memref<1x4096xf32, #tpu.memory_space<vmem>>, %arg4: memref<4096x512xbf16, #tpu.memory_space<vmem>>, %arg5: memref<1x512xf32, #tpu.memory_space<vmem>>, %arg6: memref<512x128xbf16, #tpu.memory_space<vmem>>, %arg7: memref<1x16x128xf32, #tpu.memory_space<vmem>>) attributes {dimension_semantics = [#tpu.dimension_semantics<parallel>], iteration_bounds = array<i64: 8>, scalar_prefetch = 0 : i64, scratch_operands = 0 : i64, tpu.core_type = #tpu.core_type<tc>, window_params = [{pipeline_mode = #tpu.pipeline_mode<synchronous>, transform_indices = @transform_0, window_bounds = array<i64: 16, 256>}, {pipeline_mode = #tpu.pipeline_mode<synchronous>, transform_indices = @transform_1, window_bounds = array<i64: 256, 4096>}, {pipeline_mode = #tpu.pipeline_mode<synchronous>, transform_indices = @transform_2, window_bounds = array<i64: 1, 4096>}, {transform_indices = @transform_3, window_bounds = array<i64: 4096, 512>}, {transform_indices = @transform_4, window_bounds = array<i64: 1, 512>}, {transform_indices = @transform_5, window_bounds = array<i64: 512, 128>}, {transform_indices = @transform_6, window_bounds = array<i64: 1, 16, 128>}]} {
    %c0 = arith.constant 0 : index
    %c0_0 = arith.constant 0 : index
    %0 = vector.load %arg1[%c0, %c0_0] : memref<16x256xbf16, #tpu.memory_space<vmem>>, vector<16x256xbf16>
    %c0_1 = arith.constant 0 : index
    %c0_2 = arith.constant 0 : index
    %1 = vector.load %arg2[%c0_1, %c0_2] : memref<256x4096xbf16, #tpu.memory_space<vmem>>, vector<256x4096xbf16>
    %cst = arith.constant dense<0.000000e+00> : vector<16x4096xf32>
    %2 = tpu.matmul %0, %1, %cst {dimension_numbers = #tpu.dot_dimension_numbers<[1], [0], [0], [1], [0, 0, 1, 1], [], []>} : vector<16x256xbf16>, vector<256x4096xbf16>, vector<16x4096xf32> -> vector<16x4096xf32>
    %c0_3 = arith.constant 0 : index
    %c0_4 = arith.constant 0 : index
    %3 = vector.load %arg3[%c0_3, %c0_4] : memref<1x4096xf32, #tpu.memory_space<vmem>>, vector<1x4096xf32>
    %4 = vector.broadcast %3 : vector<1x4096xf32> to vector<16x4096xf32>
    %5 = arith.addf %2, %4 : vector<16x4096xf32>
    %cst_5 = arith.constant 0.000000e+00 : f32
    %6 = vector.broadcast %cst_5 : f32 to vector<16x4096xf32>
    %7 = arith.maximumf %5, %6 : vector<16x4096xf32>
    %8 = arith.truncf %7 : vector<16x4096xf32> to vector<16x4096xbf16>
    %c0_6 = arith.constant 0 : index
    %c0_7 = arith.constant 0 : index
    %9 = vector.load %arg4[%c0_6, %c0_7] : memref<4096x512xbf16, #tpu.memory_space<vmem>>, vector<4096x512xbf16>
    %cst_8 = arith.constant dense<0.000000e+00> : vector<16x512xf32>
    %10 = tpu.matmul %8, %9, %cst_8 {dimension_numbers = #tpu.dot_dimension_numbers<[1], [0], [0], [1], [0, 0, 1, 1], [], []>} : vector<16x4096xbf16>, vector<4096x512xbf16>, vector<16x512xf32> -> vector<16x512xf32>
    %c0_9 = arith.constant 0 : index
    %c0_10 = arith.constant 0 : index
    %11 = vector.load %arg5[%c0_9, %c0_10] : memref<1x512xf32, #tpu.memory_space<vmem>>, vector<1x512xf32>
    %12 = vector.broadcast %11 : vector<1x512xf32> to vector<16x512xf32>
    %13 = arith.addf %10, %12 : vector<16x512xf32>
    %cst_11 = arith.constant 0.000000e+00 : f32
    %14 = vector.broadcast %cst_11 : f32 to vector<16x512xf32>
    %15 = arith.maximumf %13, %14 : vector<16x512xf32>
    %16 = arith.truncf %15 : vector<16x512xf32> to vector<16x512xbf16>
    %c0_12 = arith.constant 0 : index
    %c0_13 = arith.constant 0 : index
    %17 = vector.load %arg6[%c0_12, %c0_13] : memref<512x128xbf16, #tpu.memory_space<vmem>>, vector<512x128xbf16>
    %cst_14 = arith.constant dense<0.000000e+00> : vector<16x128xf32>
    %18 = tpu.matmul %16, %17, %cst_14 {dimension_numbers = #tpu.dot_dimension_numbers<[1], [0], [0], [1], [0, 0, 1, 1], [], []>} : vector<16x512xbf16>, vector<512x128xbf16>, vector<16x128xf32> -> vector<16x128xf32>
    %c0_15 = arith.constant 0 : index
    %c0_16 = arith.constant 0 : index
    %c0_17 = arith.constant 0 : index
    %19 = vector.load %arg7[%c0_15, %c0_16, %c0_17] : memref<1x16x128xf32, #tpu.memory_space<vmem>>, vector<1x16x128xf32>
    %20 = vector.shape_cast %19 : vector<1x16x128xf32> to vector<16x128xf32>
    %21 = vector.shape_cast %18 : vector<16x128xf32> to vector<1x16x128xf32>
    tpu.vector_store %arg7[%c0_15, %c0_16, %c0_17], %21 {strides = array<i32>} : memref<1x16x128xf32, #tpu.memory_space<vmem>>, vector<1x16x128xf32>,
    return
  }
  func.func @transform_0(%arg0: i32) -> (i32, i32) {
    %c0_i32 = arith.constant 0 : i32
    %c0_i32_0 = arith.constant 0 : i32
    %c0_i32_1 = arith.constant 0 : i32
    return %c0_i32, %c0_i32_0 : i32, i32
  }
  func.func @transform_1(%arg0: i32) -> (i32, i32) {
    %c0_i32 = arith.constant 0 : i32
    %c0_i32_0 = arith.constant 0 : i32
    %c0_i32_1 = arith.constant 0 : i32
    return %c0_i32, %c0_i32_0 : i32, i32
  }
  func.func @transform_2(%arg0: i32) -> (i32, i32) {
    %c0_i32 = arith.constant 0 : i32
    %c0_i32_0 = arith.constant 0 : i32
    %c0_i32_1 = arith.constant 0 : i32
    return %c0_i32, %c0_i32_0 : i32, i32
  }
  func.func @transform_3(%arg0: i32) -> (i32, i32) {
    %c0_i32 = arith.constant 0 : i32
    %c0_i32_0 = arith.constant 0 : i32
    return %c0_i32, %arg0 : i32, i32
  }
  func.func @transform_4(%arg0: i32) -> (i32, i32) {
    %c0_i32 = arith.constant 0 : i32
    %c0_i32_0 = arith.constant 0 : i32
    return %c0_i32, %arg0 : i32, i32
  }
  func.func @transform_5(%arg0: i32) -> (i32, i32) {
    %c0_i32 = arith.constant 0 : i32
    %c0_i32_0 = arith.constant 0 : i32
    return %arg0, %c0_i32 : i32, i32
  }
  func.func @transform_6(%arg0: i32) -> (i32, i32, i32) {
    %c0_i32 = arith.constant 0 : i32
    %c0_i32_0 = arith.constant 0 : i32
    %c0_i32_1 = arith.constant 0 : i32
    return %arg0, %c0_i32, %c0_i32_0 : i32, i32, i32
  }
}

module attributes {stable_mosaic.version = 11 : i64} {
  func.func @_fused_mm_kernel(%arg0: i32, %arg1: i32, %arg2: memref<16x256xbf16, #tpu.memory_space<vmem>>, %arg3: memref<256x256xbf16, #tpu.memory_space<vmem>>, %arg4: memref<1x256xf32, #tpu.memory_space<vmem>>, %arg5: memref<1x256xf32, #tpu.memory_space<vmem>>, %arg6: memref<16x256xf32, #tpu.memory_space<vmem>>, %arg7: memref<16x256xf32, #tpu.memory_space<vmem>>) attributes {dimension_semantics = [#tpu.dimension_semantics<parallel>, #tpu.dimension_semantics<arbitrary>], iteration_bounds = array<i64: 1, 1>, scalar_prefetch = 0 : i64, scratch_operands = 1 : i64, tpu.core_type = #tpu.core_type<tc>, window_params = [{transform_indices = @transform_0, window_bounds = array<i64: 16, 256>}, {transform_indices = @transform_1, window_bounds = array<i64: 256, 256>}, {transform_indices = @transform_2, window_bounds = array<i64: 1, 256>}, {transform_indices = @transform_3, window_bounds = array<i64: 1, 256>}, {transform_indices = @transform_4, window_bounds = array<i64: 16, 256>}]} {
    %c0_i32 = arith.constant 0 : i32
    %0 = arith.cmpi eq, %arg1, %c0_i32 : i32
    %1 = arith.extui %0 : i1 to i32
    %c0_i32_0 = arith.constant 0 : i32
    %2 = arith.cmpi ne, %1, %c0_i32_0 : i32
    scf.if %2 {
      %cst_10 = arith.constant 0.000000e+00 : f32
      %12 = vector.broadcast %cst_10 : f32 to vector<16x256xf32>
      %c0_11 = arith.constant 0 : index
      %c0_12 = arith.constant 0 : index
      %13 = vector.load %arg7[%c0_11, %c0_12] : memref<16x256xf32, #tpu.memory_space<vmem>>, vector<16x256xf32>
      tpu.vector_store %arg7[%c0_11, %c0_12], %12 {strides = array<i32>} : memref<16x256xf32, #tpu.memory_space<vmem>>, vector<16x256xf32>,
    } else {
    }
    %c0 = arith.constant 0 : index
    %c0_1 = arith.constant 0 : index
    %3 = vector.load %arg7[%c0, %c0_1] : memref<16x256xf32, #tpu.memory_space<vmem>>, vector<16x256xf32>
    %c0_2 = arith.constant 0 : index
    %c0_3 = arith.constant 0 : index
    %4 = vector.load %arg2[%c0_2, %c0_3] : memref<16x256xbf16, #tpu.memory_space<vmem>>, vector<16x256xbf16>
    %c0_4 = arith.constant 0 : index
    %c0_5 = arith.constant 0 : index
    %5 = vector.load %arg3[%c0_4, %c0_5] : memref<256x256xbf16, #tpu.memory_space<vmem>>, vector<256x256xbf16>
    %cst = arith.constant dense<0.000000e+00> : vector<16x256xf32>
    %6 = tpu.matmul %4, %5, %cst {dimension_numbers = #tpu.dot_dimension_numbers<[1], [0], [0], [1], [0, 0, 1, 1], [], []>} : vector<16x256xbf16>, vector<256x256xbf16>, vector<16x256xf32> -> vector<16x256xf32>
    %7 = arith.addf %3, %6 : vector<16x256xf32>
    %c0_6 = arith.constant 0 : index
    %c0_7 = arith.constant 0 : index
    %8 = vector.load %arg7[%c0_6, %c0_7] : memref<16x256xf32, #tpu.memory_space<vmem>>, vector<16x256xf32>
    tpu.vector_store %arg7[%c0_6, %c0_7], %7 {strides = array<i32>} : memref<16x256xf32, #tpu.memory_space<vmem>>, vector<16x256xf32>,
    %c0_i32_8 = arith.constant 0 : i32
    %9 = arith.cmpi eq, %arg1, %c0_i32_8 : i32
    %10 = arith.extui %9 : i1 to i32
    %c0_i32_9 = arith.constant 0 : i32
    %11 = arith.cmpi ne, %10, %c0_i32_9 : i32
    scf.if %11 {
      %c0_10 = arith.constant 0 : index
      %c0_11 = arith.constant 0 : index
      %12 = vector.load %arg7[%c0_10, %c0_11] : memref<16x256xf32, #tpu.memory_space<vmem>>, vector<16x256xf32>
      %c0_12 = arith.constant 0 : index
      %c0_13 = arith.constant 0 : index
      %13 = vector.load %arg4[%c0_12, %c0_13] : memref<1x256xf32, #tpu.memory_space<vmem>>, vector<1x256xf32>
      %14 = vector.broadcast %13 : vector<1x256xf32> to vector<16x256xf32>
      %15 = arith.mulf %12, %14 : vector<16x256xf32>
      %c0_14 = arith.constant 0 : index
      %c0_15 = arith.constant 0 : index
      %16 = vector.load %arg5[%c0_14, %c0_15] : memref<1x256xf32, #tpu.memory_space<vmem>>, vector<1x256xf32>
      %17 = vector.broadcast %16 : vector<1x256xf32> to vector<16x256xf32>
      %18 = arith.addf %15, %17 : vector<16x256xf32>
      %cst_16 = arith.constant 0.000000e+00 : f32
      %19 = vector.broadcast %cst_16 : f32 to vector<16x256xf32>
      %20 = arith.maximumf %18, %19 : vector<16x256xf32>
      %c0_17 = arith.constant 0 : index
      %c0_18 = arith.constant 0 : index
      %21 = vector.load %arg6[%c0_17, %c0_18] : memref<16x256xf32, #tpu.memory_space<vmem>>, vector<16x256xf32>
      tpu.vector_store %arg6[%c0_17, %c0_18], %20 {strides = array<i32>} : memref<16x256xf32, #tpu.memory_space<vmem>>, vector<16x256xf32>,
    } else {
    }
    return
  }
  func.func @transform_0(%arg0: i32, %arg1: i32) -> (i32, i32) {
    %c0_i32 = arith.constant 0 : i32
    %c0_i32_0 = arith.constant 0 : i32
    return %c0_i32, %arg1 : i32, i32
  }
  func.func @transform_1(%arg0: i32, %arg1: i32) -> (i32, i32) {
    %c0_i32 = arith.constant 0 : i32
    return %arg1, %arg0 : i32, i32
  }
  func.func @transform_2(%arg0: i32, %arg1: i32) -> (i32, i32) {
    %c0_i32 = arith.constant 0 : i32
    %c0_i32_0 = arith.constant 0 : i32
    return %c0_i32, %arg0 : i32, i32
  }
  func.func @transform_3(%arg0: i32, %arg1: i32) -> (i32, i32) {
    %c0_i32 = arith.constant 0 : i32
    %c0_i32_0 = arith.constant 0 : i32
    return %c0_i32, %arg0 : i32, i32
  }
  func.func @transform_4(%arg0: i32, %arg1: i32) -> (i32, i32) {
    %c0_i32 = arith.constant 0 : i32
    %c0_i32_0 = arith.constant 0 : i32
    return %c0_i32, %arg0 : i32, i32
  }
}

</mosaic_0001>

<bundles_post_ra>
// kernel: alexnet_forward.8
= control target key start
LH: loop header
LB: loop body
LE: loop exit
PB: predicated region body
PF: predicated region fallthrough
CT: control target
= control target key end

     0   :  { %9 = vsyncpa [#allocation4], 0  ;;  %s527_s15 = smov [#allocation3]   ;;  %s668_s0 = inlined_call_operand.vmem [shape: bf16[112,128], index: 0, kind: input, shape index: {}]   ;;  %s669_s1 = inlined_call_operand.hbm [shape: bf16[128,128], index: 1, kind: input, shape index: {}]   ;;  %s670_s2 = inlined_call_operand.vmem [shape: f32[1,128], index: 2, kind: input, shape index: {}]   ;;  %s671_s3 = inlined_call_operand.vmem [shape: f32[1,128], index: 3, kind: input, shape index: {}]   ;;  %s672_s4 = inlined_call_operand.vmem [shape: f32[112,128], index: 4, kind: output, shape index: {}]  }
   0x1   :  { %s17_s16 = sshll.u32 %s527_s15, 4  ;;  %s18_s16 = int_to_ptr.vmem [resolvable:$true] %s17_s16 }
   0x2   :  { %s513_s17 = scalar_lea.vmem %s18_s16, 1024  ;;  %p518_p1 = scmp.lt.s32.totalorder %s18_s16, %s18_s16 }
   0x3   :  { %p514_p0 = scmp.ne.s32.totalorder %s18_s16, %s513_s17  ;;  %p519_p2 = scmp.lt.s32.totalorder %s513_s17, %s513_s17 }
   0x5   :  { %p520_p3 = por %p519_p2, %p518_p1 }
   0x7   :  { %p521_p4 = pnand %p520_p3, %p514_p0 }
   0x9   :  { %524 = shalt.err (!%p521_p4)
}
   0xa   :  { %s528_s18 = smov 64   ;;  %s529_s19 = smov 4  }
   0xb   :  { %23 = dma.hbm_to_vmem [thread:$0]  %s669_s1, 1024, %s18_s16, [#allocation4], %s528_s18, %s528_s18, %s529_s19  }
   0xc   :  { %525 = dma.done.wait [#allocation4], 1024  }
   0xd   :  { %526 = vsyncadd [#allocation4], 4294966272  ;;  %v530_v0 = vmov 0.0   ;;  %vm531_vm0 = vmmov 0   ;;  %v490_v1 = vld [vmem:[#allocation3 + $0x38] sm:$0xff]   ;;  %v491_v2 = vld [vmem:[#allocation3 + $0x30] sm:$0xff]  }
   0xe   :  { %425 = vmatprep.subr.bf16.mxu0 %v530_v0  ;;  %469 = vmatprep.subr.bf16.mxu1 %v530_v0  ;;  %v492_v3 = vld [vmem:[#allocation3 + $0x28] sm:$0xff]   ;;  %v493_v4 = vld [vmem:[#allocation3 + $0x20] sm:$0xff]   ;;  %v494_v5 = vld [vmem:[#allocation3 + $0x18] sm:$0xff]  }
   0xf   :  { %441 = vmatprep.mubr.msk.bf16.mxu0 %vm531_vm0, %v530_v0  ;;  %457 = vmatprep.mubr.msk.bf16.mxu1 %vm531_vm0, %v530_v0  ;;  %v495_v6 = vld [vmem:[#allocation3 + $0x10] sm:$0xff]   ;;  %v496_v7 = vld [vmem:[#allocation3 + $0x8] sm:$0xff]   ;;  %v497_v8 = vld [vmem:[#allocation3] sm:$0xff]  }
  0x10   :  { %426 = vmatpush3.bf16.msra.mxu0 %v490_v1  ;;  %477 = vmatpush3.bf16.msra.mxu1 %v490_v1  ;;  %v498_v9 = vld [vmem:[%s668_s0] sm:$0xff]   ;;  %v500_v11 = vld [vmem:[%s668_s0 + $0x8] sm:$0xff]   ;;  %v502_v13 = vld [vmem:[%s668_s0 + $0x10] sm:$0xff]  }
  0x11   :  { %427 = vmatprep.subr.bf16.mxu0 %v530_v0  ;;  %470 = vmatprep.subr.bf16.mxu1 %v530_v0  ;;  %v499_v10 = vld [vmem:[%s668_s0 + $0x20] sm:$0xff]   ;;  %v501_v12 = vld [vmem:[%s668_s0 + $0x28] sm:$0xff]   ;;  %v503_v14 = vld [vmem:[%s668_s0 + $0x30] sm:$0xff]  }
  0x12   :  { %v504_v15 = vld [vmem:[%s668_s0 + $0x18] sm:$0xff]   ;;  %v591_v16 = vld [vmem:[%s670_s2] ss:$0 sm:$0xff] }
  0x13   :  { %v596_v18 = vld [vmem:[%s671_s3] ss:$0 sm:$0xff] }
  0x14   :  { %428 = vmatpush3.bf16.msra.mxu0 %v491_v2  ;;  %478 = vmatpush3.bf16.msra.mxu1 %v491_v2 }
  0x15   :  { %429 = vmatprep.subr.bf16.mxu0 %v530_v0  ;;  %471 = vmatprep.subr.bf16.mxu1 %v530_v0 }
  0x18   :  { %430 = vmatpush3.bf16.msra.mxu0 %v492_v3  ;;  %479 = vmatpush3.bf16.msra.mxu1 %v492_v3 }
  0x19   :  { %431 = vmatprep.subr.bf16.mxu0 %v530_v0  ;;  %472 = vmatprep.subr.bf16.mxu1 %v530_v0 }
  0x1c   :  { %432 = vmatpush3.bf16.msra.mxu0 %v493_v4  ;;  %480 = vmatpush3.bf16.msra.mxu1 %v493_v4 }
  0x1d   :  { %433 = vmatprep.subr.bf16.mxu0 %v530_v0  ;;  %473 = vmatprep.subr.bf16.mxu1 %v530_v0 }
  0x20   :  { %434 = vmatpush3.bf16.msra.mxu0 %v494_v5  ;;  %481 = vmatpush3.bf16.msra.mxu1 %v494_v5 }
  0x21   :  { %435 = vmatprep.subr.bf16.mxu0 %v530_v0  ;;  %474 = vmatprep.subr.bf16.mxu1 %v530_v0 }
  0x24   :  { %436 = vmatpush3.bf16.msra.mxu0 %v495_v6  ;;  %482 = vmatpush3.bf16.msra.mxu1 %v495_v6 }
  0x25   :  { %437 = vmatprep.subr.bf16.mxu0 %v530_v0  ;;  %475 = vmatprep.subr.bf16.mxu1 %v530_v0 }
  0x28   :  { %438 = vmatpush3.bf16.msra.mxu0 %v496_v7  ;;  %483 = vmatpush3.bf16.msra.mxu1 %v496_v7 }
  0x29   :  { %439 = vmatprep.subr.bf16.mxu0 %v530_v0  ;;  %476 = vmatprep.subr.bf16.mxu1 %v530_v0 }
  0x2c   :  { %440 = vmatpush3.bf16.msra.mxu0 %v497_v8  ;;  %484 = vmatpush3.bf16.msra.mxu1 %v497_v8 }
  0x2f   :  { %442 = vmatmul.mubr.bf16.vlgmr.msra.gmra.mxu0 %v498_v9  ;;  %458 = vmatmul.mubr.bf16.vlgmr.msra.gmra.mxu1 %v499_v10 }
  0x30   :  { %445 = vmatprep.mubr.msk.bf16.mxu0 %vm531_vm0, %v530_v0  ;;  %461 = vmatprep.mubr.msk.bf16.mxu1 %vm531_vm0, %v530_v0 }
  0x37   :  { %446 = vmatmul.mubr.bf16.gmra.mxu0 %v500_v11  ;;  %462 = vmatmul.mubr.bf16.gmra.mxu1 %v501_v12 }
  0x38   :  { %449 = vmatprep.mubr.msk.bf16.mxu0 %vm531_vm0, %v530_v0  ;;  %465 = vmatprep.mubr.msk.bf16.mxu1 %vm531_vm0, %v530_v0 }
  0x3f   :  { %450 = vmatmul.mubr.bf16.gmra.mxu0 %v502_v13  ;;  %466 = vmatmul.mubr.bf16.gmra.mxu1 %v503_v14 }
  0x40   :  { %453 = vmatprep.mubr.msk.bf16.mxu0 %vm531_vm0, %v530_v0 }
  0x47   :  { %454 = vmatmul.mubr.bf16.gmra.mxu0 %v504_v15 }
  0xef   :  { %v218_v17 = vpop.f32.mrf.mxu0  ;;  %v250_v19 = vpop.f32.mrf.mxu1 }
  0xf0   :  { %v325_v20 = vmul.f32 %v591_v16, %v218_v17  ;;  %v333_v21 = vmul.f32 %v591_v16, %v250_v19 }
  0xf1   :  { %v443_v22 = vpop.f32.mrf.mxu0  ;;  %v459_v23 = vpop.f32.mrf.mxu1 }
  0xf2   :  { %v346_v24 = vadd.f32 %v596_v18, %v325_v20  ;;  %v354_v25 = vadd.f32 %v596_v18, %v333_v21 }
  0xf3   :  { %v221_v26 = vpop.f32.mrf.mxu0  ;;  %v253_v27 = vpop.f32.mrf.mxu1 }
  0xf4   :  { %v360_v28 = vmax.f32 %v346_v24, 0.0  ;;  %v368_v29 = vmax.f32 %v354_v25, 0.0  ;;  %v326_v30 = vmul.f32 %v591_v16, %v221_v26  ;;  %v334_v31 = vmul.f32 %v591_v16, %v253_v27 }
  0xf5   :  { %v444_v32 = vpop.f32.mrf.mxu0  ;;  %v460_v33 = vpop.f32.mrf.mxu1 }
  0xf6   :  { %374 = vst [vmem:[%s672_s4] sm:$0xff] %v360_v28  ;;  %382 = vst [vmem:[%s672_s4 + $0x40] sm:$0xff] %v368_v29  ;;  %v347_v34 = vadd.f32 %v596_v18, %v326_v30  ;;  %v355_v35 = vadd.f32 %v596_v18, %v334_v31 }
  0xf7   :  { %v226_v36 = vpop.f32.mrf.mxu0  ;;  %v258_v37 = vpop.f32.mrf.mxu1 }
  0xf8   :  { %v361_v38 = vmax.f32 %v347_v34, 0.0  ;;  %v369_v39 = vmax.f32 %v355_v35, 0.0  ;;  %v327_v40 = vmul.f32 %v591_v16, %v226_v36  ;;  %v335_v41 = vmul.f32 %v591_v16, %v258_v37 }
  0xf9   :  { %v447_v42 = vpop.f32.mrf.mxu0  ;;  %v463_v43 = vpop.f32.mrf.mxu1 }
  0xfa   :  { %375 = vst [vmem:[%s672_s4 + $0x8] sm:$0xff] %v361_v38  ;;  %383 = vst [vmem:[%s672_s4 + $0x48] sm:$0xff] %v369_v39  ;;  %v348_v44 = vadd.f32 %v596_v18, %v327_v40  ;;  %v356_v45 = vadd.f32 %v596_v18, %v335_v41 }
  0xfb   :  { %v229_v46 = vpop.f32.mrf.mxu0  ;;  %v261_v47 = vpop.f32.mrf.mxu1 }
  0xfc   :  { %v362_v48 = vmax.f32 %v348_v44, 0.0  ;;  %v370_v49 = vmax.f32 %v356_v45, 0.0  ;;  %v328_v50 = vmul.f32 %v591_v16, %v229_v46  ;;  %v336_v51 = vmul.f32 %v591_v16, %v261_v47 }
  0xfd   :  { %v448_v52 = vpop.f32.mrf.mxu0  ;;  %v464_v53 = vpop.f32.mrf.mxu1 }
  0xfe   :  { %376 = vst [vmem:[%s672_s4 + $0x10] sm:$0xff] %v362_v48  ;;  %384 = vst [vmem:[%s672_s4 + $0x50] sm:$0xff] %v370_v49  ;;  %v349_v54 = vadd.f32 %v596_v18, %v328_v50  ;;  %v357_v55 = vadd.f32 %v596_v18, %v336_v51 }
  0xff   :  { %v234_v56 = vpop.f32.mrf.mxu0  ;;  %v266_v57 = vpop.f32.mrf.mxu1 }
 0x100   :  { %v363_v58 = vmax.f32 %v349_v54, 0.0  ;;  %v371_v59 = vmax.f32 %v357_v55, 0.0  ;;  %v329_v60 = vmul.f32 %v591_v16, %v234_v56  ;;  %v337_v61 = vmul.f32 %v591_v16, %v266_v57 }
 0x101   :  { %v451_v62 = vpop.f32.mrf.mxu0  ;;  %v467_v63 = vpop.f32.mrf.mxu1 }
 0x102   :  { %377 = vst [vmem:[%s672_s4 + $0x18] sm:$0xff] %v363_v58  ;;  %385 = vst [vmem:[%s672_s4 + $0x58] sm:$0xff] %v371_v59  ;;  %v350_v0 = vadd.f32 %v596_v18, %v329_v60  ;;  %v358_v1 = vadd.f32 %v596_v18, %v337_v61 }
 0x103   :  { %v237_v2 = vpop.f32.mrf.mxu0  ;;  %v269_v3 = vpop.f32.mrf.mxu1 }
 0x104   :  { %v364_v4 = vmax.f32 %v350_v0, 0.0  ;;  %v372_v5 = vmax.f32 %v358_v1, 0.0  ;;  %v330_v6 = vmul.f32 %v591_v16, %v237_v2  ;;  %v338_v7 = vmul.f32 %v591_v16, %v269_v3 }
 0x105   :  { %v452_v8 = vpop.f32.mrf.mxu0  ;;  %v468_v9 = vpop.f32.mrf.mxu1 }
 0x106   :  { %378 = vst [vmem:[%s672_s4 + $0x20] sm:$0xff] %v364_v4  ;;  %386 = vst [vmem:[%s672_s4 + $0x60] sm:$0xff] %v372_v5  ;;  %v351_v10 = vadd.f32 %v596_v18, %v330_v6  ;;  %v359_v11 = vadd.f32 %v596_v18, %v338_v7 }
 0x107   :  { %v242_v12 = vpop.f32.mrf.mxu0 }
 0x108   :  { %v365_v13 = vmax.f32 %v351_v10, 0.0  ;;  %v373_v14 = vmax.f32 %v359_v11, 0.0  ;;  %v331_v15 = vmul.f32 %v591_v16, %v242_v12 }
 0x109   :  { %v455_v17 = vpop.f32.mrf.mxu0 }
 0x10a   :  { %379 = vst [vmem:[%s672_s4 + $0x28] sm:$0xff] %v365_v13  ;;  %387 = vst [vmem:[%s672_s4 + $0x68] sm:$0xff] %v373_v14  ;;  %v352_v19 = vadd.f32 %v596_v18, %v331_v15 }
 0x10b   :  { %v245_v20 = vpop.f32.mrf.mxu0 }
 0x10c   :  { %v366_v21 = vmax.f32 %v352_v19, 0.0  ;;  %v332_v22 = vmul.f32 %v591_v16, %v245_v20 }
 0x10d   :  { %v456_v23 = vpop.f32.mrf.mxu0 }
 0x10e   :  { %380 = vst [vmem:[%s672_s4 + $0x30] sm:$0xff] %v366_v21  ;;  %v353_v24 = vadd.f32 %v596_v18, %v332_v22 }
 0x110   :  { %v367_v25 = vmax.f32 %v353_v24, 0.0 }
 0x112   :  { %381 = vst [vmem:[%s672_s4 + $0x38] sm:$0xff] %v367_v25 }
 0x113   :  { %392 = vsyncpa [#allocation4], 1 }

// kernel: alexnet_forward.9
= control target key start
LH: loop header
LB: loop body
LE: loop exit
PB: predicated region body
PF: predicated region fallthrough
CT: control target
= control target key end

     0   :  { %vm35_vm0 = vcmask 523264   ;;  %vm70_vm1 = vcmask 517120   ;;  %s225_s0 = inlined_call_operand.vmem [shape: f32[9,18,64], index: 0, kind: input, shape index: {}]   ;;  %s226_s1 = inlined_call_operand.vmem [shape: f32[18,64], index: 1, kind: output, shape index: {}]  }
   0x1   :  { %v8_v0 = vld [vmem:[%s225_s0] sm:$0xff]  ;;  %v11_v1 = vld [vmem:[%s225_s0 + $0x18] sm:$0xff]  ;;  %v14_v2 = vld [vmem:[%s225_s0 + $0x30] sm:$0xff] }
   0x2   :  { %v17_v3 = vld [vmem:[%s225_s0 + $0x48] sm:$0xff]  ;;  %v20_v4 = vld [vmem:[%s225_s0 + $0x60] sm:$0xff]  ;;  %v23_v5 = vld [vmem:[%s225_s0 + $0x78] sm:$0xff]  ;;  %v36_v6 = vsel %vm35_vm0, %v8_v0, -inf  ;;  %v37_v7 = vsel %vm35_vm0, %v11_v1, -inf  ;;  %v38_v8 = vsel %vm35_vm0, %v14_v2, -inf }
   0x3   :  { %v26_v9 = vld [vmem:[%s225_s0 + $0x90] sm:$0xff]  ;;  %v29_v10 = vld [vmem:[%s225_s0 + $0xa8] sm:$0xff]  ;;  %v32_v11 = vld [vmem:[%s225_s0 + $0xc0] sm:$0xff]  ;;  %v39_v12 = vmax.f32 %v36_v6, %v38_v8  ;;  %v40_v13 = vsel %vm35_vm0, %v17_v3, -inf  ;;  %v42_v14 = vsel %vm35_vm0, %v20_v4, -inf  ;;  %v44_v15 = vsel %vm35_vm0, %v23_v5, -inf }
   0x4   :  { %v41_v16 = vmax.f32 %v37_v7, %v40_v13  ;;  %v46_v17 = vsel %vm35_vm0, %v26_v9, -inf  ;;  %v48_v18 = vsel %vm35_vm0, %v29_v10, -inf  ;;  %v50_v19 = vsel %vm35_vm0, %v32_v11, -inf  ;;  %v9_v20 = vld [vmem:[%s225_s0 + $0x8] sm:$0xff]  ;;  %v12_v21 = vld [vmem:[%s225_s0 + $0x20] sm:$0xff]  ;;  %v15_v22 = vld [vmem:[%s225_s0 + $0x38] sm:$0xff] }
   0x5   :  { %v43_v23 = vmax.f32 %v39_v12, %v42_v14  ;;  %v18_v24 = vld [vmem:[%s225_s0 + $0x50] sm:$0xff]  ;;  %v21_v25 = vld [vmem:[%s225_s0 + $0x68] sm:$0xff]  ;;  %v24_v26 = vld [vmem:[%s225_s0 + $0x80] sm:$0xff]  ;;  %v53_v27 = vsel %vm35_vm0, %v9_v20, -inf  ;;  %v54_v28 = vsel %vm35_vm0, %v12_v21, -inf  ;;  %v55_v29 = vsel %vm35_vm0, %v15_v22, -inf }
   0x6   :  { %v45_v30 = vmax.f32 %v41_v16, %v44_v15  ;;  %v27_v31 = vld [vmem:[%s225_s0 + $0x98] sm:$0xff]  ;;  %v30_v32 = vld [vmem:[%s225_s0 + $0xb0] sm:$0xff]  ;;  %v33_v33 = vld [vmem:[%s225_s0 + $0xc8] sm:$0xff]  ;;  %v56_v34 = vmax.f32 %v53_v27, %v55_v29  ;;  %v57_v35 = vsel %vm35_vm0, %v18_v24, -inf  ;;  %v59_v36 = vsel %vm35_vm0, %v21_v25, -inf }
   0x7   :  { %v47_v37 = vmax.f32 %v43_v23, %v46_v17  ;;  %v58_v38 = vmax.f32 %v54_v28, %v57_v35  ;;  %v61_v39 = vsel %vm35_vm0, %v24_v26, -inf  ;;  %v63_v40 = vsel %vm35_vm0, %v27_v31, -inf  ;;  %v10_v41 = vld [vmem:[%s225_s0 + $0x10] sm:$0x3]  ;;  %v13_v42 = vld [vmem:[%s225_s0 + $0x28] sm:$0x3] }
   0x8   :  { %v49_v43 = vmax.f32 %v45_v30, %v48_v18  ;;  %v60_v44 = vmax.f32 %v56_v34, %v59_v36  ;;  %v65_v45 = vsel %vm35_vm0, %v30_v32, -inf  ;;  %v16_v46 = vld [vmem:[%s225_s0 + $0x40] sm:$0x3]  ;;  %v19_v47 = vld [vmem:[%s225_s0 + $0x58] sm:$0x3]  ;;  %v67_v50 = vsel %vm35_vm0, %v33_v33, -inf }
   0x9   :  { %v51_v48 = vmax.f32 %v47_v37, %v50_v19  ;;  %v62_v49 = vmax.f32 %v58_v38, %v61_v39  ;;  %v22_v51 = vld [vmem:[%s225_s0 + $0x70] sm:$0x3]  ;;  %v25_v52 = vld [vmem:[%s225_s0 + $0x88] sm:$0x3]  ;;  %v28_v54 = vld [vmem:[%s225_s0 + $0xa0] sm:$0x3] }
   0xa   :  { %v64_v53 = vmax.f32 %v60_v44, %v63_v40  ;;  %v31_v55 = vld [vmem:[%s225_s0 + $0xb8] sm:$0x3]  ;;  %v71_v56 = vsel %vm70_vm1, %v10_v41, -inf  ;;  %v72_v57 = vsel %vm70_vm1, %v13_v42, -inf  ;;  %v73_v60 = vsel %vm70_vm1, %v16_v46, -inf }
   0xb   :  { %v52_v58 = vmax.f32 %v51_v48, %v49_v43  ;;  %v66_v59 = vmax.f32 %v62_v49, %v65_v45  ;;  %v75_v61 = vsel %vm70_vm1, %v19_v47, -inf  ;;  %v34_v63 = vld [vmem:[%s225_s0 + $0xd0] sm:$0x3]  ;;  %v74_v0 = vmax.f32 %v71_v56, %v73_v60 }
   0xc   :  { %v68_v62 = vmax.f32 %v64_v53, %v67_v50  ;;  %v76_v1 = vmax.f32 %v72_v57, %v75_v61  ;;  %v77_v2 = vsel %vm70_vm1, %v22_v51, -inf  ;;  %v79_v3 = vsel %vm70_vm1, %v25_v52, -inf }
   0xd   :  { %88 = vst.msk [vmem:[%s226_s1] sm:$0xff] %vm35_vm0, %v52_v58  ;;  %v81_v4 = vsel %vm70_vm1, %v28_v54, -inf  ;;  %v83_v5 = vsel %vm70_vm1, %v31_v55, -inf  ;;  %v78_v7 = vmax.f32 %v74_v0, %v77_v2  ;;  %v85_v9 = vsel %vm70_vm1, %v34_v63, -inf }
   0xe   :  { %v69_v6 = vmax.f32 %v68_v62, %v66_v59  ;;  %v80_v8 = vmax.f32 %v76_v1, %v79_v3 }
   0xf   :  { %v82_v10 = vmax.f32 %v78_v7, %v81_v4 }
  0x10   :  { %89 = vst.msk [vmem:[%s226_s1 + $0x8] sm:$0xff] %vm35_vm0, %v69_v6  ;;  %v84_v11 = vmax.f32 %v80_v8, %v83_v5 }
  0x11   :  { %v86_v12 = vmax.f32 %v82_v10, %v85_v9 }
  0x13   :  { %v87_v13 = vmax.f32 %v86_v12, %v84_v11 }
  0x15   :  { %90 = vst.msk [vmem:[%s226_s1 + $0x10] sm:$0x3] %vm70_vm1, %v87_v13 }

// kernel: alexnet_forward.11
= control target key start
LH: loop header
LB: loop body
LE: loop exit
PB: predicated region body
PF: predicated region fallthrough
CT: control target
= control target key end

     0   :  { %vm17_vm0 = vcmask 1041408   ;;  %vm18_vm1 = vcmask 519170   ;;  %s106_s0 = inlined_call_operand.vmem [shape: f32[9,2,192], index: 0, kind: input, shape index: {}]   ;;  %s107_s1 = inlined_call_operand.vmem [shape: f32[2,192], index: 1, kind: output, shape index: {}]  }
   0x1   :  { %v8_v0 = vld [vmem:[%s106_s0] sm:$0xf]  ;;  %v9_v1 = vld [vmem:[%s106_s0 + $0x4] sm:$0xf]  ;;  %v10_v2 = vld [vmem:[%s106_s0 + $0x8] sm:$0xf] }
   0x2   :  { %v11_v3 = vld [vmem:[%s106_s0 + $0xc] sm:$0xf]  ;;  %v12_v4 = vld [vmem:[%s106_s0 + $0x10] sm:$0xf]  ;;  %v13_v5 = vld [vmem:[%s106_s0 + $0x14] sm:$0xf] }
   0x3   :  { %v14_v6 = vld [vmem:[%s106_s0 + $0x18] sm:$0xf]  ;;  %v15_v7 = vld [vmem:[%s106_s0 + $0x1c] sm:$0xf]  ;;  %vm76_vm2 = vmor %vm18_vm1, %vm17_vm0 }
   0x4   :  { %v16_v9 = vld [vmem:[%s106_s0 + $0x20] sm:$0xf]  ;;  %v20_v10 = vsel %vm76_vm2, %v8_v0, -inf  ;;  %v21_v11 = vsel %vm76_vm2, %v9_v1, -inf  ;;  %v22_v12 = vsel %vm76_vm2, %v10_v2, -inf  ;;  %v23_v13 = vsel %vm76_vm2, %v11_v3, -inf }
   0x5   :  { %v24_v14 = vsel %vm76_vm2, %v12_v4, -inf  ;;  %v26_v15 = vsel %vm76_vm2, %v13_v5, -inf  ;;  %v28_v16 = vsel %vm76_vm2, %v14_v6, -inf  ;;  %v30_v17 = vsel %vm76_vm2, %v15_v7, -inf }
   0x6   :  { %v25_v18 = vmax.f32 %v20_v10, %v24_v14  ;;  %v27_v19 = vmax.f32 %v21_v11, %v26_v15  ;;  %v29_v20 = vmax.f32 %v22_v12, %v28_v16  ;;  %v31_v21 = vmax.f32 %v23_v13, %v30_v17 }
   0x7   :  { %v32_v22 = vsel %vm76_vm2, %v16_v9, -inf }
   0x8   :  { %v33_v23 = vmax.f32 %v25_v18, %v32_v22  ;;  %v35_v24 = vmax.f32 %v29_v20, %v31_v21 }
   0xa   :  { %v34_v25 = vmax.f32 %v33_v23, %v27_v19 }
   0xc   :  { %v36_v26 = vmax.f32 %v34_v25, %v35_v24 }
   0xe   :  { %37 = vst.msk [vmem:[%s107_s1] sm:$0xf] %vm76_vm2, %v36_v26 }

// kernel: alexnet_forward.12
= control target key start
LH: loop header
LB: loop body
LE: loop exit
PB: predicated region body
PF: predicated region fallthrough
CT: control target
= control target key end

     0   :  { %9 = vsyncpa [#allocation4], 0  ;;  %s712_s15 = smov [#allocation3]   ;;  %s773_s0 = inlined_call_operand.vmem [shape: bf16[16,256], index: 0, kind: input, shape index: {}]   ;;  %s774_s1 = inlined_call_operand.hbm [shape: bf16[256,384], index: 1, kind: input, shape index: {}]   ;;  %s775_s2 = inlined_call_operand.vmem [shape: f32[1,384], index: 2, kind: input, shape index: {}]   ;;  %s776_s3 = inlined_call_operand.vmem [shape: f32[1,384], index: 3, kind: input, shape index: {}]   ;;  %s777_s4 = inlined_call_operand.vmem [shape: f32[16,384], index: 4, kind: output, shape index: {}]  }
   0x1   :  { %s17_s16 = sshll.u32 %s712_s15, 4  ;;  %s18_s16 = int_to_ptr.vmem [resolvable:$true] %s17_s16 }
   0x2   :  { %s698_s17 = scalar_lea.vmem %s18_s16, 6144  ;;  %p703_p1 = scmp.lt.s32.totalorder %s18_s16, %s18_s16 }
   0x3   :  { %p699_p0 = scmp.ne.s32.totalorder %s18_s16, %s698_s17  ;;  %p704_p2 = scmp.lt.s32.totalorder %s698_s17, %s698_s17 }
   0x5   :  { %p705_p3 = por %p704_p2, %p703_p1 }
   0x7   :  { %p706_p4 = pnand %p705_p3, %p699_p0 }
   0x9   :  { %709 = shalt.err (!%p706_p4)
}
   0xa   :  { %s713_s18 = smov 192   ;;  %s714_s19 = smov 12  }
   0xb   :  { %23 = dma.hbm_to_vmem [thread:$0]  %s774_s1, 6144, %s18_s16, [#allocation4], %s713_s18, %s713_s18, %s714_s19  }
   0xc   :  { %710 = dma.done.wait [#allocation4], 6144  }
   0xd   :  { %711 = vsyncadd [#allocation4], 4294961152  ;;  %v623_v0 = vld [vmem:[#allocation3 + $0xac] ss:$12 sps:$4 sm:$0xff]   ;;  %v625_v1 = vld [vmem:[#allocation3 + $0xa8] ss:$12 sps:$4 sm:$0xff]   ;;  %v487_v50 = vlaneseq }
   0xe   :  { %380 = vmatprep.subr.bf16.mxu0 %v623_v0  ;;  %v626_v2 = vld [vmem:[#allocation3 + $0x94] ss:$12 sps:$4 sm:$0xff]   ;;  %v628_v3 = vld [vmem:[#allocation3 + $0x90] ss:$12 sps:$4 sm:$0xff]   ;;  %v631_v5 = vld [vmem:[#allocation3 + $0x78] ss:$12 sps:$4 sm:$0xff]  }
   0xf   :  { %381 = vmatpush1.bf16.msra.mxu0 %v625_v1  ;;  %v629_v4 = vld [vmem:[#allocation3 + $0x7c] ss:$12 sps:$4 sm:$0xff]   ;;  %v632_v6 = vld [vmem:[#allocation3 + $0x64] ss:$12 sps:$4 sm:$0xff]   ;;  %v634_v8 = vld [vmem:[#allocation3 + $0x60] ss:$12 sps:$4 sm:$0xff]  }
  0x10   :  { %382 = vmatprep.subr.bf16.mxu0 %v626_v2  ;;  %v643_v7 = vld [vmem:[#allocation3 + $0x170] ss:$12 sps:$4 sm:$0xff]   ;;  %v635_v10 = vld [vmem:[#allocation3 + $0x4c] ss:$12 sps:$4 sm:$0xff]   ;;  %v637_v13 = vld [vmem:[#allocation3 + $0x48] ss:$12 sps:$4 sm:$0xff]  }
  0x11   :  { %598 = vmatprep.subr.bf16.mxu1 %v643_v7  ;;  %v645_v9 = vld [vmem:[#allocation3 + $0xb0] ss:$12 sps:$4 sm:$0xff]   ;;  %v648_v11 = vld [vmem:[#allocation3 + $0x158] ss:$12 sps:$4 sm:$0xff]   ;;  %v638_v14 = vld [vmem:[#allocation3 + $0x34] ss:$12 sps:$4 sm:$0xff]  }
  0x12   :  { %599 = vmatpush3.bf16.msra.mxu1 %v645_v9  ;;  %v650_v12 = vld [vmem:[#allocation3 + $0x98] ss:$12 sps:$4 sm:$0xff]   ;;  %v653_v15 = vld [vmem:[#allocation3 + $0x140] ss:$12 sps:$4 sm:$0xff]   ;;  %v640_v17 = vld [vmem:[#allocation3 + $0x30] ss:$12 sps:$4 sm:$0xff]  }
  0x13   :  { %383 = vmatpush1.bf16.msra.mxu0 %v628_v3  ;;  %600 = vmatprep.subr.bf16.mxu1 %v648_v11  ;;  %v655_v16 = vld [vmem:[#allocation3 + $0x80] ss:$12 sps:$4 sm:$0xff]   ;;  %v658_v18 = vld [vmem:[#allocation3 + $0x128] ss:$12 sps:$4 sm:$0xff]   ;;  %v644_v21 = vld [vmem:[#allocation3 + $0x18] ss:$12 sps:$4 sm:$0xff]  }
  0x14   :  { %384 = vmatprep.subr.bf16.mxu0 %v629_v4  ;;  %v641_v19 = vld [vmem:[#allocation3 + $0x1c] ss:$12 sps:$4 sm:$0xff]   ;;  %v646_v23 = vld [vmem:[#allocation3 + $0x4] ss:$12 sps:$4 sm:$0xff]   ;;  %v649_v26 = vld [vmem:[#allocation3] ss:$12 sps:$4 sm:$0xff]  }
  0x15   :  { %v660_v20 = vld [vmem:[#allocation3 + $0x68] ss:$12 sps:$4 sm:$0xff]   ;;  %v663_v22 = vld [vmem:[#allocation3 + $0x110] ss:$12 sps:$4 sm:$0xff]   ;;  %v668_v25 = vld [vmem:[#allocation3 + $0xf8] ss:$12 sps:$4 sm:$0xff]  }
  0x16   :  { %601 = vmatpush3.bf16.msra.mxu1 %v650_v12  ;;  %v665_v24 = vld [vmem:[#allocation3 + $0x50] ss:$12 sps:$4 sm:$0xff]   ;;  %v651_v27 = vld [vmem:[#allocation3 + $0x16c] ss:$12 sps:$4 sm:$0xff]   ;;  %v654_v30 = vld [vmem:[#allocation3 + $0x168] ss:$12 sps:$4 sm:$0xff]  }
  0x17   :  { %385 = vmatpush1.bf16.msra.mxu0 %v631_v5  ;;  %602 = vmatprep.subr.bf16.mxu1 %v653_v15  ;;  %v670_v28 = vld [vmem:[#allocation3 + $0x38] ss:$12 sps:$4 sm:$0xff]   ;;  %v673_v29 = vld [vmem:[#allocation3 + $0xe0] ss:$12 sps:$4 sm:$0xff]   ;;  %v678_v33 = vld [vmem:[#allocation3 + $0xc8] ss:$12 sps:$4 sm:$0xff]  }
  0x18   :  { %386 = vmatprep.subr.bf16.mxu0 %v632_v6  ;;  %v656_v31 = vld [vmem:[#allocation3 + $0x154] ss:$12 sps:$4 sm:$0xff]   ;;  %v659_v34 = vld [vmem:[#allocation3 + $0x150] ss:$12 sps:$4 sm:$0xff]   ;;  %v683_v35 = vld [vmem:[%s773_s0 + $0x4] ss:$8 sps:$4 sm:$0xff]  }
  0x19   :  { %v675_v32 = vld [vmem:[#allocation3 + $0x20] ss:$12 sps:$4 sm:$0xff]   ;;  %v661_v36 = vld [vmem:[#allocation3 + $0x13c] ss:$12 sps:$4 sm:$0xff]   ;;  %455 = vmatprep.mubr.bf16.mxu1 %v683_v35  ;;  %412 = vmatprep.mubr.bf16.mxu0 %v683_v35  ;;  %v664_v38 = vld [vmem:[#allocation3 + $0x138] ss:$12 sps:$4 sm:$0xff]  }
  0x1a   :  { %603 = vmatpush3.bf16.msra.mxu1 %v655_v16  ;;  %v680_v37 = vld [vmem:[#allocation3 + $0x8] ss:$12 sps:$4 sm:$0xff]   ;;  %v666_v39 = vld [vmem:[#allocation3 + $0x124] ss:$12 sps:$4 sm:$0xff]   ;;  %v669_v41 = vld [vmem:[#allocation3 + $0x120] ss:$12 sps:$4 sm:$0xff]  }
  0x1b   :  { %387 = vmatpush1.bf16.msra.mxu0 %v634_v8  ;;  %604 = vmatprep.subr.bf16.mxu1 %v658_v18  ;;  %v681_v40 = vld [vmem:[%s773_s0] ss:$8 sps:$4 sm:$0xff]   ;;  %v671_v42 = vld [vmem:[#allocation3 + $0x10c] ss:$12 sps:$4 sm:$0xff]   ;;  %v679_v45 = vld [vmem:[#allocation3 + $0xf0] ss:$12 sps:$4 sm:$0xff]  }
  0x1c   :  { %388 = vmatprep.subr.bf16.mxu0 %v635_v10  ;;  %v674_v43 = vld [vmem:[#allocation3 + $0x108] ss:$12 sps:$4 sm:$0xff]   ;;  %v686_v47 = vld [vmem:[#allocation3 + $0xd8] ss:$12 sps:$4 sm:$0xff]   ;;  %v689_v49 = vld [vmem:[#allocation3 + $0xc0] ss:$12 sps:$4 sm:$0xff]  }
  0x1d   :  { %v676_v44 = vld [vmem:[#allocation3 + $0xf4] ss:$12 sps:$4 sm:$0xff]   ;;  %v684_v46 = vld [vmem:[#allocation3 + $0xdc] ss:$12 sps:$4 sm:$0xff]   ;;  %v687_v48 = vld [vmem:[#allocation3 + $0xc4] ss:$12 sps:$4 sm:$0xff]  }
  0x1e   :  { %605 = vmatpush3.bf16.msra.mxu1 %v660_v20  ;;  %v488_v51 = vshrl.u32 %v487_v50, 7  ;;  %v485_v53 = vld [vmem:[%s775_s2] sm:$0x7] }
  0x1f   :  { %389 = vmatpush1.bf16.msra.mxu0 %v637_v13  ;;  %606 = vmatprep.subr.bf16.mxu1 %v663_v22  ;;  %v508_v55 = vld [vmem:[%s776_s3] sm:$0x7] }
  0x20   :  { %390 = vmatprep.subr.bf16.mxu0 %v638_v14  ;;  %v497_v52 = vsub.s32 2, %v488_v51  ;;  %v489_v5 = vsub.s32 0, %v488_v51  ;;  %v493_v6 = vsub.s32 1, %v488_v51 }
  0x22   :  { %607 = vmatpush3.bf16.msra.mxu1 %v665_v24  ;;  %v498_v56 = vrot.slane %v485_v53, %v497_v52  ;;  %v521_v59 = vrot.slane %v508_v55, %v497_v52  ;;  %v490_v7 = vrot.slane %v485_v53, %v489_v5  ;;  %v513_v8 = vrot.slane %v508_v55, %v489_v5 }
  0x23   :  { %391 = vmatpush1.bf16.msra.mxu0 %v640_v17  ;;  %608 = vmatprep.subr.bf16.mxu1 %v668_v25  ;;  %v494_v9 = vrot.slane %v485_v53, %v493_v6  ;;  %v517_v12 = vrot.slane %v508_v55, %v493_v6 }
  0x24   :  { %392 = vmatprep.subr.bf16.mxu0 %v641_v19 }
  0x26   :  { %609 = vmatpush3.bf16.msra.mxu1 %v670_v28 }
  0x27   :  { %393 = vmatpush1.bf16.msra.mxu0 %v644_v21  ;;  %610 = vmatprep.subr.bf16.mxu1 %v673_v29 }
  0x28   :  { %394 = vmatprep.subr.bf16.mxu0 %v646_v23 }
  0x2a   :  { %611 = vmatpush3.bf16.msra.mxu1 %v675_v32 }
  0x2b   :  { %395 = vmatpush1.bf16.msra.mxu0 %v649_v26  ;;  %612 = vmatprep.subr.bf16.mxu1 %v678_v33 }
  0x2c   :  { %396 = vmatprep.subr.bf16.mxu0 %v651_v27 }
  0x2e   :  { %613 = vmatpush3.bf16.msra.mxu1 %v680_v37 }
  0x2f   :  { %397 = vmatpush2.bf16.msra.mxu0 %v654_v30 }
  0x30   :  { %398 = vmatprep.subr.bf16.mxu0 %v656_v31 }
  0x31   :  { %456 = vmatmul.mubr.bf16.vlgmr.msra.gmra.mxu1 %v681_v40 }
  0x33   :  { %399 = vmatpush2.bf16.msra.mxu0 %v659_v34 }
  0x34   :  { %400 = vmatprep.subr.bf16.mxu0 %v661_v36 }
  0x37   :  { %401 = vmatpush2.bf16.msra.mxu0 %v664_v38 }
  0x38   :  { %402 = vmatprep.subr.bf16.mxu0 %v666_v39 }
  0x3b   :  { %403 = vmatpush2.bf16.msra.mxu0 %v669_v41 }
  0x3c   :  { %404 = vmatprep.subr.bf16.mxu0 %v671_v42 }
  0x3f   :  { %405 = vmatpush2.bf16.msra.mxu0 %v674_v43 }
  0x40   :  { %406 = vmatprep.subr.bf16.mxu0 %v676_v44 }
  0x43   :  { %407 = vmatpush2.bf16.msra.mxu0 %v679_v45 }
  0x44   :  { %408 = vmatprep.subr.bf16.mxu0 %v684_v46 }
  0x47   :  { %409 = vmatpush2.bf16.msra.mxu0 %v686_v47 }
  0x48   :  { %410 = vmatprep.subr.bf16.mxu0 %v687_v48 }
  0x4b   :  { %411 = vmatpush2.bf16.msra.mxu0 %v689_v49 }
  0x4e   :  { %413 = vmatmul.mubr.bf16.vlgmr.msra.gmra.mxu0 %v681_v40 }
  0xf1   :  { %v614_v54 = vpop.f32.mrf.mxu1 }
  0xf3   :  { %v615_v57 = vpop.f32.mrf.mxu1 }
  0xf4   :  { %v616_v58 = vadd.f32 %v615_v57, %v614_v54 }
  0xf5   :  { %v617_v60 = vpop.f32.mrf.mxu1 }
  0xf6   :  { %v504_v61 = vmul.f32 %v616_v58, %v498_v56 }
  0xf7   :  { %v618_v62 = vpop.f32.mrf.mxu1 }
  0xf8   :  { %v527_v63 = vadd.f32 %v521_v59, %v504_v61  ;;  %v619_v0 = vadd.f32 %v618_v62, %v617_v60 }
  0xfa   :  { %v533_v1 = vmax.f32 %v527_v63, 0.0  ;;  %v507_v2 = vmul.f32 %v619_v0, %v498_v56 }
  0xfc   :  { %539 = vst [vmem:[%s777_s4 + $0x10] sm:$0xff] %v533_v1  ;;  %v530_v3 = vadd.f32 %v521_v59, %v507_v2 }
  0xfe   :  { %v536_v4 = vmax.f32 %v530_v3, 0.0 }
 0x100   :  { %542 = vst [vmem:[%s777_s4 + $0x28] sm:$0xff] %v536_v4 }
 0x10e   :  { %v414_v10 = vpop.f32.mrf.mxu0 }
 0x10f   :  { %v502_v11 = vmul.f32 %v490_v7, %v414_v10 }
 0x110   :  { %v416_v13 = vpop.f32.mrf.mxu0 }
 0x111   :  { %v525_v14 = vadd.f32 %v513_v8, %v502_v11  ;;  %v503_v15 = vmul.f32 %v494_v9, %v416_v13 }
 0x112   :  { %v418_v16 = vpop.f32.mrf.mxu0 }
 0x113   :  { %v531_v17 = vmax.f32 %v525_v14, 0.0  ;;  %v526_v18 = vadd.f32 %v517_v12, %v503_v15  ;;  %v505_v19 = vmul.f32 %v490_v7, %v418_v16 }
 0x114   :  { %v420_v20 = vpop.f32.mrf.mxu0 }
 0x115   :  { %537 = vst [vmem:[%s777_s4] sm:$0xff] %v531_v17  ;;  %v532_v21 = vmax.f32 %v526_v18, 0.0  ;;  %v528_v22 = vadd.f32 %v513_v8, %v505_v19  ;;  %v506_v23 = vmul.f32 %v494_v9, %v420_v20 }
 0x117   :  { %538 = vst [vmem:[%s777_s4 + $0x8] sm:$0xff] %v532_v21  ;;  %v534_v24 = vmax.f32 %v528_v22, 0.0  ;;  %v529_v25 = vadd.f32 %v517_v12, %v506_v23 }
 0x119   :  { %540 = vst [vmem:[%s777_s4 + $0x18] sm:$0xff] %v534_v24  ;;  %v535_v26 = vmax.f32 %v529_v25, 0.0 }
 0x11b   :  { %541 = vst [vmem:[%s777_s4 + $0x20] sm:$0xff] %v535_v26 }
 0x11c   :  { %547 = vsyncpa [#allocation4], 1 }

// kernel: alexnet_forward.10
= control target key start
LH: loop header
LB: loop body
LE: loop exit
PB: predicated region body
PF: predicated region fallthrough
CT: control target
= control target key end

     0   :  { %9 = vsyncpa [#allocation4], 0  ;;  %s2545_s15 = smov [#allocation3]   ;;  %s2691_s0 = inlined_call_operand.vmem [shape: bf16[32,1664], index: 0, kind: input, shape index: {}]   ;;  %s2692_s1 = inlined_call_operand.hbm [shape: bf16[1664,256], index: 1, kind: input, shape index: {}]   ;;  %s2693_s2 = inlined_call_operand.vmem [shape: f32[1,256], index: 2, kind: input, shape index: {}]   ;;  %s2694_s3 = inlined_call_operand.vmem [shape: f32[1,256], index: 3, kind: input, shape index: {}]   ;;  %s2695_s4 = inlined_call_operand.vmem [shape: f32[32,256], index: 4, kind: output, shape index: {}]  }
   0x1   :  { %s17_s16 = sshll.u32 %s2545_s15, 4  ;;  %s18_s16 = int_to_ptr.vmem [resolvable:$true] %s17_s16 }
   0x2   :  { %s2531_s17 = scalar_lea.vmem %s18_s16, 26624  ;;  %p2536_p1 = scmp.lt.s32.totalorder %s18_s16, %s18_s16 }
   0x3   :  { %p2532_p0 = scmp.ne.s32.totalorder %s18_s16, %s2531_s17  ;;  %p2537_p2 = scmp.lt.s32.totalorder %s2531_s17, %s2531_s17 }
   0x5   :  { %p2538_p3 = por %p2537_p2, %p2536_p1 }
   0x7   :  { %p2539_p4 = pnand %p2538_p3, %p2532_p0 }
   0x9   :  { %2542 = shalt.err (!%p2539_p4)
}
   0xa   :  { %s2546_s18 = smov 128   ;;  %s2547_s19 = smov 8  }
   0xb   :  { %23 = dma.hbm_to_vmem [thread:$0]  %s2692_s1, 26624, %s18_s16, [#allocation4], %s2546_s18, %s2546_s18, %s2547_s19  }
   0xc   :  { %2543 = dma.done.wait [#allocation4], 26624  }
   0xd   :  { %2544 = vsyncadd [#allocation4], 4294940672  ;;  %v2173_v0 = vld [vmem:[#allocation3 + $0x74] ss:$8 sps:$4 sm:$0xff]   ;;  %v2177_v2 = vld [vmem:[#allocation3 + $0x70] ss:$8 sps:$4 sm:$0xff]  }
   0xe   :  { %v2175_v1 = vld [vmem:[#allocation3 + $0x174] ss:$8 sps:$4 sm:$0xff]   ;;  %1460 = vmatprep.subr.bf16.mxu0 %v2173_v0  ;;  %v2178_v3 = vld [vmem:[#allocation3 + $0x170] ss:$8 sps:$4 sm:$0xff]   ;;  %v2179_v4 = vld [vmem:[#allocation3 + $0x64] ss:$8 sps:$4 sm:$0xff]  }
   0xf   :  { %1513 = vmatprep.subr.bf16.mxu1 %v2175_v1  ;;  %1461 = vmatpush1.bf16.msra.mxu0 %v2177_v2  ;;  %v2181_v5 = vld [vmem:[#allocation3 + $0x164] ss:$8 sps:$4 sm:$0xff]   ;;  %v2183_v6 = vld [vmem:[#allocation3 + $0x60] ss:$8 sps:$4 sm:$0xff]   ;;  %v2185_v8 = vld [vmem:[#allocation3 + $0x54] ss:$8 sps:$4 sm:$0xff]  }
  0x10   :  { %1514 = vmatpush1.bf16.msra.mxu1 %v2178_v3  ;;  %1462 = vmatprep.subr.bf16.mxu0 %v2179_v4  ;;  %v2184_v7 = vld [vmem:[#allocation3 + $0x160] ss:$8 sps:$4 sm:$0xff]   ;;  %v2187_v9 = vld [vmem:[#allocation3 + $0x154] ss:$8 sps:$4 sm:$0xff]   ;;  %v2189_v10 = vld [vmem:[#allocation3 + $0x50] ss:$8 sps:$4 sm:$0xff]  }
  0x11   :  { %1515 = vmatprep.subr.bf16.mxu1 %v2181_v5  ;;  %v2190_v11 = vld [vmem:[#allocation3 + $0x150] ss:$8 sps:$4 sm:$0xff]   ;;  %v2191_v12 = vld [vmem:[#allocation3 + $0x44] ss:$8 sps:$4 sm:$0xff]   ;;  %v2195_v14 = vld [vmem:[#allocation3 + $0x40] ss:$8 sps:$4 sm:$0xff]  }
  0x12   :  { %v2193_v13 = vld [vmem:[#allocation3 + $0x144] ss:$8 sps:$4 sm:$0xff]   ;;  %v2196_v15 = vld [vmem:[#allocation3 + $0x140] ss:$8 sps:$4 sm:$0xff]   ;;  %v2197_v16 = vld [vmem:[#allocation3 + $0x34] ss:$8 sps:$4 sm:$0xff]  }
  0x13   :  { %1463 = vmatpush1.bf16.msra.mxu0 %v2183_v6  ;;  %v2199_v17 = vld [vmem:[#allocation3 + $0x134] ss:$8 sps:$4 sm:$0xff]   ;;  %v2201_v18 = vld [vmem:[#allocation3 + $0x30] ss:$8 sps:$4 sm:$0xff]   ;;  %v2203_v20 = vld [vmem:[#allocation3 + $0x24] ss:$8 sps:$4 sm:$0xff]  }
  0x14   :  { %1516 = vmatpush1.bf16.msra.mxu1 %v2184_v7  ;;  %1464 = vmatprep.subr.bf16.mxu0 %v2185_v8  ;;  %v2202_v19 = vld [vmem:[#allocation3 + $0x130] ss:$8 sps:$4 sm:$0xff]   ;;  %v2205_v21 = vld [vmem:[#allocation3 + $0x124] ss:$8 sps:$4 sm:$0xff]   ;;  %v2207_v22 = vld [vmem:[#allocation3 + $0x20] ss:$8 sps:$4 sm:$0xff]  }
  0x15   :  { %1517 = vmatprep.subr.bf16.mxu1 %v2187_v9  ;;  %v2208_v23 = vld [vmem:[#allocation3 + $0x120] ss:$8 sps:$4 sm:$0xff]   ;;  %v2209_v24 = vld [vmem:[#allocation3 + $0x14] ss:$8 sps:$4 sm:$0xff]   ;;  %v2213_v26 = vld [vmem:[#allocation3 + $0x10] ss:$8 sps:$4 sm:$0xff]  }
  0x16   :  { %v2211_v25 = vld [vmem:[#allocation3 + $0x114] ss:$8 sps:$4 sm:$0xff]   ;;  %v2214_v27 = vld [vmem:[#allocation3 + $0x110] ss:$8 sps:$4 sm:$0xff]   ;;  %v2215_v28 = vld [vmem:[#allocation3 + $0x4] ss:$8 sps:$4 sm:$0xff]  }
  0x17   :  { %1465 = vmatpush1.bf16.msra.mxu0 %v2189_v10  ;;  %v2217_v29 = vld [vmem:[#allocation3 + $0x104] ss:$8 sps:$4 sm:$0xff]   ;;  %v2219_v30 = vld [vmem:[#allocation3] ss:$8 sps:$4 sm:$0xff]   ;;  %v2221_v32 = vld [vmem:[#allocation3 + $0xf4] ss:$8 sps:$4 sm:$0xff]  }
  0x18   :  { %1518 = vmatpush1.bf16.msra.mxu1 %v2190_v11  ;;  %1466 = vmatprep.subr.bf16.mxu0 %v2191_v12  ;;  %v2220_v31 = vld [vmem:[#allocation3 + $0x100] ss:$8 sps:$4 sm:$0xff]   ;;  %v2223_v33 = vld [vmem:[#allocation3 + $0x1f4] ss:$8 sps:$4 sm:$0xff]   ;;  %v2225_v34 = vld [vmem:[#allocation3 + $0xf0] ss:$8 sps:$4 sm:$0xff]  }
  0x19   :  { %1519 = vmatprep.subr.bf16.mxu1 %v2193_v13  ;;  %v2226_v35 = vld [vmem:[#allocation3 + $0x1f0] ss:$8 sps:$4 sm:$0xff]   ;;  %v2227_v36 = vld [vmem:[#allocation3 + $0xe4] ss:$8 sps:$4 sm:$0xff]   ;;  %v2231_v38 = vld [vmem:[#allocation3 + $0xe0] ss:$8 sps:$4 sm:$0xff]  }
  0x1a   :  { %v2229_v37 = vld [vmem:[#allocation3 + $0x1e4] ss:$8 sps:$4 sm:$0xff]   ;;  %v2232_v39 = vld [vmem:[#allocation3 + $0x1e0] ss:$8 sps:$4 sm:$0xff]   ;;  %v2233_v40 = vld [vmem:[#allocation3 + $0xd4] ss:$8 sps:$4 sm:$0xff]  }
  0x1b   :  { %1467 = vmatpush1.bf16.msra.mxu0 %v2195_v14  ;;  %v2235_v41 = vld [vmem:[#allocation3 + $0x1d4] ss:$8 sps:$4 sm:$0xff]   ;;  %v2237_v42 = vld [vmem:[#allocation3 + $0xd0] ss:$8 sps:$4 sm:$0xff]   ;;  %v2239_v44 = vld [vmem:[#allocation3 + $0xc4] ss:$8 sps:$4 sm:$0xff]  }
  0x1c   :  { %1520 = vmatpush1.bf16.msra.mxu1 %v2196_v15  ;;  %1468 = vmatprep.subr.bf16.mxu0 %v2197_v16  ;;  %v2238_v43 = vld [vmem:[#allocation3 + $0x1d0] ss:$8 sps:$4 sm:$0xff]   ;;  %v2241_v45 = vld [vmem:[#allocation3 + $0x1c4] ss:$8 sps:$4 sm:$0xff]   ;;  %v2243_v46 = vld [vmem:[#allocation3 + $0xc0] ss:$8 sps:$4 sm:$0xff]  }
  0x1d   :  { %1521 = vmatprep.subr.bf16.mxu1 %v2199_v17  ;;  %v2244_v47 = vld [vmem:[#allocation3 + $0x1c0] ss:$8 sps:$4 sm:$0xff]   ;;  %v2245_v48 = vld [vmem:[#allocation3 + $0xb4] ss:$8 sps:$4 sm:$0xff]   ;;  %v2271_v49 = vld [vmem:[%s2691_s0 + $0x4] ss:$52 sps:$4 sm:$0xff]  }
  0x1e   :  { %v2247_v50 = vld [vmem:[#allocation3 + $0x1b4] ss:$8 sps:$4 sm:$0xff]   ;;  %v2274_v51 = vld [vmem:[%s2691_s0 + $0xc] ss:$52 sps:$4 sm:$0xff]   ;;  %1492 = vmatprep.mubr.bf16.mxu0 %v2271_v49  ;;  %v2249_v52 = vld [vmem:[#allocation3 + $0xb0] ss:$8 sps:$4 sm:$0xff]  }
  0x1f   :  { %1469 = vmatpush1.bf16.msra.mxu0 %v2201_v18  ;;  %v2250_v53 = vld [vmem:[#allocation3 + $0x1b0] ss:$8 sps:$4 sm:$0xff]   ;;  %1545 = vmatprep.mubr.bf16.mxu1 %v2274_v51  ;;  %v2251_v54 = vld [vmem:[#allocation3 + $0xa4] ss:$8 sps:$4 sm:$0xff]   ;;  %v2255_v56 = vld [vmem:[#allocation3 + $0xa0] ss:$8 sps:$4 sm:$0xff]  }
  0x20   :  { %1522 = vmatpush1.bf16.msra.mxu1 %v2202_v19  ;;  %1470 = vmatprep.subr.bf16.mxu0 %v2203_v20  ;;  %v2253_v55 = vld [vmem:[#allocation3 + $0x1a4] ss:$8 sps:$4 sm:$0xff]   ;;  %v2256_v57 = vld [vmem:[#allocation3 + $0x1a0] ss:$8 sps:$4 sm:$0xff]   ;;  %v2257_v58 = vld [vmem:[#allocation3 + $0x94] ss:$8 sps:$4 sm:$0xff]  }
  0x21   :  { %1523 = vmatprep.subr.bf16.mxu1 %v2205_v21  ;;  %v2259_v59 = vld [vmem:[#allocation3 + $0x194] ss:$8 sps:$4 sm:$0xff]   ;;  %v2261_v60 = vld [vmem:[#allocation3 + $0x90] ss:$8 sps:$4 sm:$0xff]   ;;  %v2263_v62 = vld [vmem:[#allocation3 + $0x84] ss:$8 sps:$4 sm:$0xff]  }
  0x22   :  { %v2262_v61 = vld [vmem:[#allocation3 + $0x190] ss:$8 sps:$4 sm:$0xff]   ;;  %v2265_v63 = vld [vmem:[#allocation3 + $0x184] ss:$8 sps:$4 sm:$0xff]   ;;  %v2267_v0 = vld [vmem:[#allocation3 + $0x80] ss:$8 sps:$4 sm:$0xff]  }
  0x23   :  { %1471 = vmatpush1.bf16.msra.mxu0 %v2207_v22  ;;  %v2268_v1 = vld [vmem:[#allocation3 + $0x180] ss:$8 sps:$4 sm:$0xff]   ;;  %v2277_v2 = vld [vmem:[#allocation3 + $0x274] ss:$8 sps:$4 sm:$0xff]   ;;  %v2275_v6 = vld [vmem:[#allocation3 + $0x270] ss:$8 sps:$4 sm:$0xff]  }
  0x24   :  { %1524 = vmatpush1.bf16.msra.mxu1 %v2208_v23  ;;  %1472 = vmatprep.subr.bf16.mxu0 %v2209_v24  ;;  %v2280_v3 = vld [vmem:[#allocation3 + $0x374] ss:$8 sps:$4 sm:$0xff]   ;;  %v2278_v7 = vld [vmem:[#allocation3 + $0x370] ss:$8 sps:$4 sm:$0xff]   ;;  %v2283_v8 = vld [vmem:[#allocation3 + $0x264] ss:$8 sps:$4 sm:$0xff]  }
  0x25   :  { %1525 = vmatprep.subr.bf16.mxu1 %v2211_v25  ;;  %v2269_v4 = vld [vmem:[%s2691_s0] ss:$52 sps:$4 sm:$0xff]   ;;  %v2272_v5 = vld [vmem:[%s2691_s0 + $0x8] ss:$52 sps:$4 sm:$0xff]   ;;  %v2286_v9 = vld [vmem:[#allocation3 + $0x364] ss:$8 sps:$4 sm:$0xff]  }
  0x26   :  { %v2281_v10 = vld [vmem:[#allocation3 + $0x260] ss:$8 sps:$4 sm:$0xff]   ;;  %v2289_v12 = vld [vmem:[#allocation3 + $0x254] ss:$8 sps:$4 sm:$0xff]   ;;  %v2287_v14 = vld [vmem:[#allocation3 + $0x250] ss:$8 sps:$4 sm:$0xff]  }
  0x27   :  { %1473 = vmatpush1.bf16.msra.mxu0 %v2213_v26  ;;  %v2284_v11 = vld [vmem:[#allocation3 + $0x360] ss:$8 sps:$4 sm:$0xff]   ;;  %v2292_v13 = vld [vmem:[#allocation3 + $0x354] ss:$8 sps:$4 sm:$0xff]   ;;  %v2290_v15 = vld [vmem:[#allocation3 + $0x350] ss:$8 sps:$4 sm:$0xff]  }
  0x28   :  { %1526 = vmatpush1.bf16.msra.mxu1 %v2214_v27  ;;  %1474 = vmatprep.subr.bf16.mxu0 %v2215_v28  ;;  %v2295_v16 = vld [vmem:[#allocation3 + $0x244] ss:$8 sps:$4 sm:$0xff]   ;;  %v2293_v18 = vld [vmem:[#allocation3 + $0x240] ss:$8 sps:$4 sm:$0xff]   ;;  %v2301_v20 = vld [vmem:[#allocation3 + $0x234] ss:$8 sps:$4 sm:$0xff]  }
  0x29   :  { %1527 = vmatprep.subr.bf16.mxu1 %v2217_v29  ;;  %v2298_v17 = vld [vmem:[#allocation3 + $0x344] ss:$8 sps:$4 sm:$0xff]   ;;  %v2296_v19 = vld [vmem:[#allocation3 + $0x340] ss:$8 sps:$4 sm:$0xff]   ;;  %v2304_v21 = vld [vmem:[#allocation3 + $0x334] ss:$8 sps:$4 sm:$0xff]  }
  0x2a   :  { %v2299_v22 = vld [vmem:[#allocation3 + $0x230] ss:$8 sps:$4 sm:$0xff]   ;;  %v2307_v24 = vld [vmem:[#allocation3 + $0x224] ss:$8 sps:$4 sm:$0xff]   ;;  %v2355_v27 = vld [vmem:[%s2691_s0 + $0x74] ss:$52 sps:$4 sm:$0xff]  }
  0x2b   :  { %1475 = vmatpush1.bf16.msra.mxu0 %v2219_v30  ;;  %v2302_v23 = vld [vmem:[#allocation3 + $0x330] ss:$8 sps:$4 sm:$0xff]   ;;  %v2310_v25 = vld [vmem:[#allocation3 + $0x324] ss:$8 sps:$4 sm:$0xff]   ;;  %v2357_v28 = vld [vmem:[%s2691_s0 + $0x68] ss:$52 sps:$4 sm:$0xff]  }
  0x2c   :  { %1528 = vmatpush1.bf16.msra.mxu1 %v2220_v31  ;;  %1476 = vmatprep.subr.bf16.mxu0 %v2221_v32  ;;  %v2353_v26 = vld [vmem:[%s2691_s0 + $0x6c] ss:$52 sps:$4 sm:$0xff]   ;;  %v2358_v29 = vld [vmem:[%s2691_s0 + $0x70] ss:$52 sps:$4 sm:$0xff]   ;;  %v2313_v32 = vld [vmem:[#allocation3 + $0x214] ss:$8 sps:$4 sm:$0xff]  }
  0x2d   :  { %1529 = vmatprep.subr.bf16.mxu1 %v2223_v33  ;;  %v2305_v30 = vld [vmem:[#allocation3 + $0x220] ss:$8 sps:$4 sm:$0xff]   ;;  %v2316_v33 = vld [vmem:[#allocation3 + $0x314] ss:$8 sps:$4 sm:$0xff]  }
  0x2e   :  { %v2308_v31 = vld [vmem:[#allocation3 + $0x320] ss:$8 sps:$4 sm:$0xff]   ;;  %v2340_v51 = vld [vmem:[#allocation3 + $0x3d4] ss:$8 sps:$4 sm:$0xff]  }
  0x2f   :  { %1477 = vmatpush2.bf16.msra.mxu0 %v2225_v34  ;;  %v2311_v34 = vld [vmem:[#allocation3 + $0x210] ss:$8 sps:$4 sm:$0xff]   ;;  %v2332_v49 = vld [vmem:[#allocation3 + $0x3e0] ss:$8 sps:$4 sm:$0xff]  }
  0x30   :  { %1530 = vmatpush2.bf16.msra.mxu1 %v2226_v35  ;;  %1478 = vmatprep.subr.bf16.mxu0 %v2227_v36  ;;  %v2314_v35 = vld [vmem:[#allocation3 + $0x310] ss:$8 sps:$4 sm:$0xff]   ;;  %v2319_v36 = vld [vmem:[#allocation3 + $0x204] ss:$8 sps:$4 sm:$0xff]  }
  0x31   :  { %1531 = vmatprep.subr.bf16.mxu1 %v2229_v37  ;;  %v2322_v37 = vld [vmem:[#allocation3 + $0x304] ss:$8 sps:$4 sm:$0xff]  }
  0x33   :  { %1479 = vmatpush2.bf16.msra.mxu0 %v2231_v38  ;;  %v2317_v38 = vld [vmem:[#allocation3 + $0x200] ss:$8 sps:$4 sm:$0xff]  }
  0x34   :  { %1532 = vmatpush2.bf16.msra.mxu1 %v2232_v39  ;;  %1480 = vmatprep.subr.bf16.mxu0 %v2233_v40  ;;  %v2320_v39 = vld [vmem:[#allocation3 + $0x300] ss:$8 sps:$4 sm:$0xff]   ;;  %v2325_v40 = vld [vmem:[#allocation3 + $0x2f4] ss:$8 sps:$4 sm:$0xff]  }
  0x35   :  { %1533 = vmatprep.subr.bf16.mxu1 %v2235_v41  ;;  %v2379_v41 = vld [vmem:[%s2691_s0 + $0x14] ss:$52 sps:$4 sm:$0xff]  }
  0x37   :  { %1481 = vmatpush2.bf16.msra.mxu0 %v2237_v42  ;;  %v2328_v42 = vld [vmem:[#allocation3 + $0x3f4] ss:$8 sps:$4 sm:$0xff]  }
  0x38   :  { %1534 = vmatpush2.bf16.msra.mxu1 %v2238_v43  ;;  %1482 = vmatprep.subr.bf16.mxu0 %v2239_v44  ;;  %v2382_v43 = vld [vmem:[%s2691_s0 + $0x1c] ss:$52 sps:$4 sm:$0xff]  }
  0x39   :  { %1535 = vmatprep.subr.bf16.mxu1 %v2241_v45  ;;  %v2323_v44 = vld [vmem:[#allocation3 + $0x2f0] ss:$8 sps:$4 sm:$0xff]  }
  0x3a   :  { %v2326_v45 = vld [vmem:[#allocation3 + $0x3f0] ss:$8 sps:$4 sm:$0xff]  }
  0x3b   :  { %1483 = vmatpush2.bf16.msra.mxu0 %v2243_v46  ;;  %v2331_v46 = vld [vmem:[#allocation3 + $0x2e4] ss:$8 sps:$4 sm:$0xff]  }
  0x3c   :  { %1536 = vmatpush2.bf16.msra.mxu1 %v2244_v47  ;;  %1484 = vmatprep.subr.bf16.mxu0 %v2245_v48  ;;  %v2334_v47 = vld [vmem:[#allocation3 + $0x3e4] ss:$8 sps:$4 sm:$0xff]   ;;  %v2329_v48 = vld [vmem:[#allocation3 + $0x2e0] ss:$8 sps:$4 sm:$0xff]  }
  0x3d   :  { %1537 = vmatprep.subr.bf16.mxu1 %v2247_v50  ;;  %v2337_v50 = vld [vmem:[#allocation3 + $0x2d4] ss:$8 sps:$4 sm:$0xff]  }
  0x3f   :  { %1485 = vmatpush2.bf16.msra.mxu0 %v2249_v52  ;;  %v2335_v52 = vld [vmem:[#allocation3 + $0x2d0] ss:$8 sps:$4 sm:$0xff]  }
  0x40   :  { %1538 = vmatpush2.bf16.msra.mxu1 %v2250_v53  ;;  %1486 = vmatprep.subr.bf16.mxu0 %v2251_v54  ;;  %v2338_v53 = vld [vmem:[#allocation3 + $0x3d0] ss:$8 sps:$4 sm:$0xff]   ;;  %v2343_v54 = vld [vmem:[#allocation3 + $0x2c4] ss:$8 sps:$4 sm:$0xff]  }
  0x41   :  { %1539 = vmatprep.subr.bf16.mxu1 %v2253_v55  ;;  %v2346_v55 = vld [vmem:[#allocation3 + $0x3c4] ss:$8 sps:$4 sm:$0xff]  }
  0x43   :  { %1487 = vmatpush2.bf16.msra.mxu0 %v2255_v56  ;;  %v2341_v56 = vld [vmem:[#allocation3 + $0x2c0] ss:$8 sps:$4 sm:$0xff]  }
  0x44   :  { %1540 = vmatpush2.bf16.msra.mxu1 %v2256_v57  ;;  %1488 = vmatprep.subr.bf16.mxu0 %v2257_v58  ;;  %v2344_v57 = vld [vmem:[#allocation3 + $0x3c0] ss:$8 sps:$4 sm:$0xff]   ;;  %v2349_v58 = vld [vmem:[#allocation3 + $0x2b4] ss:$8 sps:$4 sm:$0xff]  }
  0x45   :  { %1541 = vmatprep.subr.bf16.mxu1 %v2259_v59  ;;  %v2352_v59 = vld [vmem:[#allocation3 + $0x3b4] ss:$8 sps:$4 sm:$0xff]  }
  0x47   :  { %1489 = vmatpush2.bf16.msra.mxu0 %v2261_v60  ;;  %v2347_v60 = vld [vmem:[#allocation3 + $0x2b0] ss:$8 sps:$4 sm:$0xff]  }
  0x48   :  { %1542 = vmatpush2.bf16.msra.mxu1 %v2262_v61  ;;  %1490 = vmatprep.subr.bf16.mxu0 %v2263_v62  ;;  %v2350_v61 = vld [vmem:[#allocation3 + $0x3b0] ss:$8 sps:$4 sm:$0xff]   ;;  %v2361_v62 = vld [vmem:[#allocation3 + $0x2a4] ss:$8 sps:$4 sm:$0xff]  }
  0x49   :  { %1543 = vmatprep.subr.bf16.mxu1 %v2265_v63  ;;  %v2364_v63 = vld [vmem:[#allocation3 + $0x3a4] ss:$8 sps:$4 sm:$0xff]  }
  0x4b   :  { %1491 = vmatpush2.bf16.msra.mxu0 %v2267_v0  ;;  %v2359_v0 = vld [vmem:[#allocation3 + $0x2a0] ss:$8 sps:$4 sm:$0xff]  }
  0x4c   :  { %1544 = vmatpush2.bf16.msra.mxu1 %v2268_v1  ;;  %1566 = vmatprep.subr.bf16.mxu0 %v2277_v2  ;;  %v2362_v1 = vld [vmem:[#allocation3 + $0x3a0] ss:$8 sps:$4 sm:$0xff]   ;;  %v2367_v2 = vld [vmem:[#allocation3 + $0x294] ss:$8 sps:$4 sm:$0xff]  }
  0x4d   :  { %1619 = vmatprep.subr.bf16.mxu1 %v2280_v3  ;;  %v2370_v3 = vld [vmem:[#allocation3 + $0x394] ss:$8 sps:$4 sm:$0xff]  }
  0x4e   :  { %1493 = vmatmul.mubr.bf16.vlgmr.msra.gmra.mxu0 %v2269_v4  ;;  %v2365_v4 = vld [vmem:[#allocation3 + $0x290] ss:$8 sps:$4 sm:$0xff]  }
  0x4f   :  { %1546 = vmatmul.mubr.bf16.vlgmr.msra.gmra.mxu1 %v2272_v5  ;;  %1567 = vmatpush1.bf16.msra.mxu0 %v2275_v6  ;;  %v2368_v5 = vld [vmem:[#allocation3 + $0x390] ss:$8 sps:$4 sm:$0xff]   ;;  %v2373_v6 = vld [vmem:[#allocation3 + $0x284] ss:$8 sps:$4 sm:$0xff]  }
  0x50   :  { %1620 = vmatpush1.bf16.msra.mxu1 %v2278_v7  ;;  %1568 = vmatprep.subr.bf16.mxu0 %v2283_v8  ;;  %v2376_v7 = vld [vmem:[#allocation3 + $0x384] ss:$8 sps:$4 sm:$0xff]   ;;  %v2371_v8 = vld [vmem:[#allocation3 + $0x280] ss:$8 sps:$4 sm:$0xff]  }
  0x51   :  { %1621 = vmatprep.subr.bf16.mxu1 %v2286_v9  ;;  %1502 = vmatprep.mubr.bf16.mxu0 %v2353_v26  ;;  %v2374_v9 = vld [vmem:[#allocation3 + $0x380] ss:$8 sps:$4 sm:$0xff]   ;;  %v2401_v26 = vld [vmem:[#allocation3 + $0x550] ss:$8 sps:$4 sm:$0xff]  }
  0x52   :  { %1555 = vmatprep.mubr.bf16.mxu1 %v2355_v27  ;;  %v2406_v27 = vld [vmem:[%s2691_s0 + $0x80] ss:$52 sps:$4 sm:$0xff]  }
  0x53   :  { %1569 = vmatpush1.bf16.msra.mxu0 %v2281_v10  ;;  %v2385_v10 = vld [vmem:[#allocation3 + $0x474] ss:$8 sps:$4 sm:$0xff]  }
  0x54   :  { %1622 = vmatpush1.bf16.msra.mxu1 %v2284_v11  ;;  %1570 = vmatprep.subr.bf16.mxu0 %v2289_v12  ;;  %v2388_v11 = vld [vmem:[#allocation3 + $0x574] ss:$8 sps:$4 sm:$0xff]   ;;  %v2377_v12 = vld [vmem:[%s2691_s0 + $0x10] ss:$52 sps:$4 sm:$0xff]  }
  0x55   :  { %1623 = vmatprep.subr.bf16.mxu1 %v2292_v13  ;;  %v2380_v13 = vld [vmem:[%s2691_s0 + $0x18] ss:$52 sps:$4 sm:$0xff]  }
  0x56   :  { %1503 = vmatmul.mubr.bf16.gmra.mxu0 %v2357_v28  ;;  %v2409_v28 = vld [vmem:[#allocation3 + $0x444] ss:$8 sps:$4 sm:$0xff]  }
  0x57   :  { %1571 = vmatpush1.bf16.msra.mxu0 %v2287_v14  ;;  %1556 = vmatmul.mubr.bf16.gmra.mxu1 %v2358_v29  ;;  %v2383_v14 = vld [vmem:[#allocation3 + $0x470] ss:$8 sps:$4 sm:$0xff]   ;;  %v2412_v29 = vld [vmem:[#allocation3 + $0x544] ss:$8 sps:$4 sm:$0xff]  }
  0x58   :  { %1624 = vmatpush1.bf16.msra.mxu1 %v2290_v15  ;;  %1572 = vmatprep.subr.bf16.mxu0 %v2295_v16  ;;  %v2386_v15 = vld [vmem:[#allocation3 + $0x570] ss:$8 sps:$4 sm:$0xff]   ;;  %v2391_v16 = vld [vmem:[#allocation3 + $0x464] ss:$8 sps:$4 sm:$0xff]  }
  0x59   :  { %1625 = vmatprep.subr.bf16.mxu1 %v2298_v17  ;;  %1598 = vmatprep.mubr.bf16.mxu0 %v2379_v41  ;;  %v2394_v17 = vld [vmem:[#allocation3 + $0x564] ss:$8 sps:$4 sm:$0xff]   ;;  %v2422_v41 = vld [vmem:[#allocation3 + $0x520] ss:$8 sps:$4 sm:$0xff]  }
  0x5a   :  { %1651 = vmatprep.mubr.bf16.mxu1 %v2382_v43  ;;  %v2430_v43 = vld [vmem:[#allocation3 + $0x514] ss:$8 sps:$4 sm:$0xff]  }
  0x5b   :  { %1573 = vmatpush1.bf16.msra.mxu0 %v2293_v18  ;;  %v2395_v18 = vld [vmem:[%s2691_s0 + $0x7c] ss:$52 sps:$4 sm:$0xff]  }
  0x5c   :  { %1626 = vmatpush1.bf16.msra.mxu1 %v2296_v19  ;;  %1574 = vmatprep.subr.bf16.mxu0 %v2301_v20  ;;  %v2404_v19 = vld [vmem:[%s2691_s0 + $0x84] ss:$52 sps:$4 sm:$0xff]   ;;  %v2389_v20 = vld [vmem:[#allocation3 + $0x460] ss:$8 sps:$4 sm:$0xff]  }
  0x5d   :  { %1627 = vmatprep.subr.bf16.mxu1 %v2304_v21  ;;  %v2392_v21 = vld [vmem:[#allocation3 + $0x560] ss:$8 sps:$4 sm:$0xff]  }
  0x5f   :  { %1575 = vmatpush1.bf16.msra.mxu0 %v2299_v22  ;;  %v2400_v22 = vld [vmem:[#allocation3 + $0x454] ss:$8 sps:$4 sm:$0xff]  }
  0x60   :  { %1628 = vmatpush1.bf16.msra.mxu1 %v2302_v23  ;;  %1576 = vmatprep.subr.bf16.mxu0 %v2307_v24  ;;  %v2403_v23 = vld [vmem:[#allocation3 + $0x554] ss:$8 sps:$4 sm:$0xff]   ;;  %v2397_v24 = vld [vmem:[%s2691_s0 + $0x78] ss:$52 sps:$4 sm:$0xff]  }
  0x61   :  { %1629 = vmatprep.subr.bf16.mxu1 %v2310_v25  ;;  %v2398_v25 = vld [vmem:[#allocation3 + $0x450] ss:$8 sps:$4 sm:$0xff]  }
  0x63   :  { %1577 = vmatpush1.bf16.msra.mxu0 %v2305_v30  ;;  %v2407_v30 = vld [vmem:[#allocation3 + $0x440] ss:$8 sps:$4 sm:$0xff]  }
  0x64   :  { %1630 = vmatpush1.bf16.msra.mxu1 %v2308_v31  ;;  %1578 = vmatprep.subr.bf16.mxu0 %v2313_v32  ;;  %v2410_v31 = vld [vmem:[#allocation3 + $0x540] ss:$8 sps:$4 sm:$0xff]   ;;  %v2415_v32 = vld [vmem:[#allocation3 + $0x434] ss:$8 sps:$4 sm:$0xff]  }
  0x65   :  { %1631 = vmatprep.subr.bf16.mxu1 %v2316_v33  ;;  %v2487_v33 = vld [vmem:[%s2691_s0 + $0x24] ss:$52 sps:$4 sm:$0xff]  }
  0x67   :  { %1579 = vmatpush1.bf16.msra.mxu0 %v2311_v34  ;;  %v2418_v34 = vld [vmem:[#allocation3 + $0x534] ss:$8 sps:$4 sm:$0xff]  }
  0x68   :  { %1632 = vmatpush1.bf16.msra.mxu1 %v2314_v35  ;;  %1580 = vmatprep.subr.bf16.mxu0 %v2319_v36  ;;  %v2490_v35 = vld [vmem:[%s2691_s0 + $0x2c] ss:$52 sps:$4 sm:$0xff]   ;;  %v2413_v36 = vld [vmem:[#allocation3 + $0x430] ss:$8 sps:$4 sm:$0xff]  }
  0x69   :  { %1633 = vmatprep.subr.bf16.mxu1 %v2322_v37  ;;  %v2416_v37 = vld [vmem:[#allocation3 + $0x530] ss:$8 sps:$4 sm:$0xff]  }
  0x6b   :  { %1581 = vmatpush1.bf16.msra.mxu0 %v2317_v38  ;;  %v2421_v38 = vld [vmem:[#allocation3 + $0x424] ss:$8 sps:$4 sm:$0xff]  }
  0x6c   :  { %1634 = vmatpush1.bf16.msra.mxu1 %v2320_v39  ;;  %1582 = vmatprep.subr.bf16.mxu0 %v2325_v40  ;;  %v2424_v39 = vld [vmem:[#allocation3 + $0x524] ss:$8 sps:$4 sm:$0xff]   ;;  %v2419_v40 = vld [vmem:[#allocation3 + $0x420] ss:$8 sps:$4 sm:$0xff]  }
  0x6d   :  { %1635 = vmatprep.subr.bf16.mxu1 %v2328_v42  ;;  %v2427_v42 = vld [vmem:[#allocation3 + $0x414] ss:$8 sps:$4 sm:$0xff]  }
  0x6f   :  { %1583 = vmatpush2.bf16.msra.mxu0 %v2323_v44  ;;  %v2425_v44 = vld [vmem:[#allocation3 + $0x410] ss:$8 sps:$4 sm:$0xff]  }
  0x70   :  { %1636 = vmatpush2.bf16.msra.mxu1 %v2326_v45  ;;  %1584 = vmatprep.subr.bf16.mxu0 %v2331_v46  ;;  %v2428_v45 = vld [vmem:[#allocation3 + $0x510] ss:$8 sps:$4 sm:$0xff]   ;;  %v2433_v46 = vld [vmem:[#allocation3 + $0x404] ss:$8 sps:$4 sm:$0xff]  }
  0x71   :  { %1637 = vmatprep.subr.bf16.mxu1 %v2334_v47  ;;  %v2436_v47 = vld [vmem:[#allocation3 + $0x504] ss:$8 sps:$4 sm:$0xff]  }
  0x73   :  { %1585 = vmatpush2.bf16.msra.mxu0 %v2329_v48  ;;  %v2431_v48 = vld [vmem:[#allocation3 + $0x400] ss:$8 sps:$4 sm:$0xff]  }
  0x74   :  { %1638 = vmatpush2.bf16.msra.mxu1 %v2332_v49  ;;  %1586 = vmatprep.subr.bf16.mxu0 %v2337_v50  ;;  %v2434_v49 = vld [vmem:[#allocation3 + $0x500] ss:$8 sps:$4 sm:$0xff]   ;;  %v2439_v50 = vld [vmem:[#allocation3 + $0x4f4] ss:$8 sps:$4 sm:$0xff]  }
  0x75   :  { %1639 = vmatprep.subr.bf16.mxu1 %v2340_v51  ;;  %v2442_v51 = vld [vmem:[#allocation3 + $0x5f4] ss:$8 sps:$4 sm:$0xff]  }
  0x77   :  { %1587 = vmatpush2.bf16.msra.mxu0 %v2335_v52  ;;  %v2437_v52 = vld [vmem:[#allocation3 + $0x4f0] ss:$8 sps:$4 sm:$0xff]  }
  0x78   :  { %1640 = vmatpush2.bf16.msra.mxu1 %v2338_v53  ;;  %1588 = vmatprep.subr.bf16.mxu0 %v2343_v54  ;;  %v2440_v53 = vld [vmem:[#allocation3 + $0x5f0] ss:$8 sps:$4 sm:$0xff]   ;;  %v2445_v54 = vld [vmem:[#allocation3 + $0x4e4] ss:$8 sps:$4 sm:$0xff]  }
  0x79   :  { %1641 = vmatprep.subr.bf16.mxu1 %v2346_v55  ;;  %v2448_v55 = vld [vmem:[#allocation3 + $0x5e4] ss:$8 sps:$4 sm:$0xff]  }
  0x7b   :  { %1589 = vmatpush2.bf16.msra.mxu0 %v2341_v56  ;;  %v2443_v56 = vld [vmem:[#allocation3 + $0x4e0] ss:$8 sps:$4 sm:$0xff]  }
  0x7c   :  { %1642 = vmatpush2.bf16.msra.mxu1 %v2344_v57  ;;  %1590 = vmatprep.subr.bf16.mxu0 %v2349_v58  ;;  %v2446_v57 = vld [vmem:[#allocation3 + $0x5e0] ss:$8 sps:$4 sm:$0xff]   ;;  %v2451_v58 = vld [vmem:[#allocation3 + $0x4d4] ss:$8 sps:$4 sm:$0xff]  }
  0x7d   :  { %1643 = vmatprep.subr.bf16.mxu1 %v2352_v59  ;;  %v2454_v59 = vld [vmem:[#allocation3 + $0x5d4] ss:$8 sps:$4 sm:$0xff]  }
  0x7f   :  { %1591 = vmatpush2.bf16.msra.mxu0 %v2347_v60  ;;  %v2449_v60 = vld [vmem:[#allocation3 + $0x4d0] ss:$8 sps:$4 sm:$0xff]  }
  0x80   :  { %1644 = vmatpush2.bf16.msra.mxu1 %v2350_v61  ;;  %1592 = vmatprep.subr.bf16.mxu0 %v2361_v62  ;;  %v2452_v61 = vld [vmem:[#allocation3 + $0x5d0] ss:$8 sps:$4 sm:$0xff]   ;;  %v2457_v62 = vld [vmem:[#allocation3 + $0x4c4] ss:$8 sps:$4 sm:$0xff]  }
  0x81   :  { %1645 = vmatprep.subr.bf16.mxu1 %v2364_v63  ;;  %v2460_v63 = vld [vmem:[#allocation3 + $0x5c4] ss:$8 sps:$4 sm:$0xff]  }
  0x83   :  { %1593 = vmatpush2.bf16.msra.mxu0 %v2359_v0  ;;  %v2455_v0 = vld [vmem:[#allocation3 + $0x4c0] ss:$8 sps:$4 sm:$0xff]  }
  0x84   :  { %1646 = vmatpush2.bf16.msra.mxu1 %v2362_v1  ;;  %1594 = vmatprep.subr.bf16.mxu0 %v2367_v2  ;;  %v2458_v1 = vld [vmem:[#allocation3 + $0x5c0] ss:$8 sps:$4 sm:$0xff]   ;;  %v2463_v2 = vld [vmem:[#allocation3 + $0x4b4] ss:$8 sps:$4 sm:$0xff]  }
  0x85   :  { %1647 = vmatprep.subr.bf16.mxu1 %v2370_v3  ;;  %v2466_v3 = vld [vmem:[#allocation3 + $0x5b4] ss:$8 sps:$4 sm:$0xff]  }
  0x87   :  { %1595 = vmatpush2.bf16.msra.mxu0 %v2365_v4  ;;  %v2461_v4 = vld [vmem:[#allocation3 + $0x4b0] ss:$8 sps:$4 sm:$0xff]  }
  0x88   :  { %1648 = vmatpush2.bf16.msra.mxu1 %v2368_v5  ;;  %1596 = vmatprep.subr.bf16.mxu0 %v2373_v6  ;;  %v2464_v5 = vld [vmem:[#allocation3 + $0x5b0] ss:$8 sps:$4 sm:$0xff]   ;;  %v2469_v6 = vld [vmem:[#allocation3 + $0x4a4] ss:$8 sps:$4 sm:$0xff]  }
  0x89   :  { %1649 = vmatprep.subr.bf16.mxu1 %v2376_v7  ;;  %v2472_v7 = vld [vmem:[#allocation3 + $0x5a4] ss:$8 sps:$4 sm:$0xff]  }
  0x8b   :  { %1597 = vmatpush2.bf16.msra.mxu0 %v2371_v8  ;;  %v2467_v8 = vld [vmem:[#allocation3 + $0x4a0] ss:$8 sps:$4 sm:$0xff]  }
  0x8c   :  { %1650 = vmatpush2.bf16.msra.mxu1 %v2374_v9  ;;  %1672 = vmatprep.subr.bf16.mxu0 %v2385_v10  ;;  %v2470_v9 = vld [vmem:[#allocation3 + $0x5a0] ss:$8 sps:$4 sm:$0xff]   ;;  %v2475_v10 = vld [vmem:[#allocation3 + $0x494] ss:$8 sps:$4 sm:$0xff]  }
  0x8d   :  { %1725 = vmatprep.subr.bf16.mxu1 %v2388_v11  ;;  %v2478_v11 = vld [vmem:[#allocation3 + $0x594] ss:$8 sps:$4 sm:$0xff]  }
  0x8e   :  { %1599 = vmatmul.mubr.bf16.vlgmr.msra.gmra.mxu0 %v2377_v12  ;;  %v2473_v12 = vld [vmem:[#allocation3 + $0x490] ss:$8 sps:$4 sm:$0xff]  }
  0x8f   :  { %1652 = vmatmul.mubr.bf16.vlgmr.msra.gmra.mxu1 %v2380_v13  ;;  %1673 = vmatpush1.bf16.msra.mxu0 %v2383_v14  ;;  %v2476_v13 = vld [vmem:[#allocation3 + $0x590] ss:$8 sps:$4 sm:$0xff]   ;;  %v2481_v14 = vld [vmem:[#allocation3 + $0x484] ss:$8 sps:$4 sm:$0xff]  }
  0x90   :  { %1726 = vmatpush1.bf16.msra.mxu1 %v2386_v15  ;;  %1674 = vmatprep.subr.bf16.mxu0 %v2391_v16  ;;  %v2484_v15 = vld [vmem:[#allocation3 + $0x584] ss:$8 sps:$4 sm:$0xff]   ;;  %v2479_v16 = vld [vmem:[#allocation3 + $0x480] ss:$8 sps:$4 sm:$0xff]  }
  0x91   :  { %1727 = vmatprep.subr.bf16.mxu1 %v2394_v17  ;;  %1608 = vmatprep.mubr.bf16.mxu0 %v2395_v18  ;;  %v2482_v17 = vld [vmem:[#allocation3 + $0x580] ss:$8 sps:$4 sm:$0xff]   ;;  %v2493_v18 = vld [vmem:[#allocation3 + $0x674] ss:$8 sps:$4 sm:$0xff]  }
  0x92   :  { %1661 = vmatprep.mubr.bf16.mxu1 %v2404_v19  ;;  %v2485_v19 = vld [vmem:[%s2691_s0 + $0x20] ss:$52 sps:$4 sm:$0xff]  }
  0x93   :  { %1675 = vmatpush1.bf16.msra.mxu0 %v2389_v20  ;;  %v2488_v20 = vld [vmem:[%s2691_s0 + $0x28] ss:$52 sps:$4 sm:$0xff]  }
  0x94   :  { %1728 = vmatpush1.bf16.msra.mxu1 %v2392_v21  ;;  %1676 = vmatprep.subr.bf16.mxu0 %v2400_v22  ;;  %v2491_v21 = vld [vmem:[#allocation3 + $0x670] ss:$8 sps:$4 sm:$0xff]   ;;  %v2496_v22 = vld [vmem:[#allocation3 + $0x664] ss:$8 sps:$4 sm:$0xff]  }
  0x95   :  { %1729 = vmatprep.subr.bf16.mxu1 %v2403_v23  ;;  %v2497_v23 = vld [vmem:[%s2691_s0 + $0x8c] ss:$52 sps:$4 sm:$0xff]  }
  0x96   :  { %1609 = vmatmul.mubr.bf16.gmra.mxu0 %v2397_v24  ;;  %v2503_v24 = vld [vmem:[%s2691_s0 + $0x94] ss:$52 sps:$4 sm:$0xff]  }
  0x97   :  { %1662 = vmatmul.mubr.bf16.gmra.mxu1 %v2406_v27  ;;  %1677 = vmatpush1.bf16.msra.mxu0 %v2398_v25  ;;  %v2494_v25 = vld [vmem:[#allocation3 + $0x660] ss:$8 sps:$4 sm:$0xff]  }
  0x98   :  { %1730 = vmatpush1.bf16.msra.mxu1 %v2401_v26  ;;  %1678 = vmatprep.subr.bf16.mxu0 %v2409_v28  ;;  %v2502_v26 = vld [vmem:[#allocation3 + $0x654] ss:$8 sps:$4 sm:$0xff]   ;;  %v2505_v28 = vld [vmem:[%s2691_s0 + $0x90] ss:$52 sps:$4 sm:$0xff]  }
  0x99   :  { %1731 = vmatprep.subr.bf16.mxu1 %v2412_v29  ;;  %1704 = vmatprep.mubr.bf16.mxu0 %v2487_v33  ;;  %v2499_v27 = vld [vmem:[%s2691_s0 + $0x88] ss:$52 sps:$4 sm:$0xff]   ;;  %v2500_v29 = vld [vmem:[#allocation3 + $0x650] ss:$8 sps:$4 sm:$0xff]   ;;  %v2548_v33 = vmov 0  }
  0x9a   :  { %1757 = vmatprep.mubr.bf16.mxu1 %v2490_v35  ;;  %v2514_v35 = vld [vmem:[#allocation3 + $0x624] ss:$8 sps:$4 sm:$0xff]  }
  0x9b   :  { %1679 = vmatpush1.bf16.msra.mxu0 %v2407_v30  ;;  %v2508_v30 = vld [vmem:[#allocation3 + $0x644] ss:$8 sps:$4 sm:$0xff]  }
  0x9c   :  { %1732 = vmatpush1.bf16.msra.mxu1 %v2410_v31  ;;  %1680 = vmatprep.subr.bf16.mxu0 %v2415_v32  ;;  %v2506_v31 = vld [vmem:[#allocation3 + $0x640] ss:$8 sps:$4 sm:$0xff]   ;;  %v2511_v32 = vld [vmem:[#allocation3 + $0x634] ss:$8 sps:$4 sm:$0xff]  }
  0x9d   :  { %1733 = vmatprep.subr.bf16.mxu1 %v2418_v34  ;;  %v2509_v34 = vld [vmem:[#allocation3 + $0x630] ss:$8 sps:$4 sm:$0xff]  }
  0x9f   :  { %1681 = vmatpush1.bf16.msra.mxu0 %v2413_v36  ;;  %v2512_v36 = vld [vmem:[#allocation3 + $0x620] ss:$8 sps:$4 sm:$0xff]  }
  0xa0   :  { %1734 = vmatpush1.bf16.msra.mxu1 %v2416_v37  ;;  %1682 = vmatprep.subr.bf16.mxu0 %v2421_v38  ;;  %v2517_v37 = vld [vmem:[#allocation3 + $0x614] ss:$8 sps:$4 sm:$0xff]   ;;  %v2515_v38 = vld [vmem:[#allocation3 + $0x610] ss:$8 sps:$4 sm:$0xff]  }
  0xa1   :  { %1735 = vmatprep.subr.bf16.mxu1 %v2424_v39  ;;  %v2520_v39 = vld [vmem:[#allocation3 + $0x604] ss:$8 sps:$4 sm:$0xff]  }
  0xa3   :  { %1683 = vmatpush1.bf16.msra.mxu0 %v2419_v40  ;;  %v2518_v40 = vld [vmem:[#allocation3 + $0x600] ss:$8 sps:$4 sm:$0xff]  }
  0xa4   :  { %1736 = vmatpush1.bf16.msra.mxu1 %v2422_v41  ;;  %1684 = vmatprep.subr.bf16.mxu0 %v2427_v42  ;;  %v2521_v41 = vld [vmem:[%s2691_s0 + $0x30] ss:$52 sps:$4 sm:$0xff]   ;;  %v2522_v42 = vld [vmem:[%s2691_s0 + $0x98] ss:$52 sps:$4 sm:$0xff]  }
  0xa5   :  { %1737 = vmatprep.subr.bf16.mxu1 %v2430_v43 }
  0xa7   :  { %1685 = vmatpush1.bf16.msra.mxu0 %v2425_v44 }
  0xa8   :  { %1738 = vmatpush1.bf16.msra.mxu1 %v2428_v45  ;;  %1686 = vmatprep.subr.bf16.mxu0 %v2433_v46 }
  0xa9   :  { %1739 = vmatprep.subr.bf16.mxu1 %v2436_v47 }
  0xab   :  { %1687 = vmatpush1.bf16.msra.mxu0 %v2431_v48 }
  0xac   :  { %1740 = vmatpush1.bf16.msra.mxu1 %v2434_v49  ;;  %1688 = vmatprep.subr.bf16.mxu0 %v2439_v50 }
  0xad   :  { %1741 = vmatprep.subr.bf16.mxu1 %v2442_v51 }
  0xaf   :  { %1689 = vmatpush2.bf16.msra.mxu0 %v2437_v52 }
  0xb0   :  { %1742 = vmatpush2.bf16.msra.mxu1 %v2440_v53  ;;  %1690 = vmatprep.subr.bf16.mxu0 %v2445_v54 }
  0xb1   :  { %1743 = vmatprep.subr.bf16.mxu1 %v2448_v55 }
  0xb3   :  { %1691 = vmatpush2.bf16.msra.mxu0 %v2443_v56 }
  0xb4   :  { %1744 = vmatpush2.bf16.msra.mxu1 %v2446_v57  ;;  %1692 = vmatprep.subr.bf16.mxu0 %v2451_v58 }
  0xb5   :  { %1745 = vmatprep.subr.bf16.mxu1 %v2454_v59 }
  0xb7   :  { %1693 = vmatpush2.bf16.msra.mxu0 %v2449_v60 }
  0xb8   :  { %1746 = vmatpush2.bf16.msra.mxu1 %v2452_v61  ;;  %1694 = vmatprep.subr.bf16.mxu0 %v2457_v62 }
  0xb9   :  { %1747 = vmatprep.subr.bf16.mxu1 %v2460_v63 }
  0xbb   :  { %1695 = vmatpush2.bf16.msra.mxu0 %v2455_v0 }
  0xbc   :  { %1748 = vmatpush2.bf16.msra.mxu1 %v2458_v1  ;;  %1696 = vmatprep.subr.bf16.mxu0 %v2463_v2 }
  0xbd   :  { %1749 = vmatprep.subr.bf16.mxu1 %v2466_v3 }
  0xbf   :  { %1697 = vmatpush2.bf16.msra.mxu0 %v2461_v4 }
  0xc0   :  { %1750 = vmatpush2.bf16.msra.mxu1 %v2464_v5  ;;  %1698 = vmatprep.subr.bf16.mxu0 %v2469_v6 }
  0xc1   :  { %1751 = vmatprep.subr.bf16.mxu1 %v2472_v7 }
  0xc3   :  { %1699 = vmatpush2.bf16.msra.mxu0 %v2467_v8 }
  0xc4   :  { %1752 = vmatpush2.bf16.msra.mxu1 %v2470_v9  ;;  %1700 = vmatprep.subr.bf16.mxu0 %v2475_v10 }
  0xc5   :  { %1753 = vmatprep.subr.bf16.mxu1 %v2478_v11 }
  0xc7   :  { %1701 = vmatpush2.bf16.msra.mxu0 %v2473_v12 }
  0xc8   :  { %1754 = vmatpush2.bf16.msra.mxu1 %v2476_v13  ;;  %1702 = vmatprep.subr.bf16.mxu0 %v2481_v14 }
  0xc9   :  { %1755 = vmatprep.subr.bf16.mxu1 %v2484_v15 }
  0xcb   :  { %1703 = vmatpush2.bf16.msra.mxu0 %v2479_v16 }
  0xcc   :  { %1756 = vmatpush2.bf16.msra.mxu1 %v2482_v17  ;;  %1778 = vmatprep.subr.bf16.mxu0 %v2493_v18 }
  0xcd   :  { %2153 = vmatprep.subr.bf16.mxu1 %v2493_v18 }
  0xce   :  { %1705 = vmatmul.mubr.bf16.vlgmr.msra.gmra.mxu0 %v2485_v19 }
  0xcf   :  { %1758 = vmatmul.mubr.bf16.vlgmr.msra.gmra.mxu1 %v2488_v20  ;;  %1779 = vmatpush1.bf16.msra.mxu0 %v2491_v21 }
  0xd0   :  { %2161 = vmatpush1.bf16.msra.mxu1 %v2491_v21  ;;  %1780 = vmatprep.subr.bf16.mxu0 %v2496_v22  ;;  %v1860_v21 = vlaneseq }
  0xd1   :  { %2154 = vmatprep.subr.bf16.mxu1 %v2496_v22  ;;  %1714 = vmatprep.mubr.bf16.mxu0 %v2497_v23 }
  0xd2   :  { %1767 = vmatprep.mubr.bf16.mxu1 %v2503_v24 }
  0xd3   :  { %1781 = vmatpush1.bf16.msra.mxu0 %v2494_v25 }
  0xd4   :  { %2162 = vmatpush1.bf16.msra.mxu1 %v2494_v25  ;;  %1782 = vmatprep.subr.bf16.mxu0 %v2502_v26 }
  0xd5   :  { %2155 = vmatprep.subr.bf16.mxu1 %v2502_v26 }
  0xd6   :  { %1715 = vmatmul.mubr.bf16.gmra.mxu0 %v2499_v27 }
  0xd7   :  { %1768 = vmatmul.mubr.bf16.gmra.mxu1 %v2505_v28  ;;  %1783 = vmatpush1.bf16.msra.mxu0 %v2500_v29 }
  0xd8   :  { %2163 = vmatpush1.bf16.msra.mxu1 %v2500_v29  ;;  %1784 = vmatprep.subr.bf16.mxu0 %v2508_v30 }
  0xd9   :  { %2156 = vmatprep.subr.bf16.mxu1 %v2508_v30  ;;  %1810 = vmatprep.mubr.bf16.mxu0 %v2548_v33  ;;  %v1861_v30 = vshrl.u32 %v1860_v21, 7 }
  0xda   :  { %1820 = vmatprep.mubr.bf16.mxu1 %v2548_v33 }
  0xdb   :  { %1785 = vmatpush1.bf16.msra.mxu0 %v2506_v31 }
  0xdc   :  { %2164 = vmatpush1.bf16.msra.mxu1 %v2506_v31  ;;  %1786 = vmatprep.subr.bf16.mxu0 %v2511_v32 }
  0xdd   :  { %2157 = vmatprep.subr.bf16.mxu1 %v2511_v32 }
  0xdf   :  { %1787 = vmatpush1.bf16.msra.mxu0 %v2509_v34 }
  0xe0   :  { %2165 = vmatpush1.bf16.msra.mxu1 %v2509_v34  ;;  %1788 = vmatprep.subr.bf16.mxu0 %v2514_v35 }
  0xe1   :  { %2158 = vmatprep.subr.bf16.mxu1 %v2514_v35 }
  0xe3   :  { %1789 = vmatpush1.bf16.msra.mxu0 %v2512_v36 }
  0xe4   :  { %2166 = vmatpush1.bf16.msra.mxu1 %v2512_v36  ;;  %1790 = vmatprep.subr.bf16.mxu0 %v2517_v37 }
  0xe5   :  { %2159 = vmatprep.subr.bf16.mxu1 %v2517_v37 }
  0xe7   :  { %1791 = vmatpush1.bf16.msra.mxu0 %v2515_v38 }
  0xe8   :  { %2167 = vmatpush1.bf16.msra.mxu1 %v2515_v38  ;;  %1792 = vmatprep.subr.bf16.mxu0 %v2520_v39 }
  0xe9   :  { %2160 = vmatprep.subr.bf16.mxu1 %v2520_v39 }
  0xeb   :  { %1793 = vmatpush1.bf16.msra.mxu0 %v2518_v40 }
  0xec   :  { %2168 = vmatpush1.bf16.msra.mxu1 %v2518_v40 }
  0xee   :  { %1811 = vmatmul.mubr.bf16.vlgmr.msra.gmra.mxu0 %v2521_v41 }
  0xef   :  { %1821 = vmatmul.mubr.bf16.vlgmr.msra.gmra.mxu1 %v2522_v42 }
 0x10e   :  { %v1494_v43 = vpop.f32.mrf.mxu0 }
 0x10f   :  { %v1547_v44 = vpop.f32.mrf.mxu1 }
 0x110   :  { %v1496_v45 = vpop.f32.mrf.mxu0  ;;  %v1548_v22 = vadd.f32 %v1547_v44, %v1494_v43  ;;  %v1862_v43 = vsub.s32 0, %v1861_v30  ;;  %v1866_v44 = vsub.s32 1, %v1861_v30 }
 0x111   :  { %v1549_v46 = vpop.f32.mrf.mxu1 }
 0x112   :  { %v1498_v47 = vpop.f32.mrf.mxu0  ;;  %v1550_v24 = vadd.f32 %v1549_v46, %v1496_v45 }
 0x113   :  { %v1551_v48 = vpop.f32.mrf.mxu1 }
 0x114   :  { %v1500_v49 = vpop.f32.mrf.mxu0  ;;  %v1552_v33 = vadd.f32 %v1551_v48, %v1498_v47 }
 0x115   :  { %v1553_v51 = vpop.f32.mrf.mxu1 }
 0x116   :  { %v1504_v50 = vpop.f32.mrf.mxu0  ;;  %v1554_v35 = vadd.f32 %v1553_v51, %v1500_v49  ;;  %v1878_v49 = vld [vmem:[%s2694_s3] sm:$0x3] }
 0x117   :  { %v1557_v52 = vpop.f32.mrf.mxu1 }
 0x118   :  { %v1506_v53 = vpop.f32.mrf.mxu0  ;;  %v1558_v23 = vadd.f32 %v1557_v52, %v1504_v50 }
 0x119   :  { %v1559_v54 = vpop.f32.mrf.mxu1 }
 0x11a   :  { %v1508_v55 = vpop.f32.mrf.mxu0  ;;  %v1560_v25 = vadd.f32 %v1559_v54, %v1506_v53  ;;  %v1858_v53 = vld [vmem:[%s2693_s2] sm:$0x3] }
 0x11b   :  { %v1561_v56 = vpop.f32.mrf.mxu1 }
 0x11c   :  { %v1510_v57 = vpop.f32.mrf.mxu0  ;;  %v1562_v34 = vadd.f32 %v1561_v56, %v1508_v55 }
 0x11d   :  { %v1563_v59 = vpop.f32.mrf.mxu1 }
 0x11e   :  { %v1564_v36 = vadd.f32 %v1563_v59, %v1510_v57  ;;  %v1863_v59 = vrot.slane %v1858_v53, %v1862_v43 }
 0x14e   :  { %v1600_v58 = vpop.f32.mrf.mxu0 }
 0x14f   :  { %v1653_v60 = vpop.f32.mrf.mxu1  ;;  %v1601_v26 = vadd.f32 %v1600_v58, %v1548_v22  ;;  %v1887_v22 = vrot.slane %v1878_v49, %v1866_v44 }
 0x150   :  { %v1602_v61 = vpop.f32.mrf.mxu0 }
 0x151   :  { %v1655_v62 = vpop.f32.mrf.mxu1  ;;  %v1603_v31 = vadd.f32 %v1602_v61, %v1550_v24  ;;  %v1654_v37 = vadd.f32 %v1653_v60, %v1601_v26 }
 0x152   :  { %v1604_v63 = vpop.f32.mrf.mxu0 }
 0x153   :  { %v1657_v0 = vpop.f32.mrf.mxu1  ;;  %v1605_v39 = vadd.f32 %v1604_v63, %v1552_v33  ;;  %v1656_v45 = vadd.f32 %v1655_v62, %v1603_v31  ;;  %v1883_v62 = vrot.slane %v1878_v49, %v1862_v43  ;;  %v1867_v63 = vrot.slane %v1858_v53, %v1866_v44 }
 0x154   :  { %v1606_v1 = vpop.f32.mrf.mxu0 }
 0x155   :  { %v1659_v2 = vpop.f32.mrf.mxu1  ;;  %v1607_v47 = vadd.f32 %v1606_v1, %v1554_v35  ;;  %v1658_v55 = vadd.f32 %v1657_v0, %v1605_v39 }
 0x156   :  { %v1610_v3 = vpop.f32.mrf.mxu0 }
 0x157   :  { %v1663_v4 = vpop.f32.mrf.mxu1  ;;  %v1611_v27 = vadd.f32 %v1610_v3, %v1558_v23  ;;  %v1660_v3 = vadd.f32 %v1659_v2, %v1607_v47 }
 0x158   :  { %v1612_v5 = vpop.f32.mrf.mxu0 }
 0x159   :  { %v1665_v6 = vpop.f32.mrf.mxu1  ;;  %v1613_v32 = vadd.f32 %v1612_v5, %v1560_v25  ;;  %v1664_v38 = vadd.f32 %v1663_v4, %v1611_v27 }
 0x15a   :  { %v1614_v7 = vpop.f32.mrf.mxu0 }
 0x15b   :  { %v1667_v8 = vpop.f32.mrf.mxu1  ;;  %v1615_v40 = vadd.f32 %v1614_v7, %v1562_v34  ;;  %v1666_v46 = vadd.f32 %v1665_v6, %v1613_v32 }
 0x15c   :  { %v1616_v9 = vpop.f32.mrf.mxu0 }
 0x15d   :  { %v1669_v10 = vpop.f32.mrf.mxu1  ;;  %v1617_v48 = vadd.f32 %v1616_v9, %v1564_v36  ;;  %v1668_v56 = vadd.f32 %v1667_v8, %v1615_v40 }
 0x15f   :  { %v1670_v4 = vadd.f32 %v1669_v10, %v1617_v48 }
 0x18e   :  { %v1706_v11 = vpop.f32.mrf.mxu0 }
 0x18f   :  { %v1759_v12 = vpop.f32.mrf.mxu1  ;;  %v1707_v50 = vadd.f32 %v1706_v11, %v1654_v37 }
 0x190   :  { %v1708_v13 = vpop.f32.mrf.mxu0 }
 0x191   :  { %v1761_v14 = vpop.f32.mrf.mxu1  ;;  %v1709_v51 = vadd.f32 %v1708_v13, %v1656_v45  ;;  %v1760_v60 = vadd.f32 %v1759_v12, %v1707_v50 }
 0x192   :  { %v1710_v15 = vpop.f32.mrf.mxu0 }
 0x193   :  { %v2655_v16 = vpop.f32.mrf.mxu1  ;;  %v1711_v5 = vadd.f32 %v1710_v15, %v1658_v55  ;;  %v1762_v9 = vadd.f32 %v1761_v14, %v1709_v51 }
 0x194   :  { %v1712_v17 = vpop.f32.mrf.mxu0 }
 0x195   :  { %v2657_v18 = vpop.f32.mrf.mxu1  ;;  %v1713_v21 = vadd.f32 %v1712_v17, %v1660_v3  ;;  %v1764_v2 = vadd.f32 %v2655_v16, %v1711_v5 }
 0x196   :  { %v1716_v19 = vpop.f32.mrf.mxu0 }
 0x197   :  { %v1769_v20 = vpop.f32.mrf.mxu1  ;;  %v1717_v52 = vadd.f32 %v1716_v19, %v1664_v38  ;;  %v1766_v30 = vadd.f32 %v2657_v18, %v1713_v21 }
 0x198   :  { %v1718_v28 = vpop.f32.mrf.mxu0 }
 0x199   :  { %v1771_v29 = vpop.f32.mrf.mxu1  ;;  %v1719_v54 = vadd.f32 %v1718_v28, %v1666_v46  ;;  %v1770_v61 = vadd.f32 %v1769_v20, %v1717_v52 }
 0x19a   :  { %v1720_v41 = vpop.f32.mrf.mxu0 }
 0x19b   :  { %v1773_v42 = vpop.f32.mrf.mxu1  ;;  %v1721_v1 = vadd.f32 %v1720_v41, %v1668_v56  ;;  %v1772_v11 = vadd.f32 %v1771_v29, %v1719_v54 }
 0x19c   :  { %v1722_v57 = vpop.f32.mrf.mxu0 }
 0x19d   :  { %v1775_v58 = vpop.f32.mrf.mxu1  ;;  %v1723_v0 = vadd.f32 %v1722_v57, %v1670_v4  ;;  %v1774_v10 = vadd.f32 %v1773_v42, %v1721_v1 }
 0x19f   :  { %v1776_v17 = vadd.f32 %v1775_v58, %v1723_v0 }
 0x1ae   :  { %v1812_v6 = vpop.f32.mrf.mxu0 }
 0x1af   :  { %v1822_v7 = vpop.f32.mrf.mxu1  ;;  %v1813_v19 = vadd.f32 %v1812_v6, %v1760_v60 }
 0x1b0   :  { %v1823_v13 = vadd.f32 %v1822_v7, %v1770_v61  ;;  %v1814_v8 = vpop.f32.mrf.mxu0 }
 0x1b1   :  { %v1824_v23 = vpop.f32.mrf.mxu1  ;;  %v1870_v24 = vmul.f32 %v1863_v59, %v1813_v19  ;;  %v1815_v20 = vadd.f32 %v1814_v8, %v1762_v9 }
 0x1b2   :  { %v1874_v12 = vmul.f32 %v1863_v59, %v1823_v13  ;;  %v1825_v25 = vadd.f32 %v1824_v23, %v1772_v11  ;;  %v1816_v15 = vpop.f32.mrf.mxu0 }
 0x1b3   :  { %v1826_v26 = vpop.f32.mrf.mxu1  ;;  %v1890_v27 = vadd.f32 %v1883_v62, %v1870_v24  ;;  %v1871_v14 = vmul.f32 %v1867_v63, %v1815_v20  ;;  %v1817_v31 = vadd.f32 %v1816_v15, %v1764_v2 }
 0x1b4   :  { %v1894_v28 = vadd.f32 %v1883_v62, %v1874_v12  ;;  %v1875_v29 = vmul.f32 %v1867_v63, %v1825_v25  ;;  %v1827_v32 = vadd.f32 %v1826_v26, %v1774_v10  ;;  %v1818_v33 = vpop.f32.mrf.mxu0 }
 0x1b5   :  { %v1828_v34 = vpop.f32.mrf.mxu1  ;;  %v1898_v35 = vmax.f32 %v1890_v27, 0.0  ;;  %v1891_v37 = vadd.f32 %v1887_v22, %v1871_v14  ;;  %v1872_v39 = vmul.f32 %v1863_v59, %v1817_v31  ;;  %v1819_v40 = vadd.f32 %v1818_v33, %v1766_v30 }
 0x1b6   :  { %v1902_v36 = vmax.f32 %v1894_v28, 0.0  ;;  %v1895_v38 = vadd.f32 %v1887_v22, %v1875_v29  ;;  %v1876_v16 = vmul.f32 %v1863_v59, %v1827_v32  ;;  %v1829_v41 = vadd.f32 %v1828_v34, %v1776_v17 }
 0x1b7   :  { %1906 = vst [vmem:[%s2695_s4] sm:$0xff] %v1898_v35  ;;  %v1899_v18 = vmax.f32 %v1891_v37, 0.0  ;;  %v1892_v43 = vadd.f32 %v1883_v62, %v1872_v39  ;;  %v1873_v45 = vmul.f32 %v1867_v63, %v1819_v40 }
 0x1b8   :  { %1910 = vst [vmem:[%s2695_s4 + $0x20] sm:$0xff] %v1902_v36  ;;  %v1903_v42 = vmax.f32 %v1895_v38, 0.0  ;;  %v1896_v44 = vadd.f32 %v1883_v62, %v1876_v16  ;;  %v1877_v46 = vmul.f32 %v1867_v63, %v1829_v41 }
 0x1b9   :  { %1907 = vst [vmem:[%s2695_s4 + $0x8] sm:$0xff] %v1899_v18  ;;  %v1900_v50 = vmax.f32 %v1892_v43, 0.0  ;;  %v1893_v53 = vadd.f32 %v1887_v22, %v1873_v45 }
 0x1ba   :  { %1911 = vst [vmem:[%s2695_s4 + $0x28] sm:$0xff] %v1903_v42  ;;  %v1904_v52 = vmax.f32 %v1896_v44, 0.0  ;;  %v1897_v47 = vadd.f32 %v1887_v22, %v1877_v46 }
 0x1bb   :  { %1908 = vst [vmem:[%s2695_s4 + $0x10] sm:$0xff] %v1900_v50  ;;  %v1901_v48 = vmax.f32 %v1893_v53, 0.0 }
 0x1bc   :  { %1912 = vst [vmem:[%s2695_s4 + $0x30] sm:$0xff] %v1904_v52  ;;  %v1905_v49 = vmax.f32 %v1897_v47, 0.0 }
 0x1bd   :  { %1909 = vst [vmem:[%s2695_s4 + $0x18] sm:$0xff] %v1901_v48 }
 0x1be   :  { %1913 = vst [vmem:[%s2695_s4 + $0x38] sm:$0xff] %v1905_v49 }
 0x1bf   :  { %1918 = vsyncpa [#allocation4], 1 }

// kernel: alexnet_forward.13
= control target key start
LH: loop header
LB: loop body
LE: loop exit
PB: predicated region body
PF: predicated region fallthrough
CT: control target
= control target key end

     0   :  { %9 = vsyncpa [#allocation4], 0  ;;  %s780_s0 = inlined_call_operand.vmem [shape: bf16[16,384], index: 0, kind: input, shape index: {}]   ;;  %s781_s1 = inlined_call_operand.hbm [shape: bf16[384,256], index: 1, kind: input, shape index: {}]   ;;  %s782_s2 = inlined_call_operand.hbm [shape: f32[1,256], index: 2, kind: input, shape index: {}]   ;;  %s783_s3 = inlined_call_operand.hbm [shape: f32[1,256], index: 3, kind: input, shape index: {}]   ;;  %s784_s4 = inlined_call_operand.vmem [shape: f32[16,256], index: 4, kind: output, shape index: {}]  }
   0x1   :  { %10 = vsyncpa [#allocation6], 0  ;;  %s719_s15 = smov [#allocation5]   ;;  %s720_s17 = smov [#allocation3]  }
   0x2   :  { %s31_s16 = sshll.u32 %s719_s15, 4  ;;  %s18_s18 = sshll.u32 %s720_s17, 4  ;;  %s32_s16 = int_to_ptr.vmem [resolvable:$true] %s31_s16  ;;  %s19_s18 = int_to_ptr.vmem [resolvable:$true] %s18_s18 }
   0x3   :  { %s663_s19 = scalar_lea.vmem %s32_s16, 32  ;;  %p668_p1 = scmp.lt.s32.totalorder %s32_s16, %s32_s16 }
   0x4   :  { %p664_p0 = scmp.ne.s32.totalorder %s32_s16, %s663_s19  ;;  %p669_p2 = scmp.lt.s32.totalorder %s663_s19, %s663_s19 }
   0x6   :  { %p670_p3 = por %p669_p2, %p668_p1 }
   0x8   :  { %p671_p4 = pnand %p670_p3, %p664_p0 }
   0xa   :  { %674 = shalt.err (!%p671_p4)
}
   0xb   :  { %34 = dma.hbm_to_vmem [thread:$0]  %s782_s2, 32, %s32_s16, [#allocation6]  }
   0xc   :  { %s683_s22 = scalar_lea.vmem %s19_s18, 6144  ;;  %p688_p6 = scmp.lt.s32.totalorder %s19_s18, %s19_s18 }
   0xd   :  { %p684_p5 = scmp.ne.s32.totalorder %s19_s18, %s683_s22  ;;  %p689_p7 = scmp.lt.s32.totalorder %s683_s22, %s683_s22 }
   0xf   :  { %p690_p8 = por %p689_p7, %p688_p6 }
  0x11   :  { %p691_p9 = pnand %p690_p8, %p684_p5 }
  0x13   :  { %694 = shalt.err (!%p691_p9)
}
  0x14   :  { %s721_s23 = smov 128   ;;  %s722_s24 = smov 8  }
  0x15   :  { %24 = dma.hbm_to_vmem [thread:$0]  %s781_s1, 6144, %s19_s18, [#allocation4], %s721_s23, %s721_s23, %s722_s24  }
  0x16   :  { %s723_s27 = smov [#allocation7]  }
  0x17   :  { %s41_s28 = sshll.u32 %s723_s27, 4  ;;  %s42_s28 = int_to_ptr.vmem [resolvable:$true] %s41_s28 }
  0x18   :  { %s703_s29 = scalar_lea.vmem %s42_s28, 32  ;;  %p708_p11 = scmp.lt.s32.totalorder %s42_s28, %s42_s28 }
  0x19   :  { %p704_p10 = scmp.ne.s32.totalorder %s42_s28, %s703_s29  ;;  %p709_p12 = scmp.lt.s32.totalorder %s703_s29, %s703_s29 }
  0x1b   :  { %p710_p13 = por %p709_p12, %p708_p11 }
  0x1d   :  { %p711_p0 = pnand %p710_p13, %p704_p10 }
  0x1f   :  { %714 = shalt.err (!%p711_p0)
}
  0x20   :  { %44 = dma.hbm_to_vmem [thread:$0]  %s783_s3, 32, %s42_s28, [#allocation6]  }
  0x21   :  { %715 = dma.done.wait [#allocation4], 6144  }
  0x22   :  { %716 = vsyncadd [#allocation4], 4294961152 }
  0x23   :  { %717 = dma.done.wait [#allocation6], 64  }
  0x24   :  { %718 = vsyncadd [#allocation6], 4294967232  ;;  %v724_v0 = vmov 0   ;;  %v579_v1 = vld [vmem:[#allocation3 + $0x74] ss:$8 sps:$4 sm:$0xff]   ;;  %v478_v52 = vlaneseq }
  0x25   :  { %450 = vmatprep.mubr.bf16.mxu1 %v724_v0  ;;  %v581_v2 = vld [vmem:[#allocation3 + $0x70] ss:$8 sps:$4 sm:$0xff]   ;;  %375 = vmatprep.subr.bf16.mxu0 %v579_v1  ;;  %v582_v3 = vld [vmem:[#allocation3 + $0x64] ss:$8 sps:$4 sm:$0xff]   ;;  %v584_v4 = vld [vmem:[#allocation3 + $0x60] ss:$8 sps:$4 sm:$0xff]  }
  0x26   :  { %376 = vmatpush1.bf16.msra.mxu0 %v581_v2  ;;  %v585_v5 = vld [vmem:[#allocation3 + $0x54] ss:$8 sps:$4 sm:$0xff]   ;;  %v587_v6 = vld [vmem:[#allocation3 + $0x50] ss:$8 sps:$4 sm:$0xff]   ;;  %v588_v7 = vld [vmem:[#allocation3 + $0x44] ss:$8 sps:$4 sm:$0xff]  }
  0x27   :  { %377 = vmatprep.subr.bf16.mxu0 %v582_v3  ;;  %v600_v8 = vld [vmem:[#allocation3 + $0x174] ss:$8 sps:$4 sm:$0xff]   ;;  %v602_v9 = vld [vmem:[#allocation3 + $0x170] ss:$8 sps:$4 sm:$0xff]   ;;  %v590_v10 = vld [vmem:[#allocation3 + $0x40] ss:$8 sps:$4 sm:$0xff]  }
  0x28   :  { %v591_v11 = vld [vmem:[#allocation3 + $0x34] ss:$8 sps:$4 sm:$0xff]   ;;  %418 = vmatprep.subr.bf16.mxu1 %v600_v8  ;;  %v606_v12 = vld [vmem:[#allocation3 + $0x164] ss:$8 sps:$4 sm:$0xff]   ;;  %v608_v13 = vld [vmem:[#allocation3 + $0x160] ss:$8 sps:$4 sm:$0xff]  }
  0x29   :  { %419 = vmatpush1.bf16.msra.mxu1 %v602_v9  ;;  %v593_v14 = vld [vmem:[#allocation3 + $0x30] ss:$8 sps:$4 sm:$0xff]   ;;  %v612_v15 = vld [vmem:[#allocation3 + $0x154] ss:$8 sps:$4 sm:$0xff]   ;;  %v594_v16 = vld [vmem:[#allocation3 + $0x24] ss:$8 sps:$4 sm:$0xff]  }
  0x2a   :  { %378 = vmatpush1.bf16.msra.mxu0 %v584_v4  ;;  %420 = vmatprep.subr.bf16.mxu1 %v606_v12  ;;  %v614_v17 = vld [vmem:[#allocation3 + $0x150] ss:$8 sps:$4 sm:$0xff]   ;;  %v618_v18 = vld [vmem:[#allocation3 + $0x144] ss:$8 sps:$4 sm:$0xff]   ;;  %v596_v19 = vld [vmem:[#allocation3 + $0x20] ss:$8 sps:$4 sm:$0xff]  }
  0x2b   :  { %379 = vmatprep.subr.bf16.mxu0 %v585_v5  ;;  %v597_v20 = vld [vmem:[#allocation3 + $0x14] ss:$8 sps:$4 sm:$0xff]   ;;  %v620_v21 = vld [vmem:[#allocation3 + $0x140] ss:$8 sps:$4 sm:$0xff]   ;;  %v599_v23 = vld [vmem:[#allocation3 + $0x10] ss:$8 sps:$4 sm:$0xff]  }
  0x2c   :  { %v624_v22 = vld [vmem:[#allocation3 + $0x134] ss:$8 sps:$4 sm:$0xff]   ;;  %v603_v24 = vld [vmem:[#allocation3 + $0x4] ss:$8 sps:$4 sm:$0xff]   ;;  %v626_v25 = vld [vmem:[#allocation3 + $0x130] ss:$8 sps:$4 sm:$0xff]  }
  0x2d   :  { %421 = vmatpush1.bf16.msra.mxu1 %v608_v13  ;;  %v630_v26 = vld [vmem:[#allocation3 + $0x124] ss:$8 sps:$4 sm:$0xff]   ;;  %v605_v27 = vld [vmem:[#allocation3] ss:$8 sps:$4 sm:$0xff]   ;;  %v609_v28 = vld [vmem:[#allocation3 + $0xf4] ss:$8 sps:$4 sm:$0xff]  }
  0x2e   :  { %380 = vmatpush1.bf16.msra.mxu0 %v587_v6  ;;  %422 = vmatprep.subr.bf16.mxu1 %v612_v15  ;;  %v632_v29 = vld [vmem:[#allocation3 + $0x120] ss:$8 sps:$4 sm:$0xff]   ;;  %v636_v30 = vld [vmem:[#allocation3 + $0x114] ss:$8 sps:$4 sm:$0xff]   ;;  %v611_v31 = vld [vmem:[#allocation3 + $0xf0] ss:$8 sps:$4 sm:$0xff]  }
  0x2f   :  { %381 = vmatprep.subr.bf16.mxu0 %v588_v7  ;;  %v615_v32 = vld [vmem:[#allocation3 + $0xe4] ss:$8 sps:$4 sm:$0xff]   ;;  %v638_v33 = vld [vmem:[#allocation3 + $0x110] ss:$8 sps:$4 sm:$0xff]   ;;  %v617_v36 = vld [vmem:[#allocation3 + $0xe0] ss:$8 sps:$4 sm:$0xff]  }
  0x30   :  { %v642_v34 = vld [vmem:[#allocation3 + $0x104] ss:$8 sps:$4 sm:$0xff]   ;;  %v621_v37 = vld [vmem:[#allocation3 + $0xd4] ss:$8 sps:$4 sm:$0xff]   ;;  %v644_v38 = vld [vmem:[#allocation3 + $0x100] ss:$8 sps:$4 sm:$0xff]  }
  0x31   :  { %423 = vmatpush1.bf16.msra.mxu1 %v614_v17  ;;  %v654_v35 = vld [vmem:[%s780_s0 + $0x4] ss:$12 sps:$4 sm:$0xff]   ;;  %v648_v41 = vld [vmem:[%s780_s0 + $0x8] ss:$12 sps:$4 sm:$0xff]   ;;  %v652_v51 = vld [vmem:[%s780_s0] ss:$12 sps:$4 sm:$0xff]  }
  0x32   :  { %382 = vmatpush1.bf16.msra.mxu0 %v590_v10  ;;  %424 = vmatprep.subr.bf16.mxu1 %v618_v18  ;;  %v623_v39 = vld [vmem:[#allocation3 + $0xd0] ss:$8 sps:$4 sm:$0xff]   ;;  %v627_v40 = vld [vmem:[#allocation3 + $0xc4] ss:$8 sps:$4 sm:$0xff]   ;;  %v629_v42 = vld [vmem:[#allocation3 + $0xc0] ss:$8 sps:$4 sm:$0xff]  }
  0x33   :  { %383 = vmatprep.subr.bf16.mxu0 %v591_v11  ;;  %407 = vmatprep.mubr.bf16.mxu0 %v654_v35  ;;  %v633_v43 = vld [vmem:[#allocation3 + $0xb4] ss:$8 sps:$4 sm:$0xff]   ;;  %v635_v44 = vld [vmem:[#allocation3 + $0xb0] ss:$8 sps:$4 sm:$0xff]   ;;  %v639_v45 = vld [vmem:[#allocation3 + $0xa4] ss:$8 sps:$4 sm:$0xff]  }
  0x34   :  { %v641_v46 = vld [vmem:[#allocation3 + $0xa0] ss:$8 sps:$4 sm:$0xff]   ;;  %v645_v47 = vld [vmem:[#allocation3 + $0x94] ss:$8 sps:$4 sm:$0xff]   ;;  %v647_v48 = vld [vmem:[#allocation3 + $0x90] ss:$8 sps:$4 sm:$0xff]  }
  0x35   :  { %425 = vmatpush1.bf16.msra.mxu1 %v620_v21  ;;  %v649_v49 = vld [vmem:[#allocation3 + $0x84] ss:$8 sps:$4 sm:$0xff]   ;;  %v651_v50 = vld [vmem:[#allocation3 + $0x80] ss:$8 sps:$4 sm:$0xff]   ;;  %v479_v53 = vshrl.u32 %v478_v52, 7 }
  0x36   :  { %384 = vmatpush1.bf16.msra.mxu0 %v593_v14  ;;  %426 = vmatprep.subr.bf16.mxu1 %v624_v22  ;;  %v476_v56 = vld [vmem:[#allocation5] sm:$0x3]  ;;  %v492_v59 = vld [vmem:[#allocation7] sm:$0x3] }
  0x37   :  { %385 = vmatprep.subr.bf16.mxu0 %v594_v16  ;;  %v480_v55 = vsub.s32 0, %v479_v53  ;;  %v484_v57 = vsub.s32 1, %v479_v53 }
  0x39   :  { %427 = vmatpush1.bf16.msra.mxu1 %v626_v25  ;;  %v481_v60 = vrot.slane %v476_v56, %v480_v55  ;;  %v497_v63 = vrot.slane %v492_v59, %v480_v55  ;;  %v485_v0 = vrot.slane %v476_v56, %v484_v57  ;;  %v501_v5 = vrot.slane %v492_v59, %v484_v57 }
  0x3a   :  { %386 = vmatpush1.bf16.msra.mxu0 %v596_v19  ;;  %428 = vmatprep.subr.bf16.mxu1 %v630_v26 }
  0x3b   :  { %387 = vmatprep.subr.bf16.mxu0 %v597_v20 }
  0x3d   :  { %429 = vmatpush1.bf16.msra.mxu1 %v632_v29 }
  0x3e   :  { %388 = vmatpush1.bf16.msra.mxu0 %v599_v23  ;;  %430 = vmatprep.subr.bf16.mxu1 %v636_v30 }
  0x3f   :  { %389 = vmatprep.subr.bf16.mxu0 %v603_v24 }
  0x41   :  { %431 = vmatpush1.bf16.msra.mxu1 %v638_v33 }
  0x42   :  { %390 = vmatpush1.bf16.msra.mxu0 %v605_v27  ;;  %432 = vmatprep.subr.bf16.mxu1 %v642_v34 }
  0x43   :  { %391 = vmatprep.subr.bf16.mxu0 %v609_v28 }
  0x45   :  { %433 = vmatpush1.bf16.msra.mxu1 %v644_v38 }
  0x46   :  { %392 = vmatpush2.bf16.msra.mxu0 %v611_v31 }
  0x47   :  { %393 = vmatprep.subr.bf16.mxu0 %v615_v32 }
  0x48   :  { %451 = vmatmul.mubr.bf16.vlgmr.msra.gmra.mxu1 %v648_v41 }
  0x4a   :  { %394 = vmatpush2.bf16.msra.mxu0 %v617_v36 }
  0x4b   :  { %395 = vmatprep.subr.bf16.mxu0 %v621_v37 }
  0x4e   :  { %396 = vmatpush2.bf16.msra.mxu0 %v623_v39 }
  0x4f   :  { %397 = vmatprep.subr.bf16.mxu0 %v627_v40 }
  0x52   :  { %398 = vmatpush2.bf16.msra.mxu0 %v629_v42 }
  0x53   :  { %399 = vmatprep.subr.bf16.mxu0 %v633_v43 }
  0x56   :  { %400 = vmatpush2.bf16.msra.mxu0 %v635_v44 }
  0x57   :  { %401 = vmatprep.subr.bf16.mxu0 %v639_v45 }
  0x5a   :  { %402 = vmatpush2.bf16.msra.mxu0 %v641_v46 }
  0x5b   :  { %403 = vmatprep.subr.bf16.mxu0 %v645_v47 }
  0x5e   :  { %404 = vmatpush2.bf16.msra.mxu0 %v647_v48 }
  0x5f   :  { %405 = vmatprep.subr.bf16.mxu0 %v649_v49 }
  0x62   :  { %406 = vmatpush2.bf16.msra.mxu0 %v651_v50 }
  0x65   :  { %408 = vmatmul.mubr.bf16.vlgmr.msra.gmra.mxu0 %v652_v51 }
 0x108   :  { %v452_v54 = vpop.f32.mrf.mxu1 }
 0x10a   :  { %v454_v58 = vpop.f32.mrf.mxu1 }
 0x10c   :  { %v456_v1 = vpop.f32.mrf.mxu1 }
 0x10e   :  { %v458_v10 = vpop.f32.mrf.mxu1 }
 0x125   :  { %v409_v61 = vpop.f32.mrf.mxu0 }
 0x126   :  { %v453_v62 = vadd.f32 %v452_v54, %v409_v61 }
 0x127   :  { %v411_v2 = vpop.f32.mrf.mxu0 }
 0x128   :  { %v488_v3 = vmul.f32 %v481_v60, %v453_v62  ;;  %v455_v4 = vadd.f32 %v454_v58, %v411_v2 }
 0x129   :  { %v413_v6 = vpop.f32.mrf.mxu0 }
 0x12a   :  { %v504_v7 = vadd.f32 %v497_v63, %v488_v3  ;;  %v489_v8 = vmul.f32 %v485_v0, %v455_v4  ;;  %v457_v9 = vadd.f32 %v456_v1, %v413_v6 }
 0x12b   :  { %v415_v11 = vpop.f32.mrf.mxu0 }
 0x12c   :  { %v508_v12 = vmax.f32 %v504_v7, 0.0  ;;  %v505_v13 = vadd.f32 %v501_v5, %v489_v8  ;;  %v490_v14 = vmul.f32 %v481_v60, %v457_v9  ;;  %v459_v15 = vadd.f32 %v458_v10, %v415_v11 }
 0x12e   :  { %512 = vst [vmem:[%s784_s4] sm:$0xff] %v508_v12  ;;  %v509_v16 = vmax.f32 %v505_v13, 0.0  ;;  %v506_v17 = vadd.f32 %v497_v63, %v490_v14  ;;  %v491_v18 = vmul.f32 %v485_v0, %v459_v15 }
 0x130   :  { %513 = vst [vmem:[%s784_s4 + $0x8] sm:$0xff] %v509_v16  ;;  %v510_v19 = vmax.f32 %v506_v17, 0.0  ;;  %v507_v20 = vadd.f32 %v501_v5, %v491_v18 }
 0x132   :  { %514 = vst [vmem:[%s784_s4 + $0x10] sm:$0xff] %v510_v19  ;;  %v511_v21 = vmax.f32 %v507_v20, 0.0 }
 0x134   :  { %515 = vst [vmem:[%s784_s4 + $0x18] sm:$0xff] %v511_v21 }
 0x135   :  { %520 = vsyncpa [#allocation4], 1 }
 0x136   :  { %521 = vsyncpa [#allocation6], 1 }

// kernel: alexnet_forward.14
= control target key start
LH: loop header
LB: loop body
LE: loop exit
PB: predicated region body
PF: predicated region fallthrough
CT: control target
= control target key end

     0   :  { %9 = vsyncpa [#allocation4], 0  ;;  %s585_s0 = inlined_call_operand.vmem [shape: bf16[16,256], index: 0, kind: input, shape index: {}]   ;;  %s586_s1 = inlined_call_operand.hbm [shape: bf16[256,256], index: 1, kind: input, shape index: {}]   ;;  %s587_s2 = inlined_call_operand.hbm [shape: f32[1,256], index: 2, kind: input, shape index: {}]   ;;  %s588_s3 = inlined_call_operand.hbm [shape: f32[1,256], index: 3, kind: input, shape index: {}]   ;;  %s589_s4 = inlined_call_operand.vmem [shape: f32[16,256], index: 4, kind: output, shape index: {}]  }
   0x1   :  { %10 = vsyncpa [#allocation6], 0  ;;  %s528_s15 = smov [#allocation5]   ;;  %s529_s17 = smov [#allocation3]  }
   0x2   :  { %s31_s16 = sshll.u32 %s528_s15, 4  ;;  %s18_s18 = sshll.u32 %s529_s17, 4  ;;  %s32_s16 = int_to_ptr.vmem [resolvable:$true] %s31_s16  ;;  %s19_s18 = int_to_ptr.vmem [resolvable:$true] %s18_s18 }
   0x3   :  { %s472_s19 = scalar_lea.vmem %s32_s16, 32  ;;  %p477_p1 = scmp.lt.s32.totalorder %s32_s16, %s32_s16 }
   0x4   :  { %p473_p0 = scmp.ne.s32.totalorder %s32_s16, %s472_s19  ;;  %p478_p2 = scmp.lt.s32.totalorder %s472_s19, %s472_s19 }
   0x6   :  { %p479_p3 = por %p478_p2, %p477_p1 }
   0x8   :  { %p480_p4 = pnand %p479_p3, %p473_p0 }
   0xa   :  { %483 = shalt.err (!%p480_p4)
}
   0xb   :  { %34 = dma.hbm_to_vmem [thread:$0]  %s587_s2, 32, %s32_s16, [#allocation6]  }
   0xc   :  { %s492_s22 = scalar_lea.vmem %s19_s18, 4096  ;;  %p497_p6 = scmp.lt.s32.totalorder %s19_s18, %s19_s18 }
   0xd   :  { %p493_p5 = scmp.ne.s32.totalorder %s19_s18, %s492_s22  ;;  %p498_p7 = scmp.lt.s32.totalorder %s492_s22, %s492_s22 }
   0xf   :  { %p499_p8 = por %p498_p7, %p497_p6 }
  0x11   :  { %p500_p9 = pnand %p499_p8, %p493_p5 }
  0x13   :  { %503 = shalt.err (!%p500_p9)
}
  0x14   :  { %s530_s23 = smov 128   ;;  %s531_s24 = smov 8  }
  0x15   :  { %24 = dma.hbm_to_vmem [thread:$0]  %s586_s1, 4096, %s19_s18, [#allocation4], %s530_s23, %s530_s23, %s531_s24  }
  0x16   :  { %s532_s27 = smov [#allocation7]  }
  0x17   :  { %s41_s28 = sshll.u32 %s532_s27, 4  ;;  %s42_s28 = int_to_ptr.vmem [resolvable:$true] %s41_s28 }
  0x18   :  { %s512_s29 = scalar_lea.vmem %s42_s28, 32  ;;  %p517_p11 = scmp.lt.s32.totalorder %s42_s28, %s42_s28 }
  0x19   :  { %p513_p10 = scmp.ne.s32.totalorder %s42_s28, %s512_s29  ;;  %p518_p12 = scmp.lt.s32.totalorder %s512_s29, %s512_s29 }
  0x1b   :  { %p519_p13 = por %p518_p12, %p517_p11 }
  0x1d   :  { %p520_p0 = pnand %p519_p13, %p513_p10 }
  0x1f   :  { %523 = shalt.err (!%p520_p0)
}
  0x20   :  { %44 = dma.hbm_to_vmem [thread:$0]  %s588_s3, 32, %s42_s28, [#allocation6]  }
  0x21   :  { %524 = dma.done.wait [#allocation4], 4096  }
  0x22   :  { %525 = vsyncadd [#allocation4], 4294963200 }
  0x23   :  { %526 = dma.done.wait [#allocation6], 64  }
  0x24   :  { %527 = vsyncadd [#allocation6], 4294967232  ;;  %v413_v0 = vld [vmem:[#allocation3 + $0x74] ss:$8 sps:$4 sm:$0xff]   ;;  %v415_v1 = vld [vmem:[#allocation3 + $0x70] ss:$8 sps:$4 sm:$0xff]   ;;  %v330_v34 = vlaneseq }
  0x25   :  { %270 = vmatprep.subr.bf16.mxu0 %v413_v0  ;;  %v416_v2 = vld [vmem:[#allocation3 + $0x64] ss:$8 sps:$4 sm:$0xff]   ;;  %v418_v3 = vld [vmem:[#allocation3 + $0x60] ss:$8 sps:$4 sm:$0xff]   ;;  %v419_v4 = vld [vmem:[#allocation3 + $0x54] ss:$8 sps:$4 sm:$0xff]  }
  0x26   :  { %271 = vmatpush1.bf16.msra.mxu0 %v415_v1  ;;  %v421_v5 = vld [vmem:[#allocation3 + $0x50] ss:$8 sps:$4 sm:$0xff]   ;;  %v422_v6 = vld [vmem:[#allocation3 + $0x44] ss:$8 sps:$4 sm:$0xff]   ;;  %v424_v7 = vld [vmem:[#allocation3 + $0x40] ss:$8 sps:$4 sm:$0xff]  }
  0x27   :  { %272 = vmatprep.subr.bf16.mxu0 %v416_v2  ;;  %v425_v8 = vld [vmem:[#allocation3 + $0x34] ss:$8 sps:$4 sm:$0xff]   ;;  %v427_v9 = vld [vmem:[#allocation3 + $0x30] ss:$8 sps:$4 sm:$0xff]   ;;  %v428_v10 = vld [vmem:[#allocation3 + $0x24] ss:$8 sps:$4 sm:$0xff]  }
  0x28   :  { %v430_v11 = vld [vmem:[#allocation3 + $0x20] ss:$8 sps:$4 sm:$0xff]   ;;  %v431_v12 = vld [vmem:[#allocation3 + $0x14] ss:$8 sps:$4 sm:$0xff]   ;;  %v463_v13 = vld [vmem:[%s585_s0 + $0x4] ss:$8 sps:$4 sm:$0xff]  }
  0x29   :  { %v433_v14 = vld [vmem:[#allocation3 + $0x10] ss:$8 sps:$4 sm:$0xff]   ;;  %v434_v15 = vld [vmem:[#allocation3 + $0x4] ss:$8 sps:$4 sm:$0xff]   ;;  %302 = vmatprep.mubr.bf16.mxu0 %v463_v13  ;;  %v436_v16 = vld [vmem:[#allocation3] ss:$8 sps:$4 sm:$0xff]  }
  0x2a   :  { %273 = vmatpush1.bf16.msra.mxu0 %v418_v3  ;;  %v437_v17 = vld [vmem:[#allocation3 + $0xf4] ss:$8 sps:$4 sm:$0xff]   ;;  %v439_v18 = vld [vmem:[#allocation3 + $0xf0] ss:$8 sps:$4 sm:$0xff]   ;;  %v440_v19 = vld [vmem:[#allocation3 + $0xe4] ss:$8 sps:$4 sm:$0xff]  }
  0x2b   :  { %274 = vmatprep.subr.bf16.mxu0 %v419_v4  ;;  %v442_v20 = vld [vmem:[#allocation3 + $0xe0] ss:$8 sps:$4 sm:$0xff]   ;;  %v443_v21 = vld [vmem:[#allocation3 + $0xd4] ss:$8 sps:$4 sm:$0xff]   ;;  %v445_v22 = vld [vmem:[#allocation3 + $0xd0] ss:$8 sps:$4 sm:$0xff]  }
  0x2c   :  { %v446_v23 = vld [vmem:[#allocation3 + $0xc4] ss:$8 sps:$4 sm:$0xff]   ;;  %v448_v24 = vld [vmem:[#allocation3 + $0xc0] ss:$8 sps:$4 sm:$0xff]   ;;  %v449_v25 = vld [vmem:[#allocation3 + $0xb4] ss:$8 sps:$4 sm:$0xff]  }
  0x2d   :  { %v451_v26 = vld [vmem:[#allocation3 + $0xb0] ss:$8 sps:$4 sm:$0xff]   ;;  %v452_v27 = vld [vmem:[#allocation3 + $0xa4] ss:$8 sps:$4 sm:$0xff]   ;;  %v454_v28 = vld [vmem:[#allocation3 + $0xa0] ss:$8 sps:$4 sm:$0xff]  }
  0x2e   :  { %275 = vmatpush1.bf16.msra.mxu0 %v421_v5  ;;  %v455_v29 = vld [vmem:[#allocation3 + $0x94] ss:$8 sps:$4 sm:$0xff]   ;;  %v457_v30 = vld [vmem:[#allocation3 + $0x90] ss:$8 sps:$4 sm:$0xff]   ;;  %v458_v31 = vld [vmem:[#allocation3 + $0x84] ss:$8 sps:$4 sm:$0xff]  }
  0x2f   :  { %276 = vmatprep.subr.bf16.mxu0 %v422_v6  ;;  %v460_v32 = vld [vmem:[#allocation3 + $0x80] ss:$8 sps:$4 sm:$0xff]   ;;  %v331_v35 = vshrl.u32 %v330_v34, 7 }
  0x30   :  { %v461_v33 = vld [vmem:[%s585_s0] ss:$8 sps:$4 sm:$0xff]  }
  0x31   :  { %v332_v36 = vsub.s32 0, %v331_v35  ;;  %v328_v37 = vld [vmem:[#allocation5] sm:$0x3]  ;;  %v336_v38 = vsub.s32 1, %v331_v35  ;;  %v344_v39 = vld [vmem:[#allocation7] sm:$0x3] }
  0x32   :  { %277 = vmatpush1.bf16.msra.mxu0 %v424_v7 }
  0x33   :  { %278 = vmatprep.subr.bf16.mxu0 %v425_v8  ;;  %v333_v40 = vrot.slane %v328_v37, %v332_v36  ;;  %v349_v41 = vrot.slane %v344_v39, %v332_v36  ;;  %v337_v42 = vrot.slane %v328_v37, %v336_v38  ;;  %v353_v45 = vrot.slane %v344_v39, %v336_v38 }
  0x36   :  { %279 = vmatpush1.bf16.msra.mxu0 %v427_v9 }
  0x37   :  { %280 = vmatprep.subr.bf16.mxu0 %v428_v10 }
  0x3a   :  { %281 = vmatpush1.bf16.msra.mxu0 %v430_v11 }
  0x3b   :  { %282 = vmatprep.subr.bf16.mxu0 %v431_v12 }
  0x3e   :  { %283 = vmatpush1.bf16.msra.mxu0 %v433_v14 }
  0x3f   :  { %284 = vmatprep.subr.bf16.mxu0 %v434_v15 }
  0x42   :  { %285 = vmatpush1.bf16.msra.mxu0 %v436_v16 }
  0x43   :  { %286 = vmatprep.subr.bf16.mxu0 %v437_v17 }
  0x46   :  { %287 = vmatpush2.bf16.msra.mxu0 %v439_v18 }
  0x47   :  { %288 = vmatprep.subr.bf16.mxu0 %v440_v19 }
  0x4a   :  { %289 = vmatpush2.bf16.msra.mxu0 %v442_v20 }
  0x4b   :  { %290 = vmatprep.subr.bf16.mxu0 %v443_v21 }
  0x4e   :  { %291 = vmatpush2.bf16.msra.mxu0 %v445_v22 }
  0x4f   :  { %292 = vmatprep.subr.bf16.mxu0 %v446_v23 }
  0x52   :  { %293 = vmatpush2.bf16.msra.mxu0 %v448_v24 }
  0x53   :  { %294 = vmatprep.subr.bf16.mxu0 %v449_v25 }
  0x56   :  { %295 = vmatpush2.bf16.msra.mxu0 %v451_v26 }
  0x57   :  { %296 = vmatprep.subr.bf16.mxu0 %v452_v27 }
  0x5a   :  { %297 = vmatpush2.bf16.msra.mxu0 %v454_v28 }
  0x5b   :  { %298 = vmatprep.subr.bf16.mxu0 %v455_v29 }
  0x5e   :  { %299 = vmatpush2.bf16.msra.mxu0 %v457_v30 }
  0x5f   :  { %300 = vmatprep.subr.bf16.mxu0 %v458_v31 }
  0x62   :  { %301 = vmatpush2.bf16.msra.mxu0 %v460_v32 }
  0x65   :  { %303 = vmatmul.mubr.bf16.vlgmr.msra.gmra.mxu0 %v461_v33 }
 0x125   :  { %v304_v43 = vpop.f32.mrf.mxu0 }
 0x126   :  { %v340_v44 = vmul.f32 %v333_v40, %v304_v43 }
 0x127   :  { %v306_v46 = vpop.f32.mrf.mxu0 }
 0x128   :  { %v356_v47 = vadd.f32 %v349_v41, %v340_v44  ;;  %v341_v48 = vmul.f32 %v337_v42, %v306_v46 }
 0x129   :  { %v308_v49 = vpop.f32.mrf.mxu0 }
 0x12a   :  { %v360_v50 = vmax.f32 %v356_v47, 0.0  ;;  %v357_v51 = vadd.f32 %v353_v45, %v341_v48  ;;  %v342_v52 = vmul.f32 %v333_v40, %v308_v49 }
 0x12b   :  { %v310_v53 = vpop.f32.mrf.mxu0 }
 0x12c   :  { %364 = vst [vmem:[%s589_s4] sm:$0xff] %v360_v50  ;;  %v361_v54 = vmax.f32 %v357_v51, 0.0  ;;  %v358_v55 = vadd.f32 %v349_v41, %v342_v52  ;;  %v343_v56 = vmul.f32 %v337_v42, %v310_v53 }
 0x12e   :  { %365 = vst [vmem:[%s589_s4 + $0x8] sm:$0xff] %v361_v54  ;;  %v362_v57 = vmax.f32 %v358_v55, 0.0  ;;  %v359_v58 = vadd.f32 %v353_v45, %v343_v56 }
 0x130   :  { %366 = vst [vmem:[%s589_s4 + $0x10] sm:$0xff] %v362_v57  ;;  %v363_v59 = vmax.f32 %v359_v58, 0.0 }
 0x132   :  { %367 = vst [vmem:[%s589_s4 + $0x18] sm:$0xff] %v363_v59 }
 0x133   :  { %372 = vsyncpa [#allocation4], 1 }
 0x134   :  { %373 = vsyncpa [#allocation6], 1 }

// kernel: alexnet_forward.15
= control target key start
LH: loop header
LB: loop body
LE: loop exit
PB: predicated region body
PF: predicated region fallthrough
CT: control target
= control target key end

     0   :  { %s17820_s0 = inlined_call_operand.vmem [shape: bf16[16,256], index: 0, kind: input, shape index: {}]   ;;  %s17821_s1 = inlined_call_operand.hbm [shape: bf16[256,4096], index: 1, kind: input, shape index: {}]   ;;  %s17822_s2 = inlined_call_operand.hbm [shape: f32[1,4096], index: 2, kind: input, shape index: {}]   ;;  %s17823_s3 = inlined_call_operand.hbm [shape: bf16[4096,4096], index: 3, kind: input, shape index: {}]   ;;  %s17824_s4 = inlined_call_operand.hbm [shape: f32[1,4096], index: 4, kind: input, shape index: {}]   ;;  %s17825_s5 = inlined_call_operand.hbm [shape: bf16[4096,128], index: 5, kind: input, shape index: {}]   ;;  %s17826_s6 = inlined_call_operand.vmem [shape: f32[8,16,128], index: 6, kind: output, shape index: {}]  }
   0x1   :  { %17834 = sst [smem:[#allocation14_spill]] %s17821_s1 }
   0x2   :  { %17835 = sst [smem:[#allocation15_spill]] %s17823_s3 }
   0x3   :  { %11 = vsyncpa [#allocation3], 0 }
   0x4   :  { %12 = vsyncpa [#allocation5], 0  ;;  %s15955_s21 = smov 0   ;;  %s15957_s22 = smov 0  }
   0x5   :  { %s15959_s23 = smov 0   ;;  %s15961_s24 = smov 0  }
   0x6 LB: > { %17836 = sst [smem:[#allocation12_spill]] %s15903_s23  ;;  %s15974_s25 = sadd.s32 4294967295, %s15907_s24   ;;  %s15907_s24 = sphi %s15961_s24, %s17858_s24   ;;  %s15903_s23 = sphi %s15959_s23, %s17855_s23   ;;  %s15899_s22 = sphi %s15957_s22, %s17857_s22   ;;  %s15895_s21 = sphi %s15955_s21, %s17856_s21  }
   0x7   : > { %s15977_s26 = sadd.s32 1, %s15907_s24   ;;  %s88_s28 = sadd.s32 1, %s15903_s23 }
   0x8   : > { %s85_s27 = ssub.s32 %s15907_s24, %s15977_s26  ;;  %p95_p1 = scmp.ne.s32.totalorder %s15903_s23, %s15899_s22 }
   0x9   : > { %p86_p0 = scmp.eq.s32.totalorder %s85_s27, 0  ;;  %p96_p2 = scmp.eq.s32.totalorder %s15907_s24, 0 }
   0xa   : > { %p101_p3 = scmp.ne.s32.totalorder %s15899_s22, %s15895_s21  ;;  %p17827_p5 = scmp.eq.s32.totalorder %s15974_s25, 0 }
   0xb   : > { %s15987_s29 = scalar_select %p86_p0, %s15903_s23, %s88_s28  }
   0xc   : > { %p15989_p4 = por %p96_p2, %p95_p1  ;;  %p12430_p6 = scmp.ge.s32.totalorder %s15907_s24, 1 }
   0xd   : > { %17837 = sst [smem:[#allocation13_spill]] %s15987_s29  ;;  %p190_p7 = scmp.lt.s32.totalorder %s15907_s24, 9 }
   0xe   : > { %p15998_p8 = por %p17827_p5, %p101_p3  ;;  %s15909_s9 = smov [#allocation2]  }
   0xf   : > { %p16002_p9 = pnand %p12430_p6, %p190_p7  ;;  %s205_s10 = sshll.u32 %s15909_s9, 4  ;;  %s206_s10 = int_to_ptr.vmem [resolvable:$true] %s205_s10 }
  0x10   : > { %s17839_s7 = scalar_select %p15998_p8, 1, 0 }
  0x11   : > { %s17840_s8 = scalar_select %p16002_p9, 1, 0 }
  0x12   : > { %p14085_p10 = pneg %p16002_p9  ;;  %p14104_p12 = scmp.lt.s32.totalorder %s15907_s24, 8 }
  0x13   : > { %s230_s12 = sand.u32 1, %s15907_s24   ;;  %s16017_s13 = sand.u32 1, %s15903_s23  }
  0x14   : > { %p16010_p11 = pnand %p14085_p10, %p17827_p5  ;;  %p16021_p13 = pnand %p14104_p12, %p15989_p4 }
  0x15   : > { %s15740_s15 = scalar_lea.vmem %s206_s10, 65536  ;;  %p15748_p6 = scmp.lt.s32.totalorder %s206_s10, %s206_s10 }
  0x16   : > { %s17841_s11 = scalar_select %p16010_p11, 1, 0 }
  0x17   : > { %p17829_p0 = pneg %p16010_p11  ;;  %p15741_p1 = scmp.ne.s32.totalorder %s206_s10, %s15740_s15 }
  0x18   : > { %p15749_p7 = scmp.lt.s32.totalorder %s15740_s15, %s15740_s15 }
  0x19   : > { %p15743_p2 = pnand %p15741_p1, %p17829_p0 }
  0x1a   : > { %p15750_p10 = por %p15749_p7, %p15748_p6 }
  0x1b   : > { %p15744_p3 = pneg %p15743_p2 }
  0x1d   : > { %p15751_p5 = pnand %p15750_p10, %p15744_p3 }
  0x1f   : > { %15754 = shalt.err (!%p15751_p5)
}
  0x20   : > { %s15910_s16 = smov 2048   ;;  %s15911_s17 = smov 128  }
  0x21   : > { %s17843_s1 = sld [smem:[#allocation14_spill]]  ;;  %s12434_s20 = sshll.u32 %s16017_s13, 13 }
  0x22   : > { %s14023_s21 = sshll.u32 %s15907_s24, 8  ;;  %s17844_s3 = sld [smem:[#allocation15_spill]] }
  0x23   : > { %s234_s9 = scalar_lea.vmem [#allocation6], %s12434_s20  ;;  %s16046_s29 = scalar_lea.sflag [#allocation3], %s230_s12 }
  0x24   : > { %s241_s15 = sshll.u32 %s234_s9, 4  ;;  %p16052_p5 = pneg %p16021_p13  ;;  %s16044_s15 = int_to_ptr.vmem [resolvable:$true] %s241_s15 }
  0x27   : > { %14088 = dma.hbm_to_vmem [thread:$0]  (!%p16010_p11), %s17843_s1, 65536, %s206_s10, [#allocation3], %s15910_s16, %s15910_s16, %s15911_s17  }
  0x28   : > { %s16042_s30 = scalar_lea.hbm %s17844_s3, %s14023_s21  ;;  %s15760_s19 = scalar_lea.hbm %s17844_s3, 1048576 }
  0x29   : > { %s15755_s23 = scalar_lea.hbm %s16042_s30, 131072  ;;  %p15761_p2 = scmp.lt.s32.totalorder %s16042_s30, %s17844_s3 }
  0x2a   : > { %p15756_p4 = scmp.ne.s32.totalorder %s16042_s30, %s15755_s23  ;;  %p15762_p3 = scmp.lt.s32.totalorder %s15760_s19, %s15755_s23 }
  0x2c   : > { %p15758_p12 = pnand %p16052_p5, %p15756_p4  ;;  %p15763_p6 = por %p15762_p3, %p15761_p2 }
  0x2e   : > { %p15759_p1 = pneg %p15758_p12 }
  0x30   : > { %p15764_p7 = pnand %p15763_p6, %p15759_p1 }
  0x32   : > { %15767 = shalt.err (!%p15764_p7)
}
  0x33   : > { %s15768_s12 = scalar_lea.vmem %s16044_s15, 131072  ;;  %s15912_s27 = smov [#allocation6]  }
  0x34   : > { %p15769_p10 = scmp.ne.s32.totalorder %s16044_s15, %s15768_s12  ;;  %s15773_s28 = sshll.u32 %s15912_s27, 4  ;;  %s15774_s28 = int_to_ptr.vmem [resolvable:$false] %s15773_s28 }
  0x35   : > { %s15775_s9 = scalar_lea.vmem %s15774_s28, 262144  ;;  %p15776_p0 = scmp.lt.s32.totalorder %s16044_s15, %s15774_s28 }
  0x36   : > { %p15771_p4 = pnand %p15769_p10, %p16052_p5  ;;  %p15777_p8 = scmp.lt.s32.totalorder %s15775_s9, %s15768_s12 }
  0x38   : > { %p15772_p12 = pneg %p15771_p4  ;;  %p15778_p9 = por %p15777_p8, %p15776_p0 }
  0x3a   : > { %p15779_p11 = pnand %p15778_p9, %p15772_p12 }
  0x3c   : > { %15782 = shalt.err (!%p15779_p11)
}
  0x3d   : > { %s15913_s23 = smov 256   ;;  %s15914_s17 = smov 16  }
  0x3e   : > { %14095 = dma.hbm_to_vmem [thread:$0]  (!%p16021_p13), %s16042_s30, 131072, %s16044_s15, %s16046_s29, %s15910_s16, %s15913_s23, %s15914_s17  }
  0x3f   : > { %s12437_s18 = sshll.u32 %s16017_s13, 2  ;;  %s14024_s19 = sshll.u32 %s15907_s24, 6 }
  0x40   : > { %s16081_s12 = scalar_lea.hbm %s17824_s4, %s14024_s19  ;;  %s255_s27 = scalar_lea.vmem [#allocation7], %s12437_s18 }
  0x41   : > { %s263_s28 = sshll.u32 %s255_s27, 4  ;;  %s15915_s9 = smov [#allocation4]   ;;  %s264_s28 = int_to_ptr.vmem [resolvable:$true] %s263_s28 }
  0x42   : > { %s219_s1 = sshll.u32 %s15915_s9, 4  ;;  %s15783_s3 = scalar_lea.hbm %s16081_s12, 64  ;;  %s220_s1 = int_to_ptr.vmem [resolvable:$true] %s219_s1 }
  0x43   : > { %p15784_p8 = scmp.ne.s32.totalorder %s16081_s12, %s15783_s3  ;;  %s15788_s15 = scalar_lea.hbm %s17824_s4, 512 }
  0x44   : > { %p15789_p0 = scmp.lt.s32.totalorder %s16081_s12, %s17824_s4  ;;  %p15790_p1 = scmp.lt.s32.totalorder %s15788_s15, %s15783_s3 }
  0x45   : > { %p15786_p9 = pnand %p15784_p8, %p16052_p5 }
  0x46   : > { %p15791_p2 = por %p15790_p1, %p15789_p0 }
  0x47   : > { %p15787_p11 = pneg %p15786_p9 }
  0x49   : > { %p15792_p3 = pnand %p15791_p2, %p15787_p11 }
  0x4b   : > { %15795 = shalt.err (!%p15792_p3)
}
  0x4c   : > { %s15796_s18 = scalar_lea.vmem %s264_s28, 64  ;;  %s15916_s19 = smov [#allocation7]  }
  0x4d   : > { %p15797_p6 = scmp.ne.s32.totalorder %s264_s28, %s15796_s18  ;;  %s15801_s20 = sshll.u32 %s15916_s19, 4  ;;  %s15802_s20 = int_to_ptr.vmem [resolvable:$false] %s15801_s20 }
  0x4e   : > { %s15803_s21 = scalar_lea.vmem %s15802_s20, 128  ;;  %p15804_p4 = scmp.lt.s32.totalorder %s264_s28, %s15802_s20 }
  0x4f   : > { %p15799_p7 = pnand %p15797_p6, %p16052_p5  ;;  %p15805_p12 = scmp.lt.s32.totalorder %s15803_s21, %s15796_s18 }
  0x51   : > { %p15800_p10 = pneg %p15799_p7  ;;  %p15806_p8 = por %p15805_p12, %p15804_p4 }
  0x53   : > { %p15807_p9 = pnand %p15806_p8, %p15800_p10 }
  0x55   : > { %15810 = shalt.err (!%p15807_p9)
}
  0x56   : > { %14098 = dma.hbm_to_vmem [thread:$0]  (!%p16021_p13), %s16081_s12, 64, %s264_s28, %s16046_s29  }
  0x57   : > { %s12440_s3 = sshll.u32 %s16017_s13, 8  ;;  %s15822_s27 = scalar_lea.vmem %s220_s1, 512 }
  0x58   : > { %p15823_p11 = scmp.ne.s32.totalorder %s220_s1, %s15822_s27  ;;  %p17846_p0 = scmp.ne.s32.totalorder %s17841_s11, 0 }
  0x59   : > { %p15830_p6 = scmp.lt.s32.totalorder %s220_s1, %s220_s1  ;;  %p15831_p7 = scmp.lt.s32.totalorder %s15822_s27, %s15822_s27 }
  0x5a   : > { %p17847_p1 = pneg %p17846_p0 }
  0x5b   : > { %p15832_p4 = por %p15831_p7, %p15830_p6 }
  0x5c   : > { %p15825_p2 = pnand %p15823_p11, %p17847_p1 }
  0x5e   : > { %p15826_p3 = pneg %p15825_p2 }
  0x60   : > { %p15833_p10 = pnand %p15832_p4, %p15826_p3 }
  0x62   : > { %15836 = shalt.err (!%p15833_p10)
}
  0x63   : > { %14091 = dma.hbm_to_vmem [thread:$0]  (!%p17846_p0), %s17822_s2, 512, %s220_s1, [#allocation5]  }
  0x64   : > { %s14025_s13 = sshll.u32 %s15907_s24, 12  ;;  %s274_s15 = scalar_lea.vmem [#allocation8], %s12440_s3 }
  0x65   : > { %s16113_s30 = scalar_lea.hbm %s17825_s5, %s14025_s13  ;;  %s281_s23 = sshll.u32 %s274_s15, 4  ;;  %s16115_s23 = int_to_ptr.vmem [resolvable:$true] %s281_s23 }
  0x66   : > { %s15837_s11 = scalar_lea.hbm %s16113_s30, 4096  ;;  %s15842_s24 = scalar_lea.hbm %s17825_s5, 32768 }
  0x67   : > { %p15838_p12 = scmp.ne.s32.totalorder %s16113_s30, %s15837_s11  ;;  %p15843_p11 = scmp.lt.s32.totalorder %s16113_s30, %s17825_s5 }
  0x68   : > { %p15844_p0 = scmp.lt.s32.totalorder %s15842_s24, %s15837_s11 }
  0x69   : > { %p15840_p8 = pnand %p15838_p12, %p16052_p5 }
  0x6a   : > { %p15845_p1 = por %p15844_p0, %p15843_p11 }
  0x6b   : > { %p15841_p9 = pneg %p15840_p8 }
  0x6d   : > { %p15846_p2 = pnand %p15845_p1, %p15841_p9 }
  0x6f   : > { %15849 = shalt.err (!%p15846_p2)
}
  0x70   : > { %s15850_s20 = scalar_lea.vmem %s16115_s23, 4096  ;;  %s15917_s21 = smov [#allocation8]  }
  0x71   : > { %p15851_p3 = scmp.ne.s32.totalorder %s16115_s23, %s15850_s20  ;;  %s15855_s3 = sshll.u32 %s15917_s21, 4  ;;  %s15856_s3 = int_to_ptr.vmem [resolvable:$false] %s15855_s3 }
  0x72   : > { %s15857_s27 = scalar_lea.vmem %s15856_s3, 8192  ;;  %p15858_p4 = scmp.lt.s32.totalorder %s16115_s23, %s15856_s3 }
  0x73   : > { %p15853_p6 = pnand %p15851_p3, %p16052_p5  ;;  %p15859_p10 = scmp.lt.s32.totalorder %s15857_s27, %s15850_s20 }
  0x75   : > { %p15854_p7 = pneg %p15853_p6  ;;  %p15860_p12 = por %p15859_p10, %p15858_p4 }
  0x77   : > { %p15861_p8 = pnand %p15860_p12, %p15854_p7 }
  0x79   : > { %15864 = shalt.err (!%p15861_p8)
}
  0x7a   : > { %s15918_s9 = smov 64   ;;  %s15919_s16 = smov 4  }
  0x7b   : > { %14101 = dma.hbm_to_vmem [thread:$0]  (!%p16021_p13), %s16113_s30, 4096, %s16115_s23, %s16046_s29, %s15918_s9, %s15918_s9, %s15919_s16  }
  0x7c   : > { %p17848_p5 = scmp.ne.s32.totalorder %s17840_s8, 0 }
  0x7d   : > { %p17849_p9 = scmp.eq.s32.totalorder (!%p17848_p5), %s15974_s25, 0 }
  0x7e   : > { %293 = sbr.rel (%p17848_p5) target bundleno = 2092 (0x82c), region = 44 }
  0x83   : > { %15882 = dma.done.wait (%p17849_p9), [#allocation3], 65536   ;;  %p17850_p11 = pmov %p17849_p9 }
  0x84   : > { %p17851_p0 = pmov %p17849_p9 }
  0x85   : > { %15884 = vsyncadd (%p17850_p11), [#allocation3], 4294901760 }
  0x86   : > { %15886 = dma.done.wait (%p17851_p0), [#allocation5], 512   ;;  %p17852_p1 = pmov %p17851_p0 }
  0x87   : > { %s303_s14 = sand.u32 1, %s15974_s25   ;;  %s16150_s29 = sand.u32 1, %s15899_s22  }
  0x88   : > { %15888 = vsyncadd (%p17852_p1), [#allocation5], 4294966784  ;;  %s12446_s8 = sshll.u32 %s16150_s29, 13  ;;  %s304_s10 = scalar_lea.sflag [#allocation3], %s303_s14 }
  0x89   : > { %s16153_s13 = scalar_lea.vmem [#allocation6], %s12446_s8  ;;  %p17853_p13 = scmp.ne.s32.totalorder %s17839_s7, 0 }
  0x8b   : > { %15890 = dma.done.wait (%p17853_p13), %s304_s10, 135232  }
  0x8c   : > { %15892 = vsyncadd (%p17853_p13), %s304_s10, 4294832064  ;;  %v599_v0 = vld [vmem:[#allocation2 + $0x700] sm:$0xff]  ;;  %v600_v2 = vld [vmem:[#allocation2 + $0x708] sm:$0xff]  ;;  %s12447_s9 = sshll.u32 %s16150_s29, 2  ;;  %s12448_s14 = sshll.u32 %s16150_s29, 8 }
  0x8d   : > { %v615_v1 = vld [vmem:[#allocation2 + $0x780] sm:$0xff]  ;;  %v616_v4 = vld [vmem:[#allocation2 + $0x788] sm:$0xff]  ;;  %s16717_s16 = scalar_lea.vmem [#allocation7], %s12447_s9  ;;  %s17464_s8 = scalar_lea.vmem [#allocation8], %s12448_s14 }
  0x8e   : > { %v12678_v3 = vcombine.high %v599_v0, %v615_v1  ;;  %v12677_v5 = vcombine.low %v599_v0, %v615_v1  ;;  %v567_v6 = vld [vmem:[#allocation2 + $0x600] sm:$0xff]  ;;  %v12680_v8 = vcombine.high %v600_v2, %v616_v4  ;;  %v12679_v9 = vcombine.low %v600_v2, %v616_v4  ;;  %v568_v11 = vld [vmem:[#allocation2 + $0x608] sm:$0xff]  ;;  %p367_p2 = scmp.lt.s32.totalorder %s15974_s25, 7 }
  0x8f   : > { %v583_v7 = vld [vmem:[#allocation2 + $0x680] sm:$0xff]  ;;  %v584_v12 = vld [vmem:[#allocation2 + $0x688] sm:$0xff] }
  0x90   : > { %v12646_v10 = vcombine.high %v567_v6, %v583_v7  ;;  %v535_v13 = vld [vmem:[#allocation2 + $0x500] sm:$0xff]  ;;  %3625 = vmatprep.subr.bf16.mxu0 %v12678_v3  ;;  %v12648_v14 = vcombine.high %v568_v11, %v584_v12  ;;  %v536_v16 = vld [vmem:[#allocation2 + $0x508] sm:$0xff]  ;;  %3668 = vmatprep.subr.bf16.mxu1 %v12680_v8  ;;  %v12645_v18 = vcombine.low %v567_v6, %v583_v7  ;;  %s17860_s25 = smov (!%p367_p2, %s15974_s25), 7 }
  0x91   : > { %v551_v15 = vld [vmem:[#allocation2 + $0x580] sm:$0xff]  ;;  %v552_v17 = vld [vmem:[#allocation2 + $0x588] sm:$0xff]  ;;  %3626 = vmatpush1.bf16.msra.mxu0 %v12677_v5  ;;  %3669 = vmatpush1.bf16.msra.mxu1 %v12679_v9  ;;  %v12647_v19 = vcombine.low %v568_v11, %v584_v12  ;;  %s14026_s29 = sshll.u32 %s17860_s25, 4 }
  0x92   : > { %3627 = vmatprep.subr.bf16.mxu0 %v12646_v10  ;;  %v12614_v20 = vcombine.high %v535_v13, %v551_v15  ;;  %3670 = vmatprep.subr.bf16.mxu1 %v12648_v14  ;;  %v12616_v21 = vcombine.high %v536_v16, %v552_v17  ;;  %v503_v22 = vld [vmem:[#allocation2 + $0x400] sm:$0xff]  ;;  %v504_v24 = vld [vmem:[#allocation2 + $0x408] sm:$0xff]  ;;  %v12613_v26 = vcombine.low %v535_v13, %v551_v15  ;;  %s371_s7 = scalar_lea.vmem %s17826_s6, %s14026_s29 }
  0x93   : > { %v519_v23 = vld [vmem:[#allocation2 + $0x480] sm:$0xff]  ;;  %v520_v25 = vld [vmem:[#allocation2 + $0x488] sm:$0xff]  ;;  %v12615_v27 = vcombine.low %v536_v16, %v552_v17 }
  0x94   : > { %v12582_v28 = vcombine.high %v503_v22, %v519_v23  ;;  %v12584_v29 = vcombine.high %v504_v24, %v520_v25  ;;  %v471_v30 = vld [vmem:[#allocation2 + $0x300] sm:$0xff]  ;;  %v472_v32 = vld [vmem:[#allocation2 + $0x308] sm:$0xff]  ;;  %v12581_v34 = vcombine.low %v503_v22, %v519_v23  ;;  %v12583_v35 = vcombine.low %v504_v24, %v520_v25 }
  0x95   : > { %3628 = vmatpush1.bf16.msra.mxu0 %v12645_v18  ;;  %3671 = vmatpush1.bf16.msra.mxu1 %v12647_v19  ;;  %v487_v31 = vld [vmem:[#allocation2 + $0x380] sm:$0xff]  ;;  %v488_v33 = vld [vmem:[#allocation2 + $0x388] sm:$0xff] }
  0x96   : > { %3629 = vmatprep.subr.bf16.mxu0 %v12614_v20  ;;  %3672 = vmatprep.subr.bf16.mxu1 %v12616_v21  ;;  %v12550_v36 = vcombine.high %v471_v30, %v487_v31  ;;  %v12552_v37 = vcombine.high %v472_v32, %v488_v33  ;;  %v439_v38 = vld [vmem:[#allocation2 + $0x200] sm:$0xff]  ;;  %v440_v40 = vld [vmem:[#allocation2 + $0x208] sm:$0xff]  ;;  %v12549_v42 = vcombine.low %v471_v30, %v487_v31 }
  0x97   : > { %v455_v39 = vld [vmem:[#allocation2 + $0x280] sm:$0xff]  ;;  %v456_v41 = vld [vmem:[#allocation2 + $0x288] sm:$0xff]  ;;  %v12551_v43 = vcombine.low %v472_v32, %v488_v33 }
  0x98   : > { %v12518_v44 = vcombine.high %v439_v38, %v455_v39  ;;  %v12520_v45 = vcombine.high %v440_v40, %v456_v41  ;;  %v407_v46 = vld [vmem:[#allocation2 + $0x100] sm:$0xff]  ;;  %v408_v48 = vld [vmem:[#allocation2 + $0x108] sm:$0xff]  ;;  %v12517_v50 = vcombine.low %v439_v38, %v455_v39  ;;  %v12519_v51 = vcombine.low %v440_v40, %v456_v41 }
  0x99   : > { %3630 = vmatpush1.bf16.msra.mxu0 %v12613_v26  ;;  %3673 = vmatpush1.bf16.msra.mxu1 %v12615_v27  ;;  %v423_v47 = vld [vmem:[#allocation2 + $0x180] sm:$0xff]  ;;  %v424_v49 = vld [vmem:[#allocation2 + $0x188] sm:$0xff] }
  0x9a   : > { %3631 = vmatprep.subr.bf16.mxu0 %v12582_v28  ;;  %3674 = vmatprep.subr.bf16.mxu1 %v12584_v29  ;;  %v12486_v52 = vcombine.high %v407_v46, %v423_v47  ;;  %v12488_v53 = vcombine.high %v408_v48, %v424_v49  ;;  %v375_v54 = vld [vmem:[#allocation2] sm:$0xff]  ;;  %v376_v57 = vld [vmem:[#allocation2 + $0x8] sm:$0xff]  ;;  %v12485_v59 = vcombine.low %v407_v46, %v423_v47 }
  0x9b   : > { %v391_v55 = vld [vmem:[#allocation2 + $0x80] sm:$0xff]  ;;  %v392_v58 = vld [vmem:[#allocation2 + $0x88] sm:$0xff]  ;;  %v12487_v60 = vcombine.low %v408_v48, %v424_v49 }
  0x9c   : > { %v16162_v56 = vld [vmem:[%s17820_s0 + $0x4] ss:$8 sps:$4 sm:$0xff]   ;;  %v12454_v61 = vcombine.high %v375_v54, %v391_v55  ;;  %v12456_v62 = vcombine.high %v376_v57, %v392_v58  ;;  %v12453_v3 = vcombine.low %v375_v54, %v391_v55  ;;  %v12455_v4 = vcombine.low %v376_v57, %v392_v58 }
  0x9d   : > { %3632 = vmatpush1.bf16.msra.mxu0 %v12581_v34  ;;  %3675 = vmatpush1.bf16.msra.mxu1 %v12583_v35  ;;  %v855_v63 = vld [vmem:[#allocation2 + $0xf00] sm:$0xff]  ;;  %v856_v1 = vld [vmem:[#allocation2 + $0xf08] sm:$0xff] }
  0x9e   : > { %3633 = vmatprep.subr.bf16.mxu0 %v12550_v36  ;;  %3676 = vmatprep.subr.bf16.mxu1 %v12552_v37  ;;  %v871_v0 = vld [vmem:[#allocation2 + $0xf80] sm:$0xff]  ;;  %v872_v2 = vld [vmem:[#allocation2 + $0xf88] sm:$0xff] }
  0x9f   : > { %3657 = vmatprep.mubr.bf16.mxu0 %v16162_v56  ;;  %3700 = vmatprep.mubr.bf16.mxu1 %v16162_v56  ;;  %v12934_v5 = vcombine.high %v855_v63, %v871_v0  ;;  %v12936_v6 = vcombine.high %v856_v1, %v872_v2  ;;  %v823_v7 = vld [vmem:[#allocation2 + $0xe00] sm:$0xff]  ;;  %v824_v9 = vld [vmem:[#allocation2 + $0xe08] sm:$0xff]  ;;  %v12933_v11 = vcombine.low %v855_v63, %v871_v0  ;;  %v601_v0 = vld [vmem:[#allocation2 + $0x710] sm:$0xff] }
  0xa0   : > { %v839_v8 = vld [vmem:[#allocation2 + $0xe80] sm:$0xff]  ;;  %v840_v10 = vld [vmem:[#allocation2 + $0xe88] sm:$0xff]  ;;  %v12935_v12 = vcombine.low %v856_v1, %v872_v2  ;;  %v617_v1 = vld [vmem:[#allocation2 + $0x790] sm:$0xff] }
  0xa1   : > { %3634 = vmatpush1.bf16.msra.mxu0 %v12549_v42  ;;  %3677 = vmatpush1.bf16.msra.mxu1 %v12551_v43  ;;  %v12902_v13 = vcombine.high %v823_v7, %v839_v8  ;;  %v12904_v14 = vcombine.high %v824_v9, %v840_v10  ;;  %v791_v15 = vld [vmem:[#allocation2 + $0xd00] sm:$0xff]  ;;  %v792_v17 = vld [vmem:[#allocation2 + $0xd08] sm:$0xff]  ;;  %v12901_v19 = vcombine.low %v823_v7, %v839_v8  ;;  %v602_v2 = vld [vmem:[#allocation2 + $0x718] sm:$0xff] }
  0xa2   : > { %3635 = vmatprep.subr.bf16.mxu0 %v12518_v44  ;;  %3678 = vmatprep.subr.bf16.mxu1 %v12520_v45  ;;  %v807_v16 = vld [vmem:[#allocation2 + $0xd80] sm:$0xff]  ;;  %v808_v18 = vld [vmem:[#allocation2 + $0xd88] sm:$0xff]  ;;  %v12903_v20 = vcombine.low %v824_v9, %v840_v10  ;;  %v569_v8 = vld [vmem:[#allocation2 + $0x610] sm:$0xff] }
  0xa3   : > { %v12870_v21 = vcombine.high %v791_v15, %v807_v16  ;;  %v12872_v22 = vcombine.high %v792_v17, %v808_v18  ;;  %v759_v23 = vld [vmem:[#allocation2 + $0xc00] sm:$0xff]  ;;  %v760_v25 = vld [vmem:[#allocation2 + $0xc08] sm:$0xff]  ;;  %v12869_v27 = vcombine.low %v791_v15, %v807_v16  ;;  %v12871_v28 = vcombine.low %v792_v17, %v808_v18  ;;  %v585_v9 = vld [vmem:[#allocation2 + $0x690] sm:$0xff] }
  0xa4   : > { %v775_v24 = vld [vmem:[#allocation2 + $0xc80] sm:$0xff]  ;;  %v776_v26 = vld [vmem:[#allocation2 + $0xc88] sm:$0xff]  ;;  %v12650_v15 = vcombine.high %v569_v8, %v585_v9  ;;  %v537_v16 = vld [vmem:[#allocation2 + $0x510] sm:$0xff] }
  0xa5   : > { %3636 = vmatpush1.bf16.msra.mxu0 %v12517_v50  ;;  %3679 = vmatpush1.bf16.msra.mxu1 %v12519_v51  ;;  %v12838_v29 = vcombine.high %v759_v23, %v775_v24  ;;  %v12840_v30 = vcombine.high %v760_v25, %v776_v26  ;;  %v727_v31 = vld [vmem:[#allocation2 + $0xb00] sm:$0xff]  ;;  %v728_v33 = vld [vmem:[#allocation2 + $0xb08] sm:$0xff]  ;;  %v12837_v35 = vcombine.low %v759_v23, %v775_v24  ;;  %v553_v17 = vld [vmem:[#allocation2 + $0x590] sm:$0xff] }
  0xa6   : > { %3637 = vmatprep.subr.bf16.mxu0 %v12486_v52  ;;  %3680 = vmatprep.subr.bf16.mxu1 %v12488_v53  ;;  %v743_v32 = vld [vmem:[#allocation2 + $0xb80] sm:$0xff]  ;;  %v744_v34 = vld [vmem:[#allocation2 + $0xb88] sm:$0xff]  ;;  %v12839_v36 = vcombine.low %v760_v25, %v776_v26  ;;  %v12618_v23 = vcombine.high %v537_v16, %v553_v17  ;;  %v505_v24 = vld [vmem:[#allocation2 + $0x410] sm:$0xff] }
  0xa7   : > { %v12806_v37 = vcombine.high %v727_v31, %v743_v32  ;;  %v12808_v38 = vcombine.high %v728_v33, %v744_v34  ;;  %v695_v39 = vld [vmem:[#allocation2 + $0xa00] sm:$0xff]  ;;  %v696_v41 = vld [vmem:[#allocation2 + $0xa08] sm:$0xff]  ;;  %v12805_v43 = vcombine.low %v727_v31, %v743_v32  ;;  %v12807_v44 = vcombine.low %v728_v33, %v744_v34  ;;  %v521_v25 = vld [vmem:[#allocation2 + $0x490] sm:$0xff] }
  0xa8   : > { %v711_v40 = vld [vmem:[#allocation2 + $0xa80] sm:$0xff]  ;;  %v712_v42 = vld [vmem:[#allocation2 + $0xa88] sm:$0xff]  ;;  %v506_v26 = vld [vmem:[#allocation2 + $0x418] sm:$0xff]  ;;  %v12586_v31 = vcombine.high %v505_v24, %v521_v25 }
  0xa9   : > { %3638 = vmatpush1.bf16.msra.mxu0 %v12485_v59  ;;  %3681 = vmatpush1.bf16.msra.mxu1 %v12487_v60  ;;  %v12774_v45 = vcombine.high %v695_v39, %v711_v40  ;;  %v12776_v46 = vcombine.high %v696_v41, %v712_v42  ;;  %v663_v47 = vld [vmem:[#allocation2 + $0x900] sm:$0xff]  ;;  %v664_v49 = vld [vmem:[#allocation2 + $0x908] sm:$0xff]  ;;  %v12773_v51 = vcombine.low %v695_v39, %v711_v40  ;;  %v473_v32 = vld [vmem:[#allocation2 + $0x310] sm:$0xff] }
  0xaa   : > { %3639 = vmatprep.subr.bf16.mxu0 %v12454_v61  ;;  %3682 = vmatprep.subr.bf16.mxu1 %v12456_v62  ;;  %v679_v48 = vld [vmem:[#allocation2 + $0x980] sm:$0xff]  ;;  %v680_v50 = vld [vmem:[#allocation2 + $0x988] sm:$0xff]  ;;  %v12775_v52 = vcombine.low %v696_v41, %v712_v42  ;;  %v489_v33 = vld [vmem:[#allocation2 + $0x390] sm:$0xff] }
  0xab   : > { %v12742_v53 = vcombine.high %v663_v47, %v679_v48  ;;  %v12744_v54 = vcombine.high %v664_v49, %v680_v50  ;;  %v631_v55 = vld [vmem:[#allocation2 + $0x800] sm:$0xff]  ;;  %v632_v58 = vld [vmem:[#allocation2 + $0x808] sm:$0xff]  ;;  %v12741_v60 = vcombine.low %v663_v47, %v679_v48  ;;  %v12743_v61 = vcombine.low %v664_v49, %v680_v50  ;;  %v474_v34 = vld [vmem:[#allocation2 + $0x318] sm:$0xff] }
  0xac   : > { %v647_v57 = vld [vmem:[#allocation2 + $0x880] sm:$0xff]  ;;  %v648_v59 = vld [vmem:[#allocation2 + $0x888] sm:$0xff]  ;;  %v12554_v39 = vcombine.high %v473_v32, %v489_v33  ;;  %v441_v40 = vld [vmem:[#allocation2 + $0x210] sm:$0xff] }
  0xad   : > { %3640 = vmatpush1.bf16.msra.mxu0 %v12453_v3  ;;  %3683 = vmatpush1.bf16.msra.mxu1 %v12455_v4  ;;  %v12710_v62 = vcombine.high %v631_v55, %v647_v57  ;;  %v12712_v63 = vcombine.high %v632_v58, %v648_v59  ;;  %v618_v3 = vld [vmem:[#allocation2 + $0x798] sm:$0xff]  ;;  %v12709_v4 = vcombine.low %v631_v55, %v647_v57  ;;  %v16169_v10 = vld [vmem:[%s17820_s0] ss:$8 sps:$4 sm:$0xff]   ;;  %v457_v41 = vld [vmem:[#allocation2 + $0x290] sm:$0xff] }
  0xae   : > { %3641 = vmatprep.subr.bf16.mxu0 %v12934_v5  ;;  %3684 = vmatprep.subr.bf16.mxu1 %v12936_v6  ;;  %v12711_v5 = vcombine.low %v632_v58, %v648_v59  ;;  %v12682_v6 = vcombine.high %v601_v0, %v617_v1  ;;  %v12684_v7 = vcombine.high %v602_v2, %v618_v3  ;;  %v442_v42 = vld [vmem:[#allocation2 + $0x218] sm:$0xff]  ;;  %v409_v48 = vld [vmem:[#allocation2 + $0x110] sm:$0xff] }
  0xaf   : > { %v12522_v47 = vcombine.high %v441_v40, %v457_v41  ;;  %v425_v49 = vld [vmem:[#allocation2 + $0x190] sm:$0xff]  ;;  %v410_v50 = vld [vmem:[#allocation2 + $0x118] sm:$0xff] }
  0xb0   : > { %v12490_v55 = vcombine.high %v409_v48, %v425_v49  ;;  %v377_v57 = vld [vmem:[#allocation2 + $0x10] sm:$0xff]  ;;  %v378_v59 = vld [vmem:[#allocation2 + $0x18] sm:$0xff] }
  0xb1   : > { %3642 = vmatpush2.bf16.msra.mxu0 %v12933_v11  ;;  %3685 = vmatpush2.bf16.msra.mxu1 %v12935_v12  ;;  %v570_v11 = vld [vmem:[#allocation2 + $0x618] sm:$0xff]  ;;  %v393_v58 = vld [vmem:[#allocation2 + $0x90] sm:$0xff] }
  0xb2   : > { %3643 = vmatprep.subr.bf16.mxu0 %v12902_v13  ;;  %3686 = vmatprep.subr.bf16.mxu1 %v12904_v14  ;;  %v586_v12 = vld [vmem:[#allocation2 + $0x698] sm:$0xff]  ;;  %v12681_v13 = vcombine.low %v601_v0, %v617_v1  ;;  %v12683_v14 = vcombine.low %v602_v2, %v618_v3  ;;  %v12458_v0 = vcombine.high %v377_v57, %v393_v58  ;;  %v857_v1 = vld [vmem:[#allocation2 + $0xf10] sm:$0xff] }
  0xb3   : > { %v12652_v18 = vcombine.high %v570_v11, %v586_v12  ;;  %v873_v2 = vld [vmem:[#allocation2 + $0xf90] sm:$0xff]  ;;  %v858_v3 = vld [vmem:[#allocation2 + $0xf18] sm:$0xff] }
  0xb5   : > { %3644 = vmatpush2.bf16.msra.mxu0 %v12901_v19  ;;  %3687 = vmatpush2.bf16.msra.mxu1 %v12903_v20  ;;  %v538_v19 = vld [vmem:[#allocation2 + $0x518] sm:$0xff] }
  0xb6   : > { %3645 = vmatprep.subr.bf16.mxu0 %v12870_v21  ;;  %3688 = vmatprep.subr.bf16.mxu1 %v12872_v22  ;;  %v554_v20 = vld [vmem:[#allocation2 + $0x598] sm:$0xff]  ;;  %v12649_v21 = vcombine.low %v569_v8, %v585_v9  ;;  %v12651_v22 = vcombine.low %v570_v11, %v586_v12  ;;  %v12938_v8 = vcombine.high %v857_v1, %v873_v2  ;;  %v825_v9 = vld [vmem:[#allocation2 + $0xe10] sm:$0xff] }
  0xb7   : > { %v841_v11 = vld [vmem:[#allocation2 + $0xe90] sm:$0xff]  ;;  %v826_v12 = vld [vmem:[#allocation2 + $0xe18] sm:$0xff] }
  0xb9   : > { %3646 = vmatpush2.bf16.msra.mxu0 %v12869_v27  ;;  %3689 = vmatpush2.bf16.msra.mxu1 %v12871_v28  ;;  %v12620_v27 = vcombine.high %v538_v19, %v554_v20  ;;  %v522_v28 = vld [vmem:[#allocation2 + $0x498] sm:$0xff] }
  0xba   : > { %3647 = vmatprep.subr.bf16.mxu0 %v12838_v29  ;;  %3690 = vmatprep.subr.bf16.mxu1 %v12840_v30  ;;  %v12617_v29 = vcombine.low %v537_v16, %v553_v17  ;;  %v12619_v30 = vcombine.low %v538_v19, %v554_v20  ;;  %v12906_v17 = vcombine.high %v825_v9, %v841_v11  ;;  %v809_v19 = vld [vmem:[#allocation2 + $0xd90] sm:$0xff]  ;;  %v794_v20 = vld [vmem:[#allocation2 + $0xd18] sm:$0xff] }
  0xbd   : > { %3648 = vmatpush2.bf16.msra.mxu0 %v12837_v35  ;;  %3691 = vmatpush2.bf16.msra.mxu1 %v12839_v36  ;;  %v12588_v35 = vcombine.high %v506_v26, %v522_v28  ;;  %v490_v36 = vld [vmem:[#allocation2 + $0x398] sm:$0xff] }
  0xbe   : > { %3649 = vmatprep.subr.bf16.mxu0 %v12806_v37  ;;  %3692 = vmatprep.subr.bf16.mxu1 %v12808_v38  ;;  %v12585_v37 = vcombine.low %v505_v24, %v521_v25  ;;  %v12587_v38 = vcombine.low %v506_v26, %v522_v28  ;;  %v761_v26 = vld [vmem:[#allocation2 + $0xc10] sm:$0xff]  ;;  %v762_v28 = vld [vmem:[#allocation2 + $0xc18] sm:$0xff] }
  0xc1   : > { %3650 = vmatpush2.bf16.msra.mxu0 %v12805_v43  ;;  %3693 = vmatpush2.bf16.msra.mxu1 %v12807_v44  ;;  %v12556_v43 = vcombine.high %v474_v34, %v490_v36  ;;  %v458_v44 = vld [vmem:[#allocation2 + $0x298] sm:$0xff] }
  0xc2   : > { %3651 = vmatprep.subr.bf16.mxu0 %v12774_v45  ;;  %3694 = vmatprep.subr.bf16.mxu1 %v12776_v46  ;;  %v12553_v45 = vcombine.low %v473_v32, %v489_v33  ;;  %v12555_v46 = vcombine.low %v474_v34, %v490_v36  ;;  %v729_v34 = vld [vmem:[#allocation2 + $0xb10] sm:$0xff]  ;;  %v730_v36 = vld [vmem:[#allocation2 + $0xb18] sm:$0xff] }
  0xc5   : > { %3652 = vmatpush2.bf16.msra.mxu0 %v12773_v51  ;;  %3695 = vmatpush2.bf16.msra.mxu1 %v12775_v52  ;;  %v12524_v51 = vcombine.high %v442_v42, %v458_v44  ;;  %v426_v52 = vld [vmem:[#allocation2 + $0x198] sm:$0xff] }
  0xc6   : > { %3653 = vmatprep.subr.bf16.mxu0 %v12742_v53  ;;  %3696 = vmatprep.subr.bf16.mxu1 %v12744_v54  ;;  %v12521_v53 = vcombine.low %v441_v40, %v457_v41  ;;  %v12523_v54 = vcombine.low %v442_v42, %v458_v44  ;;  %v697_v42 = vld [vmem:[#allocation2 + $0xa10] sm:$0xff]  ;;  %v698_v44 = vld [vmem:[#allocation2 + $0xa18] sm:$0xff] }
  0xc9   : > { %3654 = vmatpush2.bf16.msra.mxu0 %v12741_v60  ;;  %3697 = vmatpush2.bf16.msra.mxu1 %v12743_v61  ;;  %v12492_v60 = vcombine.high %v410_v50, %v426_v52  ;;  %v394_v61 = vld [vmem:[#allocation2 + $0x98] sm:$0xff] }
  0xca   : > { %3655 = vmatprep.subr.bf16.mxu0 %v12710_v62  ;;  %3698 = vmatprep.subr.bf16.mxu1 %v12712_v63  ;;  %v12489_v62 = vcombine.low %v409_v48, %v425_v49  ;;  %v12491_v63 = vcombine.low %v410_v50, %v426_v52  ;;  %v665_v50 = vld [vmem:[#allocation2 + $0x910] sm:$0xff]  ;;  %v666_v52 = vld [vmem:[#allocation2 + $0x918] sm:$0xff] }
  0xcd   : > { %3656 = vmatpush2.bf16.msra.mxu0 %v12709_v4  ;;  %3699 = vmatpush2.bf16.msra.mxu1 %v12711_v5  ;;  %v12460_v4 = vcombine.high %v378_v59, %v394_v61  ;;  %v874_v5 = vld [vmem:[#allocation2 + $0xf98] sm:$0xff] }
  0xce   : > { %3711 = vmatprep.subr.bf16.mxu0 %v12682_v6  ;;  %3754 = vmatprep.subr.bf16.mxu1 %v12684_v7  ;;  %v12457_v6 = vcombine.low %v377_v57, %v393_v58  ;;  %v12459_v7 = vcombine.low %v378_v59, %v394_v61  ;;  %v12939_v16 = vcombine.low %v858_v3, %v874_v5  ;;  %v633_v59 = vld [vmem:[#allocation2 + $0x810] sm:$0xff]  ;;  %v634_v61 = vld [vmem:[#allocation2 + $0x818] sm:$0xff] }
  0xd0   : > { %3658 = vmatmul.mubr.bf16.vlgmr.msra.gmra.mxu0 %v16169_v10  ;;  %3701 = vmatmul.mubr.bf16.vlgmr.msra.gmra.mxu1 %v16169_v10 }
  0xd1   : > { %3712 = vmatpush1.bf16.msra.mxu0 %v12681_v13  ;;  %3755 = vmatpush1.bf16.msra.mxu1 %v12683_v14  ;;  %v12940_v13 = vcombine.high %v858_v3, %v874_v5  ;;  %v842_v14 = vld [vmem:[#allocation2 + $0xe98] sm:$0xff]  ;;  %v603_v3 = vld [vmem:[#allocation2 + $0x720] sm:$0xff]  ;;  %v604_v5 = vld [vmem:[#allocation2 + $0x728] sm:$0xff] }
  0xd2   : > { %3713 = vmatprep.subr.bf16.mxu0 %v12650_v15  ;;  %3756 = vmatprep.subr.bf16.mxu1 %v12652_v18  ;;  %v12937_v15 = vcombine.low %v857_v1, %v873_v2  ;;  %v793_v18 = vld [vmem:[#allocation2 + $0xd10] sm:$0xff]  ;;  %v12907_v24 = vcombine.low %v826_v12, %v842_v14 }
  0xd3   : > { %3743 = vmatprep.mubr.bf16.mxu0 %v16162_v56  ;;  %3786 = vmatprep.mubr.bf16.mxu1 %v16162_v56  ;;  %v12874_v25 = vcombine.high %v793_v18, %v809_v19 }
  0xd5   : > { %3714 = vmatpush1.bf16.msra.mxu0 %v12649_v21  ;;  %3757 = vmatpush1.bf16.msra.mxu1 %v12651_v22  ;;  %v12908_v21 = vcombine.high %v826_v12, %v842_v14  ;;  %v810_v22 = vld [vmem:[#allocation2 + $0xd98] sm:$0xff]  ;;  %v571_v12 = vld [vmem:[#allocation2 + $0x620] sm:$0xff]  ;;  %v572_v14 = vld [vmem:[#allocation2 + $0x628] sm:$0xff] }
  0xd6   : > { %3715 = vmatprep.subr.bf16.mxu0 %v12618_v23  ;;  %3758 = vmatprep.subr.bf16.mxu1 %v12620_v27  ;;  %v12905_v23 = vcombine.low %v825_v9, %v841_v11  ;;  %v777_v27 = vld [vmem:[#allocation2 + $0xc90] sm:$0xff]  ;;  %v12875_v32 = vcombine.low %v794_v20, %v810_v22 }
  0xd7   : > { %v12842_v33 = vcombine.high %v761_v26, %v777_v27 }
  0xd9   : > { %3716 = vmatpush1.bf16.msra.mxu0 %v12617_v29  ;;  %3759 = vmatpush1.bf16.msra.mxu1 %v12619_v30  ;;  %v12876_v29 = vcombine.high %v794_v20, %v810_v22  ;;  %v778_v30 = vld [vmem:[#allocation2 + $0xc98] sm:$0xff]  ;;  %v539_v20 = vld [vmem:[#allocation2 + $0x520] sm:$0xff] }
  0xda   : > { %3717 = vmatprep.subr.bf16.mxu0 %v12586_v31  ;;  %3760 = vmatprep.subr.bf16.mxu1 %v12588_v35  ;;  %v12873_v31 = vcombine.low %v793_v18, %v809_v19  ;;  %v745_v35 = vld [vmem:[#allocation2 + $0xb90] sm:$0xff]  ;;  %v12843_v40 = vcombine.low %v762_v28, %v778_v30 }
  0xdb   : > { %v12810_v41 = vcombine.high %v729_v34, %v745_v35 }
  0xdd   : > { %3718 = vmatpush1.bf16.msra.mxu0 %v12585_v37  ;;  %3761 = vmatpush1.bf16.msra.mxu1 %v12587_v38  ;;  %v12844_v37 = vcombine.high %v762_v28, %v778_v30  ;;  %v746_v38 = vld [vmem:[#allocation2 + $0xb98] sm:$0xff]  ;;  %v507_v28 = vld [vmem:[#allocation2 + $0x420] sm:$0xff]  ;;  %v508_v30 = vld [vmem:[#allocation2 + $0x428] sm:$0xff] }
  0xde   : > { %3719 = vmatprep.subr.bf16.mxu0 %v12554_v39  ;;  %3762 = vmatprep.subr.bf16.mxu1 %v12556_v43  ;;  %v12841_v39 = vcombine.low %v761_v26, %v777_v27  ;;  %v713_v43 = vld [vmem:[#allocation2 + $0xa90] sm:$0xff]  ;;  %v12811_v48 = vcombine.low %v730_v36, %v746_v38 }
  0xdf   : > { %v12778_v49 = vcombine.high %v697_v42, %v713_v43 }
  0xe1   : > { %3720 = vmatpush1.bf16.msra.mxu0 %v12553_v45  ;;  %3763 = vmatpush1.bf16.msra.mxu1 %v12555_v46  ;;  %v12812_v45 = vcombine.high %v730_v36, %v746_v38  ;;  %v714_v46 = vld [vmem:[#allocation2 + $0xa98] sm:$0xff]  ;;  %v491_v36 = vld [vmem:[#allocation2 + $0x3a0] sm:$0xff] }
  0xe2   : > { %3721 = vmatprep.subr.bf16.mxu0 %v12522_v47  ;;  %3764 = vmatprep.subr.bf16.mxu1 %v12524_v51  ;;  %v12809_v47 = vcombine.low %v729_v34, %v745_v35  ;;  %v681_v51 = vld [vmem:[#allocation2 + $0x990] sm:$0xff]  ;;  %v12779_v57 = vcombine.low %v698_v44, %v714_v46  ;;  %v475_v35 = vld [vmem:[#allocation2 + $0x320] sm:$0xff] }
  0xe3   : > { %v12746_v58 = vcombine.high %v665_v50, %v681_v51 }
  0xe5   : > { %3722 = vmatpush1.bf16.msra.mxu0 %v12521_v53  ;;  %3765 = vmatpush1.bf16.msra.mxu1 %v12523_v54  ;;  %v12780_v53 = vcombine.high %v698_v44, %v714_v46  ;;  %v682_v54 = vld [vmem:[#allocation2 + $0x998] sm:$0xff]  ;;  %v444_v44 = vld [vmem:[#allocation2 + $0x228] sm:$0xff] }
  0xe6   : > { %3723 = vmatprep.subr.bf16.mxu0 %v12490_v55  ;;  %3766 = vmatprep.subr.bf16.mxu1 %v12492_v60  ;;  %v12777_v55 = vcombine.low %v697_v42, %v713_v43  ;;  %v649_v60 = vld [vmem:[#allocation2 + $0x890] sm:$0xff]  ;;  %v12747_v1 = vcombine.low %v666_v52, %v682_v54  ;;  %v12558_v42 = vcombine.high %v475_v35, %v491_v36  ;;  %v443_v43 = vld [vmem:[#allocation2 + $0x220] sm:$0xff]  ;;  %v460_v46 = vld [vmem:[#allocation2 + $0x2a8] sm:$0xff] }
  0xe7   : > { %v12714_v2 = vcombine.high %v633_v59, %v649_v60 }
  0xe9   : > { %3724 = vmatpush1.bf16.msra.mxu0 %v12489_v62  ;;  %3767 = vmatpush1.bf16.msra.mxu1 %v12491_v63  ;;  %v12748_v62 = vcombine.high %v666_v52, %v682_v54  ;;  %v650_v63 = vld [vmem:[#allocation2 + $0x898] sm:$0xff]  ;;  %v412_v52 = vld [vmem:[#allocation2 + $0x128] sm:$0xff] }
  0xea   : > { %3725 = vmatprep.subr.bf16.mxu0 %v12458_v0  ;;  %3768 = vmatprep.subr.bf16.mxu1 %v12460_v4  ;;  %v12745_v0 = vcombine.low %v665_v50, %v681_v51  ;;  %v619_v4 = vld [vmem:[#allocation2 + $0x7a0] sm:$0xff]  ;;  %v12715_v9 = vcombine.low %v634_v61, %v650_v63  ;;  %v428_v54 = vld [vmem:[#allocation2 + $0x1a8] sm:$0xff] }
  0xeb   : > { %v12686_v11 = vcombine.high %v603_v3, %v619_v4  ;;  %v411_v50 = vld [vmem:[#allocation2 + $0x120] sm:$0xff] }
  0xec   : > { %v427_v51 = vld [vmem:[#allocation2 + $0x1a0] sm:$0xff] }
  0xed   : > { %3726 = vmatpush1.bf16.msra.mxu0 %v12457_v6  ;;  %3769 = vmatpush1.bf16.msra.mxu1 %v12459_v7  ;;  %v12716_v6 = vcombine.high %v634_v61, %v650_v63  ;;  %v620_v7 = vld [vmem:[#allocation2 + $0x7a8] sm:$0xff] }
  0xee   : > { %3727 = vmatprep.subr.bf16.mxu0 %v12938_v8  ;;  %3770 = vmatprep.subr.bf16.mxu1 %v12940_v13  ;;  %v12713_v8 = vcombine.low %v633_v59, %v649_v60  ;;  %v587_v13 = vld [vmem:[#allocation2 + $0x6a0] sm:$0xff]  ;;  %v12687_v18 = vcombine.low %v604_v5, %v620_v7  ;;  %v380_v61 = vld [vmem:[#allocation2 + $0x28] sm:$0xff] }
  0xef   : > { %v12654_v19 = vcombine.high %v571_v12, %v587_v13  ;;  %v379_v59 = vld [vmem:[#allocation2 + $0x20] sm:$0xff]  ;;  %v396_v63 = vld [vmem:[#allocation2 + $0xa8] sm:$0xff] }
  0xf0   : > { %v395_v60 = vld [vmem:[#allocation2 + $0xa0] sm:$0xff] }
  0xf1   : > { %3728 = vmatpush2.bf16.msra.mxu0 %v12937_v15  ;;  %3771 = vmatpush2.bf16.msra.mxu1 %v12939_v16  ;;  %v12688_v15 = vcombine.high %v604_v5, %v620_v7  ;;  %v588_v16 = vld [vmem:[#allocation2 + $0x6a8] sm:$0xff] }
  0xf2   : > { %3729 = vmatprep.subr.bf16.mxu0 %v12906_v17  ;;  %3772 = vmatprep.subr.bf16.mxu1 %v12908_v21  ;;  %v12685_v17 = vcombine.low %v603_v3, %v619_v4  ;;  %v555_v21 = vld [vmem:[#allocation2 + $0x5a0] sm:$0xff]  ;;  %v12656_v22 = vcombine.high %v572_v14, %v588_v16  ;;  %v12655_v26 = vcombine.low %v572_v14, %v588_v16  ;;  %v860_v5 = vld [vmem:[#allocation2 + $0xf28] sm:$0xff] }
  0xf3   : > { %v12622_v27 = vcombine.high %v539_v20, %v555_v21  ;;  %v859_v3 = vld [vmem:[#allocation2 + $0xf20] sm:$0xff]  ;;  %v876_v7 = vld [vmem:[#allocation2 + $0xfa8] sm:$0xff] }
  0xf4   : > { %v875_v4 = vld [vmem:[#allocation2 + $0xfa0] sm:$0xff]  ;;  %v828_v14 = vld [vmem:[#allocation2 + $0xe28] sm:$0xff] }
  0xf5   : > { %3730 = vmatpush2.bf16.msra.mxu0 %v12905_v23  ;;  %3773 = vmatpush2.bf16.msra.mxu1 %v12907_v24  ;;  %v540_v23 = vld [vmem:[#allocation2 + $0x528] sm:$0xff] }
  0xf6   : > { %3731 = vmatprep.subr.bf16.mxu0 %v12874_v25  ;;  %3774 = vmatprep.subr.bf16.mxu1 %v12876_v29  ;;  %v556_v24 = vld [vmem:[#allocation2 + $0x5a8] sm:$0xff]  ;;  %v12653_v25 = vcombine.low %v571_v12, %v587_v13  ;;  %v523_v29 = vld [vmem:[#allocation2 + $0x4a0] sm:$0xff] }
  0xf7   : > { %v12590_v34 = vcombine.high %v507_v28, %v523_v29  ;;  %v827_v12 = vld [vmem:[#allocation2 + $0xe20] sm:$0xff]  ;;  %v844_v16 = vld [vmem:[#allocation2 + $0xea8] sm:$0xff] }
  0xf8   : > { %v843_v13 = vld [vmem:[#allocation2 + $0xea0] sm:$0xff] }
  0xf9   : > { %3732 = vmatpush2.bf16.msra.mxu0 %v12873_v31  ;;  %3775 = vmatpush2.bf16.msra.mxu1 %v12875_v32  ;;  %v12624_v31 = vcombine.high %v540_v23, %v556_v24  ;;  %v524_v32 = vld [vmem:[#allocation2 + $0x4a8] sm:$0xff] }
  0xfa   : > { %3733 = vmatprep.subr.bf16.mxu0 %v12842_v33  ;;  %3776 = vmatprep.subr.bf16.mxu1 %v12844_v37  ;;  %v12621_v33 = vcombine.low %v539_v20, %v555_v21  ;;  %v476_v37 = vld [vmem:[#allocation2 + $0x328] sm:$0xff]  ;;  %v12592_v38 = vcombine.high %v508_v30, %v524_v32  ;;  %v795_v20 = vld [vmem:[#allocation2 + $0xd20] sm:$0xff] }
  0xfb   : > { %v811_v21 = vld [vmem:[#allocation2 + $0xda0] sm:$0xff] }
  0xfd   : > { %3734 = vmatpush2.bf16.msra.mxu0 %v12841_v39  ;;  %3777 = vmatpush2.bf16.msra.mxu1 %v12843_v40  ;;  %v492_v39 = vld [vmem:[#allocation2 + $0x3a8] sm:$0xff]  ;;  %v12589_v40 = vcombine.low %v507_v28, %v523_v29  ;;  %v763_v28 = vld [vmem:[#allocation2 + $0xc20] sm:$0xff] }
  0xfe   : > { %3735 = vmatprep.subr.bf16.mxu0 %v12810_v41  ;;  %3778 = vmatprep.subr.bf16.mxu1 %v12812_v45  ;;  %v12591_v41 = vcombine.low %v508_v30, %v524_v32  ;;  %v12560_v45 = vcombine.high %v476_v37, %v492_v39  ;;  %v779_v29 = vld [vmem:[#allocation2 + $0xca0] sm:$0xff]  ;;  %v764_v30 = vld [vmem:[#allocation2 + $0xc28] sm:$0xff] }
  0xff   : > { %v780_v32 = vld [vmem:[#allocation2 + $0xca8] sm:$0xff] }
 0x101   : > { %3736 = vmatpush2.bf16.msra.mxu0 %v12809_v47  ;;  %3779 = vmatpush2.bf16.msra.mxu1 %v12811_v48  ;;  %v12557_v47 = vcombine.low %v475_v35, %v491_v36  ;;  %v12559_v48 = vcombine.low %v476_v37, %v492_v39  ;;  %v731_v35 = vld [vmem:[#allocation2 + $0xb20] sm:$0xff]  ;;  %v732_v37 = vld [vmem:[#allocation2 + $0xb28] sm:$0xff] }
 0x102   : > { %3737 = vmatprep.subr.bf16.mxu0 %v12778_v49  ;;  %3780 = vmatprep.subr.bf16.mxu1 %v12780_v53  ;;  %v12528_v53 = vcombine.high %v444_v44, %v460_v46  ;;  %v747_v36 = vld [vmem:[#allocation2 + $0xba0] sm:$0xff]  ;;  %v748_v39 = vld [vmem:[#allocation2 + $0xba8] sm:$0xff] }
 0x105   : > { %3738 = vmatpush2.bf16.msra.mxu0 %v12777_v55  ;;  %3781 = vmatpush2.bf16.msra.mxu1 %v12779_v57  ;;  %v12527_v57 = vcombine.low %v444_v44, %v460_v46  ;;  %v700_v44 = vld [vmem:[#allocation2 + $0xa28] sm:$0xff] }
 0x106   : > { %3739 = vmatprep.subr.bf16.mxu0 %v12746_v58  ;;  %3782 = vmatprep.subr.bf16.mxu1 %v12748_v62  ;;  %v12494_v58 = vcombine.high %v411_v50, %v427_v51  ;;  %v12496_v62 = vcombine.high %v412_v52, %v428_v54  ;;  %v716_v46 = vld [vmem:[#allocation2 + $0xaa8] sm:$0xff] }
 0x109   : > { %3740 = vmatpush2.bf16.msra.mxu0 %v12745_v0  ;;  %3783 = vmatpush2.bf16.msra.mxu1 %v12747_v1  ;;  %v12493_v0 = vcombine.low %v411_v50, %v427_v51  ;;  %v12495_v1 = vcombine.low %v412_v52, %v428_v54  ;;  %v667_v50 = vld [vmem:[#allocation2 + $0x920] sm:$0xff]  ;;  %v668_v52 = vld [vmem:[#allocation2 + $0x928] sm:$0xff] }
 0x10a   : > { %3741 = vmatprep.subr.bf16.mxu0 %v12714_v2  ;;  %3784 = vmatprep.subr.bf16.mxu1 %v12716_v6  ;;  %v12462_v2 = vcombine.high %v379_v59, %v395_v60  ;;  %v12464_v6 = vcombine.high %v380_v61, %v396_v63  ;;  %v683_v51 = vld [vmem:[#allocation2 + $0x9a0] sm:$0xff]  ;;  %v684_v54 = vld [vmem:[#allocation2 + $0x9a8] sm:$0xff] }
 0x10d   : > { %3742 = vmatpush2.bf16.msra.mxu0 %v12713_v8  ;;  %3785 = vmatpush2.bf16.msra.mxu1 %v12715_v9  ;;  %v12461_v8 = vcombine.low %v379_v59, %v395_v60  ;;  %v12463_v9 = vcombine.low %v380_v61, %v396_v63  ;;  %v635_v59 = vld [vmem:[#allocation2 + $0x820] sm:$0xff]  ;;  %v636_v61 = vld [vmem:[#allocation2 + $0x828] sm:$0xff] }
 0x10e   : > { %3797 = vmatprep.subr.bf16.mxu0 %v12686_v11  ;;  %3840 = vmatprep.subr.bf16.mxu1 %v12688_v15  ;;  %v12942_v11 = vcombine.high %v859_v3, %v875_v4  ;;  %v12944_v15 = vcombine.high %v860_v5, %v876_v7  ;;  %v651_v60 = vld [vmem:[#allocation2 + $0x8a0] sm:$0xff]  ;;  %v652_v63 = vld [vmem:[#allocation2 + $0x8a8] sm:$0xff] }
 0x110   : > { %3744 = vmatmul.mubr.bf16.vlgmr.msra.gmra.mxu0 %v16169_v10  ;;  %3787 = vmatmul.mubr.bf16.vlgmr.msra.gmra.mxu1 %v16169_v10  ;;  %v12623_v10 = vcombine.low %v540_v23, %v556_v24  ;;  %v12912_v23 = vcombine.high %v828_v14, %v844_v16  ;;  %v812_v24 = vld [vmem:[#allocation2 + $0xda8] sm:$0xff] }
 0x111   : > { %3798 = vmatpush1.bf16.msra.mxu0 %v12685_v17  ;;  %3841 = vmatpush1.bf16.msra.mxu1 %v12687_v18  ;;  %v12941_v17 = vcombine.low %v859_v3, %v875_v4  ;;  %v12943_v18 = vcombine.low %v860_v5, %v876_v7  ;;  %v605_v3 = vld [vmem:[#allocation2 + $0x730] sm:$0xff]  ;;  %v606_v5 = vld [vmem:[#allocation2 + $0x738] sm:$0xff] }
 0x112   : > { %3799 = vmatprep.subr.bf16.mxu0 %v12654_v19  ;;  %3842 = vmatprep.subr.bf16.mxu1 %v12656_v22  ;;  %v12910_v19 = vcombine.high %v827_v12, %v843_v13  ;;  %v796_v22 = vld [vmem:[#allocation2 + $0xd28] sm:$0xff]  ;;  %v621_v4 = vld [vmem:[#allocation2 + $0x7b0] sm:$0xff]  ;;  %v622_v7 = vld [vmem:[#allocation2 + $0x7b8] sm:$0xff] }
 0x113   : > { %3829 = vmatprep.mubr.bf16.mxu0 %v16162_v56  ;;  %3872 = vmatprep.mubr.bf16.mxu1 %v16162_v56  ;;  %v459_v56 = vld [vmem:[#allocation2 + $0x2a0] sm:$0xff] }
 0x114   : > { %v12526_v49 = vcombine.high %v443_v43, %v459_v56  ;;  %v12525_v55 = vcombine.low %v443_v43, %v459_v56  ;;  %v699_v43 = vld [vmem:[#allocation2 + $0xa20] sm:$0xff] }
 0x115   : > { %3800 = vmatpush1.bf16.msra.mxu0 %v12653_v25  ;;  %3843 = vmatpush1.bf16.msra.mxu1 %v12655_v26  ;;  %v12909_v25 = vcombine.low %v827_v12, %v843_v13  ;;  %v12911_v26 = vcombine.low %v828_v14, %v844_v16  ;;  %v715_v56 = vld [vmem:[#allocation2 + $0xaa0] sm:$0xff]  ;;  %v573_v12 = vld [vmem:[#allocation2 + $0x630] sm:$0xff]  ;;  %v574_v14 = vld [vmem:[#allocation2 + $0x638] sm:$0xff] }
 0x116   : > { %3801 = vmatprep.subr.bf16.mxu0 %v12622_v27  ;;  %3844 = vmatprep.subr.bf16.mxu1 %v12624_v31  ;;  %v12878_v27 = vcombine.high %v795_v20, %v811_v21  ;;  %v12880_v31 = vcombine.high %v796_v22, %v812_v24  ;;  %v589_v13 = vld [vmem:[#allocation2 + $0x6b0] sm:$0xff]  ;;  %v590_v16 = vld [vmem:[#allocation2 + $0x6b8] sm:$0xff] }
 0x119   : > { %3802 = vmatpush1.bf16.msra.mxu0 %v12621_v33  ;;  %3845 = vmatpush1.bf16.msra.mxu1 %v12623_v10  ;;  %v12877_v33 = vcombine.low %v795_v20, %v811_v21  ;;  %v12879_v10 = vcombine.low %v796_v22, %v812_v24  ;;  %v541_v20 = vld [vmem:[#allocation2 + $0x530] sm:$0xff]  ;;  %v542_v22 = vld [vmem:[#allocation2 + $0x538] sm:$0xff] }
 0x11a   : > { %3803 = vmatprep.subr.bf16.mxu0 %v12590_v34  ;;  %3846 = vmatprep.subr.bf16.mxu1 %v12592_v38  ;;  %v12846_v34 = vcombine.high %v763_v28, %v779_v29  ;;  %v12848_v38 = vcombine.high %v764_v30, %v780_v32  ;;  %v557_v21 = vld [vmem:[#allocation2 + $0x5b0] sm:$0xff]  ;;  %v558_v24 = vld [vmem:[#allocation2 + $0x5b8] sm:$0xff] }
 0x11d   : > { %3804 = vmatpush1.bf16.msra.mxu0 %v12589_v40  ;;  %3847 = vmatpush1.bf16.msra.mxu1 %v12591_v41  ;;  %v12845_v40 = vcombine.low %v763_v28, %v779_v29  ;;  %v12847_v41 = vcombine.low %v764_v30, %v780_v32  ;;  %v12626_v28 = vcombine.high %v541_v20, %v557_v21  ;;  %v509_v29 = vld [vmem:[#allocation2 + $0x430] sm:$0xff] }
 0x11e   : > { %3805 = vmatprep.subr.bf16.mxu0 %v12558_v42  ;;  %3848 = vmatprep.subr.bf16.mxu1 %v12560_v45  ;;  %v12814_v42 = vcombine.high %v731_v35, %v747_v36  ;;  %v12816_v45 = vcombine.high %v732_v37, %v748_v39  ;;  %v525_v30 = vld [vmem:[#allocation2 + $0x4b0] sm:$0xff]  ;;  %v12628_v32 = vcombine.high %v542_v22, %v558_v24 }
 0x121   : > { %3806 = vmatpush1.bf16.msra.mxu0 %v12557_v47  ;;  %3849 = vmatpush1.bf16.msra.mxu1 %v12559_v48  ;;  %v12813_v47 = vcombine.low %v731_v35, %v747_v36  ;;  %v12815_v48 = vcombine.low %v732_v37, %v748_v39  ;;  %v12627_v35 = vcombine.low %v542_v22, %v558_v24  ;;  %v477_v37 = vld [vmem:[#allocation2 + $0x330] sm:$0xff]  ;;  %v478_v39 = vld [vmem:[#allocation2 + $0x338] sm:$0xff] }
 0x122   : > { %3807 = vmatprep.subr.bf16.mxu0 %v12526_v49  ;;  %3850 = vmatprep.subr.bf16.mxu1 %v12528_v53  ;;  %v12782_v49 = vcombine.high %v699_v43, %v715_v56  ;;  %v12784_v53 = vcombine.high %v700_v44, %v716_v46  ;;  %v12594_v36 = vcombine.high %v509_v29, %v525_v30  ;;  %v797_v22 = vld [vmem:[#allocation2 + $0xd30] sm:$0xff]  ;;  %v798_v24 = vld [vmem:[#allocation2 + $0xd38] sm:$0xff] }
 0x125   : > { %3808 = vmatpush1.bf16.msra.mxu0 %v12525_v55  ;;  %3851 = vmatpush1.bf16.msra.mxu1 %v12527_v57  ;;  %v12781_v55 = vcombine.low %v699_v43, %v715_v56  ;;  %v12783_v57 = vcombine.low %v700_v44, %v716_v46  ;;  %v445_v44 = vld [vmem:[#allocation2 + $0x230] sm:$0xff]  ;;  %v446_v46 = vld [vmem:[#allocation2 + $0x238] sm:$0xff] }
 0x126   : > { %3809 = vmatprep.subr.bf16.mxu0 %v12494_v58  ;;  %3852 = vmatprep.subr.bf16.mxu1 %v12496_v62  ;;  %v12750_v58 = vcombine.high %v667_v50, %v683_v51  ;;  %v12752_v62 = vcombine.high %v668_v52, %v684_v54 }
 0x129   : > { %3810 = vmatpush1.bf16.msra.mxu0 %v12493_v0  ;;  %3853 = vmatpush1.bf16.msra.mxu1 %v12495_v1  ;;  %v12749_v0 = vcombine.low %v667_v50, %v683_v51  ;;  %v12751_v1 = vcombine.low %v668_v52, %v684_v54  ;;  %v413_v52 = vld [vmem:[#allocation2 + $0x130] sm:$0xff]  ;;  %v414_v54 = vld [vmem:[#allocation2 + $0x138] sm:$0xff] }
 0x12a   : > { %3811 = vmatprep.subr.bf16.mxu0 %v12462_v2  ;;  %3854 = vmatprep.subr.bf16.mxu1 %v12464_v6  ;;  %v12718_v2 = vcombine.high %v635_v59, %v651_v60  ;;  %v12720_v6 = vcombine.high %v636_v61, %v652_v63 }
 0x12d   : > { %3812 = vmatpush1.bf16.msra.mxu0 %v12461_v8  ;;  %3855 = vmatpush1.bf16.msra.mxu1 %v12463_v9  ;;  %v12717_v8 = vcombine.low %v635_v59, %v651_v60  ;;  %v12719_v9 = vcombine.low %v636_v61, %v652_v63  ;;  %v381_v61 = vld [vmem:[#allocation2 + $0x30] sm:$0xff]  ;;  %v382_v63 = vld [vmem:[#allocation2 + $0x38] sm:$0xff] }
 0x12e   : > { %3813 = vmatprep.subr.bf16.mxu0 %v12942_v11  ;;  %3856 = vmatprep.subr.bf16.mxu1 %v12944_v15  ;;  %v12690_v11 = vcombine.high %v605_v3, %v621_v4  ;;  %v12692_v15 = vcombine.high %v606_v5, %v622_v7 }
 0x131   : > { %3814 = vmatpush2.bf16.msra.mxu0 %v12941_v17  ;;  %3857 = vmatpush2.bf16.msra.mxu1 %v12943_v18  ;;  %v12689_v17 = vcombine.low %v605_v3, %v621_v4  ;;  %v12691_v18 = vcombine.low %v606_v5, %v622_v7  ;;  %v861_v5 = vld [vmem:[#allocation2 + $0xf30] sm:$0xff]  ;;  %v862_v7 = vld [vmem:[#allocation2 + $0xf38] sm:$0xff] }
 0x132   : > { %3815 = vmatprep.subr.bf16.mxu0 %v12910_v19  ;;  %3858 = vmatprep.subr.bf16.mxu1 %v12912_v23  ;;  %v12658_v19 = vcombine.high %v573_v12, %v589_v13  ;;  %v12660_v23 = vcombine.high %v574_v14, %v590_v16 }
 0x135   : > { %3816 = vmatpush2.bf16.msra.mxu0 %v12909_v25  ;;  %3859 = vmatpush2.bf16.msra.mxu1 %v12911_v26  ;;  %v16182_v25 = vld [vmem:[%s17820_s0] ss:$8 sps:$4 sm:$0xff]   ;;  %v12657_v26 = vcombine.low %v573_v12, %v589_v13 }
 0x136   : > { %3817 = vmatprep.subr.bf16.mxu0 %v12878_v27  ;;  %3860 = vmatprep.subr.bf16.mxu1 %v12880_v31  ;;  %v12659_v27 = vcombine.low %v574_v14, %v590_v16  ;;  %v510_v31 = vld [vmem:[#allocation2 + $0x438] sm:$0xff]  ;;  %v829_v14 = vld [vmem:[#allocation2 + $0xe30] sm:$0xff] }
 0x137   : > { %v830_v16 = vld [vmem:[#allocation2 + $0xe38] sm:$0xff] }
 0x139   : > { %3818 = vmatpush2.bf16.msra.mxu0 %v12877_v33  ;;  %3861 = vmatpush2.bf16.msra.mxu1 %v12879_v10  ;;  %v526_v33 = vld [vmem:[#allocation2 + $0x4b8] sm:$0xff]  ;;  %v16189_v10 = vld [vmem:[%s17820_s0 + $0x4] ss:$8 sps:$4 sm:$0xff]  }
 0x13a   : > { %3819 = vmatprep.subr.bf16.mxu0 %v12846_v34  ;;  %3862 = vmatprep.subr.bf16.mxu1 %v12848_v38  ;;  %v12625_v34 = vcombine.low %v541_v20, %v557_v21  ;;  %v493_v38 = vld [vmem:[#allocation2 + $0x3b0] sm:$0xff]  ;;  %v12595_v43 = vcombine.low %v510_v31, %v526_v33 }
 0x13b   : > { %v12562_v56 = vcombine.high %v477_v37, %v493_v38 }
 0x13d   : > { %3820 = vmatpush2.bf16.msra.mxu0 %v12845_v40  ;;  %3863 = vmatpush2.bf16.msra.mxu1 %v12847_v41  ;;  %v12596_v40 = vcombine.high %v510_v31, %v526_v33  ;;  %v494_v41 = vld [vmem:[#allocation2 + $0x3b8] sm:$0xff]  ;;  %v765_v31 = vld [vmem:[#allocation2 + $0xc30] sm:$0xff] }
 0x13e   : > { %3821 = vmatprep.subr.bf16.mxu0 %v12814_v42  ;;  %3864 = vmatprep.subr.bf16.mxu1 %v12816_v45  ;;  %v12593_v42 = vcombine.low %v509_v29, %v525_v30  ;;  %v461_v45 = vld [vmem:[#allocation2 + $0x2b0] sm:$0xff]  ;;  %v12563_v50 = vcombine.low %v478_v39, %v494_v41  ;;  %v766_v33 = vld [vmem:[#allocation2 + $0xc38] sm:$0xff] }
 0x13f   : > { %v12530_v51 = vcombine.high %v445_v44, %v461_v45 }
 0x141   : > { %3822 = vmatpush2.bf16.msra.mxu0 %v12813_v47  ;;  %3865 = vmatpush2.bf16.msra.mxu1 %v12815_v48  ;;  %v12564_v47 = vcombine.high %v478_v39, %v494_v41  ;;  %v462_v48 = vld [vmem:[#allocation2 + $0x2b8] sm:$0xff]  ;;  %v733_v39 = vld [vmem:[#allocation2 + $0xb30] sm:$0xff] }
 0x142   : > { %3823 = vmatprep.subr.bf16.mxu0 %v12782_v49  ;;  %3866 = vmatprep.subr.bf16.mxu1 %v12784_v53  ;;  %v12561_v49 = vcombine.low %v477_v37, %v493_v38  ;;  %v429_v53 = vld [vmem:[#allocation2 + $0x1b0] sm:$0xff]  ;;  %v12531_v59 = vcombine.low %v446_v46, %v462_v48  ;;  %v734_v41 = vld [vmem:[#allocation2 + $0xb38] sm:$0xff] }
 0x143   : > { %v12498_v60 = vcombine.high %v413_v52, %v429_v53 }
 0x145   : > { %3824 = vmatpush2.bf16.msra.mxu0 %v12781_v55  ;;  %3867 = vmatpush2.bf16.msra.mxu1 %v12783_v57  ;;  %v12532_v55 = vcombine.high %v446_v46, %v462_v48  ;;  %v430_v57 = vld [vmem:[#allocation2 + $0x1b8] sm:$0xff]  ;;  %v701_v46 = vld [vmem:[#allocation2 + $0xa30] sm:$0xff] }
 0x146   : > { %3825 = vmatprep.subr.bf16.mxu0 %v12750_v58  ;;  %3868 = vmatprep.subr.bf16.mxu1 %v12752_v62  ;;  %v12529_v58 = vcombine.low %v445_v44, %v461_v45  ;;  %v397_v62 = vld [vmem:[#allocation2 + $0xb0] sm:$0xff]  ;;  %v12499_v3 = vcombine.low %v414_v54, %v430_v57  ;;  %v702_v48 = vld [vmem:[#allocation2 + $0xa38] sm:$0xff] }
 0x147   : > { %v12466_v4 = vcombine.high %v381_v61, %v397_v62 }
 0x149   : > { %3826 = vmatpush2.bf16.msra.mxu0 %v12749_v0  ;;  %3869 = vmatpush2.bf16.msra.mxu1 %v12751_v1  ;;  %v12500_v0 = vcombine.high %v414_v54, %v430_v57  ;;  %v398_v1 = vld [vmem:[#allocation2 + $0xb8] sm:$0xff]  ;;  %v669_v54 = vld [vmem:[#allocation2 + $0x930] sm:$0xff] }
 0x14a   : > { %3827 = vmatprep.subr.bf16.mxu0 %v12718_v2  ;;  %3870 = vmatprep.subr.bf16.mxu1 %v12720_v6  ;;  %v12497_v2 = vcombine.low %v413_v52, %v429_v53  ;;  %v877_v6 = vld [vmem:[#allocation2 + $0xfb0] sm:$0xff]  ;;  %v12467_v12 = vcombine.low %v382_v63, %v398_v1  ;;  %v670_v57 = vld [vmem:[#allocation2 + $0x938] sm:$0xff] }
 0x14b   : > { %v12946_v13 = vcombine.high %v861_v5, %v877_v6 }
 0x14d   : > { %3828 = vmatpush2.bf16.msra.mxu0 %v12717_v8  ;;  %3871 = vmatpush2.bf16.msra.mxu1 %v12719_v9  ;;  %v12468_v8 = vcombine.high %v382_v63, %v398_v1  ;;  %v878_v9 = vld [vmem:[#allocation2 + $0xfb8] sm:$0xff]  ;;  %v637_v63 = vld [vmem:[#allocation2 + $0x830] sm:$0xff] }
 0x14e   : > { %3883 = vmatprep.subr.bf16.mxu0 %v12690_v11  ;;  %3926 = vmatprep.subr.bf16.mxu1 %v12692_v15  ;;  %v12465_v11 = vcombine.low %v381_v61, %v397_v62  ;;  %v845_v15 = vld [vmem:[#allocation2 + $0xeb0] sm:$0xff]  ;;  %v12947_v20 = vcombine.low %v862_v7, %v878_v9  ;;  %v638_v1 = vld [vmem:[#allocation2 + $0x838] sm:$0xff] }
 0x14f   : > { %v12914_v21 = vcombine.high %v829_v14, %v845_v15 }
 0x150   : > { %3830 = vmatmul.mubr.bf16.vlgmr.msra.gmra.mxu0 %v16182_v25  ;;  %3873 = vmatmul.mubr.bf16.vlgmr.msra.gmra.mxu1 %v16182_v25 }
 0x151   : > { %3884 = vmatpush1.bf16.msra.mxu0 %v12689_v17  ;;  %3927 = vmatpush1.bf16.msra.mxu1 %v12691_v18  ;;  %v12948_v17 = vcombine.high %v862_v7, %v878_v9  ;;  %v846_v18 = vld [vmem:[#allocation2 + $0xeb8] sm:$0xff]  ;;  %v623_v9 = vld [vmem:[#allocation2 + $0x7c0] sm:$0xff] }
 0x152   : > { %3885 = vmatprep.subr.bf16.mxu0 %v12658_v19  ;;  %3928 = vmatprep.subr.bf16.mxu1 %v12660_v23  ;;  %v12945_v19 = vcombine.low %v861_v5, %v877_v6  ;;  %v813_v23 = vld [vmem:[#allocation2 + $0xdb0] sm:$0xff]  ;;  %v12915_v29 = vcombine.low %v830_v16, %v846_v18 }
 0x153   : > { %3915 = vmatprep.mubr.bf16.mxu0 %v16189_v10  ;;  %3958 = vmatprep.mubr.bf16.mxu1 %v16189_v10  ;;  %v12882_v30 = vcombine.high %v797_v22, %v813_v23 }
 0x155   : > { %3886 = vmatpush1.bf16.msra.mxu0 %v12657_v26  ;;  %3929 = vmatpush1.bf16.msra.mxu1 %v12659_v27  ;;  %v12916_v26 = vcombine.high %v830_v16, %v846_v18  ;;  %v814_v27 = vld [vmem:[#allocation2 + $0xdb8] sm:$0xff] }
 0x156   : > { %3887 = vmatprep.subr.bf16.mxu0 %v12626_v28  ;;  %3930 = vmatprep.subr.bf16.mxu1 %v12628_v32  ;;  %v12913_v28 = vcombine.low %v829_v14, %v845_v15  ;;  %v781_v32 = vld [vmem:[#allocation2 + $0xcb0] sm:$0xff]  ;;  %v12883_v37 = vcombine.low %v798_v24, %v814_v27  ;;  %v624_v14 = vld [vmem:[#allocation2 + $0x7c8] sm:$0xff] }
 0x157   : > { %v12850_v38 = vcombine.high %v765_v31, %v781_v32 }
 0x159   : > { %3888 = vmatpush1.bf16.msra.mxu0 %v12625_v34  ;;  %3931 = vmatpush1.bf16.msra.mxu1 %v12627_v35  ;;  %v12884_v34 = vcombine.high %v798_v24, %v814_v27  ;;  %v782_v35 = vld [vmem:[#allocation2 + $0xcb8] sm:$0xff] }
 0x15a   : > { %3889 = vmatprep.subr.bf16.mxu0 %v12594_v36  ;;  %3932 = vmatprep.subr.bf16.mxu1 %v12596_v40  ;;  %v12881_v36 = vcombine.low %v797_v22, %v813_v23  ;;  %v749_v40 = vld [vmem:[#allocation2 + $0xbb0] sm:$0xff]  ;;  %v12851_v44 = vcombine.low %v766_v33, %v782_v35  ;;  %v576_v22 = vld [vmem:[#allocation2 + $0x648] sm:$0xff] }
 0x15b   : > { %v12818_v45 = vcombine.high %v733_v39, %v749_v40 }
 0x15d   : > { %3890 = vmatpush1.bf16.msra.mxu0 %v12593_v42  ;;  %3933 = vmatpush1.bf16.msra.mxu1 %v12595_v43  ;;  %v12852_v42 = vcombine.high %v766_v33, %v782_v35  ;;  %v750_v43 = vld [vmem:[#allocation2 + $0xbb8] sm:$0xff]  ;;  %v544_v35 = vld [vmem:[#allocation2 + $0x548] sm:$0xff] }
 0x15e   : > { %3891 = vmatprep.subr.bf16.mxu0 %v12562_v56  ;;  %3934 = vmatprep.subr.bf16.mxu1 %v12564_v47  ;;  %v12849_v56 = vcombine.low %v765_v31, %v781_v32  ;;  %v717_v47 = vld [vmem:[#allocation2 + $0xab0] sm:$0xff]  ;;  %v12819_v52 = vcombine.low %v734_v41, %v750_v43  ;;  %v543_v31 = vld [vmem:[#allocation2 + $0x540] sm:$0xff] }
 0x15f   : > { %v12786_v53 = vcombine.high %v701_v46, %v717_v47  ;;  %v559_v32 = vld [vmem:[#allocation2 + $0x5c0] sm:$0xff] }
 0x161   : > { %3892 = vmatpush1.bf16.msra.mxu0 %v12561_v49  ;;  %3935 = vmatpush1.bf16.msra.mxu1 %v12563_v50  ;;  %v12820_v49 = vcombine.high %v734_v41, %v750_v43  ;;  %v718_v50 = vld [vmem:[#allocation2 + $0xab8] sm:$0xff]  ;;  %v12630_v43 = vcombine.high %v543_v31, %v559_v32 }
 0x162   : > { %3893 = vmatprep.subr.bf16.mxu0 %v12530_v51  ;;  %3936 = vmatprep.subr.bf16.mxu1 %v12532_v55  ;;  %v12817_v51 = vcombine.low %v733_v39, %v749_v40  ;;  %v685_v55 = vld [vmem:[#allocation2 + $0x9b0] sm:$0xff]  ;;  %v12787_v61 = vcombine.low %v702_v48, %v718_v50 }
 0x163   : > { %v12754_v62 = vcombine.high %v669_v54, %v685_v55  ;;  %v12753_v5 = vcombine.low %v669_v54, %v685_v55 }
 0x165   : > { %3894 = vmatpush1.bf16.msra.mxu0 %v12529_v58  ;;  %3937 = vmatpush1.bf16.msra.mxu1 %v12531_v59  ;;  %v12788_v58 = vcombine.high %v702_v48, %v718_v50  ;;  %v686_v59 = vld [vmem:[#allocation2 + $0x9b8] sm:$0xff] }
 0x166   : > { %3895 = vmatprep.subr.bf16.mxu0 %v12498_v60  ;;  %3938 = vmatprep.subr.bf16.mxu1 %v12500_v0  ;;  %v12785_v60 = vcombine.low %v701_v46, %v717_v47  ;;  %v653_v0 = vld [vmem:[#allocation2 + $0x8b0] sm:$0xff]  ;;  %v12755_v6 = vcombine.low %v670_v57, %v686_v59 }
 0x167   : > { %v12722_v7 = vcombine.high %v637_v63, %v653_v0  ;;  %v12721_v15 = vcombine.low %v637_v63, %v653_v0  ;;  %v496_v0 = vld [vmem:[#allocation2 + $0x3c8] sm:$0xff] }
 0x169   : > { %3896 = vmatpush1.bf16.msra.mxu0 %v12497_v2  ;;  %3939 = vmatpush1.bf16.msra.mxu1 %v12499_v3  ;;  %v12756_v2 = vcombine.high %v670_v57, %v686_v59  ;;  %v654_v3 = vld [vmem:[#allocation2 + $0x8b8] sm:$0xff]  ;;  %v495_v59 = vld [vmem:[#allocation2 + $0x3c0] sm:$0xff] }
 0x16a   : > { %3897 = vmatprep.subr.bf16.mxu0 %v12466_v4  ;;  %3940 = vmatprep.subr.bf16.mxu1 %v12468_v8  ;;  %v895_v4 = vlaneseq  ;;  %v607_v8 = vld [vmem:[#allocation2 + $0x740] sm:$0xff]  ;;  %v12723_v16 = vcombine.low %v638_v1, %v654_v3 }
 0x16b   : > { %v12693_v27 = vcombine.low %v607_v8, %v623_v9 }
 0x16d   : > { %3898 = vmatpush1.bf16.msra.mxu0 %v12465_v11  ;;  %3941 = vmatpush1.bf16.msra.mxu1 %v12467_v12  ;;  %v608_v11 = vld [vmem:[#allocation2 + $0x748] sm:$0xff]  ;;  %v12724_v12 = vcombine.high %v638_v1, %v654_v3 }
 0x16e   : > { %3899 = vmatprep.subr.bf16.mxu0 %v12946_v13  ;;  %3942 = vmatprep.subr.bf16.mxu1 %v12948_v17  ;;  %v16193_v13 = vshrl.u32 %v895_v4, 7  ;;  %v16195_v17 = vld [vmem:[#allocation4] sm:$0xff]  ;;  %v12696_v24 = vcombine.high %v608_v11, %v624_v14 }
 0x170   : > { %v16198_v18 = vsub.s32 2, %v16193_v13  ;;  %v16201_v23 = vsub.s32 0, %v16193_v13 }
 0x171   : > { %3900 = vmatpush2.bf16.msra.mxu0 %v12945_v19  ;;  %3943 = vmatpush2.bf16.msra.mxu1 %v12947_v20  ;;  %v12694_v19 = vcombine.high %v607_v8, %v623_v9  ;;  %v575_v20 = vld [vmem:[#allocation2 + $0x640] sm:$0xff]  ;;  %v448_v8 = vld [vmem:[#allocation2 + $0x248] sm:$0xff] }
 0x172   : > { %3901 = vmatprep.subr.bf16.mxu0 %v12914_v21  ;;  %3944 = vmatprep.subr.bf16.mxu1 %v12916_v26  ;;  %v591_v21 = vld [vmem:[#allocation2 + $0x6c0] sm:$0xff]  ;;  %v592_v26 = vld [vmem:[#allocation2 + $0x6c8] sm:$0xff]  ;;  %v898_v33 = vrot.slane %v16195_v17, %v16201_v23 }
 0x173   : > { %v12661_v39 = vcombine.low %v575_v20, %v591_v21 }
 0x175   : > { %3902 = vmatpush2.bf16.msra.mxu0 %v12913_v28  ;;  %3945 = vmatpush2.bf16.msra.mxu1 %v12915_v29  ;;  %v906_v28 = vrot.slane %v16195_v17, %v16198_v18  ;;  %v12695_v29 = vcombine.low %v608_v11, %v624_v14  ;;  %v464_v11 = vld [vmem:[#allocation2 + $0x2c8] sm:$0xff] }
 0x176   : > { %3903 = vmatprep.subr.bf16.mxu0 %v12882_v30  ;;  %3946 = vmatprep.subr.bf16.mxu1 %v12884_v34  ;;  %v12662_v30 = vcombine.high %v575_v20, %v591_v21  ;;  %v12664_v34 = vcombine.high %v576_v22, %v592_v26  ;;  %v416_v20 = vld [vmem:[#allocation2 + $0x148] sm:$0xff]  ;;  %v12536_v21 = vcombine.high %v448_v8, %v464_v11 }
 0x179   : > { %3904 = vmatpush2.bf16.msra.mxu0 %v12881_v36  ;;  %3947 = vmatpush2.bf16.msra.mxu1 %v12883_v37  ;;  %v560_v36 = vld [vmem:[#allocation2 + $0x5c8] sm:$0xff] }
 0x17a   : > { %3905 = vmatprep.subr.bf16.mxu0 %v12850_v38  ;;  %3948 = vmatprep.subr.bf16.mxu1 %v12852_v42  ;;  %v12663_v42 = vcombine.low %v576_v22, %v592_v26  ;;  %v12632_v48 = vcombine.high %v544_v35, %v560_v36  ;;  %v12631_v55 = vcombine.low %v544_v35, %v560_v36  ;;  %v432_v22 = vld [vmem:[#allocation2 + $0x1c8] sm:$0xff]  ;;  %v863_v36 = vld [vmem:[#allocation2 + $0xf40] sm:$0xff] }
 0x17b   : > { %v12535_v26 = vcombine.low %v448_v8, %v464_v11  ;;  %v736_v8 = vld [vmem:[#allocation2 + $0xb48] sm:$0xff] }
 0x17c   : > { %v752_v11 = vld [vmem:[#allocation2 + $0xbc8] sm:$0xff] }
 0x17d   : > { %3906 = vmatpush2.bf16.msra.mxu0 %v12849_v56  ;;  %3949 = vmatpush2.bf16.msra.mxu1 %v12851_v44  ;;  %v511_v56 = vld [vmem:[#allocation2 + $0x440] sm:$0xff] }
 0x17e   : > { %3907 = vmatprep.subr.bf16.mxu0 %v12818_v45  ;;  %3950 = vmatprep.subr.bf16.mxu1 %v12820_v49  ;;  %v527_v44 = vld [vmem:[#allocation2 + $0x4c0] sm:$0xff]  ;;  %v512_v45 = vld [vmem:[#allocation2 + $0x448] sm:$0xff] }
 0x17f   : > { %v528_v49 = vld [vmem:[#allocation2 + $0x4c8] sm:$0xff]  ;;  %v12598_v57 = vcombine.high %v511_v56, %v527_v44 }
 0x180   : > { %v12600_v63 = vcombine.high %v512_v45, %v528_v49  ;;  %v12599_v4 = vcombine.low %v512_v45, %v528_v49  ;;  %v847_v45 = vld [vmem:[#allocation2 + $0xec0] sm:$0xff]  ;;  %v848_v49 = vld [vmem:[#allocation2 + $0xec8] sm:$0xff] }
 0x181   : > { %3908 = vmatpush2.bf16.msra.mxu0 %v12817_v51  ;;  %3951 = vmatpush2.bf16.msra.mxu1 %v12819_v52  ;;  %v12629_v52 = vcombine.low %v543_v31, %v559_v32  ;;  %v12504_v31 = vcombine.high %v416_v20, %v432_v22  ;;  %v400_v32 = vld [vmem:[#allocation2 + $0xc8] sm:$0xff] }
 0x182   : > { %3909 = vmatprep.subr.bf16.mxu0 %v12786_v53  ;;  %3952 = vmatprep.subr.bf16.mxu1 %v12788_v58  ;;  %v479_v58 = vld [vmem:[#allocation2 + $0x340] sm:$0xff] }
 0x185   : > { %3910 = vmatpush2.bf16.msra.mxu0 %v12785_v60  ;;  %3953 = vmatpush2.bf16.msra.mxu1 %v12787_v61  ;;  %v480_v60 = vld [vmem:[#allocation2 + $0x348] sm:$0xff] }
 0x186   : > { %3911 = vmatprep.subr.bf16.mxu0 %v12754_v62  ;;  %3954 = vmatprep.subr.bf16.mxu1 %v12756_v2  ;;  %v12597_v2 = vcombine.low %v511_v56, %v527_v44  ;;  %v12568_v9 = vcombine.high %v480_v60, %v496_v0  ;;  %v12567_v14 = vcombine.low %v480_v60, %v496_v0  ;;  %v831_v44 = vld [vmem:[#allocation2 + $0xe40] sm:$0xff] }
 0x189   : > { %3912 = vmatpush2.bf16.msra.mxu0 %v12753_v5  ;;  %3955 = vmatpush2.bf16.msra.mxu1 %v12755_v6  ;;  %v12566_v5 = vcombine.high %v479_v58, %v495_v59  ;;  %v447_v6 = vld [vmem:[#allocation2 + $0x240] sm:$0xff] }
 0x18a   : > { %3913 = vmatprep.subr.bf16.mxu0 %v12722_v7  ;;  %3956 = vmatprep.subr.bf16.mxu1 %v12724_v12  ;;  %v463_v7 = vld [vmem:[#allocation2 + $0x2c0] sm:$0xff]  ;;  %v12565_v12 = vcombine.low %v479_v58, %v495_v59  ;;  %v12917_v58 = vcombine.low %v831_v44, %v847_v45 }
 0x18d   : > { %3914 = vmatpush2.bf16.msra.mxu0 %v12721_v15  ;;  %3957 = vmatpush2.bf16.msra.mxu1 %v12723_v16  ;;  %v12534_v15 = vcombine.high %v447_v6, %v463_v7  ;;  %v415_v16 = vld [vmem:[#allocation2 + $0x140] sm:$0xff] }
 0x18e   : > { %3969 = vmatprep.subr.bf16.mxu0 %v12694_v19  ;;  %4012 = vmatprep.subr.bf16.mxu1 %v12696_v24  ;;  %v431_v19 = vld [vmem:[#allocation2 + $0x1c0] sm:$0xff]  ;;  %v12533_v24 = vcombine.low %v447_v6, %v463_v7 }
 0x18f   : > { %v735_v6 = vld [vmem:[#allocation2 + $0xb40] sm:$0xff] }
 0x190   : > { %v3659_v37 = vpop.f32.mrf.mxu0  ;;  %3916 = vmatmul.mubr.bf16.vlgmr.msra.gmra.mxu0 %v16182_v25  ;;  %v3702_v38 = vpop.f32.mrf.mxu1  ;;  %3959 = vmatmul.mubr.bf16.vlgmr.msra.gmra.mxu1 %v16182_v25  ;;  %v751_v7 = vld [vmem:[#allocation2 + $0xbc0] sm:$0xff] }
 0x191   : > { %3970 = vmatpush1.bf16.msra.mxu0 %v12693_v27  ;;  %v3703_v40 = vadd.f32 %v3702_v38, %v906_v28  ;;  %4013 = vmatpush1.bf16.msra.mxu1 %v12695_v29  ;;  %v3660_v46 = vadd.f32 %v3659_v37, %v898_v33  ;;  %v12502_v27 = vcombine.high %v415_v16, %v431_v19  ;;  %v399_v29 = vld [vmem:[#allocation2 + $0xc0] sm:$0xff]  ;;  %v864_v38 = vld [vmem:[#allocation2 + $0xf48] sm:$0xff] }
 0x192   : > { %v16209_v41 = vpop.f32.mrf.mxu0  ;;  %3971 = vmatprep.subr.bf16.mxu0 %v12662_v30  ;;  %v16211_v47 = vpop.f32.mrf.mxu1  ;;  %4014 = vmatprep.subr.bf16.mxu1 %v12664_v34  ;;  %v384_v30 = vld [vmem:[#allocation2 + $0x48] sm:$0xff]  ;;  %v12503_v34 = vcombine.low %v416_v20, %v432_v22  ;;  %v879_v37 = vld [vmem:[#allocation2 + $0xfc0] sm:$0xff] }
 0x193   : > { %4001 = vmatprep.mubr.bf16.mxu0 %v16189_v10  ;;  %4044 = vmatprep.mubr.bf16.mxu1 %v16189_v10  ;;  %v4315_v53 = vmax.f32 %v3703_v40, 0.0  ;;  %v4313_v61 = vmax.f32 %v3660_v46, 0.0  ;;  %v880_v40 = vld [vmem:[#allocation2 + $0xfc8] sm:$0xff]  ;;  %v12950_v56 = vcombine.high %v863_v36, %v879_v37 }
 0x194   : > { %v3663_v25 = vpop.f32.mrf.mxu0  ;;  %v3706_v51 = vpop.f32.mrf.mxu1  ;;  %v832_v46 = vld [vmem:[#allocation2 + $0xe48] sm:$0xff] }
 0x195   : > { %v3664_v50 = vadd.f32 %v3663_v25, %v898_v33  ;;  %3972 = vmatpush1.bf16.msra.mxu0 %v12661_v39  ;;  %v3707_v54 = vadd.f32 %v3706_v51, %v906_v28  ;;  %4015 = vmatpush1.bf16.msra.mxu1 %v12663_v42  ;;  %v383_v28 = vld [vmem:[#allocation2 + $0x40] sm:$0xff]  ;;  %v12501_v33 = vcombine.low %v415_v16, %v431_v19  ;;  %v704_v20 = vld [vmem:[#allocation2 + $0xa48] sm:$0xff] }
 0x196   : > { %3973 = vmatprep.subr.bf16.mxu0 %v12630_v43  ;;  %4016 = vmatprep.subr.bf16.mxu1 %v12632_v48  ;;  %v12470_v35 = vcombine.high %v383_v28, %v399_v29  ;;  %v12472_v39 = vcombine.high %v384_v30, %v400_v32  ;;  %v12469_v42 = vcombine.low %v383_v28, %v399_v29  ;;  %v703_v16 = vld [vmem:[#allocation2 + $0xa40] sm:$0xff]  ;;  %v720_v22 = vld [vmem:[#allocation2 + $0xac8] sm:$0xff] }
 0x197   : > { %v4345_v62 = vmax.f32 %v3664_v50, 0.0  ;;  %v4347_v1 = vmax.f32 %v3707_v54, 0.0  ;;  %v12471_v43 = vcombine.low %v384_v30, %v400_v32  ;;  %v12952_v48 = vcombine.high %v864_v38, %v880_v40  ;;  %v800_v54 = vld [vmem:[#allocation2 + $0xd48] sm:$0xff]  ;;  %v719_v19 = vld [vmem:[#allocation2 + $0xac0] sm:$0xff] }
 0x198   : > { %v12949_v25 = vcombine.low %v863_v36, %v879_v37  ;;  %v12951_v50 = vcombine.low %v864_v38, %v880_v40  ;;  %v12918_v51 = vcombine.high %v831_v44, %v847_v45  ;;  %v12919_v59 = vcombine.low %v832_v46, %v848_v49  ;;  %v671_v28 = vld [vmem:[#allocation2 + $0x940] sm:$0xff]  ;;  %v672_v30 = vld [vmem:[#allocation2 + $0x948] sm:$0xff]  ;;  %v609_v44 = vld [vmem:[#allocation2 + $0x750] sm:$0xff] }
 0x199   : > { %v16215_v10 = vpack.c.bf16 %v4345_v62, %v4313_v61  ;;  %3974 = vmatpush1.bf16.msra.mxu0 %v12629_v52  ;;  %v16217_v3 = vpack.c.bf16 %v4347_v1, %v4315_v53  ;;  %4017 = vmatpush1.bf16.msra.mxu1 %v12631_v55  ;;  %v799_v52 = vld [vmem:[#allocation2 + $0xd40] sm:$0xff]  ;;  %v12920_v55 = vcombine.high %v832_v46, %v848_v49  ;;  %v784_v1 = vld [vmem:[#allocation2 + $0xcc8] sm:$0xff]  ;;  %v625_v45 = vld [vmem:[#allocation2 + $0x7d0] sm:$0xff] }
 0x19a   : > { %3975 = vmatprep.subr.bf16.mxu0 %v12598_v57  ;;  %4018 = vmatprep.subr.bf16.mxu1 %v12600_v63  ;;  %v815_v53 = vld [vmem:[#allocation2 + $0xdc0] sm:$0xff]  ;;  %v816_v57 = vld [vmem:[#allocation2 + $0xdc8] sm:$0xff]  ;;  %v610_v46 = vld [vmem:[#allocation2 + $0x758] sm:$0xff] }
 0x19b   : > { %v12886_v60 = vcombine.high %v799_v52, %v815_v53  ;;  %v767_v61 = vld [vmem:[#allocation2 + $0xc40] sm:$0xff]  ;;  %v768_v63 = vld [vmem:[#allocation2 + $0xc48] sm:$0xff]  ;;  %v12888_v0 = vcombine.high %v800_v54, %v816_v57  ;;  %v626_v49 = vld [vmem:[#allocation2 + $0x7d8] sm:$0xff] }
 0x19c   : > { %v783_v62 = vld [vmem:[#allocation2 + $0xcc0] sm:$0xff]  ;;  %v688_v32 = vld [vmem:[#allocation2 + $0x9c8] sm:$0xff] }
 0x19d   : > { %3976 = vmatpush1.bf16.msra.mxu0 %v12597_v2  ;;  %4019 = vmatpush1.bf16.msra.mxu1 %v12599_v4  ;;  %v12885_v2 = vcombine.low %v799_v52, %v815_v53  ;;  %v12887_v4 = vcombine.low %v800_v54, %v816_v57  ;;  %v687_v29 = vld [vmem:[#allocation2 + $0x9c0] sm:$0xff]  ;;  %v640_v38 = vld [vmem:[#allocation2 + $0x848] sm:$0xff]  ;;  %v12698_v52 = vcombine.high %v609_v44, %v625_v45  ;;  %v577_v53 = vld [vmem:[#allocation2 + $0x650] sm:$0xff]  ;;  %v16223_v57 = vsub.s32 4, %v16193_v13 }
 0x19e   : > { %3977 = vmatprep.subr.bf16.mxu0 %v12566_v5  ;;  %4020 = vmatprep.subr.bf16.mxu1 %v12568_v9  ;;  %v12854_v5 = vcombine.high %v767_v61, %v783_v62  ;;  %v12856_v9 = vcombine.high %v768_v63, %v784_v1  ;;  %v639_v36 = vld [vmem:[#allocation2 + $0x840] sm:$0xff]  ;;  %v656_v40 = vld [vmem:[#allocation2 + $0x8c8] sm:$0xff]  ;;  %v593_v54 = vld [vmem:[#allocation2 + $0x6d0] sm:$0xff] }
 0x19f   : > { %v655_v37 = vld [vmem:[#allocation2 + $0x8c0] sm:$0xff] }
 0x1a1   : > { %3978 = vmatpush1.bf16.msra.mxu0 %v12565_v12  ;;  %4021 = vmatpush1.bf16.msra.mxu1 %v12567_v14  ;;  %v12853_v12 = vcombine.low %v767_v61, %v783_v62  ;;  %v12855_v14 = vcombine.low %v768_v63, %v784_v1  ;;  %v16225_v61 = vpop.f32.mrf.mxu0  ;;  %v12699_v63 = vcombine.low %v610_v46, %v626_v49  ;;  %v545_v1 = vld [vmem:[#allocation2 + $0x550] sm:$0xff] }
 0x1a2   : > { %3979 = vmatprep.subr.bf16.mxu0 %v12534_v15  ;;  %4022 = vmatprep.subr.bf16.mxu1 %v12536_v21  ;;  %v12822_v15 = vcombine.high %v735_v6, %v751_v7  ;;  %v12824_v21 = vcombine.high %v736_v8, %v752_v11 }
 0x1a5   : > { %3980 = vmatpush1.bf16.msra.mxu0 %v12533_v24  ;;  %4023 = vmatpush1.bf16.msra.mxu1 %v12535_v26  ;;  %v12821_v24 = vcombine.low %v735_v6, %v751_v7  ;;  %v12823_v26 = vcombine.low %v736_v8, %v752_v11  ;;  %v914_v6 = vrot.slane %v16195_v17, %v16223_v57  ;;  %v562_v8 = vld [vmem:[#allocation2 + $0x5d8] sm:$0xff]  ;;  %v16236_v11 = vld [vmem:[%s17820_s0] ss:$8 sps:$4 sm:$0xff]  }
 0x1a6   : > { %3981 = vmatprep.subr.bf16.mxu0 %v12502_v27  ;;  %4024 = vmatprep.subr.bf16.mxu1 %v12504_v31  ;;  %v12790_v27 = vcombine.high %v703_v16, %v719_v19  ;;  %v12792_v31 = vcombine.high %v704_v20, %v720_v22 }
 0x1a9   : > { %3982 = vmatpush1.bf16.msra.mxu0 %v12501_v33  ;;  %4025 = vmatpush1.bf16.msra.mxu1 %v12503_v34  ;;  %v12789_v33 = vcombine.low %v703_v16, %v719_v19  ;;  %v12791_v34 = vcombine.low %v704_v20, %v720_v22  ;;  %v513_v20 = vld [vmem:[#allocation2 + $0x450] sm:$0xff]  ;;  %v514_v22 = vld [vmem:[#allocation2 + $0x458] sm:$0xff] }
 0x1aa   : > { %3983 = vmatprep.subr.bf16.mxu0 %v12470_v35  ;;  %4026 = vmatprep.subr.bf16.mxu1 %v12472_v39  ;;  %v12758_v35 = vcombine.high %v671_v28, %v687_v29  ;;  %v12760_v39 = vcombine.high %v672_v30, %v688_v32 }
 0x1ad   : > { %3984 = vmatpush1.bf16.msra.mxu0 %v12469_v42  ;;  %4027 = vmatpush1.bf16.msra.mxu1 %v12471_v43  ;;  %v12757_v42 = vcombine.low %v671_v28, %v687_v29  ;;  %v12759_v43 = vcombine.low %v672_v30, %v688_v32  ;;  %v530_v28 = vld [vmem:[#allocation2 + $0x4d8] sm:$0xff]  ;;  %v16247_v29 = vld [vmem:[%s17820_s0 + $0x4] ss:$8 sps:$4 sm:$0xff]  }
 0x1ae   : > { %3985 = vmatprep.subr.bf16.mxu0 %v12950_v56  ;;  %4028 = vmatprep.subr.bf16.mxu1 %v12952_v48  ;;  %v12726_v56 = vcombine.high %v639_v36, %v655_v37  ;;  %v12728_v48 = vcombine.high %v640_v38, %v656_v40 }
 0x1b1   : > { %3986 = vmatpush2.bf16.msra.mxu0 %v12949_v25  ;;  %4029 = vmatpush2.bf16.msra.mxu1 %v12951_v50  ;;  %v12725_v25 = vcombine.low %v639_v36, %v655_v37  ;;  %v12727_v50 = vcombine.low %v640_v38, %v656_v40  ;;  %v481_v38 = vld [vmem:[#allocation2 + $0x350] sm:$0xff]  ;;  %v482_v40 = vld [vmem:[#allocation2 + $0x358] sm:$0xff] }
 0x1b2   : > { %3987 = vmatprep.subr.bf16.mxu0 %v12918_v51  ;;  %4030 = vmatprep.subr.bf16.mxu1 %v12920_v55  ;;  %v16220_v51 = vsub.s32 6, %v16193_v13  ;;  %v578_v55 = vld [vmem:[#allocation2 + $0x658] sm:$0xff] }
 0x1b4   : > { %v922_v62 = vrot.slane %v16195_v17, %v16220_v51 }
 0x1b5   : > { %3988 = vmatpush2.bf16.msra.mxu0 %v12917_v58  ;;  %4031 = vmatpush2.bf16.msra.mxu1 %v12919_v59  ;;  %v12700_v58 = vcombine.high %v610_v46, %v626_v49  ;;  %v594_v59 = vld [vmem:[#allocation2 + $0x6d8] sm:$0xff] }
 0x1b6   : > { %3989 = vmatprep.subr.bf16.mxu0 %v12886_v60  ;;  %4032 = vmatprep.subr.bf16.mxu1 %v12888_v0  ;;  %v12697_v60 = vcombine.low %v609_v44, %v625_v45  ;;  %v12666_v0 = vcombine.high %v577_v53, %v593_v54  ;;  %v12668_v7 = vcombine.high %v578_v55, %v594_v59  ;;  %v498_v44 = vld [vmem:[#allocation2 + $0x3d8] sm:$0xff] }
 0x1b7   : > { %v12667_v17 = vcombine.low %v578_v55, %v594_v59  ;;  %v12572_v55 = vcombine.high %v482_v40, %v498_v44 }
 0x1b9   : > { %3990 = vmatpush2.bf16.msra.mxu0 %v12885_v2  ;;  %4033 = vmatpush2.bf16.msra.mxu1 %v12887_v4  ;;  %v561_v2 = vld [vmem:[#allocation2 + $0x5d0] sm:$0xff]  ;;  %v546_v4 = vld [vmem:[#allocation2 + $0x558] sm:$0xff] }
 0x1ba   : > { %3991 = vmatprep.subr.bf16.mxu0 %v12854_v5  ;;  %4034 = vmatprep.subr.bf16.mxu1 %v12856_v9  ;;  %v16229_v5 = vpop.f32.mrf.mxu1  ;;  %v12634_v19 = vcombine.high %v545_v1, %v561_v2  ;;  %v12635_v36 = vcombine.low %v546_v4, %v562_v8 }
 0x1bd   : > { %3992 = vmatpush2.bf16.msra.mxu0 %v12853_v12  ;;  %4035 = vmatpush2.bf16.msra.mxu1 %v12855_v14  ;;  %v12665_v14 = vcombine.low %v577_v53, %v593_v54  ;;  %v465_v53 = vld [vmem:[#allocation2 + $0x2d0] sm:$0xff]  ;;  %v450_v54 = vld [vmem:[#allocation2 + $0x258] sm:$0xff] }
 0x1be   : > { %3993 = vmatprep.subr.bf16.mxu0 %v12822_v15  ;;  %4036 = vmatprep.subr.bf16.mxu1 %v12824_v21  ;;  %v529_v21 = vld [vmem:[#allocation2 + $0x4d0] sm:$0xff] }
 0x1bf   : > { %v12602_v37 = vcombine.high %v513_v20, %v529_v21 }
 0x1c1   : > { %3994 = vmatpush2.bf16.msra.mxu0 %v12821_v24  ;;  %4037 = vmatpush2.bf16.msra.mxu1 %v12823_v26 }
 0x1c2   : > { %3995 = vmatprep.subr.bf16.mxu0 %v12790_v27  ;;  %4038 = vmatprep.subr.bf16.mxu1 %v12792_v31  ;;  %v12636_v27 = vcombine.high %v546_v4, %v562_v8  ;;  %v434_v4 = vld [vmem:[#allocation2 + $0x1d8] sm:$0xff] }
 0x1c5   : > { %3996 = vmatpush2.bf16.msra.mxu0 %v12789_v33  ;;  %4039 = vmatpush2.bf16.msra.mxu1 %v12791_v34  ;;  %v12633_v33 = vcombine.low %v545_v1, %v561_v2  ;;  %v418_v1 = vld [vmem:[#allocation2 + $0x158] sm:$0xff] }
 0x1c6   : > { %3997 = vmatprep.subr.bf16.mxu0 %v12758_v35  ;;  %4040 = vmatprep.subr.bf16.mxu1 %v12760_v39  ;;  %v497_v39 = vld [vmem:[#allocation2 + $0x3d0] sm:$0xff] }
 0x1c7   : > { %v12569_v59 = vcombine.low %v481_v38, %v497_v39 }
 0x1c9   : > { %3998 = vmatpush2.bf16.msra.mxu0 %v12757_v42  ;;  %4041 = vmatpush2.bf16.msra.mxu1 %v12759_v43 }
 0x1ca   : > { %3999 = vmatprep.subr.bf16.mxu0 %v12726_v56  ;;  %4042 = vmatprep.subr.bf16.mxu1 %v12728_v48  ;;  %v12604_v56 = vcombine.high %v514_v22, %v530_v28  ;;  %v12601_v48 = vcombine.low %v513_v20, %v529_v21  ;;  %v12507_v20 = vcombine.low %v418_v1, %v434_v4 }
 0x1cd   : > { %4000 = vmatpush2.bf16.msra.mxu0 %v12725_v25  ;;  %4043 = vmatpush2.bf16.msra.mxu1 %v12727_v50  ;;  %v12603_v25 = vcombine.low %v514_v22, %v530_v28  ;;  %v12570_v50 = vcombine.high %v481_v38, %v497_v39  ;;  %v865_v22 = vld [vmem:[#allocation2 + $0xf50] sm:$0xff]  ;;  %v850_v38 = vld [vmem:[#allocation2 + $0xed8] sm:$0xff] }
 0x1ce   : > { %4055 = vmatprep.subr.bf16.mxu0 %v12698_v52  ;;  %4098 = vmatprep.subr.bf16.mxu1 %v12700_v58  ;;  %v449_v52 = vld [vmem:[#allocation2 + $0x250] sm:$0xff]  ;;  %v466_v58 = vld [vmem:[#allocation2 + $0x2d8] sm:$0xff] }
 0x1cf   : > { %v12540_v2 = vcombine.high %v450_v54, %v466_v58 }
 0x1d0   : > { %v3745_v9 = vpop.f32.mrf.mxu0  ;;  %4002 = vmatmul.mubr.bf16.vlgmr.msra.gmra.mxu0 %v16236_v11  ;;  %v3788_v12 = vpop.f32.mrf.mxu1  ;;  %4045 = vmatmul.mubr.bf16.vlgmr.msra.gmra.mxu1 %v16236_v11 }
 0x1d1   : > { %4056 = vmatpush1.bf16.msra.mxu0 %v12697_v60  ;;  %v3789_v15 = vadd.f32 %v3788_v12, %v922_v62  ;;  %4099 = vmatpush1.bf16.msra.mxu1 %v12699_v63  ;;  %v3746_v24 = vadd.f32 %v3745_v9, %v914_v6  ;;  %v12571_v60 = vcombine.low %v482_v40, %v498_v44  ;;  %v417_v63 = vld [vmem:[#allocation2 + $0x150] sm:$0xff]  ;;  %v802_v44 = vld [vmem:[#allocation2 + $0xd58] sm:$0xff] }
 0x1d2   : > { %v16240_v16 = vpop.f32.mrf.mxu0  ;;  %4057 = vmatprep.subr.bf16.mxu0 %v12666_v0  ;;  %v16242_v26 = vpop.f32.mrf.mxu1  ;;  %4100 = vmatprep.subr.bf16.mxu1 %v12668_v7  ;;  %v433_v0 = vld [vmem:[#allocation2 + $0x1d0] sm:$0xff]  ;;  %v12539_v7 = vcombine.low %v450_v54, %v466_v58 }
 0x1d3   : > { %4087 = vmatprep.mubr.bf16.mxu0 %v16247_v29  ;;  %4130 = vmatprep.mubr.bf16.mxu1 %v16247_v29  ;;  %v4319_v34 = vmax.f32 %v3789_v15, 0.0  ;;  %v4317_v42 = vmax.f32 %v3746_v24, 0.0  ;;  %v12506_v8 = vcombine.high %v417_v63, %v433_v0  ;;  %v385_v9 = vld [vmem:[#allocation2 + $0x50] sm:$0xff]  ;;  %v12508_v15 = vcombine.high %v418_v1, %v434_v4 }
 0x1d4   : > { %v3749_v30 = vpop.f32.mrf.mxu0  ;;  %v3792_v32 = vpop.f32.mrf.mxu1  ;;  %v401_v12 = vld [vmem:[#allocation2 + $0xd0] sm:$0xff] }
 0x1d5   : > { %v3750_v31 = vadd.f32 %v3749_v30, %v914_v6  ;;  %4058 = vmatpush1.bf16.msra.mxu0 %v12665_v14  ;;  %v3793_v35 = vadd.f32 %v3792_v32, %v922_v62  ;;  %4101 = vmatpush1.bf16.msra.mxu1 %v12667_v17  ;;  %v12538_v62 = vcombine.high %v449_v52, %v465_v53  ;;  %v386_v14 = vld [vmem:[#allocation2 + $0x58] sm:$0xff]  ;;  %v881_v24 = vld [vmem:[#allocation2 + $0xfd0] sm:$0xff] }
 0x1d6   : > { %4059 = vmatprep.subr.bf16.mxu0 %v12634_v19  ;;  %4102 = vmatprep.subr.bf16.mxu1 %v12636_v27  ;;  %v12537_v6 = vcombine.low %v449_v52, %v465_v53  ;;  %v402_v17 = vld [vmem:[#allocation2 + $0xd8] sm:$0xff]  ;;  %v12505_v19 = vcombine.low %v417_v63, %v433_v0  ;;  %v12474_v21 = vcombine.high %v385_v9, %v401_v12  ;;  %v769_v53 = vld [vmem:[#allocation2 + $0xc50] sm:$0xff] }
 0x1d7   : > { %v4349_v43 = vmax.f32 %v3750_v31, 0.0  ;;  %v4351_v45 = vmax.f32 %v3793_v35, 0.0  ;;  %v866_v27 = vld [vmem:[#allocation2 + $0xf58] sm:$0xff]  ;;  %v12476_v28 = vcombine.high %v386_v14, %v402_v17  ;;  %v12473_v31 = vcombine.low %v385_v9, %v401_v12  ;;  %v849_v35 = vld [vmem:[#allocation2 + $0xed0] sm:$0xff] }
 0x1d8   : > { %v882_v30 = vld [vmem:[#allocation2 + $0xfd8] sm:$0xff]  ;;  %v12475_v32 = vcombine.low %v386_v14, %v402_v17  ;;  %v12953_v39 = vcombine.low %v865_v22, %v881_v24  ;;  %v785_v54 = vld [vmem:[#allocation2 + $0xcd0] sm:$0xff] }
 0x1d9   : > { %v16251_v46 = vpack.c.bf16 %v4349_v43, %v4317_v42  ;;  %4060 = vmatpush1.bf16.msra.mxu0 %v12633_v33  ;;  %v16253_v49 = vpack.c.bf16 %v4351_v45, %v4319_v34  ;;  %4103 = vmatpush1.bf16.msra.mxu1 %v12635_v36  ;;  %v12954_v33 = vcombine.high %v865_v22, %v881_v24  ;;  %v833_v34 = vld [vmem:[#allocation2 + $0xe50] sm:$0xff]  ;;  %v834_v36 = vld [vmem:[#allocation2 + $0xe58] sm:$0xff] }
 0x1da   : > { %4061 = vmatprep.subr.bf16.mxu0 %v12602_v37  ;;  %4104 = vmatprep.subr.bf16.mxu1 %v12604_v56  ;;  %v12956_v37 = vcombine.high %v866_v27, %v882_v30  ;;  %v12955_v40 = vcombine.low %v866_v27, %v882_v30  ;;  %v12922_v42 = vcombine.high %v833_v34, %v849_v35  ;;  %v801_v43 = vld [vmem:[#allocation2 + $0xd50] sm:$0xff] }
 0x1db   : > { %v817_v56 = vld [vmem:[#allocation2 + $0xdd0] sm:$0xff]  ;;  %v12924_v45 = vcombine.high %v834_v36, %v850_v38  ;;  %v12858_v63 = vcombine.high %v769_v53, %v785_v54 }
 0x1dc   : > { %v12890_v52 = vcombine.high %v801_v43, %v817_v56  ;;  %v737_v0 = vld [vmem:[#allocation2 + $0xb50] sm:$0xff] }
 0x1dd   : > { %4062 = vmatpush1.bf16.msra.mxu0 %v12601_v48  ;;  %4105 = vmatpush1.bf16.msra.mxu1 %v12603_v25  ;;  %v818_v48 = vld [vmem:[#allocation2 + $0xdd8] sm:$0xff]  ;;  %v12921_v25 = vcombine.low %v833_v34, %v849_v35  ;;  %v753_v1 = vld [vmem:[#allocation2 + $0xbd0] sm:$0xff] }
 0x1de   : > { %4063 = vmatprep.subr.bf16.mxu0 %v12570_v50  ;;  %4106 = vmatprep.subr.bf16.mxu1 %v12572_v55  ;;  %v12923_v50 = vcombine.low %v834_v36, %v850_v38  ;;  %v770_v55 = vld [vmem:[#allocation2 + $0xc58] sm:$0xff]  ;;  %v12892_v58 = vcombine.high %v802_v44, %v818_v48  ;;  %v12826_v9 = vcombine.high %v737_v0, %v753_v1  ;;  %v705_v12 = vld [vmem:[#allocation2 + $0xa50] sm:$0xff] }
 0x1df   : > { %v721_v14 = vld [vmem:[#allocation2 + $0xad0] sm:$0xff] }
 0x1e0   : > { %v12794_v22 = vcombine.high %v705_v12, %v721_v14  ;;  %v673_v24 = vld [vmem:[#allocation2 + $0x950] sm:$0xff] }
 0x1e1   : > { %4064 = vmatpush1.bf16.msra.mxu0 %v12569_v59  ;;  %4107 = vmatpush1.bf16.msra.mxu1 %v12571_v60  ;;  %v786_v59 = vld [vmem:[#allocation2 + $0xcd8] sm:$0xff]  ;;  %v12889_v60 = vcombine.low %v801_v43, %v817_v56  ;;  %v689_v27 = vld [vmem:[#allocation2 + $0x9d0] sm:$0xff]  ;;  %v611_v56 = vld [vmem:[#allocation2 + $0x760] sm:$0xff] }
 0x1e2   : > { %4065 = vmatprep.subr.bf16.mxu0 %v12538_v62  ;;  %4108 = vmatprep.subr.bf16.mxu1 %v12540_v2  ;;  %v12891_v62 = vcombine.low %v802_v44, %v818_v48  ;;  %v738_v2 = vld [vmem:[#allocation2 + $0xb58] sm:$0xff]  ;;  %v12860_v4 = vcombine.high %v770_v55, %v786_v59  ;;  %v12762_v34 = vcombine.high %v673_v24, %v689_v27  ;;  %v641_v35 = vld [vmem:[#allocation2 + $0x850] sm:$0xff]  ;;  %v627_v44 = vld [vmem:[#allocation2 + $0x7e0] sm:$0xff] }
 0x1e3   : > { %v657_v36 = vld [vmem:[#allocation2 + $0x8d0] sm:$0xff] }
 0x1e4   : > { %v12730_v43 = vcombine.high %v641_v35, %v657_v36 }
 0x1e5   : > { %4066 = vmatpush1.bf16.msra.mxu0 %v12537_v6  ;;  %4109 = vmatpush1.bf16.msra.mxu1 %v12539_v7  ;;  %v754_v6 = vld [vmem:[#allocation2 + $0xbd8] sm:$0xff]  ;;  %v12857_v7 = vcombine.low %v769_v53, %v785_v54  ;;  %v16255_v53 = vld [vmem:[#allocation4 + $0x8] sm:$0xff]  ;;  %v12702_v54 = vcombine.high %v611_v56, %v627_v44 }
 0x1e6   : > { %4067 = vmatprep.subr.bf16.mxu0 %v12506_v8  ;;  %4110 = vmatprep.subr.bf16.mxu1 %v12508_v15  ;;  %v12859_v8 = vcombine.low %v770_v55, %v786_v59  ;;  %v706_v15 = vld [vmem:[#allocation2 + $0xa58] sm:$0xff]  ;;  %v12828_v17 = vcombine.high %v738_v2, %v754_v6  ;;  %v579_v55 = vld [vmem:[#allocation2 + $0x660] sm:$0xff]  ;;  %v580_v59 = vld [vmem:[#allocation2 + $0x668] sm:$0xff] }
 0x1e9   : > { %4068 = vmatpush1.bf16.msra.mxu0 %v12505_v19  ;;  %4111 = vmatpush1.bf16.msra.mxu1 %v12507_v20  ;;  %v722_v19 = vld [vmem:[#allocation2 + $0xad8] sm:$0xff]  ;;  %v12825_v20 = vcombine.low %v737_v0, %v753_v1  ;;  %v16257_v0 = vpop.f32.mrf.mxu0  ;;  %v938_v1 = vrot.slane %v16255_v53, %v16198_v18 }
 0x1ea   : > { %4069 = vmatprep.subr.bf16.mxu0 %v12474_v21  ;;  %4112 = vmatprep.subr.bf16.mxu1 %v12476_v28  ;;  %v12827_v21 = vcombine.low %v738_v2, %v754_v6  ;;  %v674_v28 = vld [vmem:[#allocation2 + $0x958] sm:$0xff]  ;;  %v12796_v30 = vcombine.high %v706_v15, %v722_v19  ;;  %v16261_v6 = vpop.f32.mrf.mxu1 }
 0x1ed   : > { %4070 = vmatpush1.bf16.msra.mxu0 %v12473_v31  ;;  %4113 = vmatpush1.bf16.msra.mxu1 %v12475_v32  ;;  %v690_v31 = vld [vmem:[#allocation2 + $0x9d8] sm:$0xff]  ;;  %v12793_v32 = vcombine.low %v705_v12, %v721_v14  ;;  %v563_v12 = vld [vmem:[#allocation2 + $0x5e0] sm:$0xff] }
 0x1ee   : > { %4071 = vmatprep.subr.bf16.mxu0 %v12954_v33  ;;  %4114 = vmatprep.subr.bf16.mxu1 %v12956_v37  ;;  %v12795_v33 = vcombine.low %v706_v15, %v722_v19  ;;  %v642_v37 = vld [vmem:[#allocation2 + $0x858] sm:$0xff]  ;;  %v12764_v38 = vcombine.high %v674_v28, %v690_v31  ;;  %v548_v15 = vld [vmem:[#allocation2 + $0x568] sm:$0xff] }
 0x1f1   : > { %4072 = vmatpush2.bf16.msra.mxu0 %v12953_v39  ;;  %4115 = vmatpush2.bf16.msra.mxu1 %v12955_v40  ;;  %v658_v39 = vld [vmem:[#allocation2 + $0x8d8] sm:$0xff]  ;;  %v12761_v40 = vcombine.low %v673_v24, %v689_v27 }
 0x1f2   : > { %4073 = vmatprep.subr.bf16.mxu0 %v12922_v42  ;;  %4116 = vmatprep.subr.bf16.mxu1 %v12924_v45  ;;  %v12763_v42 = vcombine.low %v674_v28, %v690_v31  ;;  %v612_v45 = vld [vmem:[#allocation2 + $0x768] sm:$0xff]  ;;  %v12732_v48 = vcombine.high %v642_v37, %v658_v39 }
 0x1f5   : > { %4074 = vmatpush2.bf16.msra.mxu0 %v12921_v25  ;;  %4117 = vmatpush2.bf16.msra.mxu1 %v12923_v50  ;;  %v628_v25 = vld [vmem:[#allocation2 + $0x7e8] sm:$0xff]  ;;  %v12729_v50 = vcombine.low %v641_v35, %v657_v36 }
 0x1f6   : > { %4075 = vmatprep.subr.bf16.mxu0 %v12890_v52  ;;  %4118 = vmatprep.subr.bf16.mxu1 %v12892_v58  ;;  %v12731_v52 = vcombine.low %v642_v37, %v658_v39  ;;  %v595_v58 = vld [vmem:[#allocation2 + $0x6e0] sm:$0xff]  ;;  %v12703_v2 = vcombine.low %v612_v45, %v628_v25  ;;  %v532_v35 = vld [vmem:[#allocation2 + $0x4e8] sm:$0xff] }
 0x1f7   : > { %v483_v39 = vld [vmem:[#allocation2 + $0x360] sm:$0xff] }
 0x1f9   : > { %4076 = vmatpush2.bf16.msra.mxu0 %v12889_v60  ;;  %4119 = vmatpush2.bf16.msra.mxu1 %v12891_v62  ;;  %v12704_v60 = vcombine.high %v612_v45, %v628_v25  ;;  %v596_v62 = vld [vmem:[#allocation2 + $0x6e8] sm:$0xff] }
 0x1fa   : > { %4077 = vmatprep.subr.bf16.mxu0 %v12858_v63  ;;  %4120 = vmatprep.subr.bf16.mxu1 %v12860_v4  ;;  %v12701_v63 = vcombine.low %v611_v56, %v627_v44  ;;  %v12670_v4 = vcombine.high %v579_v55, %v595_v58  ;;  %v12671_v28 = vcombine.low %v580_v59, %v596_v62 }
 0x1fd   : > { %4078 = vmatpush2.bf16.msra.mxu0 %v12857_v7  ;;  %4121 = vmatpush2.bf16.msra.mxu1 %v12859_v8  ;;  %v930_v7 = vrot.slane %v16255_v53, %v16201_v23  ;;  %v12672_v8 = vcombine.high %v580_v59, %v596_v62  ;;  %v467_v59 = vld [vmem:[#allocation2 + $0x2e0] sm:$0xff] }
 0x1fe   : > { %4079 = vmatprep.subr.bf16.mxu0 %v12826_v9  ;;  %4122 = vmatprep.subr.bf16.mxu1 %v12828_v17  ;;  %v547_v9 = vld [vmem:[#allocation2 + $0x560] sm:$0xff]  ;;  %v564_v17 = vld [vmem:[#allocation2 + $0x5e8] sm:$0xff] }
 0x1ff   : > { %v12639_v56 = vcombine.low %v548_v15, %v564_v17 }
 0x201   : > { %4080 = vmatpush2.bf16.msra.mxu0 %v12825_v20  ;;  %4123 = vmatpush2.bf16.msra.mxu1 %v12827_v21  ;;  %v12669_v20 = vcombine.low %v579_v55, %v595_v58  ;;  %v515_v21 = vld [vmem:[#allocation2 + $0x460] sm:$0xff] }
 0x202   : > { %4081 = vmatprep.subr.bf16.mxu0 %v12794_v22  ;;  %4124 = vmatprep.subr.bf16.mxu1 %v12796_v30  ;;  %v531_v22 = vld [vmem:[#allocation2 + $0x4e0] sm:$0xff]  ;;  %v12638_v30 = vcombine.high %v547_v9, %v563_v12 }
 0x203   : > { %v12606_v44 = vcombine.high %v515_v21, %v531_v22  ;;  %v12605_v55 = vcombine.low %v515_v21, %v531_v22  ;;  %v451_v58 = vld [vmem:[#allocation2 + $0x260] sm:$0xff] }
 0x205   : > { %4082 = vmatpush2.bf16.msra.mxu0 %v12793_v32  ;;  %4125 = vmatpush2.bf16.msra.mxu1 %v12795_v33  ;;  %v12640_v33 = vcombine.high %v548_v15, %v564_v17  ;;  %v420_v15 = vld [vmem:[#allocation2 + $0x168] sm:$0xff] }
 0x206   : > { %4083 = vmatprep.subr.bf16.mxu0 %v12762_v34  ;;  %4126 = vmatprep.subr.bf16.mxu1 %v12764_v38  ;;  %v12637_v38 = vcombine.low %v547_v9, %v563_v12  ;;  %v12542_v9 = vcombine.high %v451_v58, %v467_v59  ;;  %v419_v12 = vld [vmem:[#allocation2 + $0x160] sm:$0xff] }
 0x209   : > { %4084 = vmatpush2.bf16.msra.mxu0 %v12761_v40  ;;  %4127 = vmatpush2.bf16.msra.mxu1 %v12763_v42  ;;  %v499_v40 = vld [vmem:[#allocation2 + $0x3e0] sm:$0xff] }
 0x20a   : > { %4085 = vmatprep.subr.bf16.mxu0 %v12730_v43  ;;  %4128 = vmatprep.subr.bf16.mxu1 %v12732_v48 }
 0x20d   : > { %4086 = vmatpush2.bf16.msra.mxu0 %v12729_v50  ;;  %4129 = vmatpush2.bf16.msra.mxu1 %v12731_v52  ;;  %v484_v52 = vld [vmem:[#allocation2 + $0x368] sm:$0xff] }
 0x20e   : > { %4141 = vmatprep.subr.bf16.mxu0 %v12702_v54  ;;  %4184 = vmatprep.subr.bf16.mxu1 %v12704_v60  ;;  %v500_v54 = vld [vmem:[#allocation2 + $0x3e8] sm:$0xff] }
 0x210   : > { %v3831_v14 = vpop.f32.mrf.mxu0  ;;  %4088 = vmatmul.mubr.bf16.vlgmr.msra.gmra.mxu0 %v16236_v11  ;;  %v3874_v19 = vpop.f32.mrf.mxu1  ;;  %4131 = vmatmul.mubr.bf16.vlgmr.msra.gmra.mxu1 %v16236_v11  ;;  %v516_v11 = vld [vmem:[#allocation2 + $0x468] sm:$0xff] }
 0x211   : > { %4142 = vmatpush1.bf16.msra.mxu0 %v12701_v63  ;;  %v3875_v24 = vadd.f32 %v3874_v19, %v938_v1  ;;  %4185 = vmatpush1.bf16.msra.mxu1 %v12703_v2  ;;  %v3832_v31 = vadd.f32 %v3831_v14, %v930_v7  ;;  %v12608_v25 = vcombine.high %v516_v11, %v532_v35  ;;  %v452_v2 = vld [vmem:[#allocation2 + $0x268] sm:$0xff]  ;;  %v435_v14 = vld [vmem:[#allocation2 + $0x1e0] sm:$0xff] }
 0x212   : > { %v16267_v27 = vpop.f32.mrf.mxu0  ;;  %4143 = vmatprep.subr.bf16.mxu0 %v12670_v4  ;;  %v16269_v32 = vpop.f32.mrf.mxu1  ;;  %4186 = vmatprep.subr.bf16.mxu1 %v12672_v8  ;;  %v12607_v62 = vcombine.low %v516_v11, %v532_v35  ;;  %v12574_v63 = vcombine.high %v483_v39, %v499_v40  ;;  %v468_v4 = vld [vmem:[#allocation2 + $0x2e8] sm:$0xff]  ;;  %v12575_v8 = vcombine.low %v484_v52, %v500_v54 }
 0x213   : > { %4173 = vmatprep.mubr.bf16.mxu0 %v16247_v29  ;;  %4216 = vmatprep.mubr.bf16.mxu1 %v16247_v29  ;;  %v4323_v42 = vmax.f32 %v3875_v24, 0.0  ;;  %v4321_v45 = vmax.f32 %v3832_v31, 0.0  ;;  %v12544_v17 = vcombine.high %v452_v2, %v468_v4  ;;  %v436_v19 = vld [vmem:[#allocation2 + $0x1e8] sm:$0xff]  ;;  %v12543_v21 = vcombine.low %v452_v2, %v468_v4  ;;  %v387_v24 = vld [vmem:[#allocation2 + $0x60] sm:$0xff] }
 0x214   : > { %v3835_v34 = vpop.f32.mrf.mxu0  ;;  %v3878_v37 = vpop.f32.mrf.mxu1  ;;  %v12510_v22 = vcombine.high %v419_v12, %v435_v14  ;;  %v12512_v31 = vcombine.high %v420_v15, %v436_v19  ;;  %v12511_v11 = vcombine.low %v420_v15, %v436_v19  ;;  %v788_v15 = vld [vmem:[#allocation2 + $0xce8] sm:$0xff] }
 0x215   : > { %v3836_v36 = vadd.f32 %v3835_v34, %v930_v7  ;;  %4144 = vmatpush1.bf16.msra.mxu0 %v12669_v20  ;;  %v3879_v43 = vadd.f32 %v3878_v37, %v938_v1  ;;  %4187 = vmatpush1.bf16.msra.mxu1 %v12671_v28  ;;  %v12576_v1 = vcombine.high %v484_v52, %v500_v54  ;;  %v403_v28 = vld [vmem:[#allocation2 + $0xe0] sm:$0xff] }
 0x216   : > { %4145 = vmatprep.subr.bf16.mxu0 %v12638_v30  ;;  %4188 = vmatprep.subr.bf16.mxu1 %v12640_v33  ;;  %v12573_v7 = vcombine.low %v483_v39, %v499_v40  ;;  %v12541_v20 = vcombine.low %v451_v58, %v467_v59  ;;  %v388_v30 = vld [vmem:[#allocation2 + $0x68] sm:$0xff]  ;;  %v12509_v34 = vcombine.low %v419_v12, %v435_v14  ;;  %v883_v37 = vld [vmem:[#allocation2 + $0xfe0] sm:$0xff] }
 0x217   : > { %v4353_v48 = vmax.f32 %v3836_v36, 0.0  ;;  %v4355_v50 = vmax.f32 %v3879_v43, 0.0  ;;  %v404_v33 = vld [vmem:[#allocation2 + $0xe8] sm:$0xff]  ;;  %v12478_v35 = vcombine.high %v387_v24, %v403_v28  ;;  %v867_v36 = vld [vmem:[#allocation2 + $0xf60] sm:$0xff] }
 0x218   : > { %v12480_v39 = vcombine.high %v388_v30, %v404_v33  ;;  %v884_v40 = vld [vmem:[#allocation2 + $0xfe8] sm:$0xff]  ;;  %v12479_v43 = vcombine.low %v388_v30, %v404_v33  ;;  %v12957_v52 = vcombine.low %v867_v36, %v883_v37  ;;  %v803_v58 = vld [vmem:[#allocation2 + $0xd60] sm:$0xff] }
 0x219   : > { %v16273_v29 = vpack.c.bf16 %v4353_v48, %v4321_v45  ;;  %4146 = vmatpush1.bf16.msra.mxu0 %v12637_v38  ;;  %v16275_v60 = vpack.c.bf16 %v4355_v50, %v4323_v42  ;;  %4189 = vmatpush1.bf16.msra.mxu1 %v12639_v56  ;;  %v868_v38 = vld [vmem:[#allocation2 + $0xf68] sm:$0xff]  ;;  %v12477_v42 = vcombine.low %v387_v24, %v403_v28  ;;  %v851_v45 = vld [vmem:[#allocation2 + $0xee0] sm:$0xff] }
 0x21a   : > { %4147 = vmatprep.subr.bf16.mxu0 %v12606_v44  ;;  %4190 = vmatprep.subr.bf16.mxu1 %v12608_v25  ;;  %v12958_v56 = vcombine.high %v867_v36, %v883_v37  ;;  %v835_v44 = vld [vmem:[#allocation2 + $0xe60] sm:$0xff]  ;;  %v836_v48 = vld [vmem:[#allocation2 + $0xe68] sm:$0xff]  ;;  %v12960_v25 = vcombine.high %v868_v38, %v884_v40  ;;  %v12959_v54 = vcombine.low %v868_v38, %v884_v40 }
 0x21b   : > { %v852_v50 = vld [vmem:[#allocation2 + $0xee8] sm:$0xff]  ;;  %v819_v59 = vld [vmem:[#allocation2 + $0xde0] sm:$0xff]  ;;  %v12925_v2 = vcombine.low %v835_v44, %v851_v45 }
 0x21c   : > { %v12927_v4 = vcombine.low %v836_v48, %v852_v50  ;;  %v772_v12 = vld [vmem:[#allocation2 + $0xc68] sm:$0xff] }
 0x21d   : > { %4148 = vmatpush1.bf16.msra.mxu0 %v12605_v55  ;;  %4191 = vmatpush1.bf16.msra.mxu1 %v12607_v62  ;;  %v12926_v55 = vcombine.high %v835_v44, %v851_v45  ;;  %v804_v62 = vld [vmem:[#allocation2 + $0xd68] sm:$0xff]  ;;  %v12864_v28 = vcombine.high %v772_v12, %v788_v15  ;;  %v12863_v33 = vcombine.low %v772_v12, %v788_v15  ;;  %v630_v12 = vld [vmem:[#allocation2 + $0x7f8] sm:$0xff] }
 0x21e   : > { %4149 = vmatprep.subr.bf16.mxu0 %v12574_v63  ;;  %4192 = vmatprep.subr.bf16.mxu1 %v12576_v1  ;;  %v12928_v63 = vcombine.high %v836_v48, %v852_v50  ;;  %v820_v1 = vld [vmem:[#allocation2 + $0xde8] sm:$0xff] }
 0x21f   : > { %v12896_v14 = vcombine.high %v804_v62, %v820_v1  ;;  %v12895_v19 = vcombine.low %v804_v62, %v820_v1  ;;  %v740_v24 = vld [vmem:[#allocation2 + $0xb68] sm:$0xff] }
 0x220   : > { %v756_v30 = vld [vmem:[#allocation2 + $0xbe8] sm:$0xff] }
 0x221   : > { %4150 = vmatpush1.bf16.msra.mxu0 %v12573_v7  ;;  %4193 = vmatpush1.bf16.msra.mxu1 %v12575_v8  ;;  %v12894_v7 = vcombine.high %v803_v58, %v819_v59  ;;  %v771_v8 = vld [vmem:[#allocation2 + $0xc60] sm:$0xff]  ;;  %v708_v36 = vld [vmem:[#allocation2 + $0xa68] sm:$0xff]  ;;  %v12832_v37 = vcombine.high %v740_v24, %v756_v30  ;;  %v12831_v40 = vcombine.low %v740_v24, %v756_v30  ;;  %v598_v24 = vld [vmem:[#allocation2 + $0x6f8] sm:$0xff] }
 0x222   : > { %4151 = vmatprep.subr.bf16.mxu0 %v12542_v9  ;;  %4194 = vmatprep.subr.bf16.mxu1 %v12544_v17  ;;  %v787_v9 = vld [vmem:[#allocation2 + $0xce0] sm:$0xff]  ;;  %v12893_v17 = vcombine.low %v803_v58, %v819_v59  ;;  %v724_v38 = vld [vmem:[#allocation2 + $0xae8] sm:$0xff]  ;;  %v549_v30 = vld [vmem:[#allocation2 + $0x570] sm:$0xff] }
 0x223   : > { %v676_v44 = vld [vmem:[#allocation2 + $0x968] sm:$0xff]  ;;  %v12800_v45 = vcombine.high %v708_v36, %v724_v38  ;;  %v12799_v50 = vcombine.low %v708_v36, %v724_v38  ;;  %v16281_v36 = vpop.f32.mrf.mxu1 }
 0x224   : > { %v692_v48 = vld [vmem:[#allocation2 + $0x9e8] sm:$0xff] }
 0x225   : > { %4152 = vmatpush1.bf16.msra.mxu0 %v12541_v20  ;;  %4195 = vmatpush1.bf16.msra.mxu1 %v12543_v21  ;;  %v12862_v20 = vcombine.high %v771_v8, %v787_v9  ;;  %v739_v21 = vld [vmem:[#allocation2 + $0xb60] sm:$0xff]  ;;  %v644_v58 = vld [vmem:[#allocation2 + $0x868] sm:$0xff]  ;;  %v12768_v59 = vcombine.high %v676_v44, %v692_v48  ;;  %v12767_v1 = vcombine.low %v676_v44, %v692_v48  ;;  %v533_v48 = vld [vmem:[#allocation2 + $0x4f0] sm:$0xff] }
 0x226   : > { %4153 = vmatprep.subr.bf16.mxu0 %v12510_v22  ;;  %4196 = vmatprep.subr.bf16.mxu1 %v12512_v31  ;;  %v755_v22 = vld [vmem:[#allocation2 + $0xbe0] sm:$0xff]  ;;  %v12861_v31 = vcombine.low %v771_v8, %v787_v9  ;;  %v660_v62 = vld [vmem:[#allocation2 + $0x8e8] sm:$0xff]  ;;  %v614_v8 = vld [vmem:[#allocation2 + $0x778] sm:$0xff] }
 0x227   : > { %v12736_v9 = vcombine.high %v644_v58, %v660_v62  ;;  %v12735_v15 = vcombine.low %v644_v58, %v660_v62 }
 0x229   : > { %4154 = vmatpush1.bf16.msra.mxu0 %v12509_v34  ;;  %4197 = vmatpush1.bf16.msra.mxu1 %v12511_v11  ;;  %v12830_v34 = vcombine.high %v739_v21, %v755_v22  ;;  %v707_v11 = vld [vmem:[#allocation2 + $0xa60] sm:$0xff] }
 0x22a   : > { %4155 = vmatprep.subr.bf16.mxu0 %v12478_v35  ;;  %4198 = vmatprep.subr.bf16.mxu1 %v12480_v39  ;;  %v723_v35 = vld [vmem:[#allocation2 + $0xae0] sm:$0xff]  ;;  %v12829_v39 = vcombine.low %v739_v21, %v755_v22  ;;  %v582_v21 = vld [vmem:[#allocation2 + $0x678] sm:$0xff]  ;;  %v12708_v22 = vcombine.high %v614_v8, %v630_v12 }
 0x22b   : > { %v12676_v38 = vcombine.high %v582_v21, %v598_v24 }
 0x22d   : > { %4156 = vmatpush1.bf16.msra.mxu0 %v12477_v42  ;;  %4199 = vmatpush1.bf16.msra.mxu1 %v12479_v43  ;;  %v12798_v42 = vcombine.high %v707_v11, %v723_v35  ;;  %v675_v43 = vld [vmem:[#allocation2 + $0x960] sm:$0xff] }
 0x22e   : > { %4157 = vmatprep.subr.bf16.mxu0 %v12958_v56  ;;  %4200 = vmatprep.subr.bf16.mxu1 %v12960_v25  ;;  %v691_v56 = vld [vmem:[#allocation2 + $0x9e0] sm:$0xff]  ;;  %v12797_v25 = vcombine.low %v707_v11, %v723_v35  ;;  %v12707_v11 = vcombine.low %v614_v8, %v630_v12  ;;  %v485_v8 = vld [vmem:[#allocation2 + $0x370] sm:$0xff] }
 0x231   : > { %4158 = vmatpush2.bf16.msra.mxu0 %v12957_v52  ;;  %4201 = vmatpush2.bf16.msra.mxu1 %v12959_v54  ;;  %v12766_v52 = vcombine.high %v675_v43, %v691_v56  ;;  %v643_v54 = vld [vmem:[#allocation2 + $0x860] sm:$0xff] }
 0x232   : > { %4159 = vmatprep.subr.bf16.mxu0 %v12926_v55  ;;  %4202 = vmatprep.subr.bf16.mxu1 %v12928_v63  ;;  %v659_v55 = vld [vmem:[#allocation2 + $0x8e0] sm:$0xff]  ;;  %v12765_v63 = vcombine.low %v675_v43, %v691_v56  ;;  %v566_v43 = vld [vmem:[#allocation2 + $0x5f8] sm:$0xff] }
 0x235   : > { %4160 = vmatpush2.bf16.msra.mxu0 %v12925_v2  ;;  %4203 = vmatpush2.bf16.msra.mxu1 %v12927_v4  ;;  %v12734_v2 = vcombine.high %v643_v54, %v659_v55  ;;  %v613_v4 = vld [vmem:[#allocation2 + $0x770] sm:$0xff] }
 0x236   : > { %4161 = vmatprep.subr.bf16.mxu0 %v12894_v7  ;;  %4204 = vmatprep.subr.bf16.mxu1 %v12896_v14  ;;  %v629_v7 = vld [vmem:[#allocation2 + $0x7f0] sm:$0xff]  ;;  %v12733_v14 = vcombine.low %v643_v54, %v659_v55 }
 0x239   : > { %4162 = vmatpush2.bf16.msra.mxu0 %v12893_v17  ;;  %4205 = vmatpush2.bf16.msra.mxu1 %v12895_v19  ;;  %v12706_v17 = vcombine.high %v613_v4, %v629_v7  ;;  %v581_v19 = vld [vmem:[#allocation2 + $0x670] sm:$0xff] }
 0x23a   : > { %4163 = vmatprep.subr.bf16.mxu0 %v12862_v20  ;;  %4206 = vmatprep.subr.bf16.mxu1 %v12864_v28  ;;  %v597_v20 = vld [vmem:[#allocation2 + $0x6f0] sm:$0xff]  ;;  %v12705_v28 = vcombine.low %v613_v4, %v629_v7 }
 0x23b   : > { %v12674_v35 = vcombine.high %v581_v19, %v597_v20  ;;  %v12673_v44 = vcombine.low %v581_v19, %v597_v20 }
 0x23d   : > { %4164 = vmatpush2.bf16.msra.mxu0 %v12861_v31  ;;  %4207 = vmatpush2.bf16.msra.mxu1 %v12863_v33  ;;  %v565_v31 = vld [vmem:[#allocation2 + $0x5f0] sm:$0xff]  ;;  %v16277_v33 = vpop.f32.mrf.mxu0 }
 0x23e   : > { %4165 = vmatprep.subr.bf16.mxu0 %v12830_v34  ;;  %4208 = vmatprep.subr.bf16.mxu1 %v12832_v37  ;;  %v954_v34 = vrot.slane %v16255_v53, %v16220_v51  ;;  %v946_v37 = vrot.slane %v16255_v53, %v16223_v57  ;;  %v12641_v7 = vcombine.low %v549_v30, %v565_v31 }
 0x241   : > { %4166 = vmatpush2.bf16.msra.mxu0 %v12829_v39  ;;  %4209 = vmatpush2.bf16.msra.mxu1 %v12831_v40  ;;  %v16288_v40 = vld [vmem:[%s17820_s0] ss:$8 sps:$4 sm:$0xff]  }
 0x242   : > { %4167 = vmatprep.subr.bf16.mxu0 %v12798_v42  ;;  %4210 = vmatprep.subr.bf16.mxu1 %v12800_v45  ;;  %v550_v42 = vld [vmem:[#allocation2 + $0x578] sm:$0xff]  ;;  %v517_v45 = vld [vmem:[#allocation2 + $0x470] sm:$0xff] }
 0x243   : > { %v12644_v58 = vcombine.high %v550_v42, %v566_v43 }
 0x245   : > { %4168 = vmatpush2.bf16.msra.mxu0 %v12797_v25  ;;  %4211 = vmatpush2.bf16.msra.mxu1 %v12799_v50  ;;  %v12675_v50 = vcombine.low %v582_v21, %v598_v24  ;;  %v486_v24 = vld [vmem:[#allocation2 + $0x378] sm:$0xff] }
 0x246   : > { %4169 = vmatprep.subr.bf16.mxu0 %v12766_v52  ;;  %4212 = vmatprep.subr.bf16.mxu1 %v12768_v59  ;;  %v12642_v52 = vcombine.high %v549_v30, %v565_v31  ;;  %v15723_v59 = vld [vmem:[%s17820_s0 + $0x4] ss:$8 sps:$4 sm:$0xff]   ;;  %v453_v30 = vld [vmem:[#allocation2 + $0x270] sm:$0xff] }
 0x247   : > { %v469_v31 = vld [vmem:[#allocation2 + $0x2f0] sm:$0xff] }
 0x249   : > { %4170 = vmatpush2.bf16.msra.mxu0 %v12765_v63  ;;  %4213 = vmatpush2.bf16.msra.mxu1 %v12767_v1  ;;  %v518_v63 = vld [vmem:[#allocation2 + $0x478] sm:$0xff] }
 0x24a   : > { %4171 = vmatprep.subr.bf16.mxu0 %v12734_v2  ;;  %4214 = vmatprep.subr.bf16.mxu1 %v12736_v9  ;;  %v534_v1 = vld [vmem:[#allocation2 + $0x4f8] sm:$0xff]  ;;  %v501_v9 = vld [vmem:[#allocation2 + $0x3f0] sm:$0xff] }
 0x24b   : > { %v12612_v21 = vcombine.high %v518_v63, %v534_v1 }
 0x24d   : > { %4172 = vmatpush2.bf16.msra.mxu0 %v12733_v14  ;;  %4215 = vmatpush2.bf16.msra.mxu1 %v12735_v15  ;;  %v12643_v15 = vcombine.low %v550_v42, %v566_v43  ;;  %v454_v42 = vld [vmem:[#allocation2 + $0x278] sm:$0xff] }
 0x24e   : > { %4227 = vmatprep.subr.bf16.mxu0 %v12706_v17  ;;  %4270 = vmatprep.subr.bf16.mxu1 %v12708_v22  ;;  %v12610_v17 = vcombine.high %v517_v45, %v533_v48  ;;  %v470_v43 = vld [vmem:[#allocation2 + $0x2f8] sm:$0xff] }
 0x250   : > { %v3917_v39 = vpop.f32.mrf.mxu0  ;;  %4174 = vmatmul.mubr.bf16.vlgmr.msra.gmra.mxu0 %v16288_v40  ;;  %v3960_v56 = vpop.f32.mrf.mxu1  ;;  %4217 = vmatmul.mubr.bf16.vlgmr.msra.gmra.mxu1 %v16288_v40 }
 0x251   : > { %4228 = vmatpush1.bf16.msra.mxu0 %v12705_v28  ;;  %v3961_v53 = vadd.f32 %v3960_v56, %v954_v34  ;;  %4271 = vmatpush1.bf16.msra.mxu1 %v12707_v11  ;;  %v3918_v54 = vadd.f32 %v3917_v39, %v946_v37  ;;  %v502_v28 = vld [vmem:[#allocation2 + $0x3f8] sm:$0xff]  ;;  %v12577_v56 = vcombine.low %v485_v8, %v501_v9 }
 0x252   : > { %v16292_v25 = vpop.f32.mrf.mxu0  ;;  %4229 = vmatprep.subr.bf16.mxu0 %v12674_v35  ;;  %v16294_v55 = vpop.f32.mrf.mxu1  ;;  %4272 = vmatprep.subr.bf16.mxu1 %v12676_v38  ;;  %v12609_v35 = vcombine.low %v517_v45, %v533_v48  ;;  %v12578_v38 = vcombine.high %v485_v8, %v501_v9  ;;  %v12580_v39 = vcombine.high %v486_v24, %v502_v28  ;;  %v437_v45 = vld [vmem:[#allocation2 + $0x1f0] sm:$0xff]  ;;  %v422_v48 = vld [vmem:[#allocation2 + $0x178] sm:$0xff] }
 0x253   : > { %4259 = vmatprep.mubr.bf16.mxu0 %v15723_v59  ;;  %4302 = vmatprep.mubr.bf16.mxu1 %v15723_v59  ;;  %v4327_v12 = vmax.f32 %v3961_v53, 0.0  ;;  %v4325_v19 = vmax.f32 %v3918_v54, 0.0  ;;  %v12546_v53 = vcombine.high %v453_v30, %v469_v31  ;;  %v438_v54 = vld [vmem:[#allocation2 + $0x1f8] sm:$0xff]  ;;  %v12547_v59 = vcombine.low %v454_v42, %v470_v43 }
 0x254   : > { %v3921_v62 = vpop.f32.mrf.mxu0  ;;  %v3964_v4 = vpop.f32.mrf.mxu1  ;;  %v12515_v9 = vcombine.low %v422_v48, %v438_v54 }
 0x255   : > { %v3922_v2 = vadd.f32 %v3921_v62, %v946_v37  ;;  %4230 = vmatpush1.bf16.msra.mxu0 %v12673_v44  ;;  %v3965_v14 = vadd.f32 %v3964_v4, %v954_v34  ;;  %4273 = vmatpush1.bf16.msra.mxu1 %v12675_v50  ;;  %v12611_v34 = vcombine.low %v518_v63, %v534_v1  ;;  %v421_v50 = vld [vmem:[#allocation2 + $0x170] sm:$0xff] }
 0x256   : > { %4231 = vmatprep.subr.bf16.mxu0 %v12642_v52  ;;  %4274 = vmatprep.subr.bf16.mxu1 %v12644_v58  ;;  %v12579_v44 = vcombine.low %v486_v24, %v502_v28  ;;  %v12548_v52 = vcombine.high %v454_v42, %v470_v43  ;;  %v12545_v58 = vcombine.low %v453_v30, %v469_v31  ;;  %v389_v63 = vld [vmem:[#allocation2 + $0x70] sm:$0xff]  ;;  %v838_v30 = vld [vmem:[#allocation2 + $0xe78] sm:$0xff] }
 0x257   : > { %v4357_v20 = vmax.f32 %v3922_v2, 0.0  ;;  %v4359_v22 = vmax.f32 %v3965_v14, 0.0  ;;  %v12514_v62 = vcombine.high %v421_v50, %v437_v45  ;;  %v405_v1 = vld [vmem:[#allocation2 + $0xf0] sm:$0xff]  ;;  %v390_v2 = vld [vmem:[#allocation2 + $0x78] sm:$0xff]  ;;  %v12516_v4 = vcombine.high %v422_v48, %v438_v54 }
 0x258   : > { %v12513_v8 = vcombine.low %v421_v50, %v437_v45  ;;  %v869_v14 = vld [vmem:[#allocation2 + $0xf70] sm:$0xff]  ;;  %v822_v50 = vld [vmem:[#allocation2 + $0xdf8] sm:$0xff] }
 0x259   : > { %v16299_v11 = vpack.c.bf16 %v4357_v20, %v4325_v19  ;;  %4232 = vmatpush1.bf16.msra.mxu0 %v12641_v7  ;;  %v16301_v37 = vpack.c.bf16 %v4359_v22, %v4327_v12  ;;  %4275 = vmatpush1.bf16.msra.mxu1 %v12643_v15  ;;  %v406_v7 = vld [vmem:[#allocation2 + $0xf8] sm:$0xff]  ;;  %v12482_v12 = vcombine.high %v389_v63, %v405_v1  ;;  %v885_v15 = vld [vmem:[#allocation2 + $0xff0] sm:$0xff] }
 0x25a   : > { %4233 = vmatprep.subr.bf16.mxu0 %v12610_v17  ;;  %4276 = vmatprep.subr.bf16.mxu1 %v12612_v21  ;;  %v870_v17 = vld [vmem:[#allocation2 + $0xf78] sm:$0xff]  ;;  %v12484_v19 = vcombine.high %v390_v2, %v406_v7  ;;  %v12481_v21 = vcombine.low %v389_v63, %v405_v1  ;;  %v12483_v22 = vcombine.low %v390_v2, %v406_v7  ;;  %v837_v28 = vld [vmem:[#allocation2 + $0xe70] sm:$0xff] }
 0x25b   : > { %v886_v20 = vld [vmem:[#allocation2 + $0xff8] sm:$0xff]  ;;  %v12962_v24 = vcombine.high %v869_v14, %v885_v15  ;;  %v805_v43 = vld [vmem:[#allocation2 + $0xd70] sm:$0xff] }
 0x25c   : > { %v12964_v31 = vcombine.high %v870_v17, %v886_v20  ;;  %v773_v54 = vld [vmem:[#allocation2 + $0xc70] sm:$0xff]  ;;  %v790_v63 = vld [vmem:[#allocation2 + $0xcf8] sm:$0xff] }
 0x25d   : > { %4234 = vmatpush1.bf16.msra.mxu0 %v12609_v35  ;;  %4277 = vmatpush1.bf16.msra.mxu1 %v12611_v34  ;;  %v853_v35 = vld [vmem:[#allocation2 + $0xef0] sm:$0xff]  ;;  %v854_v34 = vld [vmem:[#allocation2 + $0xef8] sm:$0xff] }
 0x25e   : > { %4235 = vmatprep.subr.bf16.mxu0 %v12578_v38  ;;  %4278 = vmatprep.subr.bf16.mxu1 %v12580_v39  ;;  %v12961_v38 = vcombine.low %v869_v14, %v885_v15  ;;  %v12963_v39 = vcombine.low %v870_v17, %v886_v20  ;;  %v12930_v42 = vcombine.high %v837_v28, %v853_v35  ;;  %v741_v7 = vld [vmem:[#allocation2 + $0xb70] sm:$0xff]  ;;  %v758_v14 = vld [vmem:[#allocation2 + $0xbf8] sm:$0xff] }
 0x25f   : > { %v12929_v45 = vcombine.low %v837_v28, %v853_v35  ;;  %v12931_v48 = vcombine.low %v838_v30, %v854_v34  ;;  %v709_v20 = vld [vmem:[#allocation2 + $0xa70] sm:$0xff]  ;;  %v726_v28 = vld [vmem:[#allocation2 + $0xaf8] sm:$0xff] }
 0x261   : > { %4236 = vmatpush1.bf16.msra.mxu0 %v12577_v56  ;;  %4279 = vmatpush1.bf16.msra.mxu1 %v12579_v44  ;;  %v821_v56 = vld [vmem:[#allocation2 + $0xdf0] sm:$0xff]  ;;  %v806_v44 = vld [vmem:[#allocation2 + $0xd78] sm:$0xff] }
 0x262   : > { %4237 = vmatprep.subr.bf16.mxu0 %v12546_v53  ;;  %4280 = vmatprep.subr.bf16.mxu1 %v12548_v52  ;;  %v12932_v53 = vcombine.high %v838_v30, %v854_v34  ;;  %v12898_v52 = vcombine.high %v805_v43, %v821_v56  ;;  %v12897_v1 = vcombine.low %v805_v43, %v821_v56  ;;  %v677_v34 = vld [vmem:[#allocation2 + $0x970] sm:$0xff]  ;;  %v694_v43 = vld [vmem:[#allocation2 + $0x9f8] sm:$0xff] }
 0x263   : > { %v12899_v2 = vcombine.low %v806_v44, %v822_v50 }
 0x265   : > { %4238 = vmatpush1.bf16.msra.mxu0 %v12545_v58  ;;  %4281 = vmatpush1.bf16.msra.mxu1 %v12547_v59  ;;  %v789_v58 = vld [vmem:[#allocation2 + $0xcf0] sm:$0xff]  ;;  %v774_v59 = vld [vmem:[#allocation2 + $0xc78] sm:$0xff] }
 0x266   : > { %4239 = vmatprep.subr.bf16.mxu0 %v12514_v62  ;;  %4282 = vmatprep.subr.bf16.mxu1 %v12516_v4  ;;  %v12900_v62 = vcombine.high %v806_v44, %v822_v50  ;;  %v12866_v4 = vcombine.high %v773_v54, %v789_v58  ;;  %v12865_v15 = vcombine.low %v773_v54, %v789_v58  ;;  %v16304_v44 = vsub.s32 1, %v16193_v13 }
 0x267   : > { %v12867_v17 = vcombine.low %v774_v59, %v790_v63  ;;  %v16307_v54 = vsub.s32 3, %v16193_v13 }
 0x269   : > { %4240 = vmatpush1.bf16.msra.mxu0 %v12513_v8  ;;  %4283 = vmatpush1.bf16.msra.mxu1 %v12515_v9  ;;  %v757_v8 = vld [vmem:[#allocation2 + $0xbf0] sm:$0xff]  ;;  %v742_v9 = vld [vmem:[#allocation2 + $0xb78] sm:$0xff] }
 0x26a   : > { %4241 = vmatprep.subr.bf16.mxu0 %v12482_v12  ;;  %4284 = vmatprep.subr.bf16.mxu1 %v12484_v19  ;;  %v12868_v12 = vcombine.high %v774_v59, %v790_v63  ;;  %v12834_v19 = vcombine.high %v741_v7, %v757_v8  ;;  %v12833_v35 = vcombine.low %v741_v7, %v757_v8  ;;  %v662_v59 = vld [vmem:[#allocation2 + $0x8f8] sm:$0xff]  ;;  %v16309_v63 = vld [vmem:[#allocation4] sm:$0xff] }
 0x26b   : > { %v12835_v30 = vcombine.low %v742_v9, %v758_v14  ;;  %v910_v7 = vrot.slane %v16309_v63, %v16307_v54 }
 0x26d   : > { %4242 = vmatpush1.bf16.msra.mxu0 %v12481_v21  ;;  %4285 = vmatpush1.bf16.msra.mxu1 %v12483_v22  ;;  %v725_v21 = vld [vmem:[#allocation2 + $0xaf0] sm:$0xff]  ;;  %v710_v22 = vld [vmem:[#allocation2 + $0xa78] sm:$0xff] }
 0x26e   : > { %4243 = vmatprep.subr.bf16.mxu0 %v12962_v24  ;;  %4286 = vmatprep.subr.bf16.mxu1 %v12964_v31  ;;  %v12836_v24 = vcombine.high %v742_v9, %v758_v14  ;;  %v12802_v31 = vcombine.high %v709_v20, %v725_v21  ;;  %v12801_v56 = vcombine.low %v709_v20, %v725_v21  ;;  %v14152_v20 = vld [vmem:[%s16153_s13 + $0xe4] ss:$16 sps:$4 sm:$0xff]  }
 0x26f   : > { %v14155_v21 = vld [vmem:[%s16153_s13 + $0x2e4] ss:$16 sps:$4 sm:$0xff]  }
 0x271   : > { %4244 = vmatpush2.bf16.msra.mxu0 %v12961_v38  ;;  %4287 = vmatpush2.bf16.msra.mxu1 %v12963_v39  ;;  %v693_v38 = vld [vmem:[#allocation2 + $0x9f0] sm:$0xff]  ;;  %v678_v39 = vld [vmem:[#allocation2 + $0x978] sm:$0xff] }
 0x272   : > { %4245 = vmatprep.subr.bf16.mxu0 %v12930_v42  ;;  %4288 = vmatprep.subr.bf16.mxu1 %v12932_v53  ;;  %v12804_v42 = vcombine.high %v710_v22, %v726_v28  ;;  %v12803_v53 = vcombine.low %v710_v22, %v726_v28  ;;  %v12770_v50 = vcombine.high %v677_v34, %v693_v38  ;;  %v14153_v28 = vld [vmem:[%s16153_s13 + $0x2e0] ss:$16 sps:$4 sm:$0xff]  }
 0x273   : > { %v12772_v58 = vcombine.high %v678_v39, %v694_v43  ;;  %v3705_v22 = vadd.f32 %v16211_v47, %v910_v7  ;;  %v14161_v47 = vld [vmem:[%s16153_s13 + $0x2c4] ss:$16 sps:$4 sm:$0xff]  }
 0x275   : > { %4246 = vmatpush2.bf16.msra.mxu0 %v12929_v45  ;;  %4289 = vmatpush2.bf16.msra.mxu1 %v12931_v48  ;;  %v645_v45 = vld [vmem:[#allocation2 + $0x870] sm:$0xff] }
 0x276   : > { %4247 = vmatprep.subr.bf16.mxu0 %v12898_v52  ;;  %4290 = vmatprep.subr.bf16.mxu1 %v12900_v62  ;;  %v661_v48 = vld [vmem:[#allocation2 + $0x8f0] sm:$0xff]  ;;  %v646_v52 = vld [vmem:[#allocation2 + $0x878] sm:$0xff]  ;;  %v12769_v62 = vcombine.low %v677_v34, %v693_v38  ;;  %v4316_v34 = vmax.f32 %v3705_v22, 0.0  ;;  %v16331_v38 = vpop.f32.mrf.mxu1 }
 0x277   : > { %v12740_v8 = vcombine.high %v646_v52, %v662_v59  ;;  %v12737_v14 = vcombine.low %v645_v45, %v661_v48  ;;  %v14168_v22 = vld [vmem:[%s16153_s13 + $0x80] ss:$16 sps:$4 sm:$0xff]  }
 0x279   : > { %4248 = vmatpush2.bf16.msra.mxu0 %v12897_v1  ;;  %4291 = vmatpush2.bf16.msra.mxu1 %v12899_v2  ;;  %v902_v1 = vrot.slane %v16309_v63, %v16304_v44  ;;  %v12771_v2 = vcombine.low %v678_v39, %v694_v43 }
 0x27a   : > { %4249 = vmatprep.subr.bf16.mxu0 %v12866_v4  ;;  %4292 = vmatprep.subr.bf16.mxu1 %v12868_v12  ;;  %v12738_v4 = vcombine.high %v645_v45, %v661_v48  ;;  %v3709_v12 = vadd.f32 %v16229_v5, %v910_v7  ;;  %v14164_v48 = vld [vmem:[%s16153_s13 + $0xa4] ss:$16 sps:$4 sm:$0xff]  }
 0x27b   : > { %v3666_v9 = vadd.f32 %v16225_v61, %v902_v1 }
 0x27c   : > { %v4348_v5 = vmax.f32 %v3709_v12, 0.0  ;;  %v14173_v12 = vld [vmem:[%s16153_s13 + $0x284] ss:$16 sps:$4 sm:$0xff]  }
 0x27d   : > { %4250 = vmatpush2.bf16.msra.mxu0 %v12865_v15  ;;  %4293 = vmatpush2.bf16.msra.mxu1 %v12867_v17  ;;  %v3662_v15 = vadd.f32 %v16209_v41, %v902_v1  ;;  %v12739_v17 = vcombine.low %v646_v52, %v662_v59  ;;  %v4346_v61 = vmax.f32 %v3666_v9, 0.0  ;;  %v14167_v52 = vld [vmem:[%s16153_s13 + $0x2a4] ss:$16 sps:$4 sm:$0xff]  }
 0x27e   : > { %4251 = vmatprep.subr.bf16.mxu0 %v12834_v19  ;;  %4294 = vmatprep.subr.bf16.mxu1 %v12836_v24  ;;  %v16318_v19 = vld [vmem:[#allocation4 + $0x10] sm:$0xff] }
 0x27f   : > { %v14150_v24 = vld [vmem:[%s16153_s13 + $0xe0] ss:$16 sps:$4 sm:$0xff]   ;;  %v4314_v41 = vmax.f32 %v3662_v15, 0.0  ;;  %v962_v39 = vrot.slane %v16318_v19, %v16201_v23  ;;  %v14170_v9 = vld [vmem:[%s16153_s13 + $0x84] ss:$16 sps:$4 sm:$0xff]  }
 0x281   : > { %4252 = vmatpush2.bf16.msra.mxu0 %v12833_v35  ;;  %4295 = vmatpush2.bf16.msra.mxu1 %v12835_v30  ;;  %v14158_v35 = vld [vmem:[%s16153_s13 + $0xc4] ss:$16 sps:$4 sm:$0xff]   ;;  %v16326_v30 = vpop.f32.mrf.mxu0 }
 0x282   : > { %4253 = vmatprep.subr.bf16.mxu0 %v12802_v31  ;;  %4296 = vmatprep.subr.bf16.mxu1 %v12804_v42  ;;  %v970_v31 = vrot.slane %v16318_v19, %v16198_v18  ;;  %v16335_v42 = vpack.c.bf16 %v4346_v61, %v4314_v41  ;;  %v14174_v41 = vld [vmem:[%s16153_s13 + $0x60] ss:$16 sps:$4 sm:$0xff]  }
 0x285   : > { %4254 = vmatpush2.bf16.msra.mxu0 %v12801_v56  ;;  %4297 = vmatpush2.bf16.msra.mxu1 %v12803_v53  ;;  %v14156_v56 = vld [vmem:[%s16153_s13 + $0xc0] ss:$16 sps:$4 sm:$0xff]  }
 0x286   : > { %4255 = vmatprep.subr.bf16.mxu0 %v12770_v50  ;;  %4298 = vmatprep.subr.bf16.mxu1 %v12772_v58  ;;  %v14159_v53 = vld [vmem:[%s16153_s13 + $0x2c0] ss:$16 sps:$4 sm:$0xff]   ;;  %v16340_v50 = vpack.c.bf16 %v4348_v5, %v4316_v34  ;;  %v14179_v5 = vld [vmem:[%s16153_s13 + $0x264] ss:$16 sps:$4 sm:$0xff]  }
 0x287   : > { %v14180_v34 = vld [vmem:[%s16153_s13 + $0x40] ss:$16 sps:$4 sm:$0xff]  }
 0x289   : > { %4256 = vmatpush2.bf16.msra.mxu0 %v12769_v62  ;;  %4299 = vmatpush2.bf16.msra.mxu1 %v12771_v2 }
 0x28a   : > { %4257 = vmatprep.subr.bf16.mxu0 %v12738_v4  ;;  %4300 = vmatprep.subr.bf16.mxu1 %v12740_v8  ;;  %v14165_v4 = vld [vmem:[%s16153_s13 + $0x2a0] ss:$16 sps:$4 sm:$0xff]  }
 0x28d   : > { %4258 = vmatpush2.bf16.msra.mxu0 %v12737_v14  ;;  %4301 = vmatpush2.bf16.msra.mxu1 %v12739_v17 }
 0x28e   : > { %10575 = vmatprep.subr.bf16.mxu0 %v14152_v20  ;;  %10618 = vmatprep.subr.bf16.mxu1 %v14155_v21 }
 0x290   : > { %v4003_v43 = vpop.f32.mrf.mxu0  ;;  %4260 = vmatmul.mubr.bf16.vlgmr.msra.gmra.mxu0 %v16288_v40  ;;  %v4046_v45 = vpop.f32.mrf.mxu1  ;;  %4303 = vmatmul.mubr.bf16.vlgmr.msra.gmra.mxu1 %v16288_v40  ;;  %v14162_v40 = vld [vmem:[%s16153_s13 + $0xa0] ss:$16 sps:$4 sm:$0xff]  }
 0x291   : > { %10576 = vmatpush1.bf16.msra.mxu0 %v14150_v24  ;;  %v4047_v58 = vadd.f32 %v4046_v45, %v970_v31  ;;  %10607 = vmatprep.mubr.bf16.mxu0 %v16335_v42  ;;  %v4004_v62 = vadd.f32 %v4003_v43, %v962_v39  ;;  %v14171_v24 = vld [vmem:[%s16153_s13 + $0x280] ss:$16 sps:$4 sm:$0xff]   ;;  %v14191_v45 = vld [vmem:[%s16153_s13 + $0x224] ss:$16 sps:$4 sm:$0xff]  }
 0x292   : > { %10619 = vmatpush1.bf16.msra.mxu1 %v14153_v28  ;;  %v16346_v59 = vpop.f32.mrf.mxu0  ;;  %10650 = vmatprep.mubr.bf16.mxu1 %v16340_v50  ;;  %v16349_v1 = vpop.f32.mrf.mxu1  ;;  %v14176_v28 = vld [vmem:[%s16153_s13 + $0x64] ss:$16 sps:$4 sm:$0xff]   ;;  %v14183_v43 = vld [vmem:[%s16153_s13 + $0x240] ss:$16 sps:$4 sm:$0xff]  }
 0x293   : > { %10577 = vmatprep.subr.bf16.mxu0 %v14158_v35  ;;  %10620 = vmatprep.subr.bf16.mxu1 %v14161_v47  ;;  %v4331_v14 = vmax.f32 %v4047_v58, 0.0  ;;  %v4329_v17 = vmax.f32 %v4004_v62, 0.0  ;;  %v14182_v47 = vld [vmem:[%s16153_s13 + $0x44] ss:$16 sps:$4 sm:$0xff]   ;;  %v14192_v58 = vld [vmem:[%s16153_s13] ss:$16 sps:$4 sm:$0xff]  }
 0x294   : > { %v4007_v2 = vpop.f32.mrf.mxu0  ;;  %v4050_v8 = vpop.f32.mrf.mxu1  ;;  %v14197_v62 = vld [vmem:[%s16153_s13 + $0x204] ss:$16 sps:$4 sm:$0xff]  }
 0x295   : > { %v4008_v7 = vadd.f32 %v4007_v2, %v962_v39  ;;  %10578 = vmatpush1.bf16.msra.mxu0 %v14156_v56  ;;  %v4051_v15 = vadd.f32 %v4050_v8, %v970_v31  ;;  %v14177_v31 = vld [vmem:[%s16153_s13 + $0x260] ss:$16 sps:$4 sm:$0xff]   ;;  %v14185_v39 = vld [vmem:[%s16153_s13 + $0x244] ss:$16 sps:$4 sm:$0xff]  }
 0x296   : > { %10621 = vmatpush1.bf16.msra.mxu1 %v14159_v53  ;;  %10579 = vmatprep.subr.bf16.mxu0 %v14164_v48  ;;  %v14188_v56 = vld [vmem:[%s16153_s13 + $0x24] ss:$16 sps:$4 sm:$0xff]   ;;  %v14186_v53 = vld [vmem:[%s16153_s13 + $0x20] ss:$16 sps:$4 sm:$0xff]  }
 0x297   : > { %v4361_v20 = vmax.f32 %v4008_v7, 0.0  ;;  %10622 = vmatprep.subr.bf16.mxu1 %v14167_v52  ;;  %v4363_v21 = vmax.f32 %v4051_v15, 0.0  ;;  %v14189_v48 = vld [vmem:[%s16153_s13 + $0x220] ss:$16 sps:$4 sm:$0xff]   ;;  %v14194_v52 = vld [vmem:[%s16153_s13 + $0x4] ss:$16 sps:$4 sm:$0xff]  }
 0x298   : > { %v14195_v2 = vld [vmem:[%s16153_s13 + $0x200] ss:$16 sps:$4 sm:$0xff]   ;;  %v14203_v7 = vld [vmem:[%s16153_s13 + $0x3e4] ss:$16 sps:$4 sm:$0xff]  }
 0x299   : > { %v16357_v61 = vpack.c.bf16 %v4361_v20, %v4329_v17  ;;  %10580 = vmatpush1.bf16.msra.mxu0 %v14162_v40  ;;  %v16361_v35 = vpack.c.bf16 %v4363_v21, %v4331_v14  ;;  %v14200_v40 = vld [vmem:[%s16153_s13 + $0x1e4] ss:$16 sps:$4 sm:$0xff]   ;;  %v14201_v8 = vld [vmem:[%s16153_s13 + $0x3e0] ss:$16 sps:$4 sm:$0xff]  }
 0x29a   : > { %10623 = vmatpush1.bf16.msra.mxu1 %v14165_v4  ;;  %10581 = vmatprep.subr.bf16.mxu0 %v14170_v9  ;;  %v14198_v4 = vld [vmem:[%s16153_s13 + $0x1e0] ss:$16 sps:$4 sm:$0xff]   ;;  %v14206_v9 = vld [vmem:[%s16153_s13 + $0x1c4] ss:$16 sps:$4 sm:$0xff]  }
 0x29b   : > { %10624 = vmatprep.subr.bf16.mxu1 %v14173_v12  ;;  %v14204_v12 = vld [vmem:[%s16153_s13 + $0x1c0] ss:$16 sps:$4 sm:$0xff]   ;;  %v14209_v14 = vld [vmem:[%s16153_s13 + $0x3c4] ss:$16 sps:$4 sm:$0xff]  }
 0x29c   : > { %v14207_v15 = vld [vmem:[%s16153_s13 + $0x3c0] ss:$16 sps:$4 sm:$0xff]   ;;  %v14212_v17 = vld [vmem:[%s16153_s13 + $0x1a4] ss:$16 sps:$4 sm:$0xff]  }
 0x29d   : > { %10582 = vmatpush1.bf16.msra.mxu0 %v14168_v22  ;;  %v14210_v20 = vld [vmem:[%s16153_s13 + $0x1a0] ss:$16 sps:$4 sm:$0xff]   ;;  %v14215_v21 = vld [vmem:[%s16153_s13 + $0x3a4] ss:$16 sps:$4 sm:$0xff]  }
 0x29e   : > { %10625 = vmatpush1.bf16.msra.mxu1 %v14171_v24  ;;  %10583 = vmatprep.subr.bf16.mxu0 %v14176_v28  ;;  %v14213_v22 = vld [vmem:[%s16153_s13 + $0x3a0] ss:$16 sps:$4 sm:$0xff]   ;;  %v14218_v24 = vld [vmem:[%s16153_s13 + $0x184] ss:$16 sps:$4 sm:$0xff]  }
 0x29f   : > { %10626 = vmatprep.subr.bf16.mxu1 %v14179_v5  ;;  %v14216_v28 = vld [vmem:[%s16153_s13 + $0x180] ss:$16 sps:$4 sm:$0xff]   ;;  %v14221_v5 = vld [vmem:[%s16153_s13 + $0x384] ss:$16 sps:$4 sm:$0xff]  }
 0x2a1   : > { %10584 = vmatpush1.bf16.msra.mxu0 %v14174_v41  ;;  %v14219_v41 = vld [vmem:[%s16153_s13 + $0x380] ss:$16 sps:$4 sm:$0xff]  }
 0x2a2   : > { %10627 = vmatpush1.bf16.msra.mxu1 %v14177_v31  ;;  %10585 = vmatprep.subr.bf16.mxu0 %v14182_v47  ;;  %v14224_v31 = vld [vmem:[%s16153_s13 + $0x164] ss:$16 sps:$4 sm:$0xff]   ;;  %v14222_v47 = vld [vmem:[%s16153_s13 + $0x160] ss:$16 sps:$4 sm:$0xff]  }
 0x2a3   : > { %10628 = vmatprep.subr.bf16.mxu1 %v14185_v39  ;;  %v14225_v39 = vld [vmem:[%s16153_s13 + $0x360] ss:$16 sps:$4 sm:$0xff]  }
 0x2a5   : > { %10586 = vmatpush1.bf16.msra.mxu0 %v14180_v34  ;;  %v14227_v34 = vld [vmem:[%s16153_s13 + $0x364] ss:$16 sps:$4 sm:$0xff]  }
 0x2a6   : > { %10629 = vmatpush1.bf16.msra.mxu1 %v14183_v43  ;;  %10587 = vmatprep.subr.bf16.mxu0 %v14188_v56  ;;  %v14230_v43 = vld [vmem:[%s16153_s13 + $0x144] ss:$16 sps:$4 sm:$0xff]   ;;  %v14228_v56 = vld [vmem:[%s16153_s13 + $0x140] ss:$16 sps:$4 sm:$0xff]  }
 0x2a7   : > { %10630 = vmatprep.subr.bf16.mxu1 %v14191_v45  ;;  %v16401_v45 = vsub.s32 5, %v16193_v13 }
 0x2a9   : > { %10588 = vmatpush1.bf16.msra.mxu0 %v14186_v53  ;;  %v14233_v53 = vld [vmem:[%s16153_s13 + $0x344] ss:$16 sps:$4 sm:$0xff]  }
 0x2aa   : > { %10631 = vmatpush1.bf16.msra.mxu1 %v14189_v48  ;;  %10589 = vmatprep.subr.bf16.mxu0 %v14194_v52  ;;  %v14231_v48 = vld [vmem:[%s16153_s13 + $0x340] ss:$16 sps:$4 sm:$0xff]   ;;  %v14236_v52 = vld [vmem:[%s16153_s13 + $0x124] ss:$16 sps:$4 sm:$0xff]  }
 0x2ab   : > { %10632 = vmatprep.subr.bf16.mxu1 %v14197_v62  ;;  %v14234_v62 = vld [vmem:[%s16153_s13 + $0x120] ss:$16 sps:$4 sm:$0xff]  }
 0x2ad   : > { %10590 = vmatpush1.bf16.msra.mxu0 %v14192_v58  ;;  %v16406_v58 = vsub.s32 7, %v16193_v13  ;;  %v14240_v13 = vld [vmem:[%s16153_s13 + $0x100] ss:$16 sps:$4 sm:$0xff]  }
 0x2ae   : > { %10633 = vmatpush1.bf16.msra.mxu1 %v14195_v2  ;;  %10591 = vmatprep.subr.bf16.mxu0 %v14200_v40  ;;  %v14239_v2 = vld [vmem:[%s16153_s13 + $0x324] ss:$16 sps:$4 sm:$0xff]   ;;  %v918_v40 = vrot.slane %v16309_v63, %v16401_v45 }
 0x2af   : > { %10634 = vmatprep.subr.bf16.mxu1 %v14203_v7  ;;  %v14242_v7 = vld [vmem:[%s16153_s13 + $0x104] ss:$16 sps:$4 sm:$0xff]  }
 0x2b1   : > { %10592 = vmatpush2.bf16.msra.mxu0 %v14198_v4  ;;  %v14237_v4 = vld [vmem:[%s16153_s13 + $0x320] ss:$16 sps:$4 sm:$0xff]  }
 0x2b2   : > { %10635 = vmatpush2.bf16.msra.mxu1 %v14201_v8  ;;  %10593 = vmatprep.subr.bf16.mxu0 %v14206_v9  ;;  %v926_v8 = vrot.slane %v16309_v63, %v16406_v58  ;;  %v14245_v9 = vld [vmem:[%s16153_s13 + $0x304] ss:$16 sps:$4 sm:$0xff]   ;;  %v14246_v63 = vld [vmem:[%s16153_s13 + $0x4e0] ss:$16 sps:$4 sm:$0xff]  }
 0x2b3   : > { %10636 = vmatprep.subr.bf16.mxu1 %v14209_v14 }
 0x2b4   : > { %v3795_v14 = vadd.f32 %v16261_v6, %v926_v8  ;;  %v16427_v6 = vpop.f32.mrf.mxu0 }
 0x2b5   : > { %10594 = vmatpush2.bf16.msra.mxu0 %v14204_v12  ;;  %v3752_v12 = vadd.f32 %v16257_v0, %v918_v40 }
 0x2b6   : > { %10637 = vmatpush2.bf16.msra.mxu1 %v14207_v15  ;;  %10595 = vmatprep.subr.bf16.mxu0 %v14212_v17  ;;  %v3748_v15 = vadd.f32 %v16240_v16, %v918_v40  ;;  %v14243_v17 = vld [vmem:[%s16153_s13 + $0x300] ss:$16 sps:$4 sm:$0xff]   ;;  %v986_v16 = vrot.slane %v16318_v19, %v16220_v51 }
 0x2b7   : > { %10638 = vmatprep.subr.bf16.mxu1 %v14215_v21  ;;  %v14251_v21 = vld [vmem:[%s16153_s13 + $0x6e4] ss:$16 sps:$4 sm:$0xff]  }
 0x2b8   : > { %v4318_v0 = vmax.f32 %v3748_v15, 0.0 }
 0x2b9   : > { %10596 = vmatpush2.bf16.msra.mxu0 %v14210_v20  ;;  %v14248_v20 = vld [vmem:[%s16153_s13 + $0x4e4] ss:$16 sps:$4 sm:$0xff]  }
 0x2ba   : > { %10639 = vmatpush2.bf16.msra.mxu1 %v14213_v22  ;;  %10597 = vmatprep.subr.bf16.mxu0 %v14218_v24  ;;  %v3791_v22 = vadd.f32 %v16242_v26, %v926_v8  ;;  %v4350_v24 = vmax.f32 %v3752_v12, 0.0  ;;  %v978_v26 = vrot.slane %v16318_v19, %v16223_v57  ;;  %v14258_v12 = vld [vmem:[%s16153_s13 + $0x4a0] ss:$16 sps:$4 sm:$0xff]  }
 0x2bb   : > { %10640 = vmatprep.subr.bf16.mxu1 %v14221_v5  ;;  %v4352_v5 = vmax.f32 %v3795_v14, 0.0 }
 0x2bd   : > { %10598 = vmatpush2.bf16.msra.mxu0 %v14216_v28  ;;  %v14249_v28 = vld [vmem:[%s16153_s13 + $0x6e0] ss:$16 sps:$4 sm:$0xff]  }
 0x2be   : > { %10641 = vmatpush2.bf16.msra.mxu1 %v14219_v41  ;;  %10599 = vmatprep.subr.bf16.mxu0 %v14224_v31  ;;  %v4320_v41 = vmax.f32 %v3791_v22, 0.0  ;;  %v16431_v31 = vpop.f32.mrf.mxu1 }
 0x2bf   : > { %10642 = vmatprep.subr.bf16.mxu1 %v14227_v34  ;;  %v16436_v34 = vpack.c.bf16 %v4350_v24, %v4318_v0 }
 0x2c1   : > { %10600 = vmatpush2.bf16.msra.mxu0 %v14222_v47  ;;  %v14254_v47 = vld [vmem:[%s16153_s13 + $0x4c4] ss:$16 sps:$4 sm:$0xff]  }
 0x2c2   : > { %10643 = vmatpush2.bf16.msra.mxu1 %v14225_v39  ;;  %10601 = vmatprep.subr.bf16.mxu0 %v14230_v43  ;;  %v14257_v43 = vld [vmem:[%s16153_s13 + $0x6c4] ss:$16 sps:$4 sm:$0xff]  }
 0x2c3   : > { %10644 = vmatprep.subr.bf16.mxu1 %v14233_v53 }
 0x2c5   : > { %10602 = vmatpush2.bf16.msra.mxu0 %v14228_v56  ;;  %v16440_v56 = vpack.c.bf16 %v4352_v5, %v4320_v41  ;;  %v14264_v5 = vld [vmem:[%s16153_s13 + $0x480] ss:$16 sps:$4 sm:$0xff]   ;;  %v14272_v41 = vld [vmem:[%s16153_s13 + $0x464] ss:$16 sps:$4 sm:$0xff]  }
 0x2c6   : > { %10645 = vmatpush2.bf16.msra.mxu1 %v14231_v48  ;;  %10603 = vmatprep.subr.bf16.mxu0 %v14236_v52  ;;  %v14252_v48 = vld [vmem:[%s16153_s13 + $0x4c0] ss:$16 sps:$4 sm:$0xff]  }
 0x2c7   : > { %10646 = vmatprep.subr.bf16.mxu1 %v14239_v2  ;;  %v14260_v2 = vld [vmem:[%s16153_s13 + $0x4a4] ss:$16 sps:$4 sm:$0xff]  }
 0x2c9   : > { %10604 = vmatpush2.bf16.msra.mxu0 %v14234_v62  ;;  %v14255_v62 = vld [vmem:[%s16153_s13 + $0x6c0] ss:$16 sps:$4 sm:$0xff]  }
 0x2ca   : > { %10647 = vmatpush2.bf16.msra.mxu1 %v14237_v4  ;;  %10605 = vmatprep.subr.bf16.mxu0 %v14242_v7  ;;  %v14263_v7 = vld [vmem:[%s16153_s13 + $0x6a4] ss:$16 sps:$4 sm:$0xff]  }
 0x2cb   : > { %10648 = vmatprep.subr.bf16.mxu1 %v14245_v9 }
 0x2cd   : > { %10606 = vmatpush2.bf16.msra.mxu0 %v14240_v13 }
 0x2ce   : > { %10649 = vmatpush2.bf16.msra.mxu1 %v14243_v17  ;;  %10661 = vmatprep.subr.bf16.mxu0 %v14248_v20  ;;  %v14261_v17 = vld [vmem:[%s16153_s13 + $0x6a0] ss:$16 sps:$4 sm:$0xff]   ;;  %v14266_v20 = vld [vmem:[%s16153_s13 + $0x484] ss:$16 sps:$4 sm:$0xff]  }
 0x2cf   : > { %10704 = vmatprep.subr.bf16.mxu1 %v14251_v21 }
 0x2d0   : > { %v4089_v39 = vpop.f32.mrf.mxu0  ;;  %10608 = vmatmul.mubr.bf16.vlgmr.msra.gmra.mxu0 %v16215_v10  ;;  %v4132_v53 = vpop.f32.mrf.mxu1 }
 0x2d1   : > { %10651 = vmatmul.mubr.bf16.vlgmr.msra.gmra.mxu1 %v16217_v3  ;;  %10662 = vmatpush1.bf16.msra.mxu0 %v14246_v63  ;;  %v4133_v52 = vadd.f32 %v4132_v53, %v986_v16  ;;  %v4090_v40 = vadd.f32 %v4089_v39, %v978_v26  ;;  %v14269_v63 = vld [vmem:[%s16153_s13 + $0x684] ss:$16 sps:$4 sm:$0xff]   ;;  %v14273_v39 = vld [vmem:[%s16153_s13 + $0x660] ss:$16 sps:$4 sm:$0xff]  }
 0x2d2   : > { %10693 = vmatprep.mubr.bf16.mxu0 %v16436_v34  ;;  %10705 = vmatpush1.bf16.msra.mxu1 %v14249_v28  ;;  %v16445_v19 = vpop.f32.mrf.mxu0  ;;  %v16450_v4 = vpop.f32.mrf.mxu1  ;;  %v14281_v53 = vld [vmem:[%s16153_s13 + $0x644] ss:$16 sps:$4 sm:$0xff]  }
 0x2d3   : > { %10736 = vmatprep.mubr.bf16.mxu1 %v16440_v56  ;;  %10663 = vmatprep.subr.bf16.mxu0 %v14254_v47  ;;  %v4335_v14 = vmax.f32 %v4133_v52, 0.0  ;;  %v4333_v21 = vmax.f32 %v4090_v40, 0.0  ;;  %v14270_v47 = vld [vmem:[%s16153_s13 + $0x460] ss:$16 sps:$4 sm:$0xff]  }
 0x2d4   : > { %v4093_v8 = vpop.f32.mrf.mxu0  ;;  %10706 = vmatprep.subr.bf16.mxu1 %v14257_v43  ;;  %v4136_v9 = vpop.f32.mrf.mxu1  ;;  %v14278_v43 = vld [vmem:[%s16153_s13 + $0x444] ss:$16 sps:$4 sm:$0xff]   ;;  %v14279_v52 = vld [vmem:[%s16153_s13 + $0x640] ss:$16 sps:$4 sm:$0xff]  }
 0x2d5   : > { %v4094_v13 = vadd.f32 %v4093_v8, %v978_v26  ;;  %10664 = vmatpush1.bf16.msra.mxu0 %v14252_v48  ;;  %v4137_v15 = vadd.f32 %v4136_v9, %v986_v16  ;;  %v14267_v16 = vld [vmem:[%s16153_s13 + $0x680] ss:$16 sps:$4 sm:$0xff]   ;;  %v14275_v26 = vld [vmem:[%s16153_s13 + $0x664] ss:$16 sps:$4 sm:$0xff]  }
 0x2d6   : > { %10707 = vmatpush1.bf16.msra.mxu1 %v14255_v62  ;;  %10665 = vmatprep.subr.bf16.mxu0 %v14260_v2  ;;  %v14276_v48 = vld [vmem:[%s16153_s13 + $0x440] ss:$16 sps:$4 sm:$0xff]   ;;  %v14284_v62 = vld [vmem:[%s16153_s13 + $0x424] ss:$16 sps:$4 sm:$0xff]  }
 0x2d7   : > { %v4365_v22 = vmax.f32 %v4094_v13, 0.0  ;;  %10708 = vmatprep.subr.bf16.mxu1 %v14263_v7  ;;  %v4367_v24 = vmax.f32 %v4137_v15, 0.0  ;;  %v14287_v2 = vld [vmem:[%s16153_s13 + $0x624] ss:$16 sps:$4 sm:$0xff]   ;;  %v14282_v40 = vld [vmem:[%s16153_s13 + $0x420] ss:$16 sps:$4 sm:$0xff]  }
 0x2d8   : > { %v14285_v7 = vld [vmem:[%s16153_s13 + $0x620] ss:$16 sps:$4 sm:$0xff]   ;;  %v14290_v8 = vld [vmem:[%s16153_s13 + $0x404] ss:$16 sps:$4 sm:$0xff]  }
 0x2d9   : > { %v16457_v28 = vpack.c.bf16 %v4365_v22, %v4333_v21  ;;  %10666 = vmatpush1.bf16.msra.mxu0 %v14258_v12  ;;  %v16460_v0 = vpack.c.bf16 %v4367_v24, %v4335_v14  ;;  %v14293_v13 = vld [vmem:[%s16153_s13 + $0x604] ss:$16 sps:$4 sm:$0xff]   ;;  %v14288_v9 = vld [vmem:[%s16153_s13 + $0x400] ss:$16 sps:$4 sm:$0xff]  }
 0x2da   : > { %10709 = vmatpush1.bf16.msra.mxu1 %v14261_v17  ;;  %10667 = vmatprep.subr.bf16.mxu0 %v14266_v20  ;;  %v14291_v12 = vld [vmem:[%s16153_s13 + $0x600] ss:$16 sps:$4 sm:$0xff]   ;;  %v14296_v14 = vld [vmem:[%s16153_s13 + $0x5e4] ss:$16 sps:$4 sm:$0xff]  }
 0x2db   : > { %10710 = vmatprep.subr.bf16.mxu1 %v14269_v63  ;;  %v14299_v15 = vld [vmem:[%s16153_s13 + $0x7e4] ss:$16 sps:$4 sm:$0xff]   ;;  %v14294_v17 = vld [vmem:[%s16153_s13 + $0x5e0] ss:$16 sps:$4 sm:$0xff]  }
 0x2dc   : > { %v14297_v20 = vld [vmem:[%s16153_s13 + $0x7e0] ss:$16 sps:$4 sm:$0xff]   ;;  %v14302_v21 = vld [vmem:[%s16153_s13 + $0x5c4] ss:$16 sps:$4 sm:$0xff]  }
 0x2dd   : > { %10668 = vmatpush1.bf16.msra.mxu0 %v14264_v5  ;;  %v14305_v22 = vld [vmem:[%s16153_s13 + $0x7c4] ss:$16 sps:$4 sm:$0xff]   ;;  %v14300_v63 = vld [vmem:[%s16153_s13 + $0x5c0] ss:$16 sps:$4 sm:$0xff]  }
 0x2de   : > { %10711 = vmatpush1.bf16.msra.mxu1 %v14267_v16  ;;  %10669 = vmatprep.subr.bf16.mxu0 %v14272_v41  ;;  %v14303_v24 = vld [vmem:[%s16153_s13 + $0x7c0] ss:$16 sps:$4 sm:$0xff]   ;;  %v14308_v5 = vld [vmem:[%s16153_s13 + $0x5a4] ss:$16 sps:$4 sm:$0xff]  }
 0x2df   : > { %10712 = vmatprep.subr.bf16.mxu1 %v14275_v26  ;;  %v14311_v16 = vld [vmem:[%s16153_s13 + $0x7a4] ss:$16 sps:$4 sm:$0xff]   ;;  %v14306_v41 = vld [vmem:[%s16153_s13 + $0x5a0] ss:$16 sps:$4 sm:$0xff]  }
 0x2e0   : > { %v14309_v26 = vld [vmem:[%s16153_s13 + $0x7a0] ss:$16 sps:$4 sm:$0xff]  }
 0x2e1   : > { %10670 = vmatpush1.bf16.msra.mxu0 %v14270_v47  ;;  %v14314_v47 = vld [vmem:[%s16153_s13 + $0x584] ss:$16 sps:$4 sm:$0xff]  }
 0x2e2   : > { %10713 = vmatpush1.bf16.msra.mxu1 %v14273_v39  ;;  %10671 = vmatprep.subr.bf16.mxu0 %v14278_v43  ;;  %v14317_v39 = vld [vmem:[%s16153_s13 + $0x784] ss:$16 sps:$4 sm:$0xff]   ;;  %v14312_v43 = vld [vmem:[%s16153_s13 + $0x580] ss:$16 sps:$4 sm:$0xff]  }
 0x2e3   : > { %10714 = vmatprep.subr.bf16.mxu1 %v14281_v53  ;;  %v14315_v53 = vld [vmem:[%s16153_s13 + $0x780] ss:$16 sps:$4 sm:$0xff]  }
 0x2e5   : > { %10672 = vmatpush1.bf16.msra.mxu0 %v14276_v48  ;;  %v14320_v48 = vld [vmem:[%s16153_s13 + $0x564] ss:$16 sps:$4 sm:$0xff]  }
 0x2e6   : > { %10715 = vmatpush1.bf16.msra.mxu1 %v14279_v52  ;;  %10673 = vmatprep.subr.bf16.mxu0 %v14284_v62  ;;  %v14323_v52 = vld [vmem:[%s16153_s13 + $0x764] ss:$16 sps:$4 sm:$0xff]   ;;  %v14318_v62 = vld [vmem:[%s16153_s13 + $0x560] ss:$16 sps:$4 sm:$0xff]  }
 0x2e7   : > { %10716 = vmatprep.subr.bf16.mxu1 %v14287_v2  ;;  %v14321_v2 = vld [vmem:[%s16153_s13 + $0x760] ss:$16 sps:$4 sm:$0xff]  }
 0x2e9   : > { %10674 = vmatpush1.bf16.msra.mxu0 %v14282_v40  ;;  %v14326_v40 = vld [vmem:[%s16153_s13 + $0x544] ss:$16 sps:$4 sm:$0xff]  }
 0x2ea   : > { %10717 = vmatpush1.bf16.msra.mxu1 %v14285_v7  ;;  %10675 = vmatprep.subr.bf16.mxu0 %v14290_v8  ;;  %v14329_v7 = vld [vmem:[%s16153_s13 + $0x744] ss:$16 sps:$4 sm:$0xff]   ;;  %v14324_v8 = vld [vmem:[%s16153_s13 + $0x540] ss:$16 sps:$4 sm:$0xff]  }
 0x2eb   : > { %10718 = vmatprep.subr.bf16.mxu1 %v14293_v13  ;;  %v14327_v13 = vld [vmem:[%s16153_s13 + $0x740] ss:$16 sps:$4 sm:$0xff]  }
 0x2ed   : > { %10676 = vmatpush1.bf16.msra.mxu0 %v14288_v9  ;;  %v14332_v9 = vld [vmem:[%s16153_s13 + $0x524] ss:$16 sps:$4 sm:$0xff]  }
 0x2ee   : > { %10719 = vmatpush1.bf16.msra.mxu1 %v14291_v12  ;;  %10677 = vmatprep.subr.bf16.mxu0 %v14296_v14  ;;  %v14335_v12 = vld [vmem:[%s16153_s13 + $0x724] ss:$16 sps:$4 sm:$0xff]   ;;  %v14330_v14 = vld [vmem:[%s16153_s13 + $0x520] ss:$16 sps:$4 sm:$0xff]  }
 0x2ef   : > { %10720 = vmatprep.subr.bf16.mxu1 %v14299_v15  ;;  %v16506_v15 = vld [vmem:[#allocation4 + $0x8] sm:$0xff] }
 0x2f1   : > { %10678 = vmatpush2.bf16.msra.mxu0 %v14294_v17  ;;  %v934_v17 = vrot.slane %v16506_v15, %v16304_v44 }
 0x2f2   : > { %10721 = vmatpush2.bf16.msra.mxu1 %v14297_v20  ;;  %10679 = vmatprep.subr.bf16.mxu0 %v14302_v21  ;;  %v14333_v20 = vld [vmem:[%s16153_s13 + $0x720] ss:$16 sps:$4 sm:$0xff]   ;;  %v14338_v21 = vld [vmem:[%s16153_s13 + $0x504] ss:$16 sps:$4 sm:$0xff]  }
 0x2f3   : > { %10722 = vmatprep.subr.bf16.mxu1 %v14305_v22  ;;  %v942_v22 = vrot.slane %v16506_v15, %v16307_v54 }
 0x2f5   : > { %10680 = vmatpush2.bf16.msra.mxu0 %v14300_v63  ;;  %v14341_v63 = vld [vmem:[%s16153_s13 + $0x704] ss:$16 sps:$4 sm:$0xff]  }
 0x2f6   : > { %10723 = vmatpush2.bf16.msra.mxu1 %v14303_v24  ;;  %10681 = vmatprep.subr.bf16.mxu0 %v14308_v5  ;;  %v3838_v24 = vadd.f32 %v16277_v33, %v934_v17  ;;  %v3881_v5 = vadd.f32 %v16281_v36, %v942_v22  ;;  %v14342_v36 = vld [vmem:[%s16153_s13 + $0x8e0] ss:$16 sps:$4 sm:$0xff]  }
 0x2f7   : > { %10724 = vmatprep.subr.bf16.mxu1 %v14311_v16  ;;  %v14336_v16 = vld [vmem:[%s16153_s13 + $0x500] ss:$16 sps:$4 sm:$0xff]  }
 0x2f8   : > { %v4356_v33 = vmax.f32 %v3881_v5, 0.0 }
 0x2f9   : > { %10682 = vmatpush2.bf16.msra.mxu0 %v14306_v41  ;;  %v3834_v41 = vadd.f32 %v16267_v27, %v934_v17 }
 0x2fa   : > { %10725 = vmatpush2.bf16.msra.mxu1 %v14309_v26  ;;  %10683 = vmatprep.subr.bf16.mxu0 %v14314_v47  ;;  %v14339_v26 = vld [vmem:[%s16153_s13 + $0x700] ss:$16 sps:$4 sm:$0xff]   ;;  %v14344_v47 = vld [vmem:[%s16153_s13 + $0x8e4] ss:$16 sps:$4 sm:$0xff]  }
 0x2fb   : > { %10726 = vmatprep.subr.bf16.mxu1 %v14317_v39  ;;  %v3877_v39 = vadd.f32 %v16269_v32, %v942_v22  ;;  %v14345_v32 = vld [vmem:[%s16153_s13 + $0xae0] ss:$16 sps:$4 sm:$0xff]  }
 0x2fd   : > { %10684 = vmatpush2.bf16.msra.mxu0 %v14312_v43  ;;  %v14347_v43 = vld [vmem:[%s16153_s13 + $0xae4] ss:$16 sps:$4 sm:$0xff]  }
 0x2fe   : > { %10727 = vmatpush2.bf16.msra.mxu1 %v14315_v53  ;;  %10685 = vmatprep.subr.bf16.mxu0 %v14320_v48  ;;  %v4354_v53 = vmax.f32 %v3838_v24, 0.0  ;;  %v16523_v48 = vld [vmem:[#allocation4 + $0x18] sm:$0xff]  ;;  %v14356_v24 = vld [vmem:[%s16153_s13 + $0x8a4] ss:$16 sps:$4 sm:$0xff]  }
 0x2ff   : > { %10728 = vmatprep.subr.bf16.mxu1 %v14323_v52  ;;  %v4322_v52 = vmax.f32 %v3834_v41, 0.0  ;;  %v1002_v27 = vrot.slane %v16523_v48, %v16198_v18  ;;  %v14359_v41 = vld [vmem:[%s16153_s13 + $0xaa4] ss:$16 sps:$4 sm:$0xff]  }
 0x301   : > { %10686 = vmatpush2.bf16.msra.mxu0 %v14318_v62  ;;  %v16526_v62 = vpop.f32.mrf.mxu0 }
 0x302   : > { %10729 = vmatpush2.bf16.msra.mxu1 %v14321_v2  ;;  %10687 = vmatprep.subr.bf16.mxu0 %v14326_v40  ;;  %v4324_v2 = vmax.f32 %v3877_v39, 0.0  ;;  %v16531_v40 = vpop.f32.mrf.mxu1 }
 0x303   : > { %10730 = vmatprep.subr.bf16.mxu1 %v14329_v7  ;;  %v994_v7 = vrot.slane %v16523_v48, %v16201_v23 }
 0x305   : > { %10688 = vmatpush2.bf16.msra.mxu0 %v14324_v8  ;;  %v14350_v8 = vld [vmem:[%s16153_s13 + $0x8c4] ss:$16 sps:$4 sm:$0xff]  }
 0x306   : > { %10731 = vmatpush2.bf16.msra.mxu1 %v14327_v13  ;;  %10689 = vmatprep.subr.bf16.mxu0 %v14332_v9  ;;  %v16536_v13 = vpack.c.bf16 %v4354_v53, %v4322_v52  ;;  %v14362_v52 = vld [vmem:[%s16153_s13 + $0x884] ss:$16 sps:$4 sm:$0xff]  }
 0x307   : > { %10732 = vmatprep.subr.bf16.mxu1 %v14335_v12  ;;  %v14353_v12 = vld [vmem:[%s16153_s13 + $0xac4] ss:$16 sps:$4 sm:$0xff]  }
 0x309   : > { %10690 = vmatpush2.bf16.msra.mxu0 %v14330_v14  ;;  %v16540_v14 = vpack.c.bf16 %v4356_v33, %v4324_v2 }
 0x30a   : > { %10733 = vmatpush2.bf16.msra.mxu1 %v14333_v20  ;;  %10691 = vmatprep.subr.bf16.mxu0 %v14338_v21  ;;  %v14348_v20 = vld [vmem:[%s16153_s13 + $0x8c0] ss:$16 sps:$4 sm:$0xff]  }
 0x30b   : > { %10734 = vmatprep.subr.bf16.mxu1 %v14341_v63  ;;  %v14351_v63 = vld [vmem:[%s16153_s13 + $0xac0] ss:$16 sps:$4 sm:$0xff]  }
 0x30d   : > { %10692 = vmatpush2.bf16.msra.mxu0 %v14336_v16 }
 0x30e   : > { %10735 = vmatpush2.bf16.msra.mxu1 %v14339_v26  ;;  %10747 = vmatprep.subr.bf16.mxu0 %v14344_v47 }
 0x30f   : > { %10790 = vmatprep.subr.bf16.mxu1 %v14347_v43  ;;  %v14354_v43 = vld [vmem:[%s16153_s13 + $0x8a0] ss:$16 sps:$4 sm:$0xff]  }
 0x310   : > { %v4175_v9 = vpop.f32.mrf.mxu0  ;;  %10694 = vmatmul.mubr.bf16.vlgmr.msra.gmra.mxu0 %v16251_v46  ;;  %v4218_v17 = vpop.f32.mrf.mxu1 }
 0x311   : > { %10737 = vmatmul.mubr.bf16.vlgmr.msra.gmra.mxu1 %v16253_v49  ;;  %10748 = vmatpush1.bf16.msra.mxu0 %v14342_v36  ;;  %v4219_v21 = vadd.f32 %v4218_v17, %v1002_v27  ;;  %v4176_v5 = vadd.f32 %v4175_v9, %v994_v7  ;;  %v14357_v36 = vld [vmem:[%s16153_s13 + $0xaa0] ss:$16 sps:$4 sm:$0xff]  }
 0x312   : > { %10779 = vmatprep.mubr.bf16.mxu0 %v16536_v13  ;;  %10791 = vmatpush1.bf16.msra.mxu1 %v14345_v32  ;;  %v16545_v22 = vpop.f32.mrf.mxu0  ;;  %v16550_v16 = vpop.f32.mrf.mxu1  ;;  %v14363_v17 = vld [vmem:[%s16153_s13 + $0xa80] ss:$16 sps:$4 sm:$0xff]  }
 0x313   : > { %10822 = vmatprep.mubr.bf16.mxu1 %v16540_v14  ;;  %10749 = vmatprep.subr.bf16.mxu0 %v14350_v8  ;;  %v4339_v53 = vmax.f32 %v4219_v21, 0.0  ;;  %v4337_v32 = vmax.f32 %v4176_v5, 0.0  ;;  %v14365_v8 = vld [vmem:[%s16153_s13 + $0xa84] ss:$16 sps:$4 sm:$0xff]  }
 0x314   : > { %v4179_v26 = vpop.f32.mrf.mxu0  ;;  %10792 = vmatprep.subr.bf16.mxu1 %v14353_v12  ;;  %v4222_v39 = vpop.f32.mrf.mxu1  ;;  %v14371_v21 = vld [vmem:[%s16153_s13 + $0xa64] ss:$16 sps:$4 sm:$0xff]  }
 0x315   : > { %v4180_v47 = vadd.f32 %v4179_v26, %v994_v7  ;;  %10750 = vmatpush1.bf16.msra.mxu0 %v14348_v20  ;;  %v4223_v33 = vadd.f32 %v4222_v39, %v1002_v27  ;;  %v14360_v27 = vld [vmem:[%s16153_s13 + $0x880] ss:$16 sps:$4 sm:$0xff]   ;;  %v14368_v20 = vld [vmem:[%s16153_s13 + $0x864] ss:$16 sps:$4 sm:$0xff]  }
 0x316   : > { %10793 = vmatpush1.bf16.msra.mxu1 %v14351_v63  ;;  %10751 = vmatprep.subr.bf16.mxu0 %v14356_v24  ;;  %v14366_v63 = vld [vmem:[%s16153_s13 + $0x860] ss:$16 sps:$4 sm:$0xff]   ;;  %v14374_v5 = vld [vmem:[%s16153_s13 + $0x844] ss:$16 sps:$4 sm:$0xff]  }
 0x317   : > { %v4369_v2 = vmax.f32 %v4180_v47, 0.0  ;;  %10794 = vmatprep.subr.bf16.mxu1 %v14359_v41  ;;  %v4371_v7 = vmax.f32 %v4223_v33, 0.0  ;;  %v14369_v24 = vld [vmem:[%s16153_s13 + $0xa60] ss:$16 sps:$4 sm:$0xff]   ;;  %v14377_v41 = vld [vmem:[%s16153_s13 + $0xa44] ss:$16 sps:$4 sm:$0xff]  }
 0x318   : > { %v14372_v26 = vld [vmem:[%s16153_s13 + $0x840] ss:$16 sps:$4 sm:$0xff]   ;;  %v14380_v39 = vld [vmem:[%s16153_s13 + $0x824] ss:$16 sps:$4 sm:$0xff]  }
 0x319   : > { %v16557_v9 = vpack.c.bf16 %v4369_v2, %v4337_v32  ;;  %10752 = vmatpush1.bf16.msra.mxu0 %v14354_v43  ;;  %v16560_v12 = vpack.c.bf16 %v4371_v7, %v4339_v53  ;;  %v14375_v47 = vld [vmem:[%s16153_s13 + $0xa40] ss:$16 sps:$4 sm:$0xff]   ;;  %v14383_v43 = vld [vmem:[%s16153_s13 + $0xa24] ss:$16 sps:$4 sm:$0xff]  }
 0x31a   : > { %10795 = vmatpush1.bf16.msra.mxu1 %v14357_v36  ;;  %10753 = vmatprep.subr.bf16.mxu0 %v14362_v52  ;;  %v14378_v53 = vld [vmem:[%s16153_s13 + $0x820] ss:$16 sps:$4 sm:$0xff]   ;;  %v14386_v36 = vld [vmem:[%s16153_s13 + $0x804] ss:$16 sps:$4 sm:$0xff]  }
 0x31b   : > { %10796 = vmatprep.subr.bf16.mxu1 %v14365_v8  ;;  %v14381_v33 = vld [vmem:[%s16153_s13 + $0xa20] ss:$16 sps:$4 sm:$0xff]   ;;  %v14389_v52 = vld [vmem:[%s16153_s13 + $0xa04] ss:$16 sps:$4 sm:$0xff]  }
 0x31c   : > { %v14384_v32 = vld [vmem:[%s16153_s13 + $0x800] ss:$16 sps:$4 sm:$0xff]   ;;  %v14392_v8 = vld [vmem:[%s16153_s13 + $0x9e4] ss:$16 sps:$4 sm:$0xff]  }
 0x31d   : > { %10754 = vmatpush1.bf16.msra.mxu0 %v14360_v27  ;;  %v14387_v2 = vld [vmem:[%s16153_s13 + $0xa00] ss:$16 sps:$4 sm:$0xff]   ;;  %v14395_v7 = vld [vmem:[%s16153_s13 + $0xbe4] ss:$16 sps:$4 sm:$0xff]  }
 0x31e   : > { %10797 = vmatpush1.bf16.msra.mxu1 %v14363_v17  ;;  %10755 = vmatprep.subr.bf16.mxu0 %v14368_v20  ;;  %v14390_v27 = vld [vmem:[%s16153_s13 + $0x9e0] ss:$16 sps:$4 sm:$0xff]   ;;  %v14398_v20 = vld [vmem:[%s16153_s13 + $0x9c4] ss:$16 sps:$4 sm:$0xff]  }
 0x31f   : > { %10798 = vmatprep.subr.bf16.mxu1 %v14371_v21  ;;  %v14393_v17 = vld [vmem:[%s16153_s13 + $0xbe0] ss:$16 sps:$4 sm:$0xff]   ;;  %v14401_v21 = vld [vmem:[%s16153_s13 + $0xbc4] ss:$16 sps:$4 sm:$0xff]  }
 0x321   : > { %10756 = vmatpush1.bf16.msra.mxu0 %v14366_v63  ;;  %v14396_v63 = vld [vmem:[%s16153_s13 + $0x9c0] ss:$16 sps:$4 sm:$0xff]  }
 0x322   : > { %10799 = vmatpush1.bf16.msra.mxu1 %v14369_v24  ;;  %10757 = vmatprep.subr.bf16.mxu0 %v14374_v5  ;;  %v14399_v24 = vld [vmem:[%s16153_s13 + $0xbc0] ss:$16 sps:$4 sm:$0xff]   ;;  %v14404_v5 = vld [vmem:[%s16153_s13 + $0x9a4] ss:$16 sps:$4 sm:$0xff]  }
 0x323   : > { %10800 = vmatprep.subr.bf16.mxu1 %v14377_v41  ;;  %v14407_v41 = vld [vmem:[%s16153_s13 + $0xba4] ss:$16 sps:$4 sm:$0xff]  }
 0x325   : > { %10758 = vmatpush1.bf16.msra.mxu0 %v14372_v26  ;;  %v14402_v26 = vld [vmem:[%s16153_s13 + $0x9a0] ss:$16 sps:$4 sm:$0xff]  }
 0x326   : > { %10801 = vmatpush1.bf16.msra.mxu1 %v14375_v47  ;;  %10759 = vmatprep.subr.bf16.mxu0 %v14380_v39  ;;  %v14405_v47 = vld [vmem:[%s16153_s13 + $0xba0] ss:$16 sps:$4 sm:$0xff]   ;;  %v14410_v39 = vld [vmem:[%s16153_s13 + $0x984] ss:$16 sps:$4 sm:$0xff]  }
 0x327   : > { %10802 = vmatprep.subr.bf16.mxu1 %v14383_v43  ;;  %v14413_v43 = vld [vmem:[%s16153_s13 + $0xb84] ss:$16 sps:$4 sm:$0xff]  }
 0x329   : > { %10760 = vmatpush1.bf16.msra.mxu0 %v14378_v53  ;;  %v14408_v53 = vld [vmem:[%s16153_s13 + $0x980] ss:$16 sps:$4 sm:$0xff]  }
 0x32a   : > { %10803 = vmatpush1.bf16.msra.mxu1 %v14381_v33  ;;  %10761 = vmatprep.subr.bf16.mxu0 %v14386_v36  ;;  %v14411_v33 = vld [vmem:[%s16153_s13 + $0xb80] ss:$16 sps:$4 sm:$0xff]   ;;  %v14416_v36 = vld [vmem:[%s16153_s13 + $0x964] ss:$16 sps:$4 sm:$0xff]  }
 0x32b   : > { %10804 = vmatprep.subr.bf16.mxu1 %v14389_v52  ;;  %v14419_v52 = vld [vmem:[%s16153_s13 + $0xb64] ss:$16 sps:$4 sm:$0xff]  }
 0x32d   : > { %10762 = vmatpush1.bf16.msra.mxu0 %v14384_v32  ;;  %v14414_v32 = vld [vmem:[%s16153_s13 + $0x960] ss:$16 sps:$4 sm:$0xff]  }
 0x32e   : > { %10805 = vmatpush1.bf16.msra.mxu1 %v14387_v2  ;;  %10763 = vmatprep.subr.bf16.mxu0 %v14392_v8  ;;  %v14417_v2 = vld [vmem:[%s16153_s13 + $0xb60] ss:$16 sps:$4 sm:$0xff]   ;;  %v14422_v8 = vld [vmem:[%s16153_s13 + $0x944] ss:$16 sps:$4 sm:$0xff]  }
 0x32f   : > { %10806 = vmatprep.subr.bf16.mxu1 %v14395_v7  ;;  %v14425_v7 = vld [vmem:[%s16153_s13 + $0xb44] ss:$16 sps:$4 sm:$0xff]  }
 0x331   : > { %10764 = vmatpush2.bf16.msra.mxu0 %v14390_v27  ;;  %v14420_v27 = vld [vmem:[%s16153_s13 + $0x940] ss:$16 sps:$4 sm:$0xff]  }
 0x332   : > { %10807 = vmatpush2.bf16.msra.mxu1 %v14393_v17  ;;  %10765 = vmatprep.subr.bf16.mxu0 %v14398_v20  ;;  %v14423_v17 = vld [vmem:[%s16153_s13 + $0xb40] ss:$16 sps:$4 sm:$0xff]   ;;  %v14428_v20 = vld [vmem:[%s16153_s13 + $0x924] ss:$16 sps:$4 sm:$0xff]  }
 0x333   : > { %10808 = vmatprep.subr.bf16.mxu1 %v14401_v21  ;;  %v14431_v21 = vld [vmem:[%s16153_s13 + $0xb24] ss:$16 sps:$4 sm:$0xff]  }
 0x335   : > { %10766 = vmatpush2.bf16.msra.mxu0 %v14396_v63  ;;  %v14426_v63 = vld [vmem:[%s16153_s13 + $0x920] ss:$16 sps:$4 sm:$0xff]  }
 0x336   : > { %10809 = vmatpush2.bf16.msra.mxu1 %v14399_v24  ;;  %10767 = vmatprep.subr.bf16.mxu0 %v14404_v5  ;;  %v950_v24 = vrot.slane %v16506_v15, %v16401_v45  ;;  %v14429_v5 = vld [vmem:[%s16153_s13 + $0xb20] ss:$16 sps:$4 sm:$0xff]  }
 0x337   : > { %10810 = vmatprep.subr.bf16.mxu1 %v14407_v41  ;;  %v14434_v41 = vld [vmem:[%s16153_s13 + $0x904] ss:$16 sps:$4 sm:$0xff]  }
 0x339   : > { %10768 = vmatpush2.bf16.msra.mxu0 %v14402_v26  ;;  %v958_v26 = vrot.slane %v16506_v15, %v16406_v58  ;;  %v14443_v15 = vld [vmem:[%s16153_s13 + $0xee4] ss:$16 sps:$4 sm:$0xff]  }
 0x33a   : > { %10811 = vmatpush2.bf16.msra.mxu1 %v14405_v47  ;;  %10769 = vmatprep.subr.bf16.mxu0 %v14410_v39  ;;  %v14437_v47 = vld [vmem:[%s16153_s13 + $0xb04] ss:$16 sps:$4 sm:$0xff]   ;;  %v3924_v39 = vadd.f32 %v16326_v30, %v950_v24  ;;  %v14438_v30 = vld [vmem:[%s16153_s13 + $0xce0] ss:$16 sps:$4 sm:$0xff]  }
 0x33b   : > { %10812 = vmatprep.subr.bf16.mxu1 %v14413_v43  ;;  %v3967_v43 = vadd.f32 %v16331_v38, %v958_v26 }
 0x33d   : > { %10770 = vmatpush2.bf16.msra.mxu0 %v14408_v53  ;;  %v14432_v53 = vld [vmem:[%s16153_s13 + $0x900] ss:$16 sps:$4 sm:$0xff]  }
 0x33e   : > { %10813 = vmatpush2.bf16.msra.mxu1 %v14411_v33  ;;  %10771 = vmatprep.subr.bf16.mxu0 %v14416_v36  ;;  %v3920_v33 = vadd.f32 %v16292_v25, %v950_v24  ;;  %v14435_v36 = vld [vmem:[%s16153_s13 + $0xb00] ss:$16 sps:$4 sm:$0xff]   ;;  %v1018_v25 = vrot.slane %v16523_v48, %v16220_v51 }
 0x33f   : > { %10814 = vmatprep.subr.bf16.mxu1 %v14419_v52  ;;  %v14440_v52 = vld [vmem:[%s16153_s13 + $0xce4] ss:$16 sps:$4 sm:$0xff]  }
 0x340   : > { %v4326_v38 = vmax.f32 %v3920_v33, 0.0  ;;  %v14455_v33 = vld [vmem:[%s16153_s13 + $0xea4] ss:$16 sps:$4 sm:$0xff]  }
 0x341   : > { %10772 = vmatpush2.bf16.msra.mxu0 %v14414_v32  ;;  %v3963_v32 = vadd.f32 %v16294_v55, %v958_v26  ;;  %v16627_v55 = vpop.f32.mrf.mxu1  ;;  %v14444_v26 = vld [vmem:[%s16153_s13 + $0xcc0] ss:$16 sps:$4 sm:$0xff]  }
 0x342   : > { %10815 = vmatpush2.bf16.msra.mxu1 %v14417_v2  ;;  %10773 = vmatprep.subr.bf16.mxu0 %v14422_v8  ;;  %v4358_v2 = vmax.f32 %v3924_v39, 0.0  ;;  %v4360_v8 = vmax.f32 %v3967_v43, 0.0  ;;  %v14452_v39 = vld [vmem:[%s16153_s13 + $0xca4] ss:$16 sps:$4 sm:$0xff]  }
 0x343   : > { %10816 = vmatprep.subr.bf16.mxu1 %v14425_v7  ;;  %v16622_v7 = vpop.f32.mrf.mxu0 }
 0x345   : > { %10774 = vmatpush2.bf16.msra.mxu0 %v14420_v27  ;;  %v14441_v27 = vld [vmem:[%s16153_s13 + $0xee0] ss:$16 sps:$4 sm:$0xff]  }
 0x346   : > { %10817 = vmatpush2.bf16.msra.mxu1 %v14423_v17  ;;  %10775 = vmatprep.subr.bf16.mxu0 %v14428_v20  ;;  %v4328_v17 = vmax.f32 %v3963_v32, 0.0  ;;  %v1010_v20 = vrot.slane %v16523_v48, %v16223_v57  ;;  %v14447_v48 = vld [vmem:[%s16153_s13 + $0xec0] ss:$16 sps:$4 sm:$0xff]  }
 0x347   : > { %10818 = vmatprep.subr.bf16.mxu1 %v14431_v21  ;;  %v14446_v21 = vld [vmem:[%s16153_s13 + $0xcc4] ss:$16 sps:$4 sm:$0xff]  }
 0x348   : > { %v16636_v51 = vpack.c.bf16 %v4360_v8, %v4328_v17 }
 0x349   : > { %10776 = vmatpush2.bf16.msra.mxu0 %v14426_v63  ;;  %v16632_v63 = vpack.c.bf16 %v4358_v2, %v4326_v38  ;;  %v14458_v38 = vld [vmem:[%s16153_s13 + $0xc84] ss:$16 sps:$4 sm:$0xff]  }
 0x34a   : > { %10819 = vmatpush2.bf16.msra.mxu1 %v14429_v5  ;;  %10777 = vmatprep.subr.bf16.mxu0 %v14434_v41  ;;  %v14449_v5 = vld [vmem:[%s16153_s13 + $0xec4] ss:$16 sps:$4 sm:$0xff]  }
 0x34b   : > { %10820 = vmatprep.subr.bf16.mxu1 %v14437_v47 }
 0x34d   : > { %10778 = vmatpush2.bf16.msra.mxu0 %v14432_v53 }
 0x34e   : > { %10821 = vmatpush2.bf16.msra.mxu1 %v14435_v36  ;;  %10833 = vmatprep.subr.bf16.mxu0 %v14440_v52 }
 0x34f   : > { %10876 = vmatprep.subr.bf16.mxu1 %v14443_v15  ;;  %v14450_v15 = vld [vmem:[%s16153_s13 + $0xca0] ss:$16 sps:$4 sm:$0xff]  }
 0x350   : > { %v4261_v24 = vpop.f32.mrf.mxu0  ;;  %10780 = vmatmul.mubr.bf16.vlgmr.msra.gmra.mxu0 %v16273_v29  ;;  %v4304_v41 = vpop.f32.mrf.mxu1 }
 0x351   : > { %10823 = vmatmul.mubr.bf16.vlgmr.msra.gmra.mxu1 %v16275_v60  ;;  %10834 = vmatpush1.bf16.msra.mxu0 %v14438_v30  ;;  %v4305_v47 = vadd.f32 %v4304_v41, %v1018_v25  ;;  %v4262_v43 = vadd.f32 %v4261_v24, %v1010_v20  ;;  %v14453_v30 = vld [vmem:[%s16153_s13 + $0xea0] ss:$16 sps:$4 sm:$0xff]  }
 0x352   : > { %10865 = vmatprep.mubr.bf16.mxu0 %v16632_v63  ;;  %10877 = vmatpush1.bf16.msra.mxu1 %v14441_v27  ;;  %v16641_v57 = vpop.f32.mrf.mxu0  ;;  %v16646_v53 = vpop.f32.mrf.mxu1  ;;  %v14459_v41 = vld [vmem:[%s16153_s13 + $0xe80] ss:$16 sps:$4 sm:$0xff]  }
 0x353   : > { %10908 = vmatprep.mubr.bf16.mxu1 %v16636_v51  ;;  %10835 = vmatprep.subr.bf16.mxu0 %v14446_v21  ;;  %v4343_v2 = vmax.f32 %v4305_v47, 0.0  ;;  %v4341_v27 = vmax.f32 %v4262_v43, 0.0  ;;  %v14461_v21 = vld [vmem:[%s16153_s13 + $0xe84] ss:$16 sps:$4 sm:$0xff]  }
 0x354   : > { %v4265_v36 = vpop.f32.mrf.mxu0  ;;  %10878 = vmatprep.subr.bf16.mxu1 %v14449_v5  ;;  %v4308_v32 = vpop.f32.mrf.mxu1  ;;  %v14467_v47 = vld [vmem:[%s16153_s13 + $0xe64] ss:$16 sps:$4 sm:$0xff]  }
 0x355   : > { %v4266_v52 = vadd.f32 %v4265_v36, %v1010_v20  ;;  %10836 = vmatpush1.bf16.msra.mxu0 %v14444_v26  ;;  %v4309_v8 = vadd.f32 %v4308_v32, %v1018_v25  ;;  %v14456_v25 = vld [vmem:[%s16153_s13 + $0xc80] ss:$16 sps:$4 sm:$0xff]   ;;  %v14464_v26 = vld [vmem:[%s16153_s13 + $0xc64] ss:$16 sps:$4 sm:$0xff]  }
 0x356   : > { %10879 = vmatpush1.bf16.msra.mxu1 %v14447_v48  ;;  %10837 = vmatprep.subr.bf16.mxu0 %v14452_v39  ;;  %v14462_v48 = vld [vmem:[%s16153_s13 + $0xc60] ss:$16 sps:$4 sm:$0xff]   ;;  %v14470_v43 = vld [vmem:[%s16153_s13 + $0xc44] ss:$16 sps:$4 sm:$0xff]  }
 0x357   : > { %v4373_v17 = vmax.f32 %v4266_v52, 0.0  ;;  %10880 = vmatprep.subr.bf16.mxu1 %v14455_v33  ;;  %v4375_v20 = vmax.f32 %v4309_v8, 0.0  ;;  %v14465_v39 = vld [vmem:[%s16153_s13 + $0xe60] ss:$16 sps:$4 sm:$0xff]   ;;  %v14473_v33 = vld [vmem:[%s16153_s13 + $0xe44] ss:$16 sps:$4 sm:$0xff]  }
 0x358   : > { %v14468_v36 = vld [vmem:[%s16153_s13 + $0xc40] ss:$16 sps:$4 sm:$0xff]   ;;  %v14476_v32 = vld [vmem:[%s16153_s13 + $0xc24] ss:$16 sps:$4 sm:$0xff]  }
 0x359   : > { %v16653_v24 = vpack.c.bf16 %v4373_v17, %v4341_v27  ;;  %10838 = vmatpush1.bf16.msra.mxu0 %v14450_v15  ;;  %v16656_v5 = vpack.c.bf16 %v4375_v20, %v4343_v2  ;;  %v14471_v52 = vld [vmem:[%s16153_s13 + $0xe40] ss:$16 sps:$4 sm:$0xff]   ;;  %v14479_v15 = vld [vmem:[%s16153_s13 + $0xe24] ss:$16 sps:$4 sm:$0xff]  }
 0x35a   : > { %10881 = vmatpush1.bf16.msra.mxu1 %v14453_v30  ;;  %10839 = vmatprep.subr.bf16.mxu0 %v14458_v38  ;;  %v14474_v2 = vld [vmem:[%s16153_s13 + $0xc20] ss:$16 sps:$4 sm:$0xff]   ;;  %v14482_v30 = vld [vmem:[%s16153_s13 + $0xc04] ss:$16 sps:$4 sm:$0xff]  }
 0x35b   : > { %10882 = vmatprep.subr.bf16.mxu1 %v14461_v21  ;;  %v14477_v8 = vld [vmem:[%s16153_s13 + $0xe20] ss:$16 sps:$4 sm:$0xff]   ;;  %v14485_v38 = vld [vmem:[%s16153_s13 + $0xe04] ss:$16 sps:$4 sm:$0xff]  }
 0x35c   : > { %v14480_v27 = vld [vmem:[%s16153_s13 + $0xc00] ss:$16 sps:$4 sm:$0xff]   ;;  %v14488_v21 = vld [vmem:[%s16153_s13 + $0xde4] ss:$16 sps:$4 sm:$0xff]  }
 0x35d   : > { %10840 = vmatpush1.bf16.msra.mxu0 %v14456_v25  ;;  %v14483_v17 = vld [vmem:[%s16153_s13 + $0xe00] ss:$16 sps:$4 sm:$0xff]   ;;  %v14491_v20 = vld [vmem:[%s16153_s13 + $0xfe4] ss:$16 sps:$4 sm:$0xff]  }
 0x35e   : > { %10883 = vmatpush1.bf16.msra.mxu1 %v14459_v41  ;;  %10841 = vmatprep.subr.bf16.mxu0 %v14464_v26  ;;  %v14486_v25 = vld [vmem:[%s16153_s13 + $0xde0] ss:$16 sps:$4 sm:$0xff]   ;;  %v14494_v26 = vld [vmem:[%s16153_s13 + $0xdc4] ss:$16 sps:$4 sm:$0xff]  }
 0x35f   : > { %10884 = vmatprep.subr.bf16.mxu1 %v14467_v47  ;;  %v14489_v41 = vld [vmem:[%s16153_s13 + $0xfe0] ss:$16 sps:$4 sm:$0xff]   ;;  %v14497_v47 = vld [vmem:[%s16153_s13 + $0xfc4] ss:$16 sps:$4 sm:$0xff]  }
 0x361   : > { %10842 = vmatpush1.bf16.msra.mxu0 %v14462_v48  ;;  %v14492_v48 = vld [vmem:[%s16153_s13 + $0xdc0] ss:$16 sps:$4 sm:$0xff]  }
 0x362   : > { %10885 = vmatpush1.bf16.msra.mxu1 %v14465_v39  ;;  %10843 = vmatprep.subr.bf16.mxu0 %v14470_v43  ;;  %v14495_v39 = vld [vmem:[%s16153_s13 + $0xfc0] ss:$16 sps:$4 sm:$0xff]   ;;  %v14500_v43 = vld [vmem:[%s16153_s13 + $0xda4] ss:$16 sps:$4 sm:$0xff]  }
 0x363   : > { %10886 = vmatprep.subr.bf16.mxu1 %v14473_v33  ;;  %v14503_v33 = vld [vmem:[%s16153_s13 + $0xfa4] ss:$16 sps:$4 sm:$0xff]  }
 0x365   : > { %10844 = vmatpush1.bf16.msra.mxu0 %v14468_v36  ;;  %v14498_v36 = vld [vmem:[%s16153_s13 + $0xda0] ss:$16 sps:$4 sm:$0xff]  }
 0x366   : > { %10887 = vmatpush1.bf16.msra.mxu1 %v14471_v52  ;;  %10845 = vmatprep.subr.bf16.mxu0 %v14476_v32  ;;  %v14501_v52 = vld [vmem:[%s16153_s13 + $0xfa0] ss:$16 sps:$4 sm:$0xff]   ;;  %v14506_v32 = vld [vmem:[%s16153_s13 + $0xd84] ss:$16 sps:$4 sm:$0xff]  }
 0x367   : > { %10888 = vmatprep.subr.bf16.mxu1 %v14479_v15  ;;  %v14509_v15 = vld [vmem:[%s16153_s13 + $0xf84] ss:$16 sps:$4 sm:$0xff]  }
 0x369   : > { %10846 = vmatpush1.bf16.msra.mxu0 %v14474_v2  ;;  %v14504_v2 = vld [vmem:[%s16153_s13 + $0xd80] ss:$16 sps:$4 sm:$0xff]  }
 0x36a   : > { %10889 = vmatpush1.bf16.msra.mxu1 %v14477_v8  ;;  %10847 = vmatprep.subr.bf16.mxu0 %v14482_v30  ;;  %v14507_v8 = vld [vmem:[%s16153_s13 + $0xf80] ss:$16 sps:$4 sm:$0xff]   ;;  %v14512_v30 = vld [vmem:[%s16153_s13 + $0xd64] ss:$16 sps:$4 sm:$0xff]  }
 0x36b   : > { %10890 = vmatprep.subr.bf16.mxu1 %v14485_v38  ;;  %v14515_v38 = vld [vmem:[%s16153_s13 + $0xf64] ss:$16 sps:$4 sm:$0xff]  }
 0x36d   : > { %10848 = vmatpush1.bf16.msra.mxu0 %v14480_v27  ;;  %v14510_v27 = vld [vmem:[%s16153_s13 + $0xd60] ss:$16 sps:$4 sm:$0xff]  }
 0x36e   : > { %10891 = vmatpush1.bf16.msra.mxu1 %v14483_v17  ;;  %10849 = vmatprep.subr.bf16.mxu0 %v14488_v21  ;;  %v14513_v17 = vld [vmem:[%s16153_s13 + $0xf60] ss:$16 sps:$4 sm:$0xff]   ;;  %v14518_v21 = vld [vmem:[%s16153_s13 + $0xd44] ss:$16 sps:$4 sm:$0xff]  }
 0x36f   : > { %10892 = vmatprep.subr.bf16.mxu1 %v14491_v20  ;;  %v14521_v20 = vld [vmem:[%s16153_s13 + $0xf44] ss:$16 sps:$4 sm:$0xff]  }
 0x371   : > { %10850 = vmatpush2.bf16.msra.mxu0 %v14486_v25  ;;  %v14516_v25 = vld [vmem:[%s16153_s13 + $0xd40] ss:$16 sps:$4 sm:$0xff]  }
 0x372   : > { %10893 = vmatpush2.bf16.msra.mxu1 %v14489_v41  ;;  %10851 = vmatprep.subr.bf16.mxu0 %v14494_v26  ;;  %v14519_v41 = vld [vmem:[%s16153_s13 + $0xf40] ss:$16 sps:$4 sm:$0xff]   ;;  %v14524_v26 = vld [vmem:[%s16153_s13 + $0xd24] ss:$16 sps:$4 sm:$0xff]  }
 0x373   : > { %10894 = vmatprep.subr.bf16.mxu1 %v14497_v47  ;;  %v14527_v47 = vld [vmem:[%s16153_s13 + $0xf24] ss:$16 sps:$4 sm:$0xff]  }
 0x375   : > { %10852 = vmatpush2.bf16.msra.mxu0 %v14492_v48  ;;  %v14522_v48 = vld [vmem:[%s16153_s13 + $0xd20] ss:$16 sps:$4 sm:$0xff]  }
 0x376   : > { %10895 = vmatpush2.bf16.msra.mxu1 %v14495_v39  ;;  %10853 = vmatprep.subr.bf16.mxu0 %v14500_v43  ;;  %v16703_v39 = vld [vmem:[#allocation4 + $0x10] sm:$0xff] }
 0x377   : > { %10896 = vmatprep.subr.bf16.mxu1 %v14503_v33  ;;  %v966_v43 = vrot.slane %v16703_v39, %v16304_v44  ;;  %v14525_v33 = vld [vmem:[%s16153_s13 + $0xf20] ss:$16 sps:$4 sm:$0xff]  }
 0x379   : > { %10854 = vmatpush2.bf16.msra.mxu0 %v14498_v36  ;;  %v14530_v36 = vld [vmem:[%s16153_s13 + $0xd04] ss:$16 sps:$4 sm:$0xff]  }
 0x37a   : > { %10897 = vmatpush2.bf16.msra.mxu1 %v14501_v52  ;;  %10855 = vmatprep.subr.bf16.mxu0 %v14506_v32  ;;  %v974_v52 = vrot.slane %v16703_v39, %v16307_v54  ;;  %v14533_v32 = vld [vmem:[%s16153_s13 + $0xf04] ss:$16 sps:$4 sm:$0xff]  }
 0x37b   : > { %10898 = vmatprep.subr.bf16.mxu1 %v14509_v15  ;;  %v4010_v15 = vadd.f32 %v16427_v6, %v966_v43  ;;  %v14539_v6 = vld [vmem:[%s16153_s13 + $0x12e4] ss:$16 sps:$4 sm:$0xff]  }
 0x37d   : > { %10856 = vmatpush2.bf16.msra.mxu0 %v14504_v2  ;;  %v4053_v2 = vadd.f32 %v16431_v31, %v974_v52  ;;  %v4362_v31 = vmax.f32 %v4010_v15, 0.0  ;;  %v14540_v15 = vld [vmem:[%s16153_s13 + $0x10c0] ss:$16 sps:$4 sm:$0xff]  }
 0x37e   : > { %10899 = vmatpush2.bf16.msra.mxu1 %v14507_v8  ;;  %10857 = vmatprep.subr.bf16.mxu0 %v14512_v30  ;;  %v14528_v8 = vld [vmem:[%s16153_s13 + $0xd00] ss:$16 sps:$4 sm:$0xff]   ;;  %v4006_v30 = vadd.f32 %v16346_v59, %v966_v43 }
 0x37f   : > { %10900 = vmatprep.subr.bf16.mxu1 %v14515_v38  ;;  %v14531_v38 = vld [vmem:[%s16153_s13 + $0xf00] ss:$16 sps:$4 sm:$0xff]  }
 0x381   : > { %10858 = vmatpush2.bf16.msra.mxu0 %v14510_v27  ;;  %v5433_v27 = vld [vmem:[%s16717_s16] sm:$0xf] }
 0x382   : > { %10901 = vmatpush2.bf16.msra.mxu1 %v14513_v17  ;;  %10859 = vmatprep.subr.bf16.mxu0 %v14518_v21  ;;  %v14536_v17 = vld [vmem:[%s16153_s13 + $0x10e4] ss:$16 sps:$4 sm:$0xff]   ;;  %v4049_v21 = vadd.f32 %v16349_v1, %v974_v52  ;;  %v16724_v59 = vrot.slane %v5433_v27, %v16201_v23 }
 0x383   : > { %10902 = vmatprep.subr.bf16.mxu1 %v14521_v20  ;;  %v4364_v20 = vmax.f32 %v4053_v2, 0.0  ;;  %v14542_v1 = vld [vmem:[%s16153_s13 + $0x10c4] ss:$16 sps:$4 sm:$0xff]  }
 0x384   : > { %v14545_v23 = vld [vmem:[%s16153_s13 + $0x12c4] ss:$16 sps:$4 sm:$0xff]  }
 0x385   : > { %10860 = vmatpush2.bf16.msra.mxu0 %v14516_v25  ;;  %v14534_v25 = vld [vmem:[%s16153_s13 + $0x10e0] ss:$16 sps:$4 sm:$0xff]   ;;  %v14551_v27 = vld [vmem:[%s16153_s13 + $0x12a4] ss:$16 sps:$4 sm:$0xff]  }
 0x386   : > { %10903 = vmatpush2.bf16.msra.mxu1 %v14519_v41  ;;  %10861 = vmatprep.subr.bf16.mxu0 %v14524_v26  ;;  %v4330_v41 = vmax.f32 %v4006_v30, 0.0  ;;  %v16727_v26 = vpop.f32.mrf.mxu0  ;;  %v14548_v30 = vld [vmem:[%s16153_s13 + $0x10a4] ss:$16 sps:$4 sm:$0xff]  }
 0x387   : > { %10904 = vmatprep.subr.bf16.mxu1 %v14527_v47  ;;  %v14537_v47 = vld [vmem:[%s16153_s13 + $0x12e0] ss:$16 sps:$4 sm:$0xff]  }
 0x388   : > { %v16731_v43 = vpack.c.bf16 %v4362_v31, %v4330_v41  ;;  %v14557_v31 = vld [vmem:[%s16153_s13 + $0x1284] ss:$16 sps:$4 sm:$0xff]  }
 0x389   : > { %10862 = vmatpush2.bf16.msra.mxu0 %v14522_v48  ;;  %v4332_v48 = vmax.f32 %v4049_v21, 0.0  ;;  %v14549_v21 = vld [vmem:[%s16153_s13 + $0x12a0] ss:$16 sps:$4 sm:$0xff]   ;;  %v14560_v41 = vld [vmem:[%s16153_s13 + $0x1064] ss:$16 sps:$4 sm:$0xff]  }
 0x38a   : > { %10905 = vmatpush2.bf16.msra.mxu1 %v14525_v33  ;;  %10863 = vmatprep.subr.bf16.mxu0 %v14530_v36  ;;  %v16733_v33 = vpop.f32.mrf.mxu1 }
 0x38b   : > { %10906 = vmatprep.subr.bf16.mxu1 %v14533_v32  ;;  %v16737_v52 = vpack.c.bf16 %v4364_v20, %v4332_v48  ;;  %v14552_v20 = vld [vmem:[%s16153_s13 + $0x1080] ss:$16 sps:$4 sm:$0xff]  }
 0x38c   : > { %v14558_v48 = vld [vmem:[%s16153_s13 + $0x1060] ss:$16 sps:$4 sm:$0xff]  }
 0x38d   : > { %10864 = vmatpush2.bf16.msra.mxu0 %v14528_v8  ;;  %v14543_v8 = vld [vmem:[%s16153_s13 + $0x12c0] ss:$16 sps:$4 sm:$0xff]  }
 0x38e   : > { %10907 = vmatpush2.bf16.msra.mxu1 %v14531_v38  ;;  %10919 = vmatprep.subr.bf16.mxu0 %v14536_v17  ;;  %v14546_v17 = vld [vmem:[%s16153_s13 + $0x10a0] ss:$16 sps:$4 sm:$0xff]  }
 0x38f   : > { %10962 = vmatprep.subr.bf16.mxu1 %v14539_v6  ;;  %v14554_v6 = vld [vmem:[%s16153_s13 + $0x1084] ss:$16 sps:$4 sm:$0xff]  }
 0x390   : > { %v10609_v36 = vpop.f32.mrf.mxu0  ;;  %10866 = vmatmul.mubr.bf16.vlgmr.msra.gmra.mxu0 %v16299_v11 }
 0x391   : > { %v10610_v32 = vadd.f32 %v10609_v36, %v16724_v59  ;;  %10909 = vmatmul.mubr.bf16.vlgmr.msra.gmra.mxu1 %v16301_v37  ;;  %10920 = vmatpush1.bf16.msra.mxu0 %v14534_v25  ;;  %v10652_v2 = vpop.f32.mrf.mxu1  ;;  %v14555_v25 = vld [vmem:[%s16153_s13 + $0x1280] ss:$16 sps:$4 sm:$0xff]   ;;  %v14566_v36 = vld [vmem:[%s16153_s13 + $0x1044] ss:$16 sps:$4 sm:$0xff]  }
 0x392   : > { %10951 = vmatprep.mubr.bf16.mxu0 %v16731_v43  ;;  %10963 = vmatpush1.bf16.msra.mxu1 %v14537_v47  ;;  %v14563_v47 = vld [vmem:[%s16153_s13 + $0x1264] ss:$16 sps:$4 sm:$0xff]  }
 0x393   : > { %v16745_v38 = vadd.f32 %v10652_v2, %v10610_v32  ;;  %10994 = vmatprep.mubr.bf16.mxu1 %v16737_v52  ;;  %10921 = vmatprep.subr.bf16.mxu0 %v14542_v1  ;;  %v14561_v1 = vld [vmem:[%s16153_s13 + $0x1260] ss:$16 sps:$4 sm:$0xff]   ;;  %v14572_v2 = vld [vmem:[%s16153_s13 + $0x1024] ss:$16 sps:$4 sm:$0xff]  }
 0x394   : > { %10964 = vmatprep.subr.bf16.mxu1 %v14545_v23  ;;  %v14569_v23 = vld [vmem:[%s16153_s13 + $0x1244] ss:$16 sps:$4 sm:$0xff]   ;;  %v14564_v32 = vld [vmem:[%s16153_s13 + $0x1040] ss:$16 sps:$4 sm:$0xff]  }
 0x395   : > { %10922 = vmatpush1.bf16.msra.mxu0 %v14540_v15  ;;  %v14567_v15 = vld [vmem:[%s16153_s13 + $0x1240] ss:$16 sps:$4 sm:$0xff]  }
 0x396   : > { %10965 = vmatpush1.bf16.msra.mxu1 %v14543_v8  ;;  %10923 = vmatprep.subr.bf16.mxu0 %v14548_v30  ;;  %v14575_v8 = vld [vmem:[%s16153_s13 + $0x1224] ss:$16 sps:$4 sm:$0xff]   ;;  %v14570_v30 = vld [vmem:[%s16153_s13 + $0x1020] ss:$16 sps:$4 sm:$0xff]  }
 0x397   : > { %10966 = vmatprep.subr.bf16.mxu1 %v14551_v27  ;;  %v14573_v27 = vld [vmem:[%s16153_s13 + $0x1220] ss:$16 sps:$4 sm:$0xff]  }
 0x399   : > { %10924 = vmatpush1.bf16.msra.mxu0 %v14546_v17  ;;  %v14578_v17 = vld [vmem:[%s16153_s13 + $0x1004] ss:$16 sps:$4 sm:$0xff]  }
 0x39a   : > { %10967 = vmatpush1.bf16.msra.mxu1 %v14549_v21  ;;  %10925 = vmatprep.subr.bf16.mxu0 %v14554_v6  ;;  %v14581_v21 = vld [vmem:[%s16153_s13 + $0x1204] ss:$16 sps:$4 sm:$0xff]   ;;  %v14576_v6 = vld [vmem:[%s16153_s13 + $0x1000] ss:$16 sps:$4 sm:$0xff]  }
 0x39b   : > { %10968 = vmatprep.subr.bf16.mxu1 %v14557_v31  ;;  %v14579_v31 = vld [vmem:[%s16153_s13 + $0x1200] ss:$16 sps:$4 sm:$0xff]  }
 0x39d   : > { %10926 = vmatpush1.bf16.msra.mxu0 %v14552_v20  ;;  %v14584_v20 = vld [vmem:[%s16153_s13 + $0x11e4] ss:$16 sps:$4 sm:$0xff]  }
 0x39e   : > { %10969 = vmatpush1.bf16.msra.mxu1 %v14555_v25  ;;  %10927 = vmatprep.subr.bf16.mxu0 %v14560_v41  ;;  %v14587_v25 = vld [vmem:[%s16153_s13 + $0x13e4] ss:$16 sps:$4 sm:$0xff]   ;;  %v14582_v41 = vld [vmem:[%s16153_s13 + $0x11e0] ss:$16 sps:$4 sm:$0xff]  }
 0x39f   : > { %10970 = vmatprep.subr.bf16.mxu1 %v14563_v47  ;;  %v14585_v47 = vld [vmem:[%s16153_s13 + $0x13e0] ss:$16 sps:$4 sm:$0xff]  }
 0x3a1   : > { %10928 = vmatpush1.bf16.msra.mxu0 %v14558_v48  ;;  %v14590_v48 = vld [vmem:[%s16153_s13 + $0x11c4] ss:$16 sps:$4 sm:$0xff]  }
 0x3a2   : > { %10971 = vmatpush1.bf16.msra.mxu1 %v14561_v1  ;;  %10929 = vmatprep.subr.bf16.mxu0 %v14566_v36  ;;  %v14593_v1 = vld [vmem:[%s16153_s13 + $0x13c4] ss:$16 sps:$4 sm:$0xff]   ;;  %v14588_v36 = vld [vmem:[%s16153_s13 + $0x11c0] ss:$16 sps:$4 sm:$0xff]  }
 0x3a3   : > { %10972 = vmatprep.subr.bf16.mxu1 %v14569_v23  ;;  %v14591_v23 = vld [vmem:[%s16153_s13 + $0x13c0] ss:$16 sps:$4 sm:$0xff]  }
 0x3a5   : > { %10930 = vmatpush1.bf16.msra.mxu0 %v14564_v32  ;;  %v14596_v32 = vld [vmem:[%s16153_s13 + $0x11a4] ss:$16 sps:$4 sm:$0xff]  }
 0x3a6   : > { %10973 = vmatpush1.bf16.msra.mxu1 %v14567_v15  ;;  %10931 = vmatprep.subr.bf16.mxu0 %v14572_v2  ;;  %v14599_v15 = vld [vmem:[%s16153_s13 + $0x13a4] ss:$16 sps:$4 sm:$0xff]   ;;  %v14594_v2 = vld [vmem:[%s16153_s13 + $0x11a0] ss:$16 sps:$4 sm:$0xff]  }
 0x3a7   : > { %10974 = vmatprep.subr.bf16.mxu1 %v14575_v8  ;;  %v14597_v8 = vld [vmem:[%s16153_s13 + $0x13a0] ss:$16 sps:$4 sm:$0xff]  }
 0x3a9   : > { %10932 = vmatpush1.bf16.msra.mxu0 %v14570_v30  ;;  %v14602_v30 = vld [vmem:[%s16153_s13 + $0x1184] ss:$16 sps:$4 sm:$0xff]  }
 0x3aa   : > { %10975 = vmatpush1.bf16.msra.mxu1 %v14573_v27  ;;  %10933 = vmatprep.subr.bf16.mxu0 %v14578_v17  ;;  %v14605_v27 = vld [vmem:[%s16153_s13 + $0x1384] ss:$16 sps:$4 sm:$0xff]   ;;  %v14600_v17 = vld [vmem:[%s16153_s13 + $0x1180] ss:$16 sps:$4 sm:$0xff]  }
 0x3ab   : > { %10976 = vmatprep.subr.bf16.mxu1 %v14581_v21  ;;  %v14603_v21 = vld [vmem:[%s16153_s13 + $0x1380] ss:$16 sps:$4 sm:$0xff]  }
 0x3ad   : > { %10934 = vmatpush1.bf16.msra.mxu0 %v14576_v6  ;;  %v14608_v6 = vld [vmem:[%s16153_s13 + $0x1164] ss:$16 sps:$4 sm:$0xff]  }
 0x3ae   : > { %10977 = vmatpush1.bf16.msra.mxu1 %v14579_v31  ;;  %10935 = vmatprep.subr.bf16.mxu0 %v14584_v20  ;;  %v14611_v31 = vld [vmem:[%s16153_s13 + $0x1364] ss:$16 sps:$4 sm:$0xff]   ;;  %v14606_v20 = vld [vmem:[%s16153_s13 + $0x1160] ss:$16 sps:$4 sm:$0xff]  }
 0x3af   : > { %10978 = vmatprep.subr.bf16.mxu1 %v14587_v25  ;;  %v14609_v25 = vld [vmem:[%s16153_s13 + $0x1360] ss:$16 sps:$4 sm:$0xff]  }
 0x3b1   : > { %10936 = vmatpush2.bf16.msra.mxu0 %v14582_v41  ;;  %v14614_v41 = vld [vmem:[%s16153_s13 + $0x1144] ss:$16 sps:$4 sm:$0xff]  }
 0x3b2   : > { %10979 = vmatpush2.bf16.msra.mxu1 %v14585_v47  ;;  %10937 = vmatprep.subr.bf16.mxu0 %v14590_v48  ;;  %v14617_v47 = vld [vmem:[%s16153_s13 + $0x1344] ss:$16 sps:$4 sm:$0xff]   ;;  %v14612_v48 = vld [vmem:[%s16153_s13 + $0x1140] ss:$16 sps:$4 sm:$0xff]  }
 0x3b3   : > { %10980 = vmatprep.subr.bf16.mxu1 %v14593_v1  ;;  %v14615_v1 = vld [vmem:[%s16153_s13 + $0x1340] ss:$16 sps:$4 sm:$0xff]  }
 0x3b5   : > { %10938 = vmatpush2.bf16.msra.mxu0 %v14588_v36  ;;  %v14620_v36 = vld [vmem:[%s16153_s13 + $0x1124] ss:$16 sps:$4 sm:$0xff]  }
 0x3b6   : > { %10981 = vmatpush2.bf16.msra.mxu1 %v14591_v23  ;;  %10939 = vmatprep.subr.bf16.mxu0 %v14596_v32  ;;  %v14623_v23 = vld [vmem:[%s16153_s13 + $0x1324] ss:$16 sps:$4 sm:$0xff]   ;;  %v14618_v32 = vld [vmem:[%s16153_s13 + $0x1120] ss:$16 sps:$4 sm:$0xff]  }
 0x3b7   : > { %10982 = vmatprep.subr.bf16.mxu1 %v14599_v15  ;;  %v982_v15 = vrot.slane %v16703_v39, %v16401_v45 }
 0x3b9   : > { %10940 = vmatpush2.bf16.msra.mxu0 %v14594_v2  ;;  %v14621_v2 = vld [vmem:[%s16153_s13 + $0x1320] ss:$16 sps:$4 sm:$0xff]  }
 0x3ba   : > { %10983 = vmatpush2.bf16.msra.mxu1 %v14597_v8  ;;  %10941 = vmatprep.subr.bf16.mxu0 %v14602_v30  ;;  %v14626_v8 = vld [vmem:[%s16153_s13 + $0x1104] ss:$16 sps:$4 sm:$0xff]   ;;  %v990_v30 = vrot.slane %v16703_v39, %v16406_v58 }
 0x3bb   : > { %10984 = vmatprep.subr.bf16.mxu1 %v14605_v27  ;;  %v14629_v27 = vld [vmem:[%s16153_s13 + $0x1304] ss:$16 sps:$4 sm:$0xff]  }
 0x3bc   : > { %v14635_v39 = vld [vmem:[%s16153_s13 + $0x16e4] ss:$16 sps:$4 sm:$0xff]  }
 0x3bd   : > { %10942 = vmatpush2.bf16.msra.mxu0 %v14600_v17  ;;  %v4096_v17 = vadd.f32 %v16526_v62, %v982_v15  ;;  %v14630_v62 = vld [vmem:[%s16153_s13 + $0x14e0] ss:$16 sps:$4 sm:$0xff]  }
 0x3be   : > { %10985 = vmatpush2.bf16.msra.mxu1 %v14603_v21  ;;  %10943 = vmatprep.subr.bf16.mxu0 %v14608_v6  ;;  %v4139_v21 = vadd.f32 %v16531_v40, %v990_v30  ;;  %v14624_v6 = vld [vmem:[%s16153_s13 + $0x1100] ss:$16 sps:$4 sm:$0xff]  }
 0x3bf   : > { %10986 = vmatprep.subr.bf16.mxu1 %v14611_v31  ;;  %v4092_v31 = vadd.f32 %v16445_v19, %v982_v15  ;;  %v14633_v19 = vld [vmem:[%s16153_s13 + $0x16e0] ss:$16 sps:$4 sm:$0xff]  }
 0x3c0   : > { %v14636_v15 = vld [vmem:[%s16153_s13 + $0x14c0] ss:$16 sps:$4 sm:$0xff]  }
 0x3c1   : > { %10944 = vmatpush2.bf16.msra.mxu0 %v14606_v20  ;;  %v14627_v20 = vld [vmem:[%s16153_s13 + $0x1300] ss:$16 sps:$4 sm:$0xff]   ;;  %v4334_v40 = vmax.f32 %v4092_v31, 0.0 }
 0x3c2   : > { %10987 = vmatpush2.bf16.msra.mxu1 %v14609_v25  ;;  %10945 = vmatprep.subr.bf16.mxu0 %v14614_v41  ;;  %v14632_v25 = vld [vmem:[%s16153_s13 + $0x14e4] ss:$16 sps:$4 sm:$0xff]   ;;  %v4135_v41 = vadd.f32 %v16450_v4, %v990_v30  ;;  %v14648_v31 = vld [vmem:[%s16153_s13 + $0x1480] ss:$16 sps:$4 sm:$0xff]  }
 0x3c3   : > { %10988 = vmatprep.subr.bf16.mxu1 %v14617_v47  ;;  %v4366_v47 = vmax.f32 %v4096_v17, 0.0  ;;  %v14641_v4 = vld [vmem:[%s16153_s13 + $0x16c4] ss:$16 sps:$4 sm:$0xff]   ;;  %v14645_v17 = vld [vmem:[%s16153_s13 + $0x16a0] ss:$16 sps:$4 sm:$0xff]  }
 0x3c4   : > { %v14647_v30 = vld [vmem:[%s16153_s13 + $0x16a4] ss:$16 sps:$4 sm:$0xff]  }
 0x3c5   : > { %10946 = vmatpush2.bf16.msra.mxu0 %v14612_v48  ;;  %v4368_v48 = vmax.f32 %v4139_v21, 0.0  ;;  %v14650_v21 = vld [vmem:[%s16153_s13 + $0x1484] ss:$16 sps:$4 sm:$0xff]  }
 0x3c6   : > { %10989 = vmatpush2.bf16.msra.mxu1 %v14615_v1  ;;  %10947 = vmatprep.subr.bf16.mxu0 %v14620_v36  ;;  %v4336_v1 = vmax.f32 %v4135_v41, 0.0  ;;  %v14638_v36 = vld [vmem:[%s16153_s13 + $0x14c4] ss:$16 sps:$4 sm:$0xff]  }
 0x3c7   : > { %10990 = vmatprep.subr.bf16.mxu1 %v14623_v23  ;;  %v16816_v23 = vpack.c.bf16 %v4366_v47, %v4334_v40  ;;  %v14659_v41 = vld [vmem:[%s16153_s13 + $0x1664] ss:$16 sps:$4 sm:$0xff]   ;;  %v14657_v47 = vld [vmem:[%s16153_s13 + $0x1660] ss:$16 sps:$4 sm:$0xff]  }
 0x3c8   : > { %v14660_v40 = vld [vmem:[%s16153_s13 + $0x1440] ss:$16 sps:$4 sm:$0xff]  }
 0x3c9   : > { %10948 = vmatpush2.bf16.msra.mxu0 %v14618_v32  ;;  %v16820_v32 = vpack.c.bf16 %v4368_v48, %v4336_v1  ;;  %v14662_v48 = vld [vmem:[%s16153_s13 + $0x1444] ss:$16 sps:$4 sm:$0xff]  }
 0x3ca   : > { %10991 = vmatpush2.bf16.msra.mxu1 %v14621_v2  ;;  %10949 = vmatprep.subr.bf16.mxu0 %v14626_v8  ;;  %v14639_v2 = vld [vmem:[%s16153_s13 + $0x16c0] ss:$16 sps:$4 sm:$0xff]   ;;  %v14644_v8 = vld [vmem:[%s16153_s13 + $0x14a4] ss:$16 sps:$4 sm:$0xff]  }
 0x3cb   : > { %10992 = vmatprep.subr.bf16.mxu1 %v14629_v27  ;;  %v14642_v27 = vld [vmem:[%s16153_s13 + $0x14a0] ss:$16 sps:$4 sm:$0xff]   ;;  %v14668_v1 = vld [vmem:[%s16153_s13 + $0x1424] ss:$16 sps:$4 sm:$0xff]  }
 0x3cd   : > { %10950 = vmatpush2.bf16.msra.mxu0 %v14624_v6  ;;  %v14653_v6 = vld [vmem:[%s16153_s13 + $0x1684] ss:$16 sps:$4 sm:$0xff]  }
 0x3ce   : > { %10993 = vmatpush2.bf16.msra.mxu1 %v14627_v20  ;;  %11005 = vmatprep.subr.bf16.mxu0 %v14632_v25  ;;  %v14651_v20 = vld [vmem:[%s16153_s13 + $0x1680] ss:$16 sps:$4 sm:$0xff]   ;;  %v14656_v25 = vld [vmem:[%s16153_s13 + $0x1464] ss:$16 sps:$4 sm:$0xff]  }
 0x3cf   : > { %11048 = vmatprep.subr.bf16.mxu1 %v14635_v39  ;;  %v14654_v39 = vld [vmem:[%s16153_s13 + $0x1460] ss:$16 sps:$4 sm:$0xff]  }
 0x3d0   : > { %10952 = vmatmul.mubr.bf16.vlgmr.msra.gmra.mxu0 %v16357_v61 }
 0x3d1   : > { %10995 = vmatmul.mubr.bf16.vlgmr.msra.gmra.mxu1 %v16361_v35  ;;  %11006 = vmatpush1.bf16.msra.mxu0 %v14630_v62  ;;  %v14665_v62 = vld [vmem:[%s16153_s13 + $0x1644] ss:$16 sps:$4 sm:$0xff]  }
 0x3d2   : > { %11037 = vmatprep.mubr.bf16.mxu0 %v16816_v23  ;;  %11049 = vmatpush1.bf16.msra.mxu1 %v14633_v19  ;;  %v14663_v19 = vld [vmem:[%s16153_s13 + $0x1640] ss:$16 sps:$4 sm:$0xff]  }
 0x3d3   : > { %11080 = vmatprep.mubr.bf16.mxu1 %v16820_v32  ;;  %11007 = vmatprep.subr.bf16.mxu0 %v14638_v36  ;;  %v14671_v36 = vld [vmem:[%s16153_s13 + $0x1624] ss:$16 sps:$4 sm:$0xff]  }
 0x3d4   : > { %11050 = vmatprep.subr.bf16.mxu1 %v14641_v4  ;;  %v14666_v4 = vld [vmem:[%s16153_s13 + $0x1420] ss:$16 sps:$4 sm:$0xff]  }
 0x3d5   : > { %11008 = vmatpush1.bf16.msra.mxu0 %v14636_v15  ;;  %v14669_v15 = vld [vmem:[%s16153_s13 + $0x1620] ss:$16 sps:$4 sm:$0xff]  }
 0x3d6   : > { %11051 = vmatpush1.bf16.msra.mxu1 %v14639_v2  ;;  %11009 = vmatprep.subr.bf16.mxu0 %v14644_v8  ;;  %v14674_v2 = vld [vmem:[%s16153_s13 + $0x1404] ss:$16 sps:$4 sm:$0xff]  }
 0x3d7   : > { %11052 = vmatprep.subr.bf16.mxu1 %v14647_v30  ;;  %v14677_v8 = vld [vmem:[%s16153_s13 + $0x1604] ss:$16 sps:$4 sm:$0xff]   ;;  %v14672_v30 = vld [vmem:[%s16153_s13 + $0x1400] ss:$16 sps:$4 sm:$0xff]  }
 0x3d9   : > { %11010 = vmatpush1.bf16.msra.mxu0 %v14642_v27  ;;  %v14675_v27 = vld [vmem:[%s16153_s13 + $0x1600] ss:$16 sps:$4 sm:$0xff]  }
 0x3da   : > { %11053 = vmatpush1.bf16.msra.mxu1 %v14645_v17  ;;  %11011 = vmatprep.subr.bf16.mxu0 %v14650_v21  ;;  %v14680_v17 = vld [vmem:[%s16153_s13 + $0x15e4] ss:$16 sps:$4 sm:$0xff]  }
 0x3db   : > { %11054 = vmatprep.subr.bf16.mxu1 %v14653_v6  ;;  %v14683_v21 = vld [vmem:[%s16153_s13 + $0x17e4] ss:$16 sps:$4 sm:$0xff]   ;;  %v14678_v6 = vld [vmem:[%s16153_s13 + $0x15e0] ss:$16 sps:$4 sm:$0xff]  }
 0x3dd   : > { %11012 = vmatpush1.bf16.msra.mxu0 %v14648_v31  ;;  %v14681_v31 = vld [vmem:[%s16153_s13 + $0x17e0] ss:$16 sps:$4 sm:$0xff]  }
 0x3de   : > { %11055 = vmatpush1.bf16.msra.mxu1 %v14651_v20  ;;  %11013 = vmatprep.subr.bf16.mxu0 %v14656_v25  ;;  %v14686_v20 = vld [vmem:[%s16153_s13 + $0x15c4] ss:$16 sps:$4 sm:$0xff]  }
 0x3df   : > { %11056 = vmatprep.subr.bf16.mxu1 %v14659_v41  ;;  %v14689_v25 = vld [vmem:[%s16153_s13 + $0x17c4] ss:$16 sps:$4 sm:$0xff]   ;;  %v14684_v41 = vld [vmem:[%s16153_s13 + $0x15c0] ss:$16 sps:$4 sm:$0xff]  }
 0x3e1   : > { %11014 = vmatpush1.bf16.msra.mxu0 %v14654_v39  ;;  %v14687_v39 = vld [vmem:[%s16153_s13 + $0x17c0] ss:$16 sps:$4 sm:$0xff]  }
 0x3e2   : > { %11057 = vmatpush1.bf16.msra.mxu1 %v14657_v47  ;;  %11015 = vmatprep.subr.bf16.mxu0 %v14662_v48  ;;  %v14692_v47 = vld [vmem:[%s16153_s13 + $0x15a4] ss:$16 sps:$4 sm:$0xff]  }
 0x3e3   : > { %11058 = vmatprep.subr.bf16.mxu1 %v14665_v62  ;;  %v14695_v48 = vld [vmem:[%s16153_s13 + $0x17a4] ss:$16 sps:$4 sm:$0xff]   ;;  %v14690_v62 = vld [vmem:[%s16153_s13 + $0x15a0] ss:$16 sps:$4 sm:$0xff]  }
 0x3e5   : > { %11016 = vmatpush1.bf16.msra.mxu0 %v14660_v40  ;;  %v14693_v40 = vld [vmem:[%s16153_s13 + $0x17a0] ss:$16 sps:$4 sm:$0xff]  }
 0x3e6   : > { %11059 = vmatpush1.bf16.msra.mxu1 %v14663_v19  ;;  %11017 = vmatprep.subr.bf16.mxu0 %v14668_v1  ;;  %v14698_v19 = vld [vmem:[%s16153_s13 + $0x1584] ss:$16 sps:$4 sm:$0xff]  }
 0x3e7   : > { %11060 = vmatprep.subr.bf16.mxu1 %v14671_v36  ;;  %v14701_v1 = vld [vmem:[%s16153_s13 + $0x1784] ss:$16 sps:$4 sm:$0xff]   ;;  %v14696_v36 = vld [vmem:[%s16153_s13 + $0x1580] ss:$16 sps:$4 sm:$0xff]  }
 0x3e9   : > { %11018 = vmatpush1.bf16.msra.mxu0 %v14666_v4  ;;  %v14699_v4 = vld [vmem:[%s16153_s13 + $0x1780] ss:$16 sps:$4 sm:$0xff]  }
 0x3ea   : > { %11061 = vmatpush1.bf16.msra.mxu1 %v14669_v15  ;;  %11019 = vmatprep.subr.bf16.mxu0 %v14674_v2  ;;  %v14704_v15 = vld [vmem:[%s16153_s13 + $0x1564] ss:$16 sps:$4 sm:$0xff]  }
 0x3eb   : > { %11062 = vmatprep.subr.bf16.mxu1 %v14677_v8  ;;  %v14707_v2 = vld [vmem:[%s16153_s13 + $0x1764] ss:$16 sps:$4 sm:$0xff]   ;;  %v14702_v8 = vld [vmem:[%s16153_s13 + $0x1560] ss:$16 sps:$4 sm:$0xff]  }
 0x3ed   : > { %11020 = vmatpush1.bf16.msra.mxu0 %v14672_v30  ;;  %v14705_v30 = vld [vmem:[%s16153_s13 + $0x1760] ss:$16 sps:$4 sm:$0xff]  }
 0x3ee   : > { %11063 = vmatpush1.bf16.msra.mxu1 %v14675_v27  ;;  %11021 = vmatprep.subr.bf16.mxu0 %v14680_v17  ;;  %v14710_v27 = vld [vmem:[%s16153_s13 + $0x1544] ss:$16 sps:$4 sm:$0xff]  }
 0x3ef   : > { %11064 = vmatprep.subr.bf16.mxu1 %v14683_v21  ;;  %v14713_v17 = vld [vmem:[%s16153_s13 + $0x1744] ss:$16 sps:$4 sm:$0xff]   ;;  %v14708_v21 = vld [vmem:[%s16153_s13 + $0x1540] ss:$16 sps:$4 sm:$0xff]  }
 0x3f1   : > { %11022 = vmatpush2.bf16.msra.mxu0 %v14678_v6  ;;  %v14711_v6 = vld [vmem:[%s16153_s13 + $0x1740] ss:$16 sps:$4 sm:$0xff]  }
 0x3f2   : > { %11065 = vmatpush2.bf16.msra.mxu1 %v14681_v31  ;;  %11023 = vmatprep.subr.bf16.mxu0 %v14686_v20  ;;  %v14716_v31 = vld [vmem:[%s16153_s13 + $0x1524] ss:$16 sps:$4 sm:$0xff]  }
 0x3f3   : > { %11066 = vmatprep.subr.bf16.mxu1 %v14689_v25  ;;  %v14719_v20 = vld [vmem:[%s16153_s13 + $0x1724] ss:$16 sps:$4 sm:$0xff]   ;;  %v14714_v25 = vld [vmem:[%s16153_s13 + $0x1520] ss:$16 sps:$4 sm:$0xff]  }
 0x3f5   : > { %11024 = vmatpush2.bf16.msra.mxu0 %v14684_v41  ;;  %v16878_v41 = vld [vmem:[#allocation4 + $0x18] sm:$0xff] }
 0x3f6   : > { %11067 = vmatpush2.bf16.msra.mxu1 %v14687_v39  ;;  %11025 = vmatprep.subr.bf16.mxu0 %v14692_v47  ;;  %v998_v39 = vrot.slane %v16878_v41, %v16304_v44  ;;  %v14717_v47 = vld [vmem:[%s16153_s13 + $0x1720] ss:$16 sps:$4 sm:$0xff]  }
 0x3f7   : > { %11068 = vmatprep.subr.bf16.mxu1 %v14695_v48  ;;  %v14722_v48 = vld [vmem:[%s16153_s13 + $0x1504] ss:$16 sps:$4 sm:$0xff]  }
 0x3f9   : > { %11026 = vmatpush2.bf16.msra.mxu0 %v14690_v62  ;;  %v1006_v62 = vrot.slane %v16878_v41, %v16307_v54 }
 0x3fa   : > { %11069 = vmatpush2.bf16.msra.mxu1 %v14693_v40  ;;  %11027 = vmatprep.subr.bf16.mxu0 %v14698_v19  ;;  %v14725_v40 = vld [vmem:[%s16153_s13 + $0x1704] ss:$16 sps:$4 sm:$0xff]   ;;  %v4182_v19 = vadd.f32 %v16622_v7, %v998_v39  ;;  %v14726_v7 = vld [vmem:[%s16153_s13 + $0x18e0] ss:$16 sps:$4 sm:$0xff]  }
 0x3fb   : > { %11070 = vmatprep.subr.bf16.mxu1 %v14701_v1  ;;  %v4225_v1 = vadd.f32 %v16627_v55, %v1006_v62 }
 0x3fd   : > { %11028 = vmatpush2.bf16.msra.mxu0 %v14696_v36  ;;  %v14720_v36 = vld [vmem:[%s16153_s13 + $0x1500] ss:$16 sps:$4 sm:$0xff]  }
 0x3fe   : > { %11071 = vmatpush2.bf16.msra.mxu1 %v14699_v4  ;;  %11029 = vmatprep.subr.bf16.mxu0 %v14704_v15  ;;  %v4178_v4 = vadd.f32 %v16545_v22, %v998_v39  ;;  %v14723_v15 = vld [vmem:[%s16153_s13 + $0x1700] ss:$16 sps:$4 sm:$0xff]  }
 0x3ff   : > { %11072 = vmatprep.subr.bf16.mxu1 %v14707_v2  ;;  %v14728_v2 = vld [vmem:[%s16153_s13 + $0x18e4] ss:$16 sps:$4 sm:$0xff]   ;;  %v14729_v22 = vld [vmem:[%s16153_s13 + $0x1ae0] ss:$16 sps:$4 sm:$0xff]  }
 0x400   : > { %v4338_v55 = vmax.f32 %v4178_v4, 0.0  ;;  %v14735_v39 = vld [vmem:[%s16153_s13 + $0x1ac0] ss:$16 sps:$4 sm:$0xff]  }
 0x401   : > { %11030 = vmatpush2.bf16.msra.mxu0 %v14702_v8  ;;  %v4221_v8 = vadd.f32 %v16550_v16, %v1006_v62  ;;  %v14737_v16 = vld [vmem:[%s16153_s13 + $0x1ac4] ss:$16 sps:$4 sm:$0xff]   ;;  %v14738_v62 = vld [vmem:[%s16153_s13 + $0x18a0] ss:$16 sps:$4 sm:$0xff]  }
 0x402   : > { %11073 = vmatpush2.bf16.msra.mxu1 %v14705_v30  ;;  %11031 = vmatprep.subr.bf16.mxu0 %v14710_v27  ;;  %v14731_v30 = vld [vmem:[%s16153_s13 + $0x1ae4] ss:$16 sps:$4 sm:$0xff]   ;;  %v4370_v27 = vmax.f32 %v4182_v19, 0.0  ;;  %v14747_v4 = vld [vmem:[%s16153_s13 + $0x1a80] ss:$16 sps:$4 sm:$0xff]  }
 0x403   : > { %11074 = vmatprep.subr.bf16.mxu1 %v14713_v17  ;;  %v4372_v17 = vmax.f32 %v4225_v1, 0.0  ;;  %v14746_v19 = vld [vmem:[%s16153_s13 + $0x1884] ss:$16 sps:$4 sm:$0xff]  }
 0x404   : > { %v14749_v1 = vld [vmem:[%s16153_s13 + $0x1a84] ss:$16 sps:$4 sm:$0xff]  }
 0x405   : > { %11032 = vmatpush2.bf16.msra.mxu0 %v14708_v21  ;;  %v4340_v21 = vmax.f32 %v4221_v8, 0.0  ;;  %v14750_v8 = vld [vmem:[%s16153_s13 + $0x1860] ss:$16 sps:$4 sm:$0xff]  }
 0x406   : > { %11075 = vmatpush2.bf16.msra.mxu1 %v14711_v6  ;;  %11033 = vmatprep.subr.bf16.mxu0 %v14716_v31  ;;  %v14734_v6 = vld [vmem:[%s16153_s13 + $0x18c4] ss:$16 sps:$4 sm:$0xff]   ;;  %v16898_v31 = vpack.c.bf16 %v4370_v27, %v4338_v55  ;;  %v14759_v55 = vld [vmem:[%s16153_s13 + $0x1a40] ss:$16 sps:$4 sm:$0xff]  }
 0x407   : > { %11076 = vmatprep.subr.bf16.mxu1 %v14719_v20  ;;  %v16902_v20 = vpack.c.bf16 %v4372_v17, %v4340_v21  ;;  %v14758_v27 = vld [vmem:[%s16153_s13 + $0x1844] ss:$16 sps:$4 sm:$0xff]  }
 0x408   : > { %v14761_v17 = vld [vmem:[%s16153_s13 + $0x1a44] ss:$16 sps:$4 sm:$0xff]  }
 0x409   : > { %11034 = vmatpush2.bf16.msra.mxu0 %v14714_v25  ;;  %v14732_v25 = vld [vmem:[%s16153_s13 + $0x18c0] ss:$16 sps:$4 sm:$0xff]   ;;  %v14767_v21 = vld [vmem:[%s16153_s13 + $0x1a24] ss:$16 sps:$4 sm:$0xff]  }
 0x40a   : > { %11077 = vmatpush2.bf16.msra.mxu1 %v14717_v47  ;;  %11035 = vmatprep.subr.bf16.mxu0 %v14722_v48  ;;  %v14740_v47 = vld [vmem:[%s16153_s13 + $0x18a4] ss:$16 sps:$4 sm:$0xff]  }
 0x40b   : > { %11078 = vmatprep.subr.bf16.mxu1 %v14725_v40  ;;  %v14743_v48 = vld [vmem:[%s16153_s13 + $0x1aa4] ss:$16 sps:$4 sm:$0xff]   ;;  %v14741_v40 = vld [vmem:[%s16153_s13 + $0x1aa0] ss:$16 sps:$4 sm:$0xff]  }
 0x40d   : > { %11036 = vmatpush2.bf16.msra.mxu0 %v14720_v36  ;;  %v14744_v36 = vld [vmem:[%s16153_s13 + $0x1880] ss:$16 sps:$4 sm:$0xff]  }
 0x40e   : > { %11079 = vmatpush2.bf16.msra.mxu1 %v14723_v15  ;;  %11091 = vmatprep.subr.bf16.mxu0 %v14728_v2  ;;  %v14752_v15 = vld [vmem:[%s16153_s13 + $0x1864] ss:$16 sps:$4 sm:$0xff]  }
 0x40f   : > { %11134 = vmatprep.subr.bf16.mxu1 %v14731_v30  ;;  %v14755_v2 = vld [vmem:[%s16153_s13 + $0x1a64] ss:$16 sps:$4 sm:$0xff]   ;;  %v14753_v30 = vld [vmem:[%s16153_s13 + $0x1a60] ss:$16 sps:$4 sm:$0xff]  }
 0x410   : > { %11038 = vmatmul.mubr.bf16.vlgmr.msra.gmra.mxu0 %v16457_v28 }
 0x411   : > { %11081 = vmatmul.mubr.bf16.vlgmr.msra.gmra.mxu1 %v16460_v0  ;;  %11092 = vmatpush1.bf16.msra.mxu0 %v14726_v7  ;;  %v14756_v7 = vld [vmem:[%s16153_s13 + $0x1840] ss:$16 sps:$4 sm:$0xff]  }
 0x412   : > { %11123 = vmatprep.mubr.bf16.mxu0 %v16898_v31  ;;  %11135 = vmatpush1.bf16.msra.mxu1 %v14729_v22  ;;  %v14764_v22 = vld [vmem:[%s16153_s13 + $0x1824] ss:$16 sps:$4 sm:$0xff]  }
 0x413   : > { %11166 = vmatprep.mubr.bf16.mxu1 %v16902_v20  ;;  %11093 = vmatprep.subr.bf16.mxu0 %v14734_v6  ;;  %v14762_v6 = vld [vmem:[%s16153_s13 + $0x1820] ss:$16 sps:$4 sm:$0xff]  }
 0x414   : > { %11136 = vmatprep.subr.bf16.mxu1 %v14737_v16  ;;  %v14765_v16 = vld [vmem:[%s16153_s13 + $0x1a20] ss:$16 sps:$4 sm:$0xff]  }
 0x415   : > { %11094 = vmatpush1.bf16.msra.mxu0 %v14732_v25  ;;  %v14770_v25 = vld [vmem:[%s16153_s13 + $0x1804] ss:$16 sps:$4 sm:$0xff]  }
 0x416   : > { %11137 = vmatpush1.bf16.msra.mxu1 %v14735_v39  ;;  %11095 = vmatprep.subr.bf16.mxu0 %v14740_v47  ;;  %v14773_v39 = vld [vmem:[%s16153_s13 + $0x1a04] ss:$16 sps:$4 sm:$0xff]   ;;  %v14768_v47 = vld [vmem:[%s16153_s13 + $0x1800] ss:$16 sps:$4 sm:$0xff]  }
 0x417   : > { %11138 = vmatprep.subr.bf16.mxu1 %v14743_v48  ;;  %v14771_v48 = vld [vmem:[%s16153_s13 + $0x1a00] ss:$16 sps:$4 sm:$0xff]  }
 0x419   : > { %11096 = vmatpush1.bf16.msra.mxu0 %v14738_v62  ;;  %v14776_v62 = vld [vmem:[%s16153_s13 + $0x19e4] ss:$16 sps:$4 sm:$0xff]  }
 0x41a   : > { %11139 = vmatpush1.bf16.msra.mxu1 %v14741_v40  ;;  %11097 = vmatprep.subr.bf16.mxu0 %v14746_v19  ;;  %v14779_v40 = vld [vmem:[%s16153_s13 + $0x1be4] ss:$16 sps:$4 sm:$0xff]   ;;  %v14774_v19 = vld [vmem:[%s16153_s13 + $0x19e0] ss:$16 sps:$4 sm:$0xff]  }
 0x41b   : > { %11140 = vmatprep.subr.bf16.mxu1 %v14749_v1  ;;  %v14777_v1 = vld [vmem:[%s16153_s13 + $0x1be0] ss:$16 sps:$4 sm:$0xff]  }
 0x41d   : > { %11098 = vmatpush1.bf16.msra.mxu0 %v14744_v36  ;;  %v14782_v36 = vld [vmem:[%s16153_s13 + $0x19c4] ss:$16 sps:$4 sm:$0xff]  }
 0x41e   : > { %11141 = vmatpush1.bf16.msra.mxu1 %v14747_v4  ;;  %11099 = vmatprep.subr.bf16.mxu0 %v14752_v15  ;;  %v14785_v4 = vld [vmem:[%s16153_s13 + $0x1bc4] ss:$16 sps:$4 sm:$0xff]   ;;  %v14780_v15 = vld [vmem:[%s16153_s13 + $0x19c0] ss:$16 sps:$4 sm:$0xff]  }
 0x41f   : > { %11142 = vmatprep.subr.bf16.mxu1 %v14755_v2  ;;  %v14783_v2 = vld [vmem:[%s16153_s13 + $0x1bc0] ss:$16 sps:$4 sm:$0xff]  }
 0x421   : > { %11100 = vmatpush1.bf16.msra.mxu0 %v14750_v8  ;;  %v14788_v8 = vld [vmem:[%s16153_s13 + $0x19a4] ss:$16 sps:$4 sm:$0xff]  }
 0x422   : > { %11143 = vmatpush1.bf16.msra.mxu1 %v14753_v30  ;;  %11101 = vmatprep.subr.bf16.mxu0 %v14758_v27  ;;  %v14791_v30 = vld [vmem:[%s16153_s13 + $0x1ba4] ss:$16 sps:$4 sm:$0xff]   ;;  %v14786_v27 = vld [vmem:[%s16153_s13 + $0x19a0] ss:$16 sps:$4 sm:$0xff]  }
 0x423   : > { %11144 = vmatprep.subr.bf16.mxu1 %v14761_v17  ;;  %v14789_v17 = vld [vmem:[%s16153_s13 + $0x1ba0] ss:$16 sps:$4 sm:$0xff]  }
 0x425   : > { %11102 = vmatpush1.bf16.msra.mxu0 %v14756_v7  ;;  %v14794_v7 = vld [vmem:[%s16153_s13 + $0x1984] ss:$16 sps:$4 sm:$0xff]  }
 0x426   : > { %11145 = vmatpush1.bf16.msra.mxu1 %v14759_v55  ;;  %11103 = vmatprep.subr.bf16.mxu0 %v14764_v22  ;;  %v14797_v55 = vld [vmem:[%s16153_s13 + $0x1b84] ss:$16 sps:$4 sm:$0xff]   ;;  %v14792_v22 = vld [vmem:[%s16153_s13 + $0x1980] ss:$16 sps:$4 sm:$0xff]  }
 0x427   : > { %11146 = vmatprep.subr.bf16.mxu1 %v14767_v21  ;;  %v14795_v21 = vld [vmem:[%s16153_s13 + $0x1b80] ss:$16 sps:$4 sm:$0xff]  }
 0x429   : > { %11104 = vmatpush1.bf16.msra.mxu0 %v14762_v6  ;;  %v14800_v6 = vld [vmem:[%s16153_s13 + $0x1964] ss:$16 sps:$4 sm:$0xff]  }
 0x42a   : > { %11147 = vmatpush1.bf16.msra.mxu1 %v14765_v16  ;;  %11105 = vmatprep.subr.bf16.mxu0 %v14770_v25  ;;  %v14803_v16 = vld [vmem:[%s16153_s13 + $0x1b64] ss:$16 sps:$4 sm:$0xff]   ;;  %v14798_v25 = vld [vmem:[%s16153_s13 + $0x1960] ss:$16 sps:$4 sm:$0xff]  }
 0x42b   : > { %11148 = vmatprep.subr.bf16.mxu1 %v14773_v39  ;;  %v14801_v39 = vld [vmem:[%s16153_s13 + $0x1b60] ss:$16 sps:$4 sm:$0xff]  }
 0x42d   : > { %11106 = vmatpush1.bf16.msra.mxu0 %v14768_v47  ;;  %v14806_v47 = vld [vmem:[%s16153_s13 + $0x1944] ss:$16 sps:$4 sm:$0xff]  }
 0x42e   : > { %11149 = vmatpush1.bf16.msra.mxu1 %v14771_v48  ;;  %11107 = vmatprep.subr.bf16.mxu0 %v14776_v62  ;;  %v14809_v48 = vld [vmem:[%s16153_s13 + $0x1b44] ss:$16 sps:$4 sm:$0xff]   ;;  %v14804_v62 = vld [vmem:[%s16153_s13 + $0x1940] ss:$16 sps:$4 sm:$0xff]  }
 0x42f   : > { %11150 = vmatprep.subr.bf16.mxu1 %v14779_v40  ;;  %v14807_v40 = vld [vmem:[%s16153_s13 + $0x1b40] ss:$16 sps:$4 sm:$0xff]  }
 0x431   : > { %11108 = vmatpush2.bf16.msra.mxu0 %v14774_v19  ;;  %v14812_v19 = vld [vmem:[%s16153_s13 + $0x1924] ss:$16 sps:$4 sm:$0xff]  }
 0x432   : > { %11151 = vmatpush2.bf16.msra.mxu1 %v14777_v1  ;;  %11109 = vmatprep.subr.bf16.mxu0 %v14782_v36  ;;  %v14815_v1 = vld [vmem:[%s16153_s13 + $0x1b24] ss:$16 sps:$4 sm:$0xff]   ;;  %v14810_v36 = vld [vmem:[%s16153_s13 + $0x1920] ss:$16 sps:$4 sm:$0xff]  }
 0x433   : > { %11152 = vmatprep.subr.bf16.mxu1 %v14785_v4  ;;  %v1014_v4 = vrot.slane %v16878_v41, %v16401_v45 }
 0x435   : > { %11110 = vmatpush2.bf16.msra.mxu0 %v14780_v15  ;;  %v14813_v15 = vld [vmem:[%s16153_s13 + $0x1b20] ss:$16 sps:$4 sm:$0xff]   ;;  %v4264_v45 = vadd.f32 %v16641_v57, %v1014_v4 }
 0x436   : > { %11153 = vmatpush2.bf16.msra.mxu1 %v14783_v2  ;;  %11111 = vmatprep.subr.bf16.mxu0 %v14788_v8  ;;  %v14818_v2 = vld [vmem:[%s16153_s13 + $0x1904] ss:$16 sps:$4 sm:$0xff]   ;;  %v1022_v8 = vrot.slane %v16878_v41, %v16406_v58  ;;  %v14825_v57 = vld [vmem:[%s16153_s13 + $0x1ee0] ss:$16 sps:$4 sm:$0xff]  }
 0x437   : > { %11154 = vmatprep.subr.bf16.mxu1 %v14791_v30  ;;  %v14821_v30 = vld [vmem:[%s16153_s13 + $0x1b04] ss:$16 sps:$4 sm:$0xff]  }
 0x438   : > { %v14827_v58 = vld [vmem:[%s16153_s13 + $0x1ee4] ss:$16 sps:$4 sm:$0xff]  }
 0x439   : > { %11112 = vmatpush2.bf16.msra.mxu0 %v14786_v27  ;;  %v4268_v27 = vadd.f32 %v16727_v26, %v1014_v4  ;;  %v14822_v26 = vld [vmem:[%s16153_s13 + $0x1ce0] ss:$16 sps:$4 sm:$0xff]   ;;  %v14842_v4 = vld [vmem:[%s16153_s13 + $0x1c84] ss:$16 sps:$4 sm:$0xff]  }
 0x43a   : > { %11155 = vmatpush2.bf16.msra.mxu1 %v14789_v17  ;;  %11113 = vmatprep.subr.bf16.mxu0 %v14794_v7  ;;  %v4311_v17 = vadd.f32 %v16733_v33, %v1022_v8  ;;  %v14816_v7 = vld [vmem:[%s16153_s13 + $0x1900] ss:$16 sps:$4 sm:$0xff]   ;;  %v4342_v33 = vmax.f32 %v4264_v45, 0.0  ;;  %v14854_v45 = vld [vmem:[%s16153_s13 + $0x1c44] ss:$16 sps:$4 sm:$0xff]  }
 0x43b   : > { %11156 = vmatprep.subr.bf16.mxu1 %v14797_v55  ;;  %v14819_v55 = vld [vmem:[%s16153_s13 + $0x1b00] ss:$16 sps:$4 sm:$0xff]   ;;  %v4374_v41 = vmax.f32 %v4268_v27, 0.0  ;;  %v14851_v27 = vld [vmem:[%s16153_s13 + $0x1e64] ss:$16 sps:$4 sm:$0xff]  }
 0x43d   : > { %11114 = vmatpush2.bf16.msra.mxu0 %v14792_v22  ;;  %v14824_v22 = vld [vmem:[%s16153_s13 + $0x1ce4] ss:$16 sps:$4 sm:$0xff]  }
 0x43e   : > { %11157 = vmatpush2.bf16.msra.mxu1 %v14795_v21  ;;  %11115 = vmatprep.subr.bf16.mxu0 %v14800_v6  ;;  %v4307_v21 = vadd.f32 %v16646_v53, %v1022_v8  ;;  %v4376_v6 = vmax.f32 %v4311_v17, 0.0  ;;  %v14833_v53 = vld [vmem:[%s16153_s13 + $0x1ec4] ss:$16 sps:$4 sm:$0xff]   ;;  %v14843_v8 = vld [vmem:[%s16153_s13 + $0x1e80] ss:$16 sps:$4 sm:$0xff]  }
 0x43f   : > { %11158 = vmatprep.subr.bf16.mxu1 %v14803_v16  ;;  %v14846_v17 = vld [vmem:[%s16153_s13 + $0x1c60] ss:$16 sps:$4 sm:$0xff]  }
 0x440   : > { %v4344_v16 = vmax.f32 %v4307_v21, 0.0  ;;  %v14855_v21 = vld [vmem:[%s16153_s13 + $0x1e40] ss:$16 sps:$4 sm:$0xff]  }
 0x441   : > { %11116 = vmatpush2.bf16.msra.mxu0 %v14798_v25  ;;  %v14830_v25 = vld [vmem:[%s16153_s13 + $0x1cc4] ss:$16 sps:$4 sm:$0xff]  }
 0x442   : > { %11159 = vmatpush2.bf16.msra.mxu1 %v14801_v39  ;;  %11117 = vmatprep.subr.bf16.mxu0 %v14806_v47  ;;  %v16978_v39 = vpack.c.bf16 %v4374_v41, %v4342_v33  ;;  %v16982_v47 = vpack.c.bf16 %v4376_v6, %v4344_v16  ;;  %v14863_v41 = vld [vmem:[%s16153_s13 + $0x1e24] ss:$16 sps:$4 sm:$0xff]   ;;  %v14858_v6 = vld [vmem:[%s16153_s13 + $0x1c20] ss:$16 sps:$4 sm:$0xff]  }
 0x443   : > { %11160 = vmatprep.subr.bf16.mxu1 %v14809_v48  ;;  %v14828_v48 = vld [vmem:[%s16153_s13 + $0x1cc0] ss:$16 sps:$4 sm:$0xff]   ;;  %v14866_v33 = vld [vmem:[%s16153_s13 + $0x1c04] ss:$16 sps:$4 sm:$0xff]  }
 0x444   : > { %v14864_v16 = vld [vmem:[%s16153_s13 + $0x1c00] ss:$16 sps:$4 sm:$0xff]  }
 0x445   : > { %11118 = vmatpush2.bf16.msra.mxu0 %v14804_v62  ;;  %v14831_v62 = vld [vmem:[%s16153_s13 + $0x1ec0] ss:$16 sps:$4 sm:$0xff]  }
 0x446   : > { %11161 = vmatpush2.bf16.msra.mxu1 %v14807_v40  ;;  %11119 = vmatprep.subr.bf16.mxu0 %v14812_v19  ;;  %v14836_v40 = vld [vmem:[%s16153_s13 + $0x1ca4] ss:$16 sps:$4 sm:$0xff]  }
 0x447   : > { %11162 = vmatprep.subr.bf16.mxu1 %v14815_v1  ;;  %v14839_v19 = vld [vmem:[%s16153_s13 + $0x1ea4] ss:$16 sps:$4 sm:$0xff]   ;;  %v14834_v1 = vld [vmem:[%s16153_s13 + $0x1ca0] ss:$16 sps:$4 sm:$0xff]  }
 0x449   : > { %11120 = vmatpush2.bf16.msra.mxu0 %v14810_v36  ;;  %v14837_v36 = vld [vmem:[%s16153_s13 + $0x1ea0] ss:$16 sps:$4 sm:$0xff]  }
 0x44a   : > { %11163 = vmatpush2.bf16.msra.mxu1 %v14813_v15  ;;  %11121 = vmatprep.subr.bf16.mxu0 %v14818_v2  ;;  %v14845_v15 = vld [vmem:[%s16153_s13 + $0x1e84] ss:$16 sps:$4 sm:$0xff]   ;;  %v14840_v2 = vld [vmem:[%s16153_s13 + $0x1c80] ss:$16 sps:$4 sm:$0xff]  }
 0x44b   : > { %11164 = vmatprep.subr.bf16.mxu1 %v14821_v30  ;;  %v14848_v30 = vld [vmem:[%s16153_s13 + $0x1c64] ss:$16 sps:$4 sm:$0xff]  }
 0x44d   : > { %11122 = vmatpush2.bf16.msra.mxu0 %v14816_v7  ;;  %v14849_v7 = vld [vmem:[%s16153_s13 + $0x1e60] ss:$16 sps:$4 sm:$0xff]  }
 0x44e   : > { %11165 = vmatpush2.bf16.msra.mxu1 %v14819_v55  ;;  %11177 = vmatprep.subr.bf16.mxu0 %v14824_v22  ;;  %v14857_v55 = vld [vmem:[%s16153_s13 + $0x1e44] ss:$16 sps:$4 sm:$0xff]   ;;  %v14852_v22 = vld [vmem:[%s16153_s13 + $0x1c40] ss:$16 sps:$4 sm:$0xff]  }
 0x44f   : > { %11220 = vmatprep.subr.bf16.mxu1 %v14827_v58  ;;  %v14860_v58 = vld [vmem:[%s16153_s13 + $0x1c24] ss:$16 sps:$4 sm:$0xff]  }
 0x450   : > { %11124 = vmatmul.mubr.bf16.vlgmr.msra.gmra.mxu0 %v16557_v9 }
 0x451   : > { %11167 = vmatmul.mubr.bf16.vlgmr.msra.gmra.mxu1 %v16560_v12  ;;  %11178 = vmatpush1.bf16.msra.mxu0 %v14822_v26  ;;  %v14861_v26 = vld [vmem:[%s16153_s13 + $0x1e20] ss:$16 sps:$4 sm:$0xff]  }
 0x452   : > { %11209 = vmatprep.mubr.bf16.mxu0 %v16978_v39  ;;  %11221 = vmatpush1.bf16.msra.mxu1 %v14825_v57  ;;  %v14869_v57 = vld [vmem:[%s16153_s13 + $0x1e04] ss:$16 sps:$4 sm:$0xff]  }
 0x453   : > { %11252 = vmatprep.mubr.bf16.mxu1 %v16982_v47  ;;  %11179 = vmatprep.subr.bf16.mxu0 %v14830_v25  ;;  %v14867_v25 = vld [vmem:[%s16153_s13 + $0x1e00] ss:$16 sps:$4 sm:$0xff]  }
 0x454   : > { %11222 = vmatprep.subr.bf16.mxu1 %v14833_v53  ;;  %v14872_v53 = vld [vmem:[%s16153_s13 + $0x1de4] ss:$16 sps:$4 sm:$0xff]  }
 0x455   : > { %11180 = vmatpush1.bf16.msra.mxu0 %v14828_v48  ;;  %v14875_v48 = vld [vmem:[%s16153_s13 + $0x1fe4] ss:$16 sps:$4 sm:$0xff]  }
 0x456   : > { %11223 = vmatpush1.bf16.msra.mxu1 %v14831_v62  ;;  %11181 = vmatprep.subr.bf16.mxu0 %v14836_v40  ;;  %v14870_v62 = vld [vmem:[%s16153_s13 + $0x1de0] ss:$16 sps:$4 sm:$0xff]  }
 0x457   : > { %11224 = vmatprep.subr.bf16.mxu1 %v14839_v19  ;;  %v14873_v40 = vld [vmem:[%s16153_s13 + $0x1fe0] ss:$16 sps:$4 sm:$0xff]   ;;  %v14878_v19 = vld [vmem:[%s16153_s13 + $0x1dc4] ss:$16 sps:$4 sm:$0xff]  }
 0x459   : > { %11182 = vmatpush1.bf16.msra.mxu0 %v14834_v1  ;;  %v14881_v1 = vld [vmem:[%s16153_s13 + $0x1fc4] ss:$16 sps:$4 sm:$0xff]  }
 0x45a   : > { %11225 = vmatpush1.bf16.msra.mxu1 %v14837_v36  ;;  %11183 = vmatprep.subr.bf16.mxu0 %v14842_v4  ;;  %v14876_v36 = vld [vmem:[%s16153_s13 + $0x1dc0] ss:$16 sps:$4 sm:$0xff]  }
 0x45b   : > { %11226 = vmatprep.subr.bf16.mxu1 %v14845_v15  ;;  %v14879_v4 = vld [vmem:[%s16153_s13 + $0x1fc0] ss:$16 sps:$4 sm:$0xff]   ;;  %v14884_v15 = vld [vmem:[%s16153_s13 + $0x1da4] ss:$16 sps:$4 sm:$0xff]  }
 0x45d   : > { %11184 = vmatpush1.bf16.msra.mxu0 %v14840_v2  ;;  %v14887_v2 = vld [vmem:[%s16153_s13 + $0x1fa4] ss:$16 sps:$4 sm:$0xff]  }
 0x45e   : > { %11227 = vmatpush1.bf16.msra.mxu1 %v14843_v8  ;;  %11185 = vmatprep.subr.bf16.mxu0 %v14848_v30  ;;  %v14882_v8 = vld [vmem:[%s16153_s13 + $0x1da0] ss:$16 sps:$4 sm:$0xff]  }
 0x45f   : > { %11228 = vmatprep.subr.bf16.mxu1 %v14851_v27  ;;  %v14885_v30 = vld [vmem:[%s16153_s13 + $0x1fa0] ss:$16 sps:$4 sm:$0xff]   ;;  %v14890_v27 = vld [vmem:[%s16153_s13 + $0x1d84] ss:$16 sps:$4 sm:$0xff]  }
 0x461   : > { %11186 = vmatpush1.bf16.msra.mxu0 %v14846_v17  ;;  %v14893_v17 = vld [vmem:[%s16153_s13 + $0x1f84] ss:$16 sps:$4 sm:$0xff]  }
 0x462   : > { %11229 = vmatpush1.bf16.msra.mxu1 %v14849_v7  ;;  %11187 = vmatprep.subr.bf16.mxu0 %v14854_v45  ;;  %v14888_v7 = vld [vmem:[%s16153_s13 + $0x1d80] ss:$16 sps:$4 sm:$0xff]  }
 0x463   : > { %11230 = vmatprep.subr.bf16.mxu1 %v14857_v55  ;;  %v14891_v45 = vld [vmem:[%s16153_s13 + $0x1f80] ss:$16 sps:$4 sm:$0xff]   ;;  %v14896_v55 = vld [vmem:[%s16153_s13 + $0x1d64] ss:$16 sps:$4 sm:$0xff]  }
 0x465   : > { %11188 = vmatpush1.bf16.msra.mxu0 %v14852_v22  ;;  %v14899_v22 = vld [vmem:[%s16153_s13 + $0x1f64] ss:$16 sps:$4 sm:$0xff]  }
 0x466   : > { %11231 = vmatpush1.bf16.msra.mxu1 %v14855_v21  ;;  %11189 = vmatprep.subr.bf16.mxu0 %v14860_v58  ;;  %v14894_v21 = vld [vmem:[%s16153_s13 + $0x1d60] ss:$16 sps:$4 sm:$0xff]  }
 0x467   : > { %11232 = vmatprep.subr.bf16.mxu1 %v14863_v41  ;;  %v14897_v58 = vld [vmem:[%s16153_s13 + $0x1f60] ss:$16 sps:$4 sm:$0xff]   ;;  %v14902_v41 = vld [vmem:[%s16153_s13 + $0x1d44] ss:$16 sps:$4 sm:$0xff]  }
 0x469   : > { %11190 = vmatpush1.bf16.msra.mxu0 %v14858_v6  ;;  %v14905_v6 = vld [vmem:[%s16153_s13 + $0x1f44] ss:$16 sps:$4 sm:$0xff]  }
 0x46a   : > { %11233 = vmatpush1.bf16.msra.mxu1 %v14861_v26  ;;  %11191 = vmatprep.subr.bf16.mxu0 %v14866_v33  ;;  %v14900_v26 = vld [vmem:[%s16153_s13 + $0x1d40] ss:$16 sps:$4 sm:$0xff]  }
 0x46b   : > { %11234 = vmatprep.subr.bf16.mxu1 %v14869_v57  ;;  %v14903_v33 = vld [vmem:[%s16153_s13 + $0x1f40] ss:$16 sps:$4 sm:$0xff]   ;;  %v14908_v57 = vld [vmem:[%s16153_s13 + $0x1d24] ss:$16 sps:$4 sm:$0xff]  }
 0x46d   : > { %11192 = vmatpush1.bf16.msra.mxu0 %v14864_v16  ;;  %v14911_v16 = vld [vmem:[%s16153_s13 + $0x1f24] ss:$16 sps:$4 sm:$0xff]  }
 0x46e   : > { %11235 = vmatpush1.bf16.msra.mxu1 %v14867_v25  ;;  %11193 = vmatprep.subr.bf16.mxu0 %v14872_v53  ;;  %v14906_v25 = vld [vmem:[%s16153_s13 + $0x1d20] ss:$16 sps:$4 sm:$0xff]  }
 0x46f   : > { %11236 = vmatprep.subr.bf16.mxu1 %v14875_v48  ;;  %v14909_v53 = vld [vmem:[%s16153_s13 + $0x1f20] ss:$16 sps:$4 sm:$0xff]   ;;  %v14914_v48 = vld [vmem:[%s16153_s13 + $0x1d04] ss:$16 sps:$4 sm:$0xff]  }
 0x471   : > { %11194 = vmatpush2.bf16.msra.mxu0 %v14870_v62  ;;  %v14917_v62 = vld [vmem:[%s16153_s13 + $0x1f04] ss:$16 sps:$4 sm:$0xff]  }
 0x472   : > { %11237 = vmatpush2.bf16.msra.mxu1 %v14873_v40  ;;  %11195 = vmatprep.subr.bf16.mxu0 %v14878_v19  ;;  %v14912_v40 = vld [vmem:[%s16153_s13 + $0x1d00] ss:$16 sps:$4 sm:$0xff]  }
 0x473   : > { %11238 = vmatprep.subr.bf16.mxu1 %v14881_v1  ;;  %v14915_v19 = vld [vmem:[%s16153_s13 + $0x1f00] ss:$16 sps:$4 sm:$0xff]   ;;  %v14920_v1 = vld [vmem:[%s16153_s13 + $0xec] ss:$16 sps:$4 sm:$0xff]  }
 0x475   : > { %11196 = vmatpush2.bf16.msra.mxu0 %v14876_v36  ;;  %v14923_v36 = vld [vmem:[%s16153_s13 + $0x2ec] ss:$16 sps:$4 sm:$0xff]  }
 0x476   : > { %11239 = vmatpush2.bf16.msra.mxu1 %v14879_v4  ;;  %11197 = vmatprep.subr.bf16.mxu0 %v14884_v15  ;;  %v14918_v4 = vld [vmem:[%s16153_s13 + $0xe8] ss:$16 sps:$4 sm:$0xff]  }
 0x477   : > { %11240 = vmatprep.subr.bf16.mxu1 %v14887_v2  ;;  %v14921_v15 = vld [vmem:[%s16153_s13 + $0x2e8] ss:$16 sps:$4 sm:$0xff]   ;;  %v14926_v2 = vld [vmem:[%s16153_s13 + $0xcc] ss:$16 sps:$4 sm:$0xff]  }
 0x479   : > { %11198 = vmatpush2.bf16.msra.mxu0 %v14882_v8  ;;  %v14929_v8 = vld [vmem:[%s16153_s13 + $0x2cc] ss:$16 sps:$4 sm:$0xff]  }
 0x47a   : > { %11241 = vmatpush2.bf16.msra.mxu1 %v14885_v30  ;;  %11199 = vmatprep.subr.bf16.mxu0 %v14890_v27  ;;  %v14924_v30 = vld [vmem:[%s16153_s13 + $0xc8] ss:$16 sps:$4 sm:$0xff]  }
 0x47b   : > { %11242 = vmatprep.subr.bf16.mxu1 %v14893_v17  ;;  %v14927_v27 = vld [vmem:[%s16153_s13 + $0x2c8] ss:$16 sps:$4 sm:$0xff]   ;;  %v14932_v17 = vld [vmem:[%s16153_s13 + $0xac] ss:$16 sps:$4 sm:$0xff]  }
 0x47d   : > { %11200 = vmatpush2.bf16.msra.mxu0 %v14888_v7  ;;  %v14935_v7 = vld [vmem:[%s16153_s13 + $0x2ac] ss:$16 sps:$4 sm:$0xff]  }
 0x47e   : > { %11243 = vmatpush2.bf16.msra.mxu1 %v14891_v45  ;;  %11201 = vmatprep.subr.bf16.mxu0 %v14896_v55  ;;  %v14930_v45 = vld [vmem:[%s16153_s13 + $0xa8] ss:$16 sps:$4 sm:$0xff]  }
 0x47f   : > { %11244 = vmatprep.subr.bf16.mxu1 %v14899_v22  ;;  %v14933_v55 = vld [vmem:[%s16153_s13 + $0x2a8] ss:$16 sps:$4 sm:$0xff]   ;;  %v14941_v22 = vld [vmem:[%s16153_s13 + $0x28c] ss:$16 sps:$4 sm:$0xff]  }
 0x481   : > { %11202 = vmatpush2.bf16.msra.mxu0 %v14894_v21  ;;  %v14939_v21 = vld [vmem:[%s16153_s13 + $0x288] ss:$16 sps:$4 sm:$0xff]  }
 0x482   : > { %11245 = vmatpush2.bf16.msra.mxu1 %v14897_v58  ;;  %11203 = vmatprep.subr.bf16.mxu0 %v14902_v41  ;;  %v14944_v58 = vld [vmem:[%s16153_s13 + $0x6c] ss:$16 sps:$4 sm:$0xff]  }
 0x483   : > { %11246 = vmatprep.subr.bf16.mxu1 %v14905_v6  ;;  %v14947_v41 = vld [vmem:[%s16153_s13 + $0x26c] ss:$16 sps:$4 sm:$0xff]   ;;  %v14942_v6 = vld [vmem:[%s16153_s13 + $0x68] ss:$16 sps:$4 sm:$0xff]  }
 0x485   : > { %11204 = vmatpush2.bf16.msra.mxu0 %v14900_v26  ;;  %v14945_v26 = vld [vmem:[%s16153_s13 + $0x268] ss:$16 sps:$4 sm:$0xff]  }
 0x486   : > { %11247 = vmatpush2.bf16.msra.mxu1 %v14903_v33  ;;  %11205 = vmatprep.subr.bf16.mxu0 %v14908_v57  ;;  %v14950_v33 = vld [vmem:[%s16153_s13 + $0x4c] ss:$16 sps:$4 sm:$0xff]  }
 0x487   : > { %11248 = vmatprep.subr.bf16.mxu1 %v14911_v16  ;;  %v14953_v57 = vld [vmem:[%s16153_s13 + $0x24c] ss:$16 sps:$4 sm:$0xff]   ;;  %v14948_v16 = vld [vmem:[%s16153_s13 + $0x48] ss:$16 sps:$4 sm:$0xff]  }
 0x489   : > { %11206 = vmatpush2.bf16.msra.mxu0 %v14906_v25  ;;  %v14951_v25 = vld [vmem:[%s16153_s13 + $0x248] ss:$16 sps:$4 sm:$0xff]  }
 0x48a   : > { %11249 = vmatpush2.bf16.msra.mxu1 %v14909_v53  ;;  %11207 = vmatprep.subr.bf16.mxu0 %v14914_v48  ;;  %v14956_v53 = vld [vmem:[%s16153_s13 + $0x2c] ss:$16 sps:$4 sm:$0xff]  }
 0x48b   : > { %11250 = vmatprep.subr.bf16.mxu1 %v14917_v62  ;;  %v14959_v48 = vld [vmem:[%s16153_s13 + $0x22c] ss:$16 sps:$4 sm:$0xff]   ;;  %v14954_v62 = vld [vmem:[%s16153_s13 + $0x28] ss:$16 sps:$4 sm:$0xff]  }
 0x48d   : > { %11208 = vmatpush2.bf16.msra.mxu0 %v14912_v40  ;;  %v14957_v40 = vld [vmem:[%s16153_s13 + $0x228] ss:$16 sps:$4 sm:$0xff]  }
 0x48e   : > { %11251 = vmatpush2.bf16.msra.mxu1 %v14915_v19  ;;  %11263 = vmatprep.subr.bf16.mxu0 %v14920_v1  ;;  %v14962_v19 = vld [vmem:[%s16153_s13 + $0xc] ss:$16 sps:$4 sm:$0xff]  }
 0x48f   : > { %11306 = vmatprep.subr.bf16.mxu1 %v14923_v36  ;;  %v14965_v1 = vld [vmem:[%s16153_s13 + $0x20c] ss:$16 sps:$4 sm:$0xff]   ;;  %v14960_v36 = vld [vmem:[%s16153_s13 + $0x8] ss:$16 sps:$4 sm:$0xff]  }
 0x490   : > { %11210 = vmatmul.mubr.bf16.vlgmr.msra.gmra.mxu0 %v16653_v24 }
 0x491   : > { %11253 = vmatmul.mubr.bf16.vlgmr.msra.gmra.mxu1 %v16656_v5  ;;  %11264 = vmatpush1.bf16.msra.mxu0 %v14918_v4  ;;  %v14963_v4 = vld [vmem:[%s16153_s13 + $0x208] ss:$16 sps:$4 sm:$0xff]  }
 0x492   : > { %11295 = vmatprep.mubr.bf16.mxu0 %v16335_v42  ;;  %11307 = vmatpush1.bf16.msra.mxu1 %v14921_v15  ;;  %v14938_v42 = vld [vmem:[%s16153_s13 + $0x8c] ss:$16 sps:$4 sm:$0xff]  }
 0x493   : > { %11338 = vmatprep.mubr.bf16.mxu1 %v16340_v50  ;;  %11265 = vmatprep.subr.bf16.mxu0 %v14926_v2  ;;  %v14936_v50 = vld [vmem:[%s16153_s13 + $0x88] ss:$16 sps:$4 sm:$0xff]   ;;  %v14968_v15 = vld [vmem:[%s16153_s13 + $0x1ec] ss:$16 sps:$4 sm:$0xff]  }
 0x494   : > { %11308 = vmatprep.subr.bf16.mxu1 %v14929_v8  ;;  %v14971_v2 = vld [vmem:[%s16153_s13 + $0x3ec] ss:$16 sps:$4 sm:$0xff]   ;;  %v14966_v8 = vld [vmem:[%s16153_s13 + $0x1e8] ss:$16 sps:$4 sm:$0xff]  }
 0x495   : > { %11266 = vmatpush1.bf16.msra.mxu0 %v14924_v30  ;;  %v14969_v30 = vld [vmem:[%s16153_s13 + $0x3e8] ss:$16 sps:$4 sm:$0xff]  }
 0x496   : > { %11309 = vmatpush1.bf16.msra.mxu1 %v14927_v27  ;;  %11267 = vmatprep.subr.bf16.mxu0 %v14932_v17  ;;  %v14974_v27 = vld [vmem:[%s16153_s13 + $0x1cc] ss:$16 sps:$4 sm:$0xff]  }
 0x497   : > { %11310 = vmatprep.subr.bf16.mxu1 %v14935_v7  ;;  %v14977_v17 = vld [vmem:[%s16153_s13 + $0x3cc] ss:$16 sps:$4 sm:$0xff]   ;;  %v14972_v7 = vld [vmem:[%s16153_s13 + $0x1c8] ss:$16 sps:$4 sm:$0xff]  }
 0x499   : > { %11268 = vmatpush1.bf16.msra.mxu0 %v14930_v45  ;;  %v14975_v45 = vld [vmem:[%s16153_s13 + $0x3c8] ss:$16 sps:$4 sm:$0xff]  }
 0x49a   : > { %11311 = vmatpush1.bf16.msra.mxu1 %v14933_v55  ;;  %11269 = vmatprep.subr.bf16.mxu0 %v14938_v42  ;;  %v14980_v55 = vld [vmem:[%s16153_s13 + $0x1ac] ss:$16 sps:$4 sm:$0xff]  }
 0x49b   : > { %11312 = vmatprep.subr.bf16.mxu1 %v14941_v22  ;;  %v14983_v42 = vld [vmem:[%s16153_s13 + $0x3ac] ss:$16 sps:$4 sm:$0xff]   ;;  %v14978_v22 = vld [vmem:[%s16153_s13 + $0x1a8] ss:$16 sps:$4 sm:$0xff]  }
 0x49d   : > { %11270 = vmatpush1.bf16.msra.mxu0 %v14936_v50  ;;  %v14981_v50 = vld [vmem:[%s16153_s13 + $0x3a8] ss:$16 sps:$4 sm:$0xff]  }
 0x49e   : > { %11313 = vmatpush1.bf16.msra.mxu1 %v14939_v21  ;;  %11271 = vmatprep.subr.bf16.mxu0 %v14944_v58  ;;  %v14986_v21 = vld [vmem:[%s16153_s13 + $0x18c] ss:$16 sps:$4 sm:$0xff]  }
 0x49f   : > { %11314 = vmatprep.subr.bf16.mxu1 %v14947_v41  ;;  %v14989_v58 = vld [vmem:[%s16153_s13 + $0x38c] ss:$16 sps:$4 sm:$0xff]   ;;  %v14984_v41 = vld [vmem:[%s16153_s13 + $0x188] ss:$16 sps:$4 sm:$0xff]  }
 0x4a1   : > { %11272 = vmatpush1.bf16.msra.mxu0 %v14942_v6  ;;  %v14987_v6 = vld [vmem:[%s16153_s13 + $0x388] ss:$16 sps:$4 sm:$0xff]  }
 0x4a2   : > { %11315 = vmatpush1.bf16.msra.mxu1 %v14945_v26  ;;  %11273 = vmatprep.subr.bf16.mxu0 %v14950_v33  ;;  %v14992_v26 = vld [vmem:[%s16153_s13 + $0x16c] ss:$16 sps:$4 sm:$0xff]  }
 0x4a3   : > { %11316 = vmatprep.subr.bf16.mxu1 %v14953_v57  ;;  %v14995_v33 = vld [vmem:[%s16153_s13 + $0x36c] ss:$16 sps:$4 sm:$0xff]   ;;  %v14990_v57 = vld [vmem:[%s16153_s13 + $0x168] ss:$16 sps:$4 sm:$0xff]  }
 0x4a5   : > { %11274 = vmatpush1.bf16.msra.mxu0 %v14948_v16  ;;  %v14993_v16 = vld [vmem:[%s16153_s13 + $0x368] ss:$16 sps:$4 sm:$0xff]  }
 0x4a6   : > { %11317 = vmatpush1.bf16.msra.mxu1 %v14951_v25  ;;  %11275 = vmatprep.subr.bf16.mxu0 %v14956_v53  ;;  %v14998_v25 = vld [vmem:[%s16153_s13 + $0x14c] ss:$16 sps:$4 sm:$0xff]  }
 0x4a7   : > { %11318 = vmatprep.subr.bf16.mxu1 %v14959_v48  ;;  %v15001_v53 = vld [vmem:[%s16153_s13 + $0x34c] ss:$16 sps:$4 sm:$0xff]   ;;  %v14996_v48 = vld [vmem:[%s16153_s13 + $0x148] ss:$16 sps:$4 sm:$0xff]  }
 0x4a9   : > { %11276 = vmatpush1.bf16.msra.mxu0 %v14954_v62  ;;  %v14999_v62 = vld [vmem:[%s16153_s13 + $0x348] ss:$16 sps:$4 sm:$0xff]  }
 0x4aa   : > { %11319 = vmatpush1.bf16.msra.mxu1 %v14957_v40  ;;  %11277 = vmatprep.subr.bf16.mxu0 %v14962_v19  ;;  %v15004_v40 = vld [vmem:[%s16153_s13 + $0x12c] ss:$16 sps:$4 sm:$0xff]  }
 0x4ab   : > { %11320 = vmatprep.subr.bf16.mxu1 %v14965_v1  ;;  %v15007_v19 = vld [vmem:[%s16153_s13 + $0x32c] ss:$16 sps:$4 sm:$0xff]   ;;  %v15002_v1 = vld [vmem:[%s16153_s13 + $0x128] ss:$16 sps:$4 sm:$0xff]  }
 0x4ad   : > { %11278 = vmatpush1.bf16.msra.mxu0 %v14960_v36  ;;  %v15005_v36 = vld [vmem:[%s16153_s13 + $0x328] ss:$16 sps:$4 sm:$0xff]  }
 0x4ae   : > { %11321 = vmatpush1.bf16.msra.mxu1 %v14963_v4  ;;  %11279 = vmatprep.subr.bf16.mxu0 %v14968_v15  ;;  %v15010_v4 = vld [vmem:[%s16153_s13 + $0x10c] ss:$16 sps:$4 sm:$0xff]  }
 0x4af   : > { %11322 = vmatprep.subr.bf16.mxu1 %v14971_v2  ;;  %v15013_v15 = vld [vmem:[%s16153_s13 + $0x30c] ss:$16 sps:$4 sm:$0xff]   ;;  %v15008_v2 = vld [vmem:[%s16153_s13 + $0x108] ss:$16 sps:$4 sm:$0xff]  }
 0x4b1   : > { %11280 = vmatpush2.bf16.msra.mxu0 %v14966_v8  ;;  %v15011_v8 = vld [vmem:[%s16153_s13 + $0x308] ss:$16 sps:$4 sm:$0xff]  }
 0x4b2   : > { %11323 = vmatpush2.bf16.msra.mxu1 %v14969_v30  ;;  %11281 = vmatprep.subr.bf16.mxu0 %v14974_v27  ;;  %v15016_v30 = vld [vmem:[%s16153_s13 + $0x4ec] ss:$16 sps:$4 sm:$0xff]  }
 0x4b3   : > { %11324 = vmatprep.subr.bf16.mxu1 %v14977_v17  ;;  %v15019_v27 = vld [vmem:[%s16153_s13 + $0x6ec] ss:$16 sps:$4 sm:$0xff]   ;;  %v15014_v17 = vld [vmem:[%s16153_s13 + $0x4e8] ss:$16 sps:$4 sm:$0xff]  }
 0x4b5   : > { %11282 = vmatpush2.bf16.msra.mxu0 %v14972_v7  ;;  %v15017_v7 = vld [vmem:[%s16153_s13 + $0x6e8] ss:$16 sps:$4 sm:$0xff]  }
 0x4b6   : > { %11325 = vmatpush2.bf16.msra.mxu1 %v14975_v45  ;;  %11283 = vmatprep.subr.bf16.mxu0 %v14980_v55  ;;  %v15022_v45 = vld [vmem:[%s16153_s13 + $0x4cc] ss:$16 sps:$4 sm:$0xff]  }
 0x4b7   : > { %11326 = vmatprep.subr.bf16.mxu1 %v14983_v42  ;;  %v15025_v55 = vld [vmem:[%s16153_s13 + $0x6cc] ss:$16 sps:$4 sm:$0xff]   ;;  %v15020_v42 = vld [vmem:[%s16153_s13 + $0x4c8] ss:$16 sps:$4 sm:$0xff]  }
 0x4b9   : > { %11284 = vmatpush2.bf16.msra.mxu0 %v14978_v22  ;;  %v15023_v22 = vld [vmem:[%s16153_s13 + $0x6c8] ss:$16 sps:$4 sm:$0xff]  }
 0x4ba   : > { %11327 = vmatpush2.bf16.msra.mxu1 %v14981_v50  ;;  %11285 = vmatprep.subr.bf16.mxu0 %v14986_v21  ;;  %v15028_v50 = vld [vmem:[%s16153_s13 + $0x4ac] ss:$16 sps:$4 sm:$0xff]   ;;  %v15029_v21 = vld [vmem:[%s16153_s13 + $0x6a8] ss:$16 sps:$4 sm:$0xff]  }
 0x4bb   : > { %11328 = vmatprep.subr.bf16.mxu1 %v14989_v58  ;;  %v15037_v58 = vld [vmem:[%s16153_s13 + $0x68c] ss:$16 sps:$4 sm:$0xff]  }
 0x4bd   : > { %11286 = vmatpush2.bf16.msra.mxu0 %v14984_v41  ;;  %v15035_v41 = vld [vmem:[%s16153_s13 + $0x688] ss:$16 sps:$4 sm:$0xff]  }
 0x4be   : > { %11329 = vmatpush2.bf16.msra.mxu1 %v14987_v6  ;;  %11287 = vmatprep.subr.bf16.mxu0 %v14992_v26  ;;  %v15040_v6 = vld [vmem:[%s16153_s13 + $0x46c] ss:$16 sps:$4 sm:$0xff]  }
 0x4bf   : > { %11330 = vmatprep.subr.bf16.mxu1 %v14995_v33  ;;  %v15043_v26 = vld [vmem:[%s16153_s13 + $0x66c] ss:$16 sps:$4 sm:$0xff]   ;;  %v15038_v33 = vld [vmem:[%s16153_s13 + $0x468] ss:$16 sps:$4 sm:$0xff]  }
 0x4c1   : > { %11288 = vmatpush2.bf16.msra.mxu0 %v14990_v57  ;;  %v15041_v57 = vld [vmem:[%s16153_s13 + $0x668] ss:$16 sps:$4 sm:$0xff]  }
 0x4c2   : > { %11331 = vmatpush2.bf16.msra.mxu1 %v14993_v16  ;;  %11289 = vmatprep.subr.bf16.mxu0 %v14998_v25  ;;  %v15046_v16 = vld [vmem:[%s16153_s13 + $0x44c] ss:$16 sps:$4 sm:$0xff]  }
 0x4c3   : > { %11332 = vmatprep.subr.bf16.mxu1 %v15001_v53  ;;  %v15049_v25 = vld [vmem:[%s16153_s13 + $0x64c] ss:$16 sps:$4 sm:$0xff]   ;;  %v15044_v53 = vld [vmem:[%s16153_s13 + $0x448] ss:$16 sps:$4 sm:$0xff]  }
 0x4c5   : > { %11290 = vmatpush2.bf16.msra.mxu0 %v14996_v48  ;;  %v15047_v48 = vld [vmem:[%s16153_s13 + $0x648] ss:$16 sps:$4 sm:$0xff]  }
 0x4c6   : > { %11333 = vmatpush2.bf16.msra.mxu1 %v14999_v62  ;;  %11291 = vmatprep.subr.bf16.mxu0 %v15004_v40  ;;  %v15052_v62 = vld [vmem:[%s16153_s13 + $0x42c] ss:$16 sps:$4 sm:$0xff]  }
 0x4c7   : > { %11334 = vmatprep.subr.bf16.mxu1 %v15007_v19  ;;  %v15055_v40 = vld [vmem:[%s16153_s13 + $0x62c] ss:$16 sps:$4 sm:$0xff]   ;;  %v15050_v19 = vld [vmem:[%s16153_s13 + $0x428] ss:$16 sps:$4 sm:$0xff]  }
 0x4c9   : > { %11292 = vmatpush2.bf16.msra.mxu0 %v15002_v1  ;;  %v15053_v1 = vld [vmem:[%s16153_s13 + $0x628] ss:$16 sps:$4 sm:$0xff]  }
 0x4ca   : > { %11335 = vmatpush2.bf16.msra.mxu1 %v15005_v36  ;;  %11293 = vmatprep.subr.bf16.mxu0 %v15010_v4  ;;  %v15058_v36 = vld [vmem:[%s16153_s13 + $0x40c] ss:$16 sps:$4 sm:$0xff]  }
 0x4cb   : > { %11336 = vmatprep.subr.bf16.mxu1 %v15013_v15  ;;  %v15061_v4 = vld [vmem:[%s16153_s13 + $0x60c] ss:$16 sps:$4 sm:$0xff]   ;;  %v15056_v15 = vld [vmem:[%s16153_s13 + $0x408] ss:$16 sps:$4 sm:$0xff]  }
 0x4cd   : > { %11294 = vmatpush2.bf16.msra.mxu0 %v15008_v2  ;;  %v15059_v2 = vld [vmem:[%s16153_s13 + $0x608] ss:$16 sps:$4 sm:$0xff]  }
 0x4ce   : > { %11337 = vmatpush2.bf16.msra.mxu1 %v15011_v8  ;;  %11349 = vmatprep.subr.bf16.mxu0 %v15016_v30  ;;  %v15064_v8 = vld [vmem:[%s16153_s13 + $0x5ec] ss:$16 sps:$4 sm:$0xff]  }
 0x4cf   : > { %11392 = vmatprep.subr.bf16.mxu1 %v15019_v27  ;;  %v15067_v30 = vld [vmem:[%s16153_s13 + $0x7ec] ss:$16 sps:$4 sm:$0xff]   ;;  %v15062_v27 = vld [vmem:[%s16153_s13 + $0x5e8] ss:$16 sps:$4 sm:$0xff]  }
 0x4d0   : > { %11296 = vmatmul.mubr.bf16.vlgmr.msra.gmra.mxu0 %v16215_v10  ;;  %v15031_v10 = vld [vmem:[%s16153_s13 + $0x6ac] ss:$16 sps:$4 sm:$0xff]  }
 0x4d1   : > { %11339 = vmatmul.mubr.bf16.vlgmr.msra.gmra.mxu1 %v16217_v3  ;;  %11350 = vmatpush1.bf16.msra.mxu0 %v15014_v17  ;;  %v15026_v3 = vld [vmem:[%s16153_s13 + $0x4a8] ss:$16 sps:$4 sm:$0xff]  }
 0x4d2   : > { %11381 = vmatprep.mubr.bf16.mxu0 %v16436_v34  ;;  %11393 = vmatpush1.bf16.msra.mxu1 %v15017_v7  ;;  %v15034_v34 = vld [vmem:[%s16153_s13 + $0x48c] ss:$16 sps:$4 sm:$0xff]   ;;  %v15065_v17 = vld [vmem:[%s16153_s13 + $0x7e8] ss:$16 sps:$4 sm:$0xff]  }
 0x4d3   : > { %11424 = vmatprep.mubr.bf16.mxu1 %v16440_v56  ;;  %11351 = vmatprep.subr.bf16.mxu0 %v15022_v45  ;;  %v15032_v56 = vld [vmem:[%s16153_s13 + $0x488] ss:$16 sps:$4 sm:$0xff]   ;;  %v15070_v7 = vld [vmem:[%s16153_s13 + $0x5cc] ss:$16 sps:$4 sm:$0xff]  }
 0x4d4   : > { %11394 = vmatprep.subr.bf16.mxu1 %v15025_v55  ;;  %v15073_v45 = vld [vmem:[%s16153_s13 + $0x7cc] ss:$16 sps:$4 sm:$0xff]   ;;  %v15068_v55 = vld [vmem:[%s16153_s13 + $0x5c8] ss:$16 sps:$4 sm:$0xff]  }
 0x4d5   : > { %11352 = vmatpush1.bf16.msra.mxu0 %v15020_v42  ;;  %v15071_v42 = vld [vmem:[%s16153_s13 + $0x7c8] ss:$16 sps:$4 sm:$0xff]  }
 0x4d6   : > { %11395 = vmatpush1.bf16.msra.mxu1 %v15023_v22  ;;  %11353 = vmatprep.subr.bf16.mxu0 %v15028_v50  ;;  %v15076_v22 = vld [vmem:[%s16153_s13 + $0x5ac] ss:$16 sps:$4 sm:$0xff]  }
 0x4d7   : > { %11396 = vmatprep.subr.bf16.mxu1 %v15031_v10  ;;  %v15079_v50 = vld [vmem:[%s16153_s13 + $0x7ac] ss:$16 sps:$4 sm:$0xff]   ;;  %v15074_v10 = vld [vmem:[%s16153_s13 + $0x5a8] ss:$16 sps:$4 sm:$0xff]  }
 0x4d9   : > { %11354 = vmatpush1.bf16.msra.mxu0 %v15026_v3  ;;  %v15077_v3 = vld [vmem:[%s16153_s13 + $0x7a8] ss:$16 sps:$4 sm:$0xff]  }
 0x4da   : > { %11397 = vmatpush1.bf16.msra.mxu1 %v15029_v21  ;;  %11355 = vmatprep.subr.bf16.mxu0 %v15034_v34  ;;  %v15082_v21 = vld [vmem:[%s16153_s13 + $0x58c] ss:$16 sps:$4 sm:$0xff]  }
 0x4db   : > { %11398 = vmatprep.subr.bf16.mxu1 %v15037_v58  ;;  %v15085_v34 = vld [vmem:[%s16153_s13 + $0x78c] ss:$16 sps:$4 sm:$0xff]   ;;  %v15080_v58 = vld [vmem:[%s16153_s13 + $0x588] ss:$16 sps:$4 sm:$0xff]  }
 0x4dd   : > { %11356 = vmatpush1.bf16.msra.mxu0 %v15032_v56  ;;  %v15083_v56 = vld [vmem:[%s16153_s13 + $0x788] ss:$16 sps:$4 sm:$0xff]  }
 0x4de   : > { %11399 = vmatpush1.bf16.msra.mxu1 %v15035_v41  ;;  %11357 = vmatprep.subr.bf16.mxu0 %v15040_v6  ;;  %v15088_v41 = vld [vmem:[%s16153_s13 + $0x56c] ss:$16 sps:$4 sm:$0xff]  }
 0x4df   : > { %11400 = vmatprep.subr.bf16.mxu1 %v15043_v26  ;;  %v15091_v6 = vld [vmem:[%s16153_s13 + $0x76c] ss:$16 sps:$4 sm:$0xff]   ;;  %v15086_v26 = vld [vmem:[%s16153_s13 + $0x568] ss:$16 sps:$4 sm:$0xff]  }
 0x4e1   : > { %11358 = vmatpush1.bf16.msra.mxu0 %v15038_v33  ;;  %v15089_v33 = vld [vmem:[%s16153_s13 + $0x768] ss:$16 sps:$4 sm:$0xff]  }
 0x4e2   : > { %11401 = vmatpush1.bf16.msra.mxu1 %v15041_v57  ;;  %11359 = vmatprep.subr.bf16.mxu0 %v15046_v16  ;;  %v15094_v57 = vld [vmem:[%s16153_s13 + $0x54c] ss:$16 sps:$4 sm:$0xff]  }
 0x4e3   : > { %11402 = vmatprep.subr.bf16.mxu1 %v15049_v25  ;;  %v15097_v16 = vld [vmem:[%s16153_s13 + $0x74c] ss:$16 sps:$4 sm:$0xff]   ;;  %v15092_v25 = vld [vmem:[%s16153_s13 + $0x548] ss:$16 sps:$4 sm:$0xff]  }
 0x4e5   : > { %11360 = vmatpush1.bf16.msra.mxu0 %v15044_v53  ;;  %v15095_v53 = vld [vmem:[%s16153_s13 + $0x748] ss:$16 sps:$4 sm:$0xff]  }
 0x4e6   : > { %11403 = vmatpush1.bf16.msra.mxu1 %v15047_v48  ;;  %11361 = vmatprep.subr.bf16.mxu0 %v15052_v62  ;;  %v15100_v48 = vld [vmem:[%s16153_s13 + $0x52c] ss:$16 sps:$4 sm:$0xff]  }
 0x4e7   : > { %11404 = vmatprep.subr.bf16.mxu1 %v15055_v40  ;;  %v15103_v62 = vld [vmem:[%s16153_s13 + $0x72c] ss:$16 sps:$4 sm:$0xff]   ;;  %v15098_v40 = vld [vmem:[%s16153_s13 + $0x528] ss:$16 sps:$4 sm:$0xff]  }
 0x4e9   : > { %11362 = vmatpush1.bf16.msra.mxu0 %v15050_v19  ;;  %v15101_v19 = vld [vmem:[%s16153_s13 + $0x728] ss:$16 sps:$4 sm:$0xff]  }
 0x4ea   : > { %11405 = vmatpush1.bf16.msra.mxu1 %v15053_v1  ;;  %11363 = vmatprep.subr.bf16.mxu0 %v15058_v36  ;;  %v15106_v1 = vld [vmem:[%s16153_s13 + $0x50c] ss:$16 sps:$4 sm:$0xff]  }
 0x4eb   : > { %11406 = vmatprep.subr.bf16.mxu1 %v15061_v4  ;;  %v15109_v36 = vld [vmem:[%s16153_s13 + $0x70c] ss:$16 sps:$4 sm:$0xff]   ;;  %v15104_v4 = vld [vmem:[%s16153_s13 + $0x508] ss:$16 sps:$4 sm:$0xff]  }
 0x4ed   : > { %11364 = vmatpush1.bf16.msra.mxu0 %v15056_v15  ;;  %v15107_v15 = vld [vmem:[%s16153_s13 + $0x708] ss:$16 sps:$4 sm:$0xff]  }
 0x4ee   : > { %11407 = vmatpush1.bf16.msra.mxu1 %v15059_v2  ;;  %11365 = vmatprep.subr.bf16.mxu0 %v15064_v8  ;;  %v15112_v2 = vld [vmem:[%s16153_s13 + $0x8ec] ss:$16 sps:$4 sm:$0xff]  }
 0x4ef   : > { %11408 = vmatprep.subr.bf16.mxu1 %v15067_v30  ;;  %v15115_v8 = vld [vmem:[%s16153_s13 + $0xaec] ss:$16 sps:$4 sm:$0xff]   ;;  %v15110_v30 = vld [vmem:[%s16153_s13 + $0x8e8] ss:$16 sps:$4 sm:$0xff]  }
 0x4f1   : > { %11366 = vmatpush2.bf16.msra.mxu0 %v15062_v27  ;;  %v15113_v27 = vld [vmem:[%s16153_s13 + $0xae8] ss:$16 sps:$4 sm:$0xff]  }
 0x4f2   : > { %11409 = vmatpush2.bf16.msra.mxu1 %v15065_v17  ;;  %11367 = vmatprep.subr.bf16.mxu0 %v15070_v7  ;;  %v15118_v17 = vld [vmem:[%s16153_s13 + $0x8cc] ss:$16 sps:$4 sm:$0xff]  }
 0x4f3   : > { %11410 = vmatprep.subr.bf16.mxu1 %v15073_v45  ;;  %v15121_v7 = vld [vmem:[%s16153_s13 + $0xacc] ss:$16 sps:$4 sm:$0xff]   ;;  %v15116_v45 = vld [vmem:[%s16153_s13 + $0x8c8] ss:$16 sps:$4 sm:$0xff]  }
 0x4f5   : > { %11368 = vmatpush2.bf16.msra.mxu0 %v15068_v55  ;;  %v15119_v55 = vld [vmem:[%s16153_s13 + $0xac8] ss:$16 sps:$4 sm:$0xff]  }
 0x4f6   : > { %11411 = vmatpush2.bf16.msra.mxu1 %v15071_v42  ;;  %11369 = vmatprep.subr.bf16.mxu0 %v15076_v22  ;;  %v15124_v42 = vld [vmem:[%s16153_s13 + $0x8ac] ss:$16 sps:$4 sm:$0xff]   ;;  %v15125_v22 = vld [vmem:[%s16153_s13 + $0xaa8] ss:$16 sps:$4 sm:$0xff]  }
 0x4f7   : > { %11412 = vmatprep.subr.bf16.mxu1 %v15079_v50  ;;  %v15133_v50 = vld [vmem:[%s16153_s13 + $0xa8c] ss:$16 sps:$4 sm:$0xff]  }
 0x4f9   : > { %11370 = vmatpush2.bf16.msra.mxu0 %v15074_v10  ;;  %v15131_v10 = vld [vmem:[%s16153_s13 + $0xa88] ss:$16 sps:$4 sm:$0xff]  }
 0x4fa   : > { %11413 = vmatpush2.bf16.msra.mxu1 %v15077_v3  ;;  %11371 = vmatprep.subr.bf16.mxu0 %v15082_v21  ;;  %v15136_v3 = vld [vmem:[%s16153_s13 + $0x86c] ss:$16 sps:$4 sm:$0xff]  }
 0x4fb   : > { %11414 = vmatprep.subr.bf16.mxu1 %v15085_v34  ;;  %v15139_v21 = vld [vmem:[%s16153_s13 + $0xa6c] ss:$16 sps:$4 sm:$0xff]   ;;  %v15134_v34 = vld [vmem:[%s16153_s13 + $0x868] ss:$16 sps:$4 sm:$0xff]  }
 0x4fd   : > { %11372 = vmatpush2.bf16.msra.mxu0 %v15080_v58  ;;  %v15137_v58 = vld [vmem:[%s16153_s13 + $0xa68] ss:$16 sps:$4 sm:$0xff]  }
 0x4fe   : > { %11415 = vmatpush2.bf16.msra.mxu1 %v15083_v56  ;;  %11373 = vmatprep.subr.bf16.mxu0 %v15088_v41  ;;  %v15142_v56 = vld [vmem:[%s16153_s13 + $0x84c] ss:$16 sps:$4 sm:$0xff]  }
 0x4ff   : > { %11416 = vmatprep.subr.bf16.mxu1 %v15091_v6  ;;  %v15145_v41 = vld [vmem:[%s16153_s13 + $0xa4c] ss:$16 sps:$4 sm:$0xff]   ;;  %v15140_v6 = vld [vmem:[%s16153_s13 + $0x848] ss:$16 sps:$4 sm:$0xff]  }
 0x501   : > { %11374 = vmatpush2.bf16.msra.mxu0 %v15086_v26  ;;  %v15143_v26 = vld [vmem:[%s16153_s13 + $0xa48] ss:$16 sps:$4 sm:$0xff]  }
 0x502   : > { %11417 = vmatpush2.bf16.msra.mxu1 %v15089_v33  ;;  %11375 = vmatprep.subr.bf16.mxu0 %v15094_v57  ;;  %v15148_v33 = vld [vmem:[%s16153_s13 + $0x82c] ss:$16 sps:$4 sm:$0xff]  }
 0x503   : > { %11418 = vmatprep.subr.bf16.mxu1 %v15097_v16  ;;  %v15151_v57 = vld [vmem:[%s16153_s13 + $0xa2c] ss:$16 sps:$4 sm:$0xff]   ;;  %v15146_v16 = vld [vmem:[%s16153_s13 + $0x828] ss:$16 sps:$4 sm:$0xff]  }
 0x505   : > { %11376 = vmatpush2.bf16.msra.mxu0 %v15092_v25  ;;  %v15149_v25 = vld [vmem:[%s16153_s13 + $0xa28] ss:$16 sps:$4 sm:$0xff]  }
 0x506   : > { %11419 = vmatpush2.bf16.msra.mxu1 %v15095_v53  ;;  %11377 = vmatprep.subr.bf16.mxu0 %v15100_v48  ;;  %v15154_v53 = vld [vmem:[%s16153_s13 + $0x80c] ss:$16 sps:$4 sm:$0xff]  }
 0x507   : > { %11420 = vmatprep.subr.bf16.mxu1 %v15103_v62  ;;  %v15157_v48 = vld [vmem:[%s16153_s13 + $0xa0c] ss:$16 sps:$4 sm:$0xff]   ;;  %v15152_v62 = vld [vmem:[%s16153_s13 + $0x808] ss:$16 sps:$4 sm:$0xff]  }
 0x509   : > { %11378 = vmatpush2.bf16.msra.mxu0 %v15098_v40  ;;  %v15155_v40 = vld [vmem:[%s16153_s13 + $0xa08] ss:$16 sps:$4 sm:$0xff]  }
 0x50a   : > { %11421 = vmatpush2.bf16.msra.mxu1 %v15101_v19  ;;  %11379 = vmatprep.subr.bf16.mxu0 %v15106_v1  ;;  %v15160_v19 = vld [vmem:[%s16153_s13 + $0x9ec] ss:$16 sps:$4 sm:$0xff]  }
 0x50b   : > { %11422 = vmatprep.subr.bf16.mxu1 %v15109_v36  ;;  %v15163_v1 = vld [vmem:[%s16153_s13 + $0xbec] ss:$16 sps:$4 sm:$0xff]   ;;  %v15158_v36 = vld [vmem:[%s16153_s13 + $0x9e8] ss:$16 sps:$4 sm:$0xff]  }
 0x50d   : > { %11380 = vmatpush2.bf16.msra.mxu0 %v15104_v4  ;;  %v15161_v4 = vld [vmem:[%s16153_s13 + $0xbe8] ss:$16 sps:$4 sm:$0xff]  }
 0x50e   : > { %11423 = vmatpush2.bf16.msra.mxu1 %v15107_v15  ;;  %11435 = vmatprep.subr.bf16.mxu0 %v15112_v2  ;;  %v15166_v15 = vld [vmem:[%s16153_s13 + $0x9cc] ss:$16 sps:$4 sm:$0xff]  }
 0x50f   : > { %11478 = vmatprep.subr.bf16.mxu1 %v15115_v8  ;;  %v15169_v2 = vld [vmem:[%s16153_s13 + $0xbcc] ss:$16 sps:$4 sm:$0xff]   ;;  %v15164_v8 = vld [vmem:[%s16153_s13 + $0x9c8] ss:$16 sps:$4 sm:$0xff]  }
 0x510   : > { %11382 = vmatmul.mubr.bf16.vlgmr.msra.gmra.mxu0 %v16251_v46  ;;  %v15127_v46 = vld [vmem:[%s16153_s13 + $0xaac] ss:$16 sps:$4 sm:$0xff]  }
 0x511   : > { %11425 = vmatmul.mubr.bf16.vlgmr.msra.gmra.mxu1 %v16253_v49  ;;  %11436 = vmatpush1.bf16.msra.mxu0 %v15110_v30  ;;  %v15122_v49 = vld [vmem:[%s16153_s13 + $0x8a8] ss:$16 sps:$4 sm:$0xff]  }
 0x512   : > { %11467 = vmatprep.mubr.bf16.mxu0 %v16536_v13  ;;  %11479 = vmatpush1.bf16.msra.mxu1 %v15113_v27  ;;  %v15130_v13 = vld [vmem:[%s16153_s13 + $0x88c] ss:$16 sps:$4 sm:$0xff]   ;;  %v15167_v30 = vld [vmem:[%s16153_s13 + $0xbc8] ss:$16 sps:$4 sm:$0xff]  }
 0x513   : > { %11510 = vmatprep.mubr.bf16.mxu1 %v16540_v14  ;;  %11437 = vmatprep.subr.bf16.mxu0 %v15118_v17  ;;  %v15128_v14 = vld [vmem:[%s16153_s13 + $0x888] ss:$16 sps:$4 sm:$0xff]   ;;  %v15172_v27 = vld [vmem:[%s16153_s13 + $0x9ac] ss:$16 sps:$4 sm:$0xff]  }
 0x514   : > { %11480 = vmatprep.subr.bf16.mxu1 %v15121_v7  ;;  %v15175_v17 = vld [vmem:[%s16153_s13 + $0xbac] ss:$16 sps:$4 sm:$0xff]   ;;  %v15170_v7 = vld [vmem:[%s16153_s13 + $0x9a8] ss:$16 sps:$4 sm:$0xff]  }
 0x515   : > { %11438 = vmatpush1.bf16.msra.mxu0 %v15116_v45  ;;  %v15173_v45 = vld [vmem:[%s16153_s13 + $0xba8] ss:$16 sps:$4 sm:$0xff]  }
 0x516   : > { %11481 = vmatpush1.bf16.msra.mxu1 %v15119_v55  ;;  %11439 = vmatprep.subr.bf16.mxu0 %v15124_v42  ;;  %v15178_v55 = vld [vmem:[%s16153_s13 + $0x98c] ss:$16 sps:$4 sm:$0xff]  }
 0x517   : > { %11482 = vmatprep.subr.bf16.mxu1 %v15127_v46  ;;  %v15181_v42 = vld [vmem:[%s16153_s13 + $0xb8c] ss:$16 sps:$4 sm:$0xff]   ;;  %v15176_v46 = vld [vmem:[%s16153_s13 + $0x988] ss:$16 sps:$4 sm:$0xff]  }
 0x519   : > { %11440 = vmatpush1.bf16.msra.mxu0 %v15122_v49  ;;  %v15179_v49 = vld [vmem:[%s16153_s13 + $0xb88] ss:$16 sps:$4 sm:$0xff]  }
 0x51a   : > { %11483 = vmatpush1.bf16.msra.mxu1 %v15125_v22  ;;  %11441 = vmatprep.subr.bf16.mxu0 %v15130_v13  ;;  %v15184_v22 = vld [vmem:[%s16153_s13 + $0x96c] ss:$16 sps:$4 sm:$0xff]  }
 0x51b   : > { %11484 = vmatprep.subr.bf16.mxu1 %v15133_v50  ;;  %v15187_v13 = vld [vmem:[%s16153_s13 + $0xb6c] ss:$16 sps:$4 sm:$0xff]   ;;  %v15182_v50 = vld [vmem:[%s16153_s13 + $0x968] ss:$16 sps:$4 sm:$0xff]  }
 0x51d   : > { %11442 = vmatpush1.bf16.msra.mxu0 %v15128_v14  ;;  %v15185_v14 = vld [vmem:[%s16153_s13 + $0xb68] ss:$16 sps:$4 sm:$0xff]  }
 0x51e   : > { %11485 = vmatpush1.bf16.msra.mxu1 %v15131_v10  ;;  %11443 = vmatprep.subr.bf16.mxu0 %v15136_v3  ;;  %v15190_v10 = vld [vmem:[%s16153_s13 + $0x94c] ss:$16 sps:$4 sm:$0xff]  }
 0x51f   : > { %11486 = vmatprep.subr.bf16.mxu1 %v15139_v21  ;;  %v15193_v3 = vld [vmem:[%s16153_s13 + $0xb4c] ss:$16 sps:$4 sm:$0xff]   ;;  %v15188_v21 = vld [vmem:[%s16153_s13 + $0x948] ss:$16 sps:$4 sm:$0xff]  }
 0x521   : > { %11444 = vmatpush1.bf16.msra.mxu0 %v15134_v34  ;;  %v15191_v34 = vld [vmem:[%s16153_s13 + $0xb48] ss:$16 sps:$4 sm:$0xff]  }
 0x522   : > { %11487 = vmatpush1.bf16.msra.mxu1 %v15137_v58  ;;  %11445 = vmatprep.subr.bf16.mxu0 %v15142_v56  ;;  %v15196_v58 = vld [vmem:[%s16153_s13 + $0x92c] ss:$16 sps:$4 sm:$0xff]  }
 0x523   : > { %11488 = vmatprep.subr.bf16.mxu1 %v15145_v41  ;;  %v15199_v56 = vld [vmem:[%s16153_s13 + $0xb2c] ss:$16 sps:$4 sm:$0xff]   ;;  %v15194_v41 = vld [vmem:[%s16153_s13 + $0x928] ss:$16 sps:$4 sm:$0xff]  }
 0x525   : > { %11446 = vmatpush1.bf16.msra.mxu0 %v15140_v6  ;;  %v15197_v6 = vld [vmem:[%s16153_s13 + $0xb28] ss:$16 sps:$4 sm:$0xff]  }
 0x526   : > { %11489 = vmatpush1.bf16.msra.mxu1 %v15143_v26  ;;  %11447 = vmatprep.subr.bf16.mxu0 %v15148_v33  ;;  %v15202_v26 = vld [vmem:[%s16153_s13 + $0x90c] ss:$16 sps:$4 sm:$0xff]  }
 0x527   : > { %11490 = vmatprep.subr.bf16.mxu1 %v15151_v57  ;;  %v15205_v33 = vld [vmem:[%s16153_s13 + $0xb0c] ss:$16 sps:$4 sm:$0xff]   ;;  %v15200_v57 = vld [vmem:[%s16153_s13 + $0x908] ss:$16 sps:$4 sm:$0xff]  }
 0x529   : > { %11448 = vmatpush1.bf16.msra.mxu0 %v15146_v16  ;;  %v15203_v16 = vld [vmem:[%s16153_s13 + $0xb08] ss:$16 sps:$4 sm:$0xff]  }
 0x52a   : > { %11491 = vmatpush1.bf16.msra.mxu1 %v15149_v25  ;;  %11449 = vmatprep.subr.bf16.mxu0 %v15154_v53  ;;  %v15208_v25 = vld [vmem:[%s16153_s13 + $0xcec] ss:$16 sps:$4 sm:$0xff]  }
 0x52b   : > { %11492 = vmatprep.subr.bf16.mxu1 %v15157_v48  ;;  %v15211_v53 = vld [vmem:[%s16153_s13 + $0xeec] ss:$16 sps:$4 sm:$0xff]   ;;  %v15206_v48 = vld [vmem:[%s16153_s13 + $0xce8] ss:$16 sps:$4 sm:$0xff]  }
 0x52d   : > { %11450 = vmatpush1.bf16.msra.mxu0 %v15152_v62  ;;  %v15209_v62 = vld [vmem:[%s16153_s13 + $0xee8] ss:$16 sps:$4 sm:$0xff]  }
 0x52e   : > { %11493 = vmatpush1.bf16.msra.mxu1 %v15155_v40  ;;  %11451 = vmatprep.subr.bf16.mxu0 %v15160_v19  ;;  %v15214_v40 = vld [vmem:[%s16153_s13 + $0xccc] ss:$16 sps:$4 sm:$0xff]  }
 0x52f   : > { %11494 = vmatprep.subr.bf16.mxu1 %v15163_v1  ;;  %v15217_v19 = vld [vmem:[%s16153_s13 + $0xecc] ss:$16 sps:$4 sm:$0xff]   ;;  %v15212_v1 = vld [vmem:[%s16153_s13 + $0xcc8] ss:$16 sps:$4 sm:$0xff]  }
 0x531   : > { %11452 = vmatpush2.bf16.msra.mxu0 %v15158_v36  ;;  %v15215_v36 = vld [vmem:[%s16153_s13 + $0xec8] ss:$16 sps:$4 sm:$0xff]  }
 0x532   : > { %11495 = vmatpush2.bf16.msra.mxu1 %v15161_v4  ;;  %11453 = vmatprep.subr.bf16.mxu0 %v15166_v15  ;;  %v15220_v4 = vld [vmem:[%s16153_s13 + $0xcac] ss:$16 sps:$4 sm:$0xff]   ;;  %v15221_v15 = vld [vmem:[%s16153_s13 + $0xea8] ss:$16 sps:$4 sm:$0xff]  }
 0x533   : > { %11496 = vmatprep.subr.bf16.mxu1 %v15169_v2  ;;  %v15229_v2 = vld [vmem:[%s16153_s13 + $0xe8c] ss:$16 sps:$4 sm:$0xff]  }
 0x535   : > { %11454 = vmatpush2.bf16.msra.mxu0 %v15164_v8  ;;  %v15227_v8 = vld [vmem:[%s16153_s13 + $0xe88] ss:$16 sps:$4 sm:$0xff]  }
 0x536   : > { %11497 = vmatpush2.bf16.msra.mxu1 %v15167_v30  ;;  %11455 = vmatprep.subr.bf16.mxu0 %v15172_v27  ;;  %v15232_v30 = vld [vmem:[%s16153_s13 + $0xc6c] ss:$16 sps:$4 sm:$0xff]  }
 0x537   : > { %11498 = vmatprep.subr.bf16.mxu1 %v15175_v17  ;;  %v15235_v27 = vld [vmem:[%s16153_s13 + $0xe6c] ss:$16 sps:$4 sm:$0xff]   ;;  %v15230_v17 = vld [vmem:[%s16153_s13 + $0xc68] ss:$16 sps:$4 sm:$0xff]  }
 0x539   : > { %11456 = vmatpush2.bf16.msra.mxu0 %v15170_v7  ;;  %v15233_v7 = vld [vmem:[%s16153_s13 + $0xe68] ss:$16 sps:$4 sm:$0xff]  }
 0x53a   : > { %11499 = vmatpush2.bf16.msra.mxu1 %v15173_v45  ;;  %11457 = vmatprep.subr.bf16.mxu0 %v15178_v55  ;;  %v15238_v45 = vld [vmem:[%s16153_s13 + $0xc4c] ss:$16 sps:$4 sm:$0xff]  }
 0x53b   : > { %11500 = vmatprep.subr.bf16.mxu1 %v15181_v42  ;;  %v15241_v55 = vld [vmem:[%s16153_s13 + $0xe4c] ss:$16 sps:$4 sm:$0xff]   ;;  %v15236_v42 = vld [vmem:[%s16153_s13 + $0xc48] ss:$16 sps:$4 sm:$0xff]  }
 0x53d   : > { %11458 = vmatpush2.bf16.msra.mxu0 %v15176_v46  ;;  %v15239_v46 = vld [vmem:[%s16153_s13 + $0xe48] ss:$16 sps:$4 sm:$0xff]  }
 0x53e   : > { %11501 = vmatpush2.bf16.msra.mxu1 %v15179_v49  ;;  %11459 = vmatprep.subr.bf16.mxu0 %v15184_v22  ;;  %v15244_v49 = vld [vmem:[%s16153_s13 + $0xc2c] ss:$16 sps:$4 sm:$0xff]  }
 0x53f   : > { %11502 = vmatprep.subr.bf16.mxu1 %v15187_v13  ;;  %v15247_v22 = vld [vmem:[%s16153_s13 + $0xe2c] ss:$16 sps:$4 sm:$0xff]   ;;  %v15242_v13 = vld [vmem:[%s16153_s13 + $0xc28] ss:$16 sps:$4 sm:$0xff]  }
 0x541   : > { %11460 = vmatpush2.bf16.msra.mxu0 %v15182_v50  ;;  %v15245_v50 = vld [vmem:[%s16153_s13 + $0xe28] ss:$16 sps:$4 sm:$0xff]  }
 0x542   : > { %11503 = vmatpush2.bf16.msra.mxu1 %v15185_v14  ;;  %11461 = vmatprep.subr.bf16.mxu0 %v15190_v10  ;;  %v15250_v14 = vld [vmem:[%s16153_s13 + $0xc0c] ss:$16 sps:$4 sm:$0xff]  }
 0x543   : > { %11504 = vmatprep.subr.bf16.mxu1 %v15193_v3  ;;  %v15253_v10 = vld [vmem:[%s16153_s13 + $0xe0c] ss:$16 sps:$4 sm:$0xff]   ;;  %v15248_v3 = vld [vmem:[%s16153_s13 + $0xc08] ss:$16 sps:$4 sm:$0xff]  }
 0x545   : > { %11462 = vmatpush2.bf16.msra.mxu0 %v15188_v21  ;;  %v15251_v21 = vld [vmem:[%s16153_s13 + $0xe08] ss:$16 sps:$4 sm:$0xff]  }
 0x546   : > { %11505 = vmatpush2.bf16.msra.mxu1 %v15191_v34  ;;  %11463 = vmatprep.subr.bf16.mxu0 %v15196_v58  ;;  %v15256_v34 = vld [vmem:[%s16153_s13 + $0xdec] ss:$16 sps:$4 sm:$0xff]  }
 0x547   : > { %11506 = vmatprep.subr.bf16.mxu1 %v15199_v56  ;;  %v15259_v58 = vld [vmem:[%s16153_s13 + $0xfec] ss:$16 sps:$4 sm:$0xff]   ;;  %v15254_v56 = vld [vmem:[%s16153_s13 + $0xde8] ss:$16 sps:$4 sm:$0xff]  }
 0x549   : > { %11464 = vmatpush2.bf16.msra.mxu0 %v15194_v41  ;;  %v15257_v41 = vld [vmem:[%s16153_s13 + $0xfe8] ss:$16 sps:$4 sm:$0xff]  }
 0x54a   : > { %11507 = vmatpush2.bf16.msra.mxu1 %v15197_v6  ;;  %11465 = vmatprep.subr.bf16.mxu0 %v15202_v26  ;;  %v15262_v6 = vld [vmem:[%s16153_s13 + $0xdcc] ss:$16 sps:$4 sm:$0xff]  }
 0x54b   : > { %11508 = vmatprep.subr.bf16.mxu1 %v15205_v33  ;;  %v15265_v26 = vld [vmem:[%s16153_s13 + $0xfcc] ss:$16 sps:$4 sm:$0xff]   ;;  %v15260_v33 = vld [vmem:[%s16153_s13 + $0xdc8] ss:$16 sps:$4 sm:$0xff]  }
 0x54d   : > { %11466 = vmatpush2.bf16.msra.mxu0 %v15200_v57  ;;  %v15263_v57 = vld [vmem:[%s16153_s13 + $0xfc8] ss:$16 sps:$4 sm:$0xff]  }
 0x54e   : > { %11509 = vmatpush2.bf16.msra.mxu1 %v15203_v16  ;;  %11521 = vmatprep.subr.bf16.mxu0 %v15208_v25  ;;  %v15268_v16 = vld [vmem:[%s16153_s13 + $0xdac] ss:$16 sps:$4 sm:$0xff]  }
 0x54f   : > { %11564 = vmatprep.subr.bf16.mxu1 %v15211_v53  ;;  %v15271_v25 = vld [vmem:[%s16153_s13 + $0xfac] ss:$16 sps:$4 sm:$0xff]   ;;  %v15266_v53 = vld [vmem:[%s16153_s13 + $0xda8] ss:$16 sps:$4 sm:$0xff]  }
 0x550   : > { %11468 = vmatmul.mubr.bf16.vlgmr.msra.gmra.mxu0 %v16273_v29  ;;  %v15223_v29 = vld [vmem:[%s16153_s13 + $0xeac] ss:$16 sps:$4 sm:$0xff]  }
 0x551   : > { %11511 = vmatmul.mubr.bf16.vlgmr.msra.gmra.mxu1 %v16275_v60  ;;  %11522 = vmatpush1.bf16.msra.mxu0 %v15206_v48  ;;  %v15218_v60 = vld [vmem:[%s16153_s13 + $0xca8] ss:$16 sps:$4 sm:$0xff]  }
 0x552   : > { %11553 = vmatprep.mubr.bf16.mxu0 %v16632_v63  ;;  %11565 = vmatpush1.bf16.msra.mxu1 %v15209_v62  ;;  %v15226_v63 = vld [vmem:[%s16153_s13 + $0xc8c] ss:$16 sps:$4 sm:$0xff]   ;;  %v15269_v48 = vld [vmem:[%s16153_s13 + $0xfa8] ss:$16 sps:$4 sm:$0xff]  }
 0x553   : > { %11596 = vmatprep.mubr.bf16.mxu1 %v16636_v51  ;;  %11523 = vmatprep.subr.bf16.mxu0 %v15214_v40  ;;  %v15224_v51 = vld [vmem:[%s16153_s13 + $0xc88] ss:$16 sps:$4 sm:$0xff]   ;;  %v15274_v62 = vld [vmem:[%s16153_s13 + $0xd8c] ss:$16 sps:$4 sm:$0xff]  }
 0x554   : > { %11566 = vmatprep.subr.bf16.mxu1 %v15217_v19  ;;  %v15277_v40 = vld [vmem:[%s16153_s13 + $0xf8c] ss:$16 sps:$4 sm:$0xff]   ;;  %v15272_v19 = vld [vmem:[%s16153_s13 + $0xd88] ss:$16 sps:$4 sm:$0xff]  }
 0x555   : > { %11524 = vmatpush1.bf16.msra.mxu0 %v15212_v1  ;;  %v15275_v1 = vld [vmem:[%s16153_s13 + $0xf88] ss:$16 sps:$4 sm:$0xff]  }
 0x556   : > { %11567 = vmatpush1.bf16.msra.mxu1 %v15215_v36  ;;  %11525 = vmatprep.subr.bf16.mxu0 %v15220_v4  ;;  %v15280_v36 = vld [vmem:[%s16153_s13 + $0xd6c] ss:$16 sps:$4 sm:$0xff]  }
 0x557   : > { %11568 = vmatprep.subr.bf16.mxu1 %v15223_v29  ;;  %v15283_v4 = vld [vmem:[%s16153_s13 + $0xf6c] ss:$16 sps:$4 sm:$0xff]   ;;  %v15278_v29 = vld [vmem:[%s16153_s13 + $0xd68] ss:$16 sps:$4 sm:$0xff]  }
 0x559   : > { %11526 = vmatpush1.bf16.msra.mxu0 %v15218_v60  ;;  %v15281_v60 = vld [vmem:[%s16153_s13 + $0xf68] ss:$16 sps:$4 sm:$0xff]  }
 0x55a   : > { %11569 = vmatpush1.bf16.msra.mxu1 %v15221_v15  ;;  %11527 = vmatprep.subr.bf16.mxu0 %v15226_v63  ;;  %v15286_v15 = vld [vmem:[%s16153_s13 + $0xd4c] ss:$16 sps:$4 sm:$0xff]  }
 0x55b   : > { %11570 = vmatprep.subr.bf16.mxu1 %v15229_v2  ;;  %v15289_v63 = vld [vmem:[%s16153_s13 + $0xf4c] ss:$16 sps:$4 sm:$0xff]   ;;  %v15284_v2 = vld [vmem:[%s16153_s13 + $0xd48] ss:$16 sps:$4 sm:$0xff]  }
 0x55d   : > { %11528 = vmatpush1.bf16.msra.mxu0 %v15224_v51  ;;  %v15287_v51 = vld [vmem:[%s16153_s13 + $0xf48] ss:$16 sps:$4 sm:$0xff]  }
 0x55e   : > { %11571 = vmatpush1.bf16.msra.mxu1 %v15227_v8  ;;  %11529 = vmatprep.subr.bf16.mxu0 %v15232_v30  ;;  %v15292_v8 = vld [vmem:[%s16153_s13 + $0xd2c] ss:$16 sps:$4 sm:$0xff]  }
 0x55f   : > { %11572 = vmatprep.subr.bf16.mxu1 %v15235_v27  ;;  %v15295_v30 = vld [vmem:[%s16153_s13 + $0xf2c] ss:$16 sps:$4 sm:$0xff]   ;;  %v15290_v27 = vld [vmem:[%s16153_s13 + $0xd28] ss:$16 sps:$4 sm:$0xff]  }
 0x561   : > { %11530 = vmatpush1.bf16.msra.mxu0 %v15230_v17  ;;  %v15293_v17 = vld [vmem:[%s16153_s13 + $0xf28] ss:$16 sps:$4 sm:$0xff]  }
 0x562   : > { %11573 = vmatpush1.bf16.msra.mxu1 %v15233_v7  ;;  %11531 = vmatprep.subr.bf16.mxu0 %v15238_v45  ;;  %v15298_v7 = vld [vmem:[%s16153_s13 + $0xd0c] ss:$16 sps:$4 sm:$0xff]  }
 0x563   : > { %11574 = vmatprep.subr.bf16.mxu1 %v15241_v55  ;;  %v15301_v45 = vld [vmem:[%s16153_s13 + $0xf0c] ss:$16 sps:$4 sm:$0xff]   ;;  %v15296_v55 = vld [vmem:[%s16153_s13 + $0xd08] ss:$16 sps:$4 sm:$0xff]  }
 0x565   : > { %11532 = vmatpush1.bf16.msra.mxu0 %v15236_v42  ;;  %v15299_v42 = vld [vmem:[%s16153_s13 + $0xf08] ss:$16 sps:$4 sm:$0xff]  }
 0x566   : > { %11575 = vmatpush1.bf16.msra.mxu1 %v15239_v46  ;;  %11533 = vmatprep.subr.bf16.mxu0 %v15244_v49  ;;  %v15304_v46 = vld [vmem:[%s16153_s13 + $0x10ec] ss:$16 sps:$4 sm:$0xff]  }
 0x567   : > { %11576 = vmatprep.subr.bf16.mxu1 %v15247_v22  ;;  %v15307_v49 = vld [vmem:[%s16153_s13 + $0x12ec] ss:$16 sps:$4 sm:$0xff]   ;;  %v15302_v22 = vld [vmem:[%s16153_s13 + $0x10e8] ss:$16 sps:$4 sm:$0xff]  }
 0x569   : > { %11534 = vmatpush1.bf16.msra.mxu0 %v15242_v13  ;;  %v15305_v13 = vld [vmem:[%s16153_s13 + $0x12e8] ss:$16 sps:$4 sm:$0xff]  }
 0x56a   : > { %11577 = vmatpush1.bf16.msra.mxu1 %v15245_v50  ;;  %11535 = vmatprep.subr.bf16.mxu0 %v15250_v14  ;;  %v15310_v50 = vld [vmem:[%s16153_s13 + $0x10cc] ss:$16 sps:$4 sm:$0xff]  }
 0x56b   : > { %11578 = vmatprep.subr.bf16.mxu1 %v15253_v10  ;;  %v15313_v14 = vld [vmem:[%s16153_s13 + $0x12cc] ss:$16 sps:$4 sm:$0xff]   ;;  %v15308_v10 = vld [vmem:[%s16153_s13 + $0x10c8] ss:$16 sps:$4 sm:$0xff]  }
 0x56d   : > { %11536 = vmatpush1.bf16.msra.mxu0 %v15248_v3  ;;  %v15311_v3 = vld [vmem:[%s16153_s13 + $0x12c8] ss:$16 sps:$4 sm:$0xff]  }
 0x56e   : > { %11579 = vmatpush1.bf16.msra.mxu1 %v15251_v21  ;;  %11537 = vmatprep.subr.bf16.mxu0 %v15256_v34  ;;  %v15316_v21 = vld [vmem:[%s16153_s13 + $0x10ac] ss:$16 sps:$4 sm:$0xff]   ;;  %v15317_v34 = vld [vmem:[%s16153_s13 + $0x12a8] ss:$16 sps:$4 sm:$0xff]  }
 0x56f   : > { %11580 = vmatprep.subr.bf16.mxu1 %v15259_v58  ;;  %v15325_v58 = vld [vmem:[%s16153_s13 + $0x128c] ss:$16 sps:$4 sm:$0xff]  }
 0x571   : > { %11538 = vmatpush2.bf16.msra.mxu0 %v15254_v56  ;;  %v15323_v56 = vld [vmem:[%s16153_s13 + $0x1288] ss:$16 sps:$4 sm:$0xff]  }
 0x572   : > { %11581 = vmatpush2.bf16.msra.mxu1 %v15257_v41  ;;  %11539 = vmatprep.subr.bf16.mxu0 %v15262_v6  ;;  %v15328_v41 = vld [vmem:[%s16153_s13 + $0x106c] ss:$16 sps:$4 sm:$0xff]  }
 0x573   : > { %11582 = vmatprep.subr.bf16.mxu1 %v15265_v26  ;;  %v15331_v6 = vld [vmem:[%s16153_s13 + $0x126c] ss:$16 sps:$4 sm:$0xff]   ;;  %v15326_v26 = vld [vmem:[%s16153_s13 + $0x1068] ss:$16 sps:$4 sm:$0xff]  }
 0x575   : > { %11540 = vmatpush2.bf16.msra.mxu0 %v15260_v33  ;;  %v15329_v33 = vld [vmem:[%s16153_s13 + $0x1268] ss:$16 sps:$4 sm:$0xff]  }
 0x576   : > { %11583 = vmatpush2.bf16.msra.mxu1 %v15263_v57  ;;  %11541 = vmatprep.subr.bf16.mxu0 %v15268_v16  ;;  %v15334_v57 = vld [vmem:[%s16153_s13 + $0x104c] ss:$16 sps:$4 sm:$0xff]  }
 0x577   : > { %11584 = vmatprep.subr.bf16.mxu1 %v15271_v25  ;;  %v15337_v16 = vld [vmem:[%s16153_s13 + $0x124c] ss:$16 sps:$4 sm:$0xff]   ;;  %v15332_v25 = vld [vmem:[%s16153_s13 + $0x1048] ss:$16 sps:$4 sm:$0xff]  }
 0x579   : > { %11542 = vmatpush2.bf16.msra.mxu0 %v15266_v53  ;;  %v15335_v53 = vld [vmem:[%s16153_s13 + $0x1248] ss:$16 sps:$4 sm:$0xff]  }
 0x57a   : > { %11585 = vmatpush2.bf16.msra.mxu1 %v15269_v48  ;;  %11543 = vmatprep.subr.bf16.mxu0 %v15274_v62  ;;  %v15340_v48 = vld [vmem:[%s16153_s13 + $0x102c] ss:$16 sps:$4 sm:$0xff]  }
 0x57b   : > { %11586 = vmatprep.subr.bf16.mxu1 %v15277_v40  ;;  %v15343_v62 = vld [vmem:[%s16153_s13 + $0x122c] ss:$16 sps:$4 sm:$0xff]   ;;  %v15338_v40 = vld [vmem:[%s16153_s13 + $0x1028] ss:$16 sps:$4 sm:$0xff]  }
 0x57d   : > { %11544 = vmatpush2.bf16.msra.mxu0 %v15272_v19  ;;  %v15341_v19 = vld [vmem:[%s16153_s13 + $0x1228] ss:$16 sps:$4 sm:$0xff]  }
 0x57e   : > { %11587 = vmatpush2.bf16.msra.mxu1 %v15275_v1  ;;  %11545 = vmatprep.subr.bf16.mxu0 %v15280_v36  ;;  %v15346_v1 = vld [vmem:[%s16153_s13 + $0x100c] ss:$16 sps:$4 sm:$0xff]  }
 0x57f   : > { %11588 = vmatprep.subr.bf16.mxu1 %v15283_v4  ;;  %v15349_v36 = vld [vmem:[%s16153_s13 + $0x120c] ss:$16 sps:$4 sm:$0xff]   ;;  %v15344_v4 = vld [vmem:[%s16153_s13 + $0x1008] ss:$16 sps:$4 sm:$0xff]  }
 0x581   : > { %11546 = vmatpush2.bf16.msra.mxu0 %v15278_v29  ;;  %v15347_v29 = vld [vmem:[%s16153_s13 + $0x1208] ss:$16 sps:$4 sm:$0xff]  }
 0x582   : > { %11589 = vmatpush2.bf16.msra.mxu1 %v15281_v60  ;;  %11547 = vmatprep.subr.bf16.mxu0 %v15286_v15  ;;  %v15352_v60 = vld [vmem:[%s16153_s13 + $0x11ec] ss:$16 sps:$4 sm:$0xff]  }
 0x583   : > { %11590 = vmatprep.subr.bf16.mxu1 %v15289_v63  ;;  %v15355_v15 = vld [vmem:[%s16153_s13 + $0x13ec] ss:$16 sps:$4 sm:$0xff]   ;;  %v15350_v63 = vld [vmem:[%s16153_s13 + $0x11e8] ss:$16 sps:$4 sm:$0xff]  }
 0x585   : > { %11548 = vmatpush2.bf16.msra.mxu0 %v15284_v2  ;;  %v15353_v2 = vld [vmem:[%s16153_s13 + $0x13e8] ss:$16 sps:$4 sm:$0xff]  }
 0x586   : > { %11591 = vmatpush2.bf16.msra.mxu1 %v15287_v51  ;;  %11549 = vmatprep.subr.bf16.mxu0 %v15292_v8  ;;  %v15358_v51 = vld [vmem:[%s16153_s13 + $0x11cc] ss:$16 sps:$4 sm:$0xff]  }
 0x587   : > { %11592 = vmatprep.subr.bf16.mxu1 %v15295_v30  ;;  %v15361_v8 = vld [vmem:[%s16153_s13 + $0x13cc] ss:$16 sps:$4 sm:$0xff]   ;;  %v15356_v30 = vld [vmem:[%s16153_s13 + $0x11c8] ss:$16 sps:$4 sm:$0xff]  }
 0x589   : > { %11550 = vmatpush2.bf16.msra.mxu0 %v15290_v27  ;;  %v15359_v27 = vld [vmem:[%s16153_s13 + $0x13c8] ss:$16 sps:$4 sm:$0xff]  }
 0x58a   : > { %11593 = vmatpush2.bf16.msra.mxu1 %v15293_v17  ;;  %11551 = vmatprep.subr.bf16.mxu0 %v15298_v7  ;;  %v15364_v17 = vld [vmem:[%s16153_s13 + $0x11ac] ss:$16 sps:$4 sm:$0xff]  }
 0x58b   : > { %11594 = vmatprep.subr.bf16.mxu1 %v15301_v45  ;;  %v15367_v7 = vld [vmem:[%s16153_s13 + $0x13ac] ss:$16 sps:$4 sm:$0xff]   ;;  %v15362_v45 = vld [vmem:[%s16153_s13 + $0x11a8] ss:$16 sps:$4 sm:$0xff]  }
 0x58d   : > { %11552 = vmatpush2.bf16.msra.mxu0 %v15296_v55  ;;  %v15365_v55 = vld [vmem:[%s16153_s13 + $0x13a8] ss:$16 sps:$4 sm:$0xff]  }
 0x58e   : > { %11595 = vmatpush2.bf16.msra.mxu1 %v15299_v42  ;;  %11607 = vmatprep.subr.bf16.mxu0 %v15304_v46  ;;  %v15370_v42 = vld [vmem:[%s16153_s13 + $0x118c] ss:$16 sps:$4 sm:$0xff]  }
 0x58f   : > { %11650 = vmatprep.subr.bf16.mxu1 %v15307_v49  ;;  %v15373_v46 = vld [vmem:[%s16153_s13 + $0x138c] ss:$16 sps:$4 sm:$0xff]   ;;  %v15368_v49 = vld [vmem:[%s16153_s13 + $0x1188] ss:$16 sps:$4 sm:$0xff]  }
 0x590   : > { %11554 = vmatmul.mubr.bf16.vlgmr.msra.gmra.mxu0 %v16299_v11  ;;  %v15319_v11 = vld [vmem:[%s16153_s13 + $0x12ac] ss:$16 sps:$4 sm:$0xff]  }
 0x591   : > { %11597 = vmatmul.mubr.bf16.vlgmr.msra.gmra.mxu1 %v16301_v37  ;;  %11608 = vmatpush1.bf16.msra.mxu0 %v15302_v22  ;;  %v15314_v37 = vld [vmem:[%s16153_s13 + $0x10a8] ss:$16 sps:$4 sm:$0xff]  }
 0x592   : > { %11639 = vmatprep.mubr.bf16.mxu0 %v16731_v43  ;;  %11651 = vmatpush1.bf16.msra.mxu1 %v15305_v13  ;;  %v15322_v43 = vld [vmem:[%s16153_s13 + $0x108c] ss:$16 sps:$4 sm:$0xff]   ;;  %v15371_v22 = vld [vmem:[%s16153_s13 + $0x1388] ss:$16 sps:$4 sm:$0xff]  }
 0x593   : > { %11682 = vmatprep.mubr.bf16.mxu1 %v16737_v52  ;;  %11609 = vmatprep.subr.bf16.mxu0 %v15310_v50  ;;  %v15320_v52 = vld [vmem:[%s16153_s13 + $0x1088] ss:$16 sps:$4 sm:$0xff]   ;;  %v15376_v13 = vld [vmem:[%s16153_s13 + $0x116c] ss:$16 sps:$4 sm:$0xff]  }
 0x594   : > { %11652 = vmatprep.subr.bf16.mxu1 %v15313_v14  ;;  %v15379_v50 = vld [vmem:[%s16153_s13 + $0x136c] ss:$16 sps:$4 sm:$0xff]   ;;  %v15374_v14 = vld [vmem:[%s16153_s13 + $0x1168] ss:$16 sps:$4 sm:$0xff]  }
 0x595   : > { %11610 = vmatpush1.bf16.msra.mxu0 %v15308_v10  ;;  %v15377_v10 = vld [vmem:[%s16153_s13 + $0x1368] ss:$16 sps:$4 sm:$0xff]  }
 0x596   : > { %11653 = vmatpush1.bf16.msra.mxu1 %v15311_v3  ;;  %11611 = vmatprep.subr.bf16.mxu0 %v15316_v21  ;;  %v15382_v3 = vld [vmem:[%s16153_s13 + $0x114c] ss:$16 sps:$4 sm:$0xff]  }
 0x597   : > { %11654 = vmatprep.subr.bf16.mxu1 %v15319_v11  ;;  %v15385_v21 = vld [vmem:[%s16153_s13 + $0x134c] ss:$16 sps:$4 sm:$0xff]   ;;  %v15380_v11 = vld [vmem:[%s16153_s13 + $0x1148] ss:$16 sps:$4 sm:$0xff]  }
 0x599   : > { %11612 = vmatpush1.bf16.msra.mxu0 %v15314_v37  ;;  %v15383_v37 = vld [vmem:[%s16153_s13 + $0x1348] ss:$16 sps:$4 sm:$0xff]  }
 0x59a   : > { %11655 = vmatpush1.bf16.msra.mxu1 %v15317_v34  ;;  %11613 = vmatprep.subr.bf16.mxu0 %v15322_v43  ;;  %v15388_v34 = vld [vmem:[%s16153_s13 + $0x112c] ss:$16 sps:$4 sm:$0xff]  }
 0x59b   : > { %11656 = vmatprep.subr.bf16.mxu1 %v15325_v58  ;;  %v15391_v43 = vld [vmem:[%s16153_s13 + $0x132c] ss:$16 sps:$4 sm:$0xff]   ;;  %v15386_v58 = vld [vmem:[%s16153_s13 + $0x1128] ss:$16 sps:$4 sm:$0xff]  }
 0x59d   : > { %11614 = vmatpush1.bf16.msra.mxu0 %v15320_v52  ;;  %v15389_v52 = vld [vmem:[%s16153_s13 + $0x1328] ss:$16 sps:$4 sm:$0xff]  }
 0x59e   : > { %11657 = vmatpush1.bf16.msra.mxu1 %v15323_v56  ;;  %11615 = vmatprep.subr.bf16.mxu0 %v15328_v41  ;;  %v15394_v56 = vld [vmem:[%s16153_s13 + $0x110c] ss:$16 sps:$4 sm:$0xff]  }
 0x59f   : > { %11658 = vmatprep.subr.bf16.mxu1 %v15331_v6  ;;  %v15397_v41 = vld [vmem:[%s16153_s13 + $0x130c] ss:$16 sps:$4 sm:$0xff]   ;;  %v15392_v6 = vld [vmem:[%s16153_s13 + $0x1108] ss:$16 sps:$4 sm:$0xff]  }
 0x5a1   : > { %11616 = vmatpush1.bf16.msra.mxu0 %v15326_v26  ;;  %v15395_v26 = vld [vmem:[%s16153_s13 + $0x1308] ss:$16 sps:$4 sm:$0xff]  }
 0x5a2   : > { %11659 = vmatpush1.bf16.msra.mxu1 %v15329_v33  ;;  %11617 = vmatprep.subr.bf16.mxu0 %v15334_v57  ;;  %v15400_v33 = vld [vmem:[%s16153_s13 + $0x14ec] ss:$16 sps:$4 sm:$0xff]  }
 0x5a3   : > { %11660 = vmatprep.subr.bf16.mxu1 %v15337_v16  ;;  %v15403_v57 = vld [vmem:[%s16153_s13 + $0x16ec] ss:$16 sps:$4 sm:$0xff]   ;;  %v15398_v16 = vld [vmem:[%s16153_s13 + $0x14e8] ss:$16 sps:$4 sm:$0xff]  }
 0x5a5   : > { %11618 = vmatpush1.bf16.msra.mxu0 %v15332_v25  ;;  %v15401_v25 = vld [vmem:[%s16153_s13 + $0x16e8] ss:$16 sps:$4 sm:$0xff]  }
 0x5a6   : > { %11661 = vmatpush1.bf16.msra.mxu1 %v15335_v53  ;;  %11619 = vmatprep.subr.bf16.mxu0 %v15340_v48  ;;  %v15406_v53 = vld [vmem:[%s16153_s13 + $0x14cc] ss:$16 sps:$4 sm:$0xff]  }
 0x5a7   : > { %11662 = vmatprep.subr.bf16.mxu1 %v15343_v62  ;;  %v15409_v48 = vld [vmem:[%s16153_s13 + $0x16cc] ss:$16 sps:$4 sm:$0xff]   ;;  %v15404_v62 = vld [vmem:[%s16153_s13 + $0x14c8] ss:$16 sps:$4 sm:$0xff]  }
 0x5a9   : > { %11620 = vmatpush1.bf16.msra.mxu0 %v15338_v40  ;;  %v15407_v40 = vld [vmem:[%s16153_s13 + $0x16c8] ss:$16 sps:$4 sm:$0xff]  }
 0x5aa   : > { %11663 = vmatpush1.bf16.msra.mxu1 %v15341_v19  ;;  %11621 = vmatprep.subr.bf16.mxu0 %v15346_v1  ;;  %v15412_v19 = vld [vmem:[%s16153_s13 + $0x14ac] ss:$16 sps:$4 sm:$0xff]   ;;  %v15413_v1 = vld [vmem:[%s16153_s13 + $0x16a8] ss:$16 sps:$4 sm:$0xff]  }
 0x5ab   : > { %11664 = vmatprep.subr.bf16.mxu1 %v15349_v36  ;;  %v15421_v36 = vld [vmem:[%s16153_s13 + $0x168c] ss:$16 sps:$4 sm:$0xff]  }
 0x5ad   : > { %11622 = vmatpush1.bf16.msra.mxu0 %v15344_v4  ;;  %v15419_v4 = vld [vmem:[%s16153_s13 + $0x1688] ss:$16 sps:$4 sm:$0xff]  }
 0x5ae   : > { %11665 = vmatpush1.bf16.msra.mxu1 %v15347_v29  ;;  %11623 = vmatprep.subr.bf16.mxu0 %v15352_v60  ;;  %v15424_v29 = vld [vmem:[%s16153_s13 + $0x146c] ss:$16 sps:$4 sm:$0xff]  }
 0x5af   : > { %11666 = vmatprep.subr.bf16.mxu1 %v15355_v15  ;;  %v15427_v60 = vld [vmem:[%s16153_s13 + $0x166c] ss:$16 sps:$4 sm:$0xff]   ;;  %v15422_v15 = vld [vmem:[%s16153_s13 + $0x1468] ss:$16 sps:$4 sm:$0xff]  }
 0x5b1   : > { %11624 = vmatpush2.bf16.msra.mxu0 %v15350_v63  ;;  %v15425_v63 = vld [vmem:[%s16153_s13 + $0x1668] ss:$16 sps:$4 sm:$0xff]  }
 0x5b2   : > { %11667 = vmatpush2.bf16.msra.mxu1 %v15353_v2  ;;  %11625 = vmatprep.subr.bf16.mxu0 %v15358_v51  ;;  %v15430_v2 = vld [vmem:[%s16153_s13 + $0x144c] ss:$16 sps:$4 sm:$0xff]  }
 0x5b3   : > { %11668 = vmatprep.subr.bf16.mxu1 %v15361_v8  ;;  %v15433_v51 = vld [vmem:[%s16153_s13 + $0x164c] ss:$16 sps:$4 sm:$0xff]   ;;  %v15428_v8 = vld [vmem:[%s16153_s13 + $0x1448] ss:$16 sps:$4 sm:$0xff]  }
 0x5b5   : > { %11626 = vmatpush2.bf16.msra.mxu0 %v15356_v30  ;;  %v15431_v30 = vld [vmem:[%s16153_s13 + $0x1648] ss:$16 sps:$4 sm:$0xff]  }
 0x5b6   : > { %11669 = vmatpush2.bf16.msra.mxu1 %v15359_v27  ;;  %11627 = vmatprep.subr.bf16.mxu0 %v15364_v17  ;;  %v15436_v27 = vld [vmem:[%s16153_s13 + $0x142c] ss:$16 sps:$4 sm:$0xff]  }
 0x5b7   : > { %11670 = vmatprep.subr.bf16.mxu1 %v15367_v7  ;;  %v15439_v17 = vld [vmem:[%s16153_s13 + $0x162c] ss:$16 sps:$4 sm:$0xff]   ;;  %v15434_v7 = vld [vmem:[%s16153_s13 + $0x1428] ss:$16 sps:$4 sm:$0xff]  }
 0x5b9   : > { %11628 = vmatpush2.bf16.msra.mxu0 %v15362_v45  ;;  %v15437_v45 = vld [vmem:[%s16153_s13 + $0x1628] ss:$16 sps:$4 sm:$0xff]  }
 0x5ba   : > { %11671 = vmatpush2.bf16.msra.mxu1 %v15365_v55  ;;  %11629 = vmatprep.subr.bf16.mxu0 %v15370_v42  ;;  %v15442_v55 = vld [vmem:[%s16153_s13 + $0x140c] ss:$16 sps:$4 sm:$0xff]  }
 0x5bb   : > { %11672 = vmatprep.subr.bf16.mxu1 %v15373_v46  ;;  %v15445_v42 = vld [vmem:[%s16153_s13 + $0x160c] ss:$16 sps:$4 sm:$0xff]   ;;  %v15440_v46 = vld [vmem:[%s16153_s13 + $0x1408] ss:$16 sps:$4 sm:$0xff]  }
 0x5bd   : > { %11630 = vmatpush2.bf16.msra.mxu0 %v15368_v49  ;;  %v15443_v49 = vld [vmem:[%s16153_s13 + $0x1608] ss:$16 sps:$4 sm:$0xff]  }
 0x5be   : > { %11673 = vmatpush2.bf16.msra.mxu1 %v15371_v22  ;;  %11631 = vmatprep.subr.bf16.mxu0 %v15376_v13  ;;  %v15448_v22 = vld [vmem:[%s16153_s13 + $0x15ec] ss:$16 sps:$4 sm:$0xff]  }
 0x5bf   : > { %11674 = vmatprep.subr.bf16.mxu1 %v15379_v50  ;;  %v15451_v13 = vld [vmem:[%s16153_s13 + $0x17ec] ss:$16 sps:$4 sm:$0xff]   ;;  %v15446_v50 = vld [vmem:[%s16153_s13 + $0x15e8] ss:$16 sps:$4 sm:$0xff]  }
 0x5c1   : > { %11632 = vmatpush2.bf16.msra.mxu0 %v15374_v14  ;;  %v15449_v14 = vld [vmem:[%s16153_s13 + $0x17e8] ss:$16 sps:$4 sm:$0xff]  }
 0x5c2   : > { %11675 = vmatpush2.bf16.msra.mxu1 %v15377_v10  ;;  %11633 = vmatprep.subr.bf16.mxu0 %v15382_v3  ;;  %v15454_v10 = vld [vmem:[%s16153_s13 + $0x15cc] ss:$16 sps:$4 sm:$0xff]  }
 0x5c3   : > { %11676 = vmatprep.subr.bf16.mxu1 %v15385_v21  ;;  %v15457_v3 = vld [vmem:[%s16153_s13 + $0x17cc] ss:$16 sps:$4 sm:$0xff]   ;;  %v15452_v21 = vld [vmem:[%s16153_s13 + $0x15c8] ss:$16 sps:$4 sm:$0xff]  }
 0x5c5   : > { %11634 = vmatpush2.bf16.msra.mxu0 %v15380_v11  ;;  %v15455_v11 = vld [vmem:[%s16153_s13 + $0x17c8] ss:$16 sps:$4 sm:$0xff]  }
 0x5c6   : > { %11677 = vmatpush2.bf16.msra.mxu1 %v15383_v37  ;;  %11635 = vmatprep.subr.bf16.mxu0 %v15388_v34  ;;  %v15460_v37 = vld [vmem:[%s16153_s13 + $0x15ac] ss:$16 sps:$4 sm:$0xff]  }
 0x5c7   : > { %11678 = vmatprep.subr.bf16.mxu1 %v15391_v43  ;;  %v15463_v34 = vld [vmem:[%s16153_s13 + $0x17ac] ss:$16 sps:$4 sm:$0xff]   ;;  %v15458_v43 = vld [vmem:[%s16153_s13 + $0x15a8] ss:$16 sps:$4 sm:$0xff]  }
 0x5c9   : > { %11636 = vmatpush2.bf16.msra.mxu0 %v15386_v58  ;;  %v15461_v58 = vld [vmem:[%s16153_s13 + $0x17a8] ss:$16 sps:$4 sm:$0xff]  }
 0x5ca   : > { %11679 = vmatpush2.bf16.msra.mxu1 %v15389_v52  ;;  %11637 = vmatprep.subr.bf16.mxu0 %v15394_v56  ;;  %v15466_v52 = vld [vmem:[%s16153_s13 + $0x158c] ss:$16 sps:$4 sm:$0xff]  }
 0x5cb   : > { %11680 = vmatprep.subr.bf16.mxu1 %v15397_v41  ;;  %v15469_v56 = vld [vmem:[%s16153_s13 + $0x178c] ss:$16 sps:$4 sm:$0xff]   ;;  %v15464_v41 = vld [vmem:[%s16153_s13 + $0x1588] ss:$16 sps:$4 sm:$0xff]  }
 0x5cd   : > { %11638 = vmatpush2.bf16.msra.mxu0 %v15392_v6  ;;  %v15467_v6 = vld [vmem:[%s16153_s13 + $0x1788] ss:$16 sps:$4 sm:$0xff]  }
 0x5ce   : > { %11681 = vmatpush2.bf16.msra.mxu1 %v15395_v26  ;;  %11693 = vmatprep.subr.bf16.mxu0 %v15400_v33  ;;  %v15472_v26 = vld [vmem:[%s16153_s13 + $0x156c] ss:$16 sps:$4 sm:$0xff]  }
 0x5cf   : > { %11736 = vmatprep.subr.bf16.mxu1 %v15403_v57  ;;  %v15475_v33 = vld [vmem:[%s16153_s13 + $0x176c] ss:$16 sps:$4 sm:$0xff]   ;;  %v15470_v57 = vld [vmem:[%s16153_s13 + $0x1568] ss:$16 sps:$4 sm:$0xff]  }
 0x5d0   : > { %11640 = vmatmul.mubr.bf16.vlgmr.msra.gmra.mxu0 %v16357_v61  ;;  %v15415_v61 = vld [vmem:[%s16153_s13 + $0x16ac] ss:$16 sps:$4 sm:$0xff]  }
 0x5d1   : > { %11683 = vmatmul.mubr.bf16.vlgmr.msra.gmra.mxu1 %v16361_v35  ;;  %11694 = vmatpush1.bf16.msra.mxu0 %v15398_v16  ;;  %v15410_v35 = vld [vmem:[%s16153_s13 + $0x14a8] ss:$16 sps:$4 sm:$0xff]  }
 0x5d2   : > { %11725 = vmatprep.mubr.bf16.mxu0 %v16816_v23  ;;  %11737 = vmatpush1.bf16.msra.mxu1 %v15401_v25  ;;  %v15418_v23 = vld [vmem:[%s16153_s13 + $0x148c] ss:$16 sps:$4 sm:$0xff]   ;;  %v15473_v16 = vld [vmem:[%s16153_s13 + $0x1768] ss:$16 sps:$4 sm:$0xff]  }
 0x5d3   : > { %11768 = vmatprep.mubr.bf16.mxu1 %v16820_v32  ;;  %11695 = vmatprep.subr.bf16.mxu0 %v15406_v53  ;;  %v15416_v32 = vld [vmem:[%s16153_s13 + $0x1488] ss:$16 sps:$4 sm:$0xff]   ;;  %v15478_v25 = vld [vmem:[%s16153_s13 + $0x154c] ss:$16 sps:$4 sm:$0xff]  }
 0x5d4   : > { %11738 = vmatprep.subr.bf16.mxu1 %v15409_v48  ;;  %v15481_v53 = vld [vmem:[%s16153_s13 + $0x174c] ss:$16 sps:$4 sm:$0xff]   ;;  %v15476_v48 = vld [vmem:[%s16153_s13 + $0x1548] ss:$16 sps:$4 sm:$0xff]  }
 0x5d5   : > { %11696 = vmatpush1.bf16.msra.mxu0 %v15404_v62  ;;  %v15479_v62 = vld [vmem:[%s16153_s13 + $0x1748] ss:$16 sps:$4 sm:$0xff]  }
 0x5d6   : > { %11739 = vmatpush1.bf16.msra.mxu1 %v15407_v40  ;;  %11697 = vmatprep.subr.bf16.mxu0 %v15412_v19  ;;  %v15484_v40 = vld [vmem:[%s16153_s13 + $0x152c] ss:$16 sps:$4 sm:$0xff]  }
 0x5d7   : > { %11740 = vmatprep.subr.bf16.mxu1 %v15415_v61  ;;  %v15487_v19 = vld [vmem:[%s16153_s13 + $0x172c] ss:$16 sps:$4 sm:$0xff]   ;;  %v15482_v61 = vld [vmem:[%s16153_s13 + $0x1528] ss:$16 sps:$4 sm:$0xff]  }
 0x5d9   : > { %11698 = vmatpush1.bf16.msra.mxu0 %v15410_v35  ;;  %v15485_v35 = vld [vmem:[%s16153_s13 + $0x1728] ss:$16 sps:$4 sm:$0xff]  }
 0x5da   : > { %11741 = vmatpush1.bf16.msra.mxu1 %v15413_v1  ;;  %11699 = vmatprep.subr.bf16.mxu0 %v15418_v23  ;;  %v15490_v1 = vld [vmem:[%s16153_s13 + $0x150c] ss:$16 sps:$4 sm:$0xff]  }
 0x5db   : > { %11742 = vmatprep.subr.bf16.mxu1 %v15421_v36  ;;  %v15493_v23 = vld [vmem:[%s16153_s13 + $0x170c] ss:$16 sps:$4 sm:$0xff]   ;;  %v15488_v36 = vld [vmem:[%s16153_s13 + $0x1508] ss:$16 sps:$4 sm:$0xff]  }
 0x5dd   : > { %11700 = vmatpush1.bf16.msra.mxu0 %v15416_v32  ;;  %v15491_v32 = vld [vmem:[%s16153_s13 + $0x1708] ss:$16 sps:$4 sm:$0xff]  }
 0x5de   : > { %11743 = vmatpush1.bf16.msra.mxu1 %v15419_v4  ;;  %11701 = vmatprep.subr.bf16.mxu0 %v15424_v29  ;;  %v15496_v4 = vld [vmem:[%s16153_s13 + $0x18ec] ss:$16 sps:$4 sm:$0xff]  }
 0x5df   : > { %11744 = vmatprep.subr.bf16.mxu1 %v15427_v60  ;;  %v15499_v29 = vld [vmem:[%s16153_s13 + $0x1aec] ss:$16 sps:$4 sm:$0xff]   ;;  %v15494_v60 = vld [vmem:[%s16153_s13 + $0x18e8] ss:$16 sps:$4 sm:$0xff]  }
 0x5e1   : > { %11702 = vmatpush1.bf16.msra.mxu0 %v15422_v15  ;;  %v15497_v15 = vld [vmem:[%s16153_s13 + $0x1ae8] ss:$16 sps:$4 sm:$0xff]  }
 0x5e2   : > { %11745 = vmatpush1.bf16.msra.mxu1 %v15425_v63  ;;  %11703 = vmatprep.subr.bf16.mxu0 %v15430_v2  ;;  %v15502_v63 = vld [vmem:[%s16153_s13 + $0x18cc] ss:$16 sps:$4 sm:$0xff]   ;;  %v15500_v2 = vld [vmem:[%s16153_s13 + $0x18c8] ss:$16 sps:$4 sm:$0xff]  }
 0x5e3   : > { %11746 = vmatprep.subr.bf16.mxu1 %v15433_v51  ;;  %v15505_v51 = vld [vmem:[%s16153_s13 + $0x1acc] ss:$16 sps:$4 sm:$0xff]  }
 0x5e5   : > { %11704 = vmatpush1.bf16.msra.mxu0 %v15428_v8  ;;  %v15503_v8 = vld [vmem:[%s16153_s13 + $0x1ac8] ss:$16 sps:$4 sm:$0xff]  }
 0x5e6   : > { %11747 = vmatpush1.bf16.msra.mxu1 %v15431_v30  ;;  %11705 = vmatprep.subr.bf16.mxu0 %v15436_v27  ;;  %v15508_v30 = vld [vmem:[%s16153_s13 + $0x18ac] ss:$16 sps:$4 sm:$0xff]  }
 0x5e7   : > { %11748 = vmatprep.subr.bf16.mxu1 %v15439_v17  ;;  %v15511_v27 = vld [vmem:[%s16153_s13 + $0x1aac] ss:$16 sps:$4 sm:$0xff]   ;;  %v15506_v17 = vld [vmem:[%s16153_s13 + $0x18a8] ss:$16 sps:$4 sm:$0xff]  }
 0x5e9   : > { %11706 = vmatpush1.bf16.msra.mxu0 %v15434_v7  ;;  %v15514_v7 = vld [vmem:[%s16153_s13 + $0x188c] ss:$16 sps:$4 sm:$0xff]  }
 0x5ea   : > { %11749 = vmatpush1.bf16.msra.mxu1 %v15437_v45  ;;  %11707 = vmatprep.subr.bf16.mxu0 %v15442_v55  ;;  %v17474_v45 = vpop.f32.mrf.mxu0  ;;  %v15520_v55 = vld [vmem:[%s16153_s13 + $0x186c] ss:$16 sps:$4 sm:$0xff]  }
 0x5eb   : > { %11750 = vmatprep.subr.bf16.mxu1 %v15445_v42  ;;  %v15523_v42 = vld [vmem:[%s16153_s13 + $0x1a6c] ss:$16 sps:$4 sm:$0xff]  }
 0x5ed   : > { %11708 = vmatpush1.bf16.msra.mxu0 %v15440_v46  ;;  %v17480_v46 = vpop.f32.mrf.mxu0 }
 0x5ee   : > { %11751 = vmatpush1.bf16.msra.mxu1 %v15443_v49  ;;  %11709 = vmatprep.subr.bf16.mxu0 %v15448_v22  ;;  %v15518_v49 = vld [vmem:[%s16153_s13 + $0x1868] ss:$16 sps:$4 sm:$0xff]  }
 0x5ef   : > { %11752 = vmatprep.subr.bf16.mxu1 %v15451_v13  ;;  %v15521_v22 = vld [vmem:[%s16153_s13 + $0x1a68] ss:$16 sps:$4 sm:$0xff]   ;;  %v17484_v13 = vpop.f32.mrf.mxu1 }
 0x5f1   : > { %11710 = vmatpush2.bf16.msra.mxu0 %v15446_v50  ;;  %v15526_v50 = vld [vmem:[%s16153_s13 + $0x184c] ss:$16 sps:$4 sm:$0xff]  }
 0x5f2   : > { %11753 = vmatpush2.bf16.msra.mxu1 %v15449_v14  ;;  %11711 = vmatprep.subr.bf16.mxu0 %v15454_v10  ;;  %v15529_v14 = vld [vmem:[%s16153_s13 + $0x1a4c] ss:$16 sps:$4 sm:$0xff]   ;;  %v17488_v10 = vpop.f32.mrf.mxu0 }
 0x5f3   : > { %11754 = vmatprep.subr.bf16.mxu1 %v15457_v3  ;;  %v15524_v3 = vld [vmem:[%s16153_s13 + $0x1848] ss:$16 sps:$4 sm:$0xff]  }
 0x5f5   : > { %11712 = vmatpush2.bf16.msra.mxu0 %v15452_v21  ;;  %v15527_v21 = vld [vmem:[%s16153_s13 + $0x1a48] ss:$16 sps:$4 sm:$0xff]  }
 0x5f6   : > { %11755 = vmatpush2.bf16.msra.mxu1 %v15455_v11  ;;  %11713 = vmatprep.subr.bf16.mxu0 %v15460_v37  ;;  %v17492_v11 = vpop.f32.mrf.mxu1  ;;  %v17494_v37 = vpop.f32.mrf.mxu0 }
 0x5f7   : > { %11756 = vmatprep.subr.bf16.mxu1 %v15463_v34  ;;  %v15532_v34 = vld [vmem:[%s16153_s13 + $0x182c] ss:$16 sps:$4 sm:$0xff]  }
 0x5f9   : > { %11714 = vmatpush2.bf16.msra.mxu0 %v15458_v43  ;;  %v15535_v43 = vld [vmem:[%s16153_s13 + $0x1a2c] ss:$16 sps:$4 sm:$0xff]  }
 0x5fa   : > { %11757 = vmatpush2.bf16.msra.mxu1 %v15461_v58  ;;  %11715 = vmatprep.subr.bf16.mxu0 %v15466_v52  ;;  %v15530_v58 = vld [vmem:[%s16153_s13 + $0x1828] ss:$16 sps:$4 sm:$0xff]  }
 0x5fb   : > { %11758 = vmatprep.subr.bf16.mxu1 %v15469_v56  ;;  %v15533_v52 = vld [vmem:[%s16153_s13 + $0x1a28] ss:$16 sps:$4 sm:$0xff]   ;;  %v17500_v56 = vpop.f32.mrf.mxu1 }
 0x5fd   : > { %11716 = vmatpush2.bf16.msra.mxu0 %v15464_v41  ;;  %v17502_v41 = vpop.f32.mrf.mxu0 }
 0x5fe   : > { %11759 = vmatpush2.bf16.msra.mxu1 %v15467_v6  ;;  %11717 = vmatprep.subr.bf16.mxu0 %v15472_v26  ;;  %v15538_v6 = vld [vmem:[%s16153_s13 + $0x180c] ss:$16 sps:$4 sm:$0xff]  }
 0x5ff   : > { %11760 = vmatprep.subr.bf16.mxu1 %v15475_v33  ;;  %v15541_v26 = vld [vmem:[%s16153_s13 + $0x1a0c] ss:$16 sps:$4 sm:$0xff]   ;;  %v17506_v33 = vpop.f32.mrf.mxu1 }
 0x601   : > { %11718 = vmatpush2.bf16.msra.mxu0 %v15470_v57  ;;  %v17508_v57 = vpop.f32.mrf.mxu0 }
 0x602   : > { %11761 = vmatpush2.bf16.msra.mxu1 %v15473_v16  ;;  %11719 = vmatprep.subr.bf16.mxu0 %v15478_v25  ;;  %v15536_v16 = vld [vmem:[%s16153_s13 + $0x1808] ss:$16 sps:$4 sm:$0xff]  }
 0x603   : > { %11762 = vmatprep.subr.bf16.mxu1 %v15481_v53  ;;  %v15539_v25 = vld [vmem:[%s16153_s13 + $0x1a08] ss:$16 sps:$4 sm:$0xff]   ;;  %v15544_v53 = vld [vmem:[%s16153_s13 + $0x19ec] ss:$16 sps:$4 sm:$0xff]  }
 0x605   : > { %11720 = vmatpush2.bf16.msra.mxu0 %v15476_v48  ;;  %v17513_v48 = vpop.f32.mrf.mxu1 }
 0x606   : > { %11763 = vmatpush2.bf16.msra.mxu1 %v15479_v62  ;;  %11721 = vmatprep.subr.bf16.mxu0 %v15484_v40  ;;  %v15547_v62 = vld [vmem:[%s16153_s13 + $0x1bec] ss:$16 sps:$4 sm:$0xff]   ;;  %v17516_v40 = vpop.f32.mrf.mxu0 }
 0x607   : > { %11764 = vmatprep.subr.bf16.mxu1 %v15487_v19  ;;  %v15542_v19 = vld [vmem:[%s16153_s13 + $0x19e8] ss:$16 sps:$4 sm:$0xff]  }
 0x609   : > { %11722 = vmatpush2.bf16.msra.mxu0 %v15482_v61  ;;  %v15545_v61 = vld [vmem:[%s16153_s13 + $0x1be8] ss:$16 sps:$4 sm:$0xff]  }
 0x60a   : > { %11765 = vmatpush2.bf16.msra.mxu1 %v15485_v35  ;;  %11723 = vmatprep.subr.bf16.mxu0 %v15490_v1  ;;  %v15550_v35 = vld [vmem:[%s16153_s13 + $0x19cc] ss:$16 sps:$4 sm:$0xff]   ;;  %v17521_v1 = vpop.f32.mrf.mxu1 }
 0x60b   : > { %11766 = vmatprep.subr.bf16.mxu1 %v15493_v23  ;;  %v17523_v23 = vpop.f32.mrf.mxu0 }
 0x60d   : > { %11724 = vmatpush2.bf16.msra.mxu0 %v15488_v36  ;;  %v15553_v36 = vld [vmem:[%s16153_s13 + $0x1bcc] ss:$16 sps:$4 sm:$0xff]  }
 0x60e   : > { %11767 = vmatpush2.bf16.msra.mxu1 %v15491_v32  ;;  %11779 = vmatprep.subr.bf16.mxu0 %v15496_v4  ;;  %v15548_v32 = vld [vmem:[%s16153_s13 + $0x19c8] ss:$16 sps:$4 sm:$0xff]  }
 0x60f   : > { %11822 = vmatprep.subr.bf16.mxu1 %v15499_v29  ;;  %v15551_v4 = vld [vmem:[%s16153_s13 + $0x1bc8] ss:$16 sps:$4 sm:$0xff]   ;;  %v15556_v29 = vld [vmem:[%s16153_s13 + $0x19ac] ss:$16 sps:$4 sm:$0xff]  }
 0x610   : > { %11726 = vmatmul.mubr.bf16.vlgmr.msra.gmra.mxu0 %v16457_v28  ;;  %v15509_v28 = vld [vmem:[%s16153_s13 + $0x1aa8] ss:$16 sps:$4 sm:$0xff]  }
 0x611   : > { %11769 = vmatmul.mubr.bf16.vlgmr.msra.gmra.mxu1 %v16460_v0  ;;  %11780 = vmatpush1.bf16.msra.mxu0 %v15494_v60  ;;  %v15517_v0 = vld [vmem:[%s16153_s13 + $0x1a8c] ss:$16 sps:$4 sm:$0xff]   ;;  %v17529_v60 = vpop.f32.mrf.mxu1 }
 0x612   : > { %11811 = vmatprep.mubr.bf16.mxu0 %v16898_v31  ;;  %11823 = vmatpush1.bf16.msra.mxu1 %v15497_v15  ;;  %v15512_v31 = vld [vmem:[%s16153_s13 + $0x1888] ss:$16 sps:$4 sm:$0xff]   ;;  %v17531_v15 = vpop.f32.mrf.mxu0 }
 0x613   : > { %11854 = vmatprep.mubr.bf16.mxu1 %v16902_v20  ;;  %11781 = vmatprep.subr.bf16.mxu0 %v15502_v63  ;;  %v15515_v20 = vld [vmem:[%s16153_s13 + $0x1a88] ss:$16 sps:$4 sm:$0xff]   ;;  %v15559_v63 = vld [vmem:[%s16153_s13 + $0x1bac] ss:$16 sps:$4 sm:$0xff]  }
 0x614   : > { %11824 = vmatprep.subr.bf16.mxu1 %v15505_v51  ;;  %v15554_v51 = vld [vmem:[%s16153_s13 + $0x19a8] ss:$16 sps:$4 sm:$0xff]  }
 0x615   : > { %11782 = vmatpush1.bf16.msra.mxu0 %v15500_v2  ;;  %v17534_v2 = vpop.f32.mrf.mxu1 }
 0x616   : > { %11825 = vmatpush1.bf16.msra.mxu1 %v15503_v8  ;;  %11783 = vmatprep.subr.bf16.mxu0 %v15508_v30  ;;  %v15557_v8 = vld [vmem:[%s16153_s13 + $0x1ba8] ss:$16 sps:$4 sm:$0xff]   ;;  %v15562_v30 = vld [vmem:[%s16153_s13 + $0x198c] ss:$16 sps:$4 sm:$0xff]  }
 0x617   : > { %11826 = vmatprep.subr.bf16.mxu1 %v15511_v27  ;;  %v17539_v27 = vpop.f32.mrf.mxu0 }
 0x619   : > { %11784 = vmatpush1.bf16.msra.mxu0 %v15506_v17  ;;  %v15565_v17 = vld [vmem:[%s16153_s13 + $0x1b8c] ss:$16 sps:$4 sm:$0xff]  }
 0x61a   : > { %11827 = vmatpush1.bf16.msra.mxu1 %v15509_v28  ;;  %11785 = vmatprep.subr.bf16.mxu0 %v15514_v7  ;;  %v17542_v28 = vpop.f32.mrf.mxu1  ;;  %v15560_v7 = vld [vmem:[%s16153_s13 + $0x1988] ss:$16 sps:$4 sm:$0xff]  }
 0x61b   : > { %11828 = vmatprep.subr.bf16.mxu1 %v15517_v0  ;;  %v15563_v0 = vld [vmem:[%s16153_s13 + $0x1b88] ss:$16 sps:$4 sm:$0xff]  }
 0x61d   : > { %11786 = vmatpush1.bf16.msra.mxu0 %v15512_v31  ;;  %v15568_v31 = vld [vmem:[%s16153_s13 + $0x196c] ss:$16 sps:$4 sm:$0xff]  }
 0x61e   : > { %11829 = vmatpush1.bf16.msra.mxu1 %v15515_v20  ;;  %11787 = vmatprep.subr.bf16.mxu0 %v15520_v55  ;;  %v17547_v20 = vpop.f32.mrf.mxu0  ;;  %v15571_v55 = vld [vmem:[%s16153_s13 + $0x1b6c] ss:$16 sps:$4 sm:$0xff]  }
 0x61f   : > { %11830 = vmatprep.subr.bf16.mxu1 %v15523_v42  ;;  %v17550_v42 = vpop.f32.mrf.mxu1 }
 0x621   : > { %11788 = vmatpush1.bf16.msra.mxu0 %v15518_v49  ;;  %v17552_v49 = vpop.f32.mrf.mxu0 }
 0x622   : > { %11831 = vmatpush1.bf16.msra.mxu1 %v15521_v22  ;;  %11789 = vmatprep.subr.bf16.mxu0 %v15526_v50  ;;  %v15566_v22 = vld [vmem:[%s16153_s13 + $0x1968] ss:$16 sps:$4 sm:$0xff]  }
 0x623   : > { %11832 = vmatprep.subr.bf16.mxu1 %v15529_v14  ;;  %v15569_v50 = vld [vmem:[%s16153_s13 + $0x1b68] ss:$16 sps:$4 sm:$0xff]   ;;  %v15574_v14 = vld [vmem:[%s16153_s13 + $0x194c] ss:$16 sps:$4 sm:$0xff]  }
 0x625   : > { %11790 = vmatpush1.bf16.msra.mxu0 %v15524_v3  ;;  %v15577_v3 = vld [vmem:[%s16153_s13 + $0x1b4c] ss:$16 sps:$4 sm:$0xff]  }
 0x626   : > { %11833 = vmatpush1.bf16.msra.mxu1 %v15527_v21  ;;  %11791 = vmatprep.subr.bf16.mxu0 %v15532_v34  ;;  %v17558_v21 = vpop.f32.mrf.mxu1  ;;  %v17560_v34 = vpop.f32.mrf.mxu0 }
 0x627   : > { %11834 = vmatprep.subr.bf16.mxu1 %v15535_v43  ;;  %v15572_v43 = vld [vmem:[%s16153_s13 + $0x1948] ss:$16 sps:$4 sm:$0xff]  }
 0x629   : > { %11792 = vmatpush1.bf16.msra.mxu0 %v15530_v58  ;;  %v15575_v58 = vld [vmem:[%s16153_s13 + $0x1b48] ss:$16 sps:$4 sm:$0xff]  }
 0x62a   : > { %11835 = vmatpush1.bf16.msra.mxu1 %v15533_v52  ;;  %11793 = vmatprep.subr.bf16.mxu0 %v15538_v6  ;;  %v15580_v52 = vld [vmem:[%s16153_s13 + $0x192c] ss:$16 sps:$4 sm:$0xff]   ;;  %v17565_v6 = vpop.f32.mrf.mxu1 }
 0x62b   : > { %11836 = vmatprep.subr.bf16.mxu1 %v15541_v26  ;;  %v15583_v26 = vld [vmem:[%s16153_s13 + $0x1b2c] ss:$16 sps:$4 sm:$0xff]  }
 0x62d   : > { %11794 = vmatpush1.bf16.msra.mxu0 %v15536_v16  ;;  %v17568_v16 = vpop.f32.mrf.mxu0 }
 0x62e   : > { %11837 = vmatpush1.bf16.msra.mxu1 %v15539_v25  ;;  %11795 = vmatprep.subr.bf16.mxu0 %v15544_v53  ;;  %v15578_v25 = vld [vmem:[%s16153_s13 + $0x1928] ss:$16 sps:$4 sm:$0xff]  }
 0x62f   : > { %11838 = vmatprep.subr.bf16.mxu1 %v15547_v62  ;;  %v15581_v53 = vld [vmem:[%s16153_s13 + $0x1b28] ss:$16 sps:$4 sm:$0xff]   ;;  %v15586_v62 = vld [vmem:[%s16153_s13 + $0x190c] ss:$16 sps:$4 sm:$0xff]  }
 0x631   : > { %11796 = vmatpush2.bf16.msra.mxu0 %v15542_v19  ;;  %v17573_v19 = vpop.f32.mrf.mxu1 }
 0x632   : > { %11839 = vmatpush2.bf16.msra.mxu1 %v15545_v61  ;;  %11797 = vmatprep.subr.bf16.mxu0 %v15550_v35  ;;  %v15589_v61 = vld [vmem:[%s16153_s13 + $0x1b0c] ss:$16 sps:$4 sm:$0xff]   ;;  %v17576_v35 = vpop.f32.mrf.mxu0 }
 0x633   : > { %11840 = vmatprep.subr.bf16.mxu1 %v15553_v36  ;;  %v15584_v36 = vld [vmem:[%s16153_s13 + $0x1908] ss:$16 sps:$4 sm:$0xff]  }
 0x635   : > { %11798 = vmatpush2.bf16.msra.mxu0 %v15548_v32  ;;  %v15587_v32 = vld [vmem:[%s16153_s13 + $0x1b08] ss:$16 sps:$4 sm:$0xff]  }
 0x636   : > { %11841 = vmatpush2.bf16.msra.mxu1 %v15551_v4  ;;  %11799 = vmatprep.subr.bf16.mxu0 %v15556_v29  ;;  %v15592_v4 = vld [vmem:[%s16153_s13 + $0x1cec] ss:$16 sps:$4 sm:$0xff]   ;;  %v17581_v29 = vpop.f32.mrf.mxu1 }
 0x637   : > { %11842 = vmatprep.subr.bf16.mxu1 %v15559_v63  ;;  %v17583_v63 = vpop.f32.mrf.mxu0 }
 0x639   : > { %11800 = vmatpush2.bf16.msra.mxu0 %v15554_v51  ;;  %v15595_v51 = vld [vmem:[%s16153_s13 + $0x1eec] ss:$16 sps:$4 sm:$0xff]  }
 0x63a   : > { %11843 = vmatpush2.bf16.msra.mxu1 %v15557_v8  ;;  %11801 = vmatprep.subr.bf16.mxu0 %v15562_v30  ;;  %v15590_v8 = vld [vmem:[%s16153_s13 + $0x1ce8] ss:$16 sps:$4 sm:$0xff]  }
 0x63b   : > { %11844 = vmatprep.subr.bf16.mxu1 %v15565_v17  ;;  %v15593_v30 = vld [vmem:[%s16153_s13 + $0x1ee8] ss:$16 sps:$4 sm:$0xff]   ;;  %v17588_v17 = vpop.f32.mrf.mxu1 }
 0x63d   : > { %11802 = vmatpush2.bf16.msra.mxu0 %v15560_v7  ;;  %v17590_v7 = vpop.f32.mrf.mxu0 }
 0x63e   : > { %11845 = vmatpush2.bf16.msra.mxu1 %v15563_v0  ;;  %11803 = vmatprep.subr.bf16.mxu0 %v15568_v31  ;;  %v15598_v0 = vld [vmem:[%s16153_s13 + $0x1ccc] ss:$16 sps:$4 sm:$0xff]  }
 0x63f   : > { %11846 = vmatprep.subr.bf16.mxu1 %v15571_v55  ;;  %v15601_v31 = vld [vmem:[%s16153_s13 + $0x1ecc] ss:$16 sps:$4 sm:$0xff]   ;;  %v17595_v55 = vpop.f32.mrf.mxu1 }
 0x641   : > { %11804 = vmatpush2.bf16.msra.mxu0 %v15566_v22  ;;  %v15596_v22 = vld [vmem:[%s16153_s13 + $0x1cc8] ss:$16 sps:$4 sm:$0xff]  }
 0x642   : > { %11847 = vmatpush2.bf16.msra.mxu1 %v15569_v50  ;;  %11805 = vmatprep.subr.bf16.mxu0 %v15574_v14  ;;  %v15599_v50 = vld [vmem:[%s16153_s13 + $0x1ec8] ss:$16 sps:$4 sm:$0xff]   ;;  %v15604_v14 = vld [vmem:[%s16153_s13 + $0x1cac] ss:$16 sps:$4 sm:$0xff]  }
 0x643   : > { %11848 = vmatprep.subr.bf16.mxu1 %v15577_v3  ;;  %v17602_v3 = vpop.f32.mrf.mxu0 }
 0x645   : > { %11806 = vmatpush2.bf16.msra.mxu0 %v15572_v43  ;;  %v15602_v43 = vld [vmem:[%s16153_s13 + $0x1ca8] ss:$16 sps:$4 sm:$0xff]  }
 0x646   : > { %11849 = vmatpush2.bf16.msra.mxu1 %v15575_v58  ;;  %11807 = vmatprep.subr.bf16.mxu0 %v15580_v52  ;;  %v15610_v58 = vld [vmem:[%s16153_s13 + $0x1c8c] ss:$16 sps:$4 sm:$0xff]   ;;  %v17611_v52 = vpop.f32.mrf.mxu0 }
 0x647   : > { %11850 = vmatprep.subr.bf16.mxu1 %v15583_v26  ;;  %v15613_v26 = vld [vmem:[%s16153_s13 + $0x1e8c] ss:$16 sps:$4 sm:$0xff]  }
 0x649   : > { %11808 = vmatpush2.bf16.msra.mxu0 %v15578_v25 }
 0x64a   : > { %11851 = vmatpush2.bf16.msra.mxu1 %v15581_v53  ;;  %11809 = vmatprep.subr.bf16.mxu0 %v15586_v62  ;;  %v17621_v62 = vpop.f32.mrf.mxu0 }
 0x64b   : > { %11852 = vmatprep.subr.bf16.mxu1 %v15589_v61  ;;  %v15608_v61 = vld [vmem:[%s16153_s13 + $0x1c88] ss:$16 sps:$4 sm:$0xff]  }
 0x64d   : > { %11810 = vmatpush2.bf16.msra.mxu0 %v15584_v36 }
 0x64e   : > { %11853 = vmatpush2.bf16.msra.mxu1 %v15587_v32  ;;  %11865 = vmatprep.subr.bf16.mxu0 %v15592_v4  ;;  %v15611_v32 = vld [vmem:[%s16153_s13 + $0x1e88] ss:$16 sps:$4 sm:$0xff]   ;;  %v15616_v4 = vld [vmem:[%s16153_s13 + $0x1c6c] ss:$16 sps:$4 sm:$0xff]  }
 0x64f   : > { %11908 = vmatprep.subr.bf16.mxu1 %v15595_v51  ;;  %v15619_v51 = vld [vmem:[%s16153_s13 + $0x1e6c] ss:$16 sps:$4 sm:$0xff]  }
 0x650   : > { %11812 = vmatmul.mubr.bf16.vlgmr.msra.gmra.mxu0 %v16557_v9  ;;  %v15607_v9 = vld [vmem:[%s16153_s13 + $0x1eac] ss:$16 sps:$4 sm:$0xff]  }
 0x651   : > { %11855 = vmatmul.mubr.bf16.vlgmr.msra.gmra.mxu1 %v16560_v12  ;;  %11866 = vmatpush1.bf16.msra.mxu0 %v15590_v8  ;;  %v17606_v12 = vpop.f32.mrf.mxu1 }
 0x652   : > { %11897 = vmatprep.mubr.bf16.mxu0 %v16978_v39  ;;  %11909 = vmatpush1.bf16.msra.mxu1 %v15593_v30  ;;  %v15605_v39 = vld [vmem:[%s16153_s13 + $0x1ea8] ss:$16 sps:$4 sm:$0xff]   ;;  %v17631_v30 = vpop.f32.mrf.mxu0 }
 0x653   : > { %11940 = vmatprep.mubr.bf16.mxu1 %v16982_v47  ;;  %11867 = vmatprep.subr.bf16.mxu0 %v15598_v0  ;;  %v17615_v47 = vld [vmem:[%s16717_s16] sm:$0xf]  ;;  %v17619_v53 = vpop.f32.mrf.mxu1  ;;  %v15614_v0 = vld [vmem:[%s16153_s13 + $0x1c68] ss:$16 sps:$4 sm:$0xff]  }
 0x654   : > { %11910 = vmatprep.subr.bf16.mxu1 %v15601_v31  ;;  %v5442_v25 = vrot.slane %v17615_v47, %v16304_v44 }
 0x655   : > { %11868 = vmatpush1.bf16.msra.mxu0 %v15596_v22  ;;  %v17629_v8 = vpop.f32.mrf.mxu1  ;;  %v15622_v22 = vld [vmem:[%s16153_s13 + $0x1c4c] ss:$16 sps:$4 sm:$0xff]  }
 0x656   : > { %11911 = vmatpush1.bf16.msra.mxu1 %v15599_v50  ;;  %11869 = vmatprep.subr.bf16.mxu0 %v15604_v14  ;;  %v10616_v36 = vadd.f32 %v17488_v10, %v5442_v25  ;;  %v10612_v44 = vadd.f32 %v17474_v45, %v5442_v25  ;;  %v15617_v10 = vld [vmem:[%s16153_s13 + $0x1e68] ss:$16 sps:$4 sm:$0xff]   ;;  %v15625_v45 = vld [vmem:[%s16153_s13 + $0x1e4c] ss:$16 sps:$4 sm:$0xff]  }
 0x657   : > { %11912 = vmatprep.subr.bf16.mxu1 %v15607_v9  ;;  %v17637_v50 = vpop.f32.mrf.mxu1 }
 0x658   : > { %v10659_v31 = vadd.f32 %v17500_v56, %v10616_v36  ;;  %v10655_v14 = vadd.f32 %v17484_v13, %v10612_v44  ;;  %v15620_v56 = vld [vmem:[%s16153_s13 + $0x1c48] ss:$16 sps:$4 sm:$0xff]   ;;  %v15631_v13 = vld [vmem:[%s16153_s13 + $0x1e2c] ss:$16 sps:$4 sm:$0xff]  }
 0x659   : > { %11870 = vmatpush1.bf16.msra.mxu0 %v15602_v43  ;;  %v17642_v43 = vpop.f32.mrf.mxu0  ;;  %v17648_v25 = vpop.f32.mrf.mxu1  ;;  %v15626_v36 = vld [vmem:[%s16153_s13 + $0x1c28] ss:$16 sps:$4 sm:$0xff]  }
 0x65a   : > { %11913 = vmatpush1.bf16.msra.mxu1 %v15605_v39  ;;  %11871 = vmatprep.subr.bf16.mxu0 %v15610_v58  ;;  %v10702_v9 = vadd.f32 %v17516_v40, %v10659_v31  ;;  %v10698_v39 = vadd.f32 %v17502_v41, %v10655_v14  ;;  %v15623_v58 = vld [vmem:[%s16153_s13 + $0x1e48] ss:$16 sps:$4 sm:$0xff]  }
 0x65b   : > { %11914 = vmatprep.subr.bf16.mxu1 %v15613_v26  ;;  %v15628_v26 = vld [vmem:[%s16153_s13 + $0x1c2c] ss:$16 sps:$4 sm:$0xff]   ;;  %v17652_v40 = vpop.f32.mrf.mxu0  ;;  %v17659_v44 = vpop.f32.mrf.mxu1 }
 0x65c   : > { %v10741_v41 = vadd.f32 %v17513_v48, %v10698_v39  ;;  %v15632_v48 = vld [vmem:[%s16153_s13 + $0x1c08] ss:$16 sps:$4 sm:$0xff]  }
 0x65d   : > { %11872 = vmatpush1.bf16.msra.mxu0 %v15608_v61  ;;  %v10745_v61 = vadd.f32 %v17529_v60, %v10702_v9  ;;  %v15637_v60 = vld [vmem:[%s16153_s13 + $0x1e0c] ss:$16 sps:$4 sm:$0xff]  }
 0x65e   : > { %11915 = vmatpush1.bf16.msra.mxu1 %v15611_v32  ;;  %11873 = vmatprep.subr.bf16.mxu0 %v15616_v4  ;;  %v15629_v4 = vld [vmem:[%s16153_s13 + $0x1e28] ss:$16 sps:$4 sm:$0xff]   ;;  %v10784_v31 = vadd.f32 %v17531_v15, %v10741_v41  ;;  %v15643_v9 = vld [vmem:[%s16153_s13 + $0x1fec] ss:$16 sps:$4 sm:$0xff]  }
 0x65f   : > { %11916 = vmatprep.subr.bf16.mxu1 %v15619_v51  ;;  %v10788_v32 = vadd.f32 %v17547_v20, %v10745_v61  ;;  %v15634_v51 = vld [vmem:[%s16153_s13 + $0x1c0c] ss:$16 sps:$4 sm:$0xff]   ;;  %v15635_v20 = vld [vmem:[%s16153_s13 + $0x1e08] ss:$16 sps:$4 sm:$0xff]  }
 0x660   : > { %v15644_v41 = vld [vmem:[%s16153_s13 + $0x1dc8] ss:$16 sps:$4 sm:$0xff]  }
 0x661   : > { %11874 = vmatpush1.bf16.msra.mxu0 %v15614_v0  ;;  %v17661_v0 = vpop.f32.mrf.mxu0 }
 0x662   : > { %11917 = vmatpush1.bf16.msra.mxu1 %v15617_v10  ;;  %11875 = vmatprep.subr.bf16.mxu0 %v15622_v22  ;;  %v10831_v10 = vadd.f32 %v17558_v21, %v10788_v32  ;;  %v15640_v22 = vld [vmem:[%s16153_s13 + $0x1dec] ss:$16 sps:$4 sm:$0xff]   ;;  %v15638_v21 = vld [vmem:[%s16153_s13 + $0x1de8] ss:$16 sps:$4 sm:$0xff]  }
 0x663   : > { %11918 = vmatprep.subr.bf16.mxu1 %v15625_v45  ;;  %v11088_v45 = vpop.f32.mrf.mxu1  ;;  %v17669_v14 = vpop.f32.mrf.mxu0 }
 0x664   : > { %v10874_v15 = vadd.f32 %v17576_v35, %v10831_v10 }
 0x665   : > { %11876 = vmatpush1.bf16.msra.mxu0 %v15620_v56  ;;  %v10827_v56 = vadd.f32 %v17542_v28, %v10784_v31  ;;  %v17674_v39 = vpop.f32.mrf.mxu1  ;;  %v17680_v61 = vpop.f32.mrf.mxu0  ;;  %v15649_v28 = vld [vmem:[%s16153_s13 + $0x1fcc] ss:$16 sps:$4 sm:$0xff]  }
 0x666   : > { %11919 = vmatpush1.bf16.msra.mxu1 %v15623_v58  ;;  %11877 = vmatprep.subr.bf16.mxu0 %v15628_v26  ;;  %v15641_v26 = vld [vmem:[%s16153_s13 + $0x1fe8] ss:$16 sps:$4 sm:$0xff]   ;;  %v15655_v31 = vld [vmem:[%s16153_s13 + $0x1fac] ss:$16 sps:$4 sm:$0xff]  }
 0x667   : > { %11920 = vmatprep.subr.bf16.mxu1 %v15631_v13  ;;  %v10870_v58 = vadd.f32 %v17560_v34, %v10827_v56  ;;  %v15646_v13 = vld [vmem:[%s16153_s13 + $0x1dcc] ss:$16 sps:$4 sm:$0xff]   ;;  %v17684_v35 = vpop.f32.mrf.mxu1 }
 0x669   : > { %11878 = vmatpush1.bf16.msra.mxu0 %v15626_v36  ;;  %v10917_v36 = vadd.f32 %v17588_v17, %v10874_v15  ;;  %v10913_v34 = vadd.f32 %v17573_v19, %v10870_v58  ;;  %v15650_v19 = vld [vmem:[%s16153_s13 + $0x1da8] ss:$16 sps:$4 sm:$0xff]  }
 0x66a   : > { %11921 = vmatpush1.bf16.msra.mxu1 %v15629_v4  ;;  %11879 = vmatprep.subr.bf16.mxu0 %v15634_v51  ;;  %v15647_v4 = vld [vmem:[%s16153_s13 + $0x1fc8] ss:$16 sps:$4 sm:$0xff]   ;;  %v15652_v51 = vld [vmem:[%s16153_s13 + $0x1dac] ss:$16 sps:$4 sm:$0xff]  }
 0x66b   : > { %11922 = vmatprep.subr.bf16.mxu1 %v15637_v60  ;;  %v10960_v32 = vadd.f32 %v17611_v52, %v10917_v36  ;;  %v11131_v60 = vpop.f32.mrf.mxu0  ;;  %v10956_v17 = vadd.f32 %v17590_v7, %v10913_v34  ;;  %v10614_v7 = vadd.f32 %v17480_v46, %v16724_v59  ;;  %v15667_v59 = vld [vmem:[%s16153_s13 + $0x1f6c] ss:$16 sps:$4 sm:$0xff]  }
 0x66d   : > { %11880 = vmatpush1.bf16.msra.mxu0 %v15632_v48  ;;  %v17693_v48 = vpop.f32.mrf.mxu1  ;;  %v17695_v10 = vpop.f32.mrf.mxu0  ;;  %v11003_v52 = vadd.f32 %v17629_v8, %v10960_v32  ;;  %v10999_v56 = vadd.f32 %v17606_v12, %v10956_v17  ;;  %v15656_v8 = vld [vmem:[%s16153_s13 + $0x1d88] ss:$16 sps:$4 sm:$0xff]   ;;  %v10657_v46 = vadd.f32 %v17492_v11, %v10614_v7  ;;  %v15673_v11 = vld [vmem:[%s16153_s13 + $0x1f4c] ss:$16 sps:$4 sm:$0xff]  }
 0x66e   : > { %11923 = vmatpush1.bf16.msra.mxu1 %v15635_v20  ;;  %11881 = vmatprep.subr.bf16.mxu0 %v15640_v22  ;;  %v15653_v20 = vld [vmem:[%s16153_s13 + $0x1fa8] ss:$16 sps:$4 sm:$0xff]   ;;  %v15658_v22 = vld [vmem:[%s16153_s13 + $0x1d8c] ss:$16 sps:$4 sm:$0xff]  }
 0x66f   : > { %11924 = vmatprep.subr.bf16.mxu1 %v15643_v9  ;;  %v15661_v9 = vld [vmem:[%s16153_s13 + $0x1f8c] ss:$16 sps:$4 sm:$0xff]   ;;  %v11046_v15 = vadd.f32 %v17652_v40, %v11003_v52  ;;  %v11213_v58 = vpop.f32.mrf.mxu0  ;;  %v15671_v52 = vld [vmem:[%s16153_s13 + $0x1f48] ss:$16 sps:$4 sm:$0xff]  }
 0x670   : > { %v15674_v7 = vld [vmem:[%s16153_s13 + $0x1d28] ss:$16 sps:$4 sm:$0xff]  }
 0x671   : > { %11882 = vmatpush2.bf16.msra.mxu0 %v15638_v21  ;;  %v11174_v21 = vpop.f32.mrf.mxu1  ;;  %v11089_v12 = vadd.f32 %v11088_v45, %v11046_v15  ;;  %v17714_v40 = vpop.f32.mrf.mxu0  ;;  %v10696_v45 = vadd.f32 %v17494_v37, %v16745_v38  ;;  %v15679_v38 = vld [vmem:[%s16153_s13 + $0x1f2c] ss:$16 sps:$4 sm:$0xff]  }
 0x672   : > { %11925 = vmatpush2.bf16.msra.mxu1 %v15641_v26  ;;  %11883 = vmatprep.subr.bf16.mxu0 %v15646_v13  ;;  %v11042_v26 = vadd.f32 %v17631_v30, %v10999_v56  ;;  %v15659_v13 = vld [vmem:[%s16153_s13 + $0x1f88] ss:$16 sps:$4 sm:$0xff]   ;;  %v10700_v30 = vadd.f32 %v17508_v57, %v10657_v46  ;;  %v15686_v46 = vld [vmem:[%s17464_s8 + $0x78] sm:$0xff]  }
 0x673   : > { %11926 = vmatprep.subr.bf16.mxu1 %v15649_v28  ;;  %v15664_v28 = vld [vmem:[%s16153_s13 + $0x1d6c] ss:$16 sps:$4 sm:$0xff]   ;;  %v17710_v36 = vpop.f32.mrf.mxu1  ;;  %v11132_v32 = vadd.f32 %v11131_v60, %v11089_v12  ;;  %v15668_v57 = vld [vmem:[%s16153_s13 + $0x1d48] ss:$16 sps:$4 sm:$0xff]   ;;  %v10739_v37 = vadd.f32 %v17506_v33, %v10696_v45  ;;  %v15702_v45 = vld [vmem:[%s17464_s8 + $0xf8] sm:$0xff]  }
 0x674   : > { %v11085_v34 = vadd.f32 %v17648_v25, %v11042_v26  ;;  %v10743_v25 = vadd.f32 %v17521_v1, %v10700_v30  ;;  %v15685_v33 = vld [vmem:[%s16153_s13 + $0x1f0c] ss:$16 sps:$4 sm:$0xff]  }
 0x675   : > { %11884 = vmatpush2.bf16.msra.mxu0 %v15644_v41  ;;  %v15662_v41 = vld [vmem:[%s16153_s13 + $0x1d68] ss:$16 sps:$4 sm:$0xff]   ;;  %v11175_v60 = vadd.f32 %v11174_v21, %v11132_v32  ;;  %v10782_v56 = vadd.f32 %v17523_v23, %v10739_v37 }
 0x676   : > { %11927 = vmatpush2.bf16.msra.mxu1 %v15647_v4  ;;  %11885 = vmatprep.subr.bf16.mxu0 %v15652_v51  ;;  %v15665_v4 = vld [vmem:[%s16153_s13 + $0x1f68] ss:$16 sps:$4 sm:$0xff]   ;;  %v15670_v51 = vld [vmem:[%s16153_s13 + $0x1d4c] ss:$16 sps:$4 sm:$0xff]   ;;  %v11128_v17 = vadd.f32 %v17669_v14, %v11085_v34  ;;  %v10786_v14 = vadd.f32 %v17539_v27, %v10743_v25  ;;  %v15695_v25 = vld [vmem:[%s17464_s8 + $0x18] sm:$0xff]  }
 0x677   : > { %11928 = vmatprep.subr.bf16.mxu1 %v15655_v31  ;;  %v11256_v31 = vpop.f32.mrf.mxu1  ;;  %v15677_v21 = vld [vmem:[%s16153_s13 + $0x1f28] ss:$16 sps:$4 sm:$0xff]  }
 0x678   : > { %v10829_v27 = vadd.f32 %v17550_v42, %v10786_v14  ;;  %v15687_v42 = vld [vmem:[%s17464_s8 + $0x38] sm:$0xff]  }
 0x679   : > { %11886 = vmatpush2.bf16.msra.mxu0 %v15650_v19  ;;  %v11217_v19 = vpop.f32.mrf.mxu0 }
 0x67a   : > { %11929 = vmatpush2.bf16.msra.mxu1 %v15653_v20  ;;  %11887 = vmatprep.subr.bf16.mxu0 %v15658_v22  ;;  %v15676_v20 = vld [vmem:[%s16153_s13 + $0x1d2c] ss:$16 sps:$4 sm:$0xff]   ;;  %v17729_v22 = vpop.f32.mrf.mxu1  ;;  %v11218_v1 = vadd.f32 %v11217_v19, %v11175_v60  ;;  %v10872_v23 = vadd.f32 %v17568_v16, %v10829_v27  ;;  %v15706_v60 = vld [vmem:[%s17464_s8 + $0xe8] sm:$0xff]  }
 0x67b   : > { %11930 = vmatprep.subr.bf16.mxu1 %v15661_v9  ;;  %v11171_v9 = vadd.f32 %v17684_v35, %v11128_v17  ;;  %v15703_v17 = vld [vmem:[%s17464_s8 + $0xb8] sm:$0xff]   ;;  %v15704_v19 = vld [vmem:[%s17464_s8 + $0xf0] sm:$0xff]   ;;  %v15715_v27 = vld [vmem:[%s17464_s8 + $0x88] sm:$0xff]  }
 0x67c   : > { %v11260_v26 = vpop.f32.mrf.mxu1  ;;  %v10915_v30 = vadd.f32 %v17581_v29, %v10872_v23 }
 0x67d   : > { %11888 = vmatpush2.bf16.msra.mxu0 %v15656_v8  ;;  %v11214_v15 = vadd.f32 %v11213_v58, %v11171_v9  ;;  %v15682_v8 = vld [vmem:[%s16153_s13 + $0x1d0c] ss:$16 sps:$4 sm:$0xff]   ;;  %v11261_v35 = vadd.f32 %v11260_v26, %v11218_v1 }
 0x67e   : > { %11931 = vmatpush2.bf16.msra.mxu1 %v15659_v13  ;;  %11889 = vmatprep.subr.bf16.mxu0 %v15664_v28  ;;  %v15680_v13 = vld [vmem:[%s16153_s13 + $0x1d08] ss:$16 sps:$4 sm:$0xff]   ;;  %v10825_v28 = vadd.f32 %v17534_v2, %v10782_v56  ;;  %v10958_v32 = vadd.f32 %v17602_v3, %v10915_v30  ;;  %v15691_v3 = vld [vmem:[%s17464_s8 + $0x28] sm:$0xff]   ;;  %v11340_v23 = vpop.f32.mrf.mxu1 }
 0x67f   : > { %11932 = vmatprep.subr.bf16.mxu1 %v15667_v59  ;;  %v11257_v58 = vadd.f32 %v11256_v31, %v11214_v15  ;;  %v15683_v59 = vld [vmem:[%s16153_s13 + $0x1f08] ss:$16 sps:$4 sm:$0xff]  }
 0x680   : > { %v10868_v12 = vadd.f32 %v17552_v49, %v10825_v28  ;;  %v15688_v2 = vld [vmem:[%s17464_s8 + $0x70] sm:$0xff]   ;;  %v15709_v1 = vld [vmem:[%s17464_s8 + $0xa0] sm:$0xff]   ;;  %v11297_v28 = vpop.f32.mrf.mxu0 }
 0x681   : > { %11890 = vmatpush2.bf16.msra.mxu0 %v15662_v41  ;;  %v11956_v41 = vmax.f32 %v11261_v35, 0.0  ;;  %v11952_v34 = vmax.f32 %v11257_v58, 0.0  ;;  %v15689_v49 = vld [vmem:[%s17464_s8 + $0x30] sm:$0xff]   ;;  %v15700_v56 = vld [vmem:[%s17464_s8 + $0x40] sm:$0xff]  }
 0x682   : > { %11933 = vmatpush2.bf16.msra.mxu1 %v15665_v4  ;;  %11891 = vmatprep.subr.bf16.mxu0 %v15670_v51  ;;  %v10911_v16 = vadd.f32 %v17565_v6, %v10868_v12  ;;  %v15690_v51 = vld [vmem:[%s17464_s8 + $0x68] sm:$0xff]   ;;  %v11001_v6 = vadd.f32 %v17619_v53, %v10958_v32  ;;  %v15712_v26 = vld [vmem:[%s17464_s8 + $0xd0] sm:$0xff]   ;;  %v15716_v35 = vld [vmem:[%s17464_s8 + $0xc0] sm:$0xff]   ;;  %v11299_v58 = vpop.f32.mrf.mxu0 }
 0x683   : > { %11934 = vmatprep.subr.bf16.mxu1 %v15673_v11  ;;  %v11960_v4 = vpack.c.bf16 %v11956_v41, %v11952_v34 }
 0x684   : > { %v10954_v29 = vadd.f32 %v17583_v63, %v10911_v16  ;;  %v11044_v31 = vadd.f32 %v17642_v43, %v11001_v6  ;;  %v15693_v63 = vld [vmem:[%s17464_s8 + $0x20] sm:$0xff]  }
 0x685   : > { %11892 = vmatpush2.bf16.msra.mxu0 %v15668_v57 }
 0x686   : > { %11935 = vmatpush2.bf16.msra.mxu1 %v15671_v52  ;;  %11893 = vmatprep.subr.bf16.mxu0 %v15676_v20  ;;  %v11087_v53 = vadd.f32 %v17659_v44, %v11044_v31  ;;  %v15696_v44 = vld [vmem:[%s17464_s8 + $0x50] sm:$0xff]  }
 0x687   : > { %11936 = vmatprep.subr.bf16.mxu1 %v15679_v38  ;;  %v15708_v38 = vld [vmem:[%s17464_s8 + $0xe0] sm:$0xff]  }
 0x688   : > { %v11130_v57 = vadd.f32 %v17680_v61, %v11087_v53  ;;  %v15697_v61 = vld [vmem:[%s17464_s8 + $0x10] sm:$0xff]  }
 0x689   : > { %11894 = vmatpush2.bf16.msra.mxu0 %v15674_v7 }
 0x68a   : > { %11937 = vmatpush2.bf16.msra.mxu1 %v15677_v21  ;;  %11895 = vmatprep.subr.bf16.mxu0 %v15682_v8  ;;  %v11173_v20 = vadd.f32 %v17693_v48, %v11130_v57  ;;  %v15699_v48 = vld [vmem:[%s17464_s8 + $0x8] sm:$0xff]   ;;  %v15711_v8 = vld [vmem:[%s17464_s8 + $0x98] sm:$0xff]  }
 0x68b   : > { %11938 = vmatprep.subr.bf16.mxu1 %v15685_v33  ;;  %v15713_v33 = vld [vmem:[%s17464_s8 + $0x90] sm:$0xff]  }
 0x68c   : > { %v11216_v14 = vadd.f32 %v17714_v40, %v11173_v20  ;;  %v15701_v40 = vld [vmem:[%s17464_s8] sm:$0xff]  }
 0x68d   : > { %11896 = vmatpush2.bf16.msra.mxu0 %v15680_v13  ;;  %v15717_v13 = vld [vmem:[%s17464_s8 + $0x80] sm:$0xff]  }
 0x68e   : > { %11939 = vmatpush2.bf16.msra.mxu1 %v15683_v59  ;;  %14027 = vmatprep.subr.bf16.mxu0 %v15686_v46  ;;  %v11259_v7 = vadd.f32 %v17729_v22, %v11216_v14  ;;  %v15710_v22 = vld [vmem:[%s17464_s8 + $0xd8] sm:$0xff]   ;;  %v11342_v59 = vpop.f32.mrf.mxu1  ;;  %v11301_v46 = vpop.f32.mrf.mxu0 }
 0x68f   : > { %14049 = vmatprep.subr.bf16.mxu1 %v15702_v45 }
 0x690   : > { %11898 = vmatmul.mubr.bf16.vlgmr.msra.gmra.mxu0 %v16653_v24  ;;  %v10997_v24 = vadd.f32 %v17595_v55, %v10954_v29  ;;  %v15694_v55 = vld [vmem:[%s17464_s8 + $0x58] sm:$0xff]   ;;  %v11344_v12 = vpop.f32.mrf.mxu1  ;;  %v11303_v41 = vpop.f32.mrf.mxu0 }
 0x691   : > { %11941 = vmatmul.mubr.bf16.vlgmr.msra.gmra.mxu1 %v16656_v5  ;;  %14028 = vmatpush3.bf16.msra.mxu0 %v15687_v42  ;;  %v15692_v5 = vld [vmem:[%s17464_s8 + $0x60] sm:$0xff]  }
 0x692   : > { %12251 = vmatprep.mubr.bf16.mxu0 %v11960_v4  ;;  %14029 = vmatprep.subr.bf16.mxu0 %v15688_v2  ;;  %v11040_v11 = vadd.f32 %v17621_v62, %v10997_v24  ;;  %v15705_v62 = vld [vmem:[%s17464_s8 + $0xb0] sm:$0xff]   ;;  %v11346_v42 = vpop.f32.mrf.mxu1  ;;  %v11383_v30 = vpop.f32.mrf.mxu0 }
 0x693   : > { %14050 = vmatpush3.bf16.msra.mxu1 %v15703_v17 }
 0x694   : > { %v11083_v43 = vadd.f32 %v17637_v50, %v11040_v11  ;;  %14051 = vmatprep.subr.bf16.mxu1 %v15704_v19  ;;  %v15707_v50 = vld [vmem:[%s17464_s8 + $0xa8] sm:$0xff]   ;;  %v11426_v34 = vpop.f32.mrf.mxu1  ;;  %v11385_v2 = vpop.f32.mrf.mxu0 }
 0x695   : > { %14030 = vmatpush3.bf16.msra.mxu0 %v15689_v49 }
 0x696   : > { %14031 = vmatprep.subr.bf16.mxu0 %v15690_v51  ;;  %v11126_v52 = vadd.f32 %v17661_v0, %v11083_v43  ;;  %v15698_v0 = vld [vmem:[%s17464_s8 + $0x48] sm:$0xff]   ;;  %v11428_v16 = vpop.f32.mrf.mxu1  ;;  %v11387_v32 = vpop.f32.mrf.mxu0 }
 0x697   : > { %14052 = vmatpush3.bf16.msra.mxu1 %v15705_v62  ;;  %v5450_v62 = vrot.slane %v17615_v47, %v16307_v54 }
 0x698   : > { %14053 = vmatprep.subr.bf16.mxu1 %v15706_v60  ;;  %v11169_v37 = vadd.f32 %v17674_v39, %v11126_v52  ;;  %v11430_v4 = vpop.f32.mrf.mxu1  ;;  %v11389_v49 = vpop.f32.mrf.mxu0  ;;  %v5446_v60 = vrot.slane %v17615_v47, %v16198_v18 }
 0x699   : > { %14032 = vmatpush3.bf16.msra.mxu0 %v15691_v3  ;;  %v11300_v20 = vadd.f32 %v11299_v58, %v5450_v62 }
 0x69a   : > { %14033 = vmatprep.subr.bf16.mxu0 %v15692_v5  ;;  %v11212_v9 = vadd.f32 %v17695_v10, %v11169_v37  ;;  %v11955_v10 = vmax.f32 %v11259_v7, 0.0  ;;  %v11432_v29 = vpop.f32.mrf.mxu1  ;;  %v11469_v51 = vpop.f32.mrf.mxu0 }
 0x69b   : > { %14054 = vmatpush3.bf16.msra.mxu1 %v15707_v50  ;;  %v11298_v50 = vadd.f32 %v11297_v28, %v5446_v60  ;;  %v11343_v14 = vadd.f32 %v11342_v59, %v11300_v20 }
 0x69c   : > { %14055 = vmatprep.subr.bf16.mxu1 %v15708_v38  ;;  %v11255_v39 = vadd.f32 %v17710_v36, %v11212_v9  ;;  %v15714_v36 = vld [vmem:[%s17464_s8 + $0xc8] sm:$0xff]   ;;  %v11512_v6 = vpop.f32.mrf.mxu1  ;;  %v11471_v3 = vpop.f32.mrf.mxu0  ;;  %v11302_v38 = vadd.f32 %v11301_v46, %v5446_v60 }
 0x69d   : > { %14034 = vmatpush3.bf16.msra.mxu0 %v15693_v63  ;;  %v11341_v9 = vadd.f32 %v11340_v23, %v11298_v50  ;;  %v11386_v7 = vadd.f32 %v11385_v2, %v11343_v14 }
 0x69e   : > { %14035 = vmatprep.subr.bf16.mxu0 %v15694_v55  ;;  %v11951_v15 = vmax.f32 %v11255_v39, 0.0  ;;  %v11514_v24 = vpop.f32.mrf.mxu1  ;;  %v11473_v31 = vpop.f32.mrf.mxu0 }
 0x69f   : > { %14056 = vmatpush3.bf16.msra.mxu1 %v15709_v1  ;;  %v11384_v39 = vadd.f32 %v11383_v30, %v11341_v9 }
 0x6a0   : > { %v11959_v21 = vpack.c.bf16 %v11955_v10, %v11951_v15  ;;  %14057 = vmatprep.subr.bf16.mxu1 %v15710_v22  ;;  %v11516_v5 = vpop.f32.mrf.mxu1  ;;  %v11475_v11 = vpop.f32.mrf.mxu0  ;;  %v11429_v15 = vadd.f32 %v11428_v16, %v11386_v7 }
 0x6a1   : > { %14036 = vmatpush3.bf16.msra.mxu0 %v15695_v25 }
 0x6a2   : > { %14037 = vmatprep.subr.bf16.mxu0 %v15696_v44  ;;  %v11518_v63 = vpop.f32.mrf.mxu1  ;;  %v11555_v45 = vpop.f32.mrf.mxu0 }
 0x6a3   : > { %14058 = vmatpush3.bf16.msra.mxu1 %v15711_v8 }
 0x6a4   : > { %14059 = vmatprep.subr.bf16.mxu1 %v15712_v26  ;;  %v11598_v17 = vpop.f32.mrf.mxu1  ;;  %v11557_v19 = vpop.f32.mrf.mxu0  ;;  %v11472_v26 = vadd.f32 %v11471_v3, %v11429_v15 }
 0x6a5   : > { %14038 = vmatpush3.bf16.msra.mxu0 %v15697_v61 }
 0x6a6   : > { %14039 = vmatprep.subr.bf16.mxu0 %v15698_v0  ;;  %v11600_v53 = vpop.f32.mrf.mxu1  ;;  %v11559_v55 = vpop.f32.mrf.mxu0  ;;  %v11304_v0 = vadd.f32 %v11303_v41, %v5450_v62  ;;  %v11515_v28 = vadd.f32 %v11514_v24, %v11472_v26 }
 0x6a7   : > { %14060 = vmatpush3.bf16.msra.mxu1 %v15713_v33 }
 0x6a8   : > { %14061 = vmatprep.subr.bf16.mxu1 %v15714_v36  ;;  %v11602_v43 = vpop.f32.mrf.mxu1  ;;  %v11561_v57 = vpop.f32.mrf.mxu0  ;;  %v11347_v54 = vadd.f32 %v11346_v42, %v11304_v0 }
 0x6a9   : > { %14040 = vmatpush3.bf16.msra.mxu0 %v15699_v48  ;;  %v11345_v48 = vadd.f32 %v11344_v12, %v11302_v38  ;;  %v11558_v12 = vadd.f32 %v11557_v19, %v11515_v28 }
 0x6aa   : > { %14041 = vmatprep.subr.bf16.mxu0 %v15700_v56  ;;  %v11604_v25 = vpop.f32.mrf.mxu1  ;;  %v11641_v52 = vpop.f32.mrf.mxu0  ;;  %v11390_v18 = vadd.f32 %v11389_v49, %v11347_v54 }
 0x6ab   : > { %14062 = vmatpush3.bf16.msra.mxu1 %v15715_v27 }
 0x6ac   : > { %14063 = vmatprep.subr.bf16.mxu1 %v15716_v35  ;;  %v11684_v44 = vpop.f32.mrf.mxu1  ;;  %v11643_v61 = vpop.f32.mrf.mxu0  ;;  %v11433_v27 = vadd.f32 %v11432_v29, %v11390_v18 }
 0x6ad   : > { %14042 = vmatpush3.bf16.msra.mxu0 %v15701_v40  ;;  %v11388_v40 = vadd.f32 %v11387_v32, %v11345_v48 }
 0x6ae   : > { %v11686_v37 = vpop.f32.mrf.mxu1  ;;  %v11645_v1 = vpop.f32.mrf.mxu0  ;;  %v11476_v23 = vadd.f32 %v11475_v11, %v11433_v27 }
 0x6af   : > { %14064 = vmatpush3.bf16.msra.mxu1 %v15717_v13  ;;  %v11431_v8 = vadd.f32 %v11430_v4, %v11388_v40 }
 0x6b0   : > { %12252 = vmatmul.mubr.bf16.vlgmr.msra.gmra.mxu0 %v11959_v21  ;;  %v11688_v56 = vpop.f32.mrf.mxu1  ;;  %v11647_v10 = vpop.f32.mrf.mxu0  ;;  %v11427_v21 = vadd.f32 %v11426_v34, %v11384_v39  ;;  %v11519_v30 = vadd.f32 %v11518_v63, %v11476_v23  ;;  %v11601_v34 = vadd.f32 %v11600_v53, %v11558_v12 }
 0x6b1   : > { %v11474_v35 = vadd.f32 %v11473_v31, %v11431_v8 }
 0x6b2   : > { %v11690_v47 = vpop.f32.mrf.mxu1  ;;  %v11470_v36 = vadd.f32 %v11469_v51, %v11427_v21  ;;  %v11562_v32 = vadd.f32 %v11561_v57, %v11519_v30  ;;  %v11644_v51 = vadd.f32 %v11643_v61, %v11601_v34 }
 0x6b3   : > { %v11517_v46 = vadd.f32 %v11516_v5, %v11474_v35 }
 0x6b4   : > { %v11513_v59 = vadd.f32 %v11512_v6, %v11470_v36  ;;  %v11605_v24 = vadd.f32 %v11604_v25, %v11562_v32  ;;  %v11687_v6 = vadd.f32 %v11686_v37, %v11644_v51 }
 0x6b5   : > { %v11560_v2 = vadd.f32 %v11559_v55, %v11517_v46 }
 0x6b6   : > { %v11556_v41 = vadd.f32 %v11555_v45, %v11513_v59  ;;  %v11648_v5 = vadd.f32 %v11647_v10, %v11605_v24 }
 0x6b7   : > { %v11603_v3 = vadd.f32 %v11602_v43, %v11560_v2 }
 0x6b8   : > { %v11599_v4 = vadd.f32 %v11598_v17, %v11556_v41  ;;  %v11691_v53 = vadd.f32 %v11690_v47, %v11648_v5 }
 0x6b9   : > { %v11646_v11 = vadd.f32 %v11645_v1, %v11603_v3 }
 0x6ba   : > { %v11642_v31 = vadd.f32 %v11641_v52, %v11599_v4 }
 0x6bb   : > { %v11689_v20 = vadd.f32 %v11688_v56, %v11646_v11 }
 0x6bc   : > { %v11685_v19 = vadd.f32 %v11684_v44, %v11642_v31 }
 0x6d0   : > { %v11727_v22 = vpop.f32.mrf.mxu0 }
 0x6d1   : > { %v11770_v33 = vpop.f32.mrf.mxu1  ;;  %v11728_v50 = vadd.f32 %v11727_v22, %v11685_v19 }
 0x6d2   : > { %v11729_v13 = vpop.f32.mrf.mxu0 }
 0x6d3   : > { %v11772_v58 = vpop.f32.mrf.mxu1  ;;  %v11730_v63 = vadd.f32 %v11729_v13, %v11687_v6  ;;  %v11771_v14 = vadd.f32 %v11770_v33, %v11728_v50 }
 0x6d4   : > { %v11731_v42 = vpop.f32.mrf.mxu0 }
 0x6d5   : > { %v11774_v16 = vpop.f32.mrf.mxu1  ;;  %v11732_v57 = vadd.f32 %v11731_v42, %v11689_v20  ;;  %v11773_v38 = vadd.f32 %v11772_v58, %v11730_v63 }
 0x6d6   : > { %v11733_v49 = vpop.f32.mrf.mxu0 }
 0x6d7   : > { %v11776_v29 = vpop.f32.mrf.mxu1  ;;  %v11734_v43 = vadd.f32 %v11733_v49, %v11691_v53  ;;  %v11775_v52 = vadd.f32 %v11774_v16, %v11732_v57 }
 0x6d9   : > { %v11777_v1 = vadd.f32 %v11776_v29, %v11734_v43 }
 0x710   : > { %v11813_v62 = vpop.f32.mrf.mxu0 }
 0x711   : > { %v11856_v60 = vpop.f32.mrf.mxu1  ;;  %v11814_v25 = vadd.f32 %v11813_v62, %v11771_v14 }
 0x712   : > { %v11815_v45 = vpop.f32.mrf.mxu0 }
 0x713   : > { %v11858_v55 = vpop.f32.mrf.mxu1  ;;  %v11816_v0 = vadd.f32 %v11815_v45, %v11773_v38  ;;  %v11857_v54 = vadd.f32 %v11856_v60, %v11814_v25 }
 0x714   : > { %v11817_v17 = vpop.f32.mrf.mxu0 }
 0x715   : > { %v11860_v61 = vpop.f32.mrf.mxu1  ;;  %v11818_v37 = vadd.f32 %v11817_v17, %v11775_v52  ;;  %v11859_v7 = vadd.f32 %v11858_v55, %v11816_v0 }
 0x716   : > { %v11819_v9 = vpop.f32.mrf.mxu0 }
 0x717   : > { %v11862_v48 = vpop.f32.mrf.mxu1  ;;  %v11820_v56 = vadd.f32 %v11819_v9, %v11777_v1  ;;  %v11861_v10 = vadd.f32 %v11860_v61, %v11818_v37 }
 0x719   : > { %v11863_v22 = vadd.f32 %v11862_v48, %v11820_v56 }
 0x750   : > { %v11899_v44 = vpop.f32.mrf.mxu0 }
 0x751   : > { %v11942_v39 = vpop.f32.mrf.mxu1  ;;  %v11900_v47 = vadd.f32 %v11899_v44, %v11857_v54 }
 0x752   : > { %v11901_v40 = vpop.f32.mrf.mxu0 }
 0x753   : > { %v11902_v15 = vadd.f32 %v11901_v40, %v11859_v7  ;;  %v11944_v18 = vpop.f32.mrf.mxu1  ;;  %v11943_v13 = vadd.f32 %v11942_v39, %v11900_v47 }
 0x754   : > { %v11903_v21 = vpop.f32.mrf.mxu0 }
 0x755   : > { %v11904_v8 = vadd.f32 %v11903_v21, %v11861_v10  ;;  %v11946_v26 = vpop.f32.mrf.mxu1  ;;  %v11945_v36 = vadd.f32 %v11944_v18, %v11902_v15  ;;  %v11953_v12 = vmax.f32 %v11943_v13, 0.0 }
 0x756   : > { %v11905_v33 = vpop.f32.mrf.mxu0 }
 0x757   : > { %v11947_v27 = vadd.f32 %v11946_v26, %v11904_v8  ;;  %v11906_v35 = vadd.f32 %v11905_v33, %v11863_v22  ;;  %v11948_v28 = vpop.f32.mrf.mxu1  ;;  %v11954_v59 = vmax.f32 %v11945_v36, 0.0 }
 0x759   : > { %v11949_v23 = vadd.f32 %v11948_v28, %v11906_v35  ;;  %v11957_v58 = vmax.f32 %v11947_v27, 0.0 }
 0x75b   : > { %v11958_v46 = vmax.f32 %v11949_v23, 0.0  ;;  %v11961_v42 = vpack.c.bf16 %v11957_v58, %v11953_v12 }
 0x75d   : > { %v11962_v41 = vpack.c.bf16 %v11958_v46, %v11954_v59 }
 0x75f   : > { %12292 = vmatprep.mubr.bf16.mxu1 %v11962_v41 }
 0x760   : > { %12293 = vmatmul.mubr.bf16.vlgmr.msra.gmra.mxu1 %v11961_v42 }
 0x770   : > { %v14043_v30 = vpop.f32.mrf.mxu0 }
 0x772   : > { %v14044_v2 = vpop.f32.mrf.mxu0 }
 0x773   : > { %v14045_v4 = vadd.f32 %v14044_v2, %v14043_v30 }
 0x774   : > { %v14046_v16 = vpop.f32.mrf.mxu0 }
 0x776   : > { %v14047_v3 = vpop.f32.mrf.mxu0 }
 0x777   : > { %v14048_v62 = vadd.f32 %v14047_v3, %v14046_v16 }
 0x820   : > { %v14065_v34 = vpop.f32.mrf.mxu1 }
 0x822   : > { %v14066_v32 = vpop.f32.mrf.mxu1 }
 0x823   : > { %v14067_v49 = vadd.f32 %v14066_v32, %v14065_v34 }
 0x824   : > { %v14068_v51 = vpop.f32.mrf.mxu1 }
 0x825   : > { %v12295_v29 = vadd.f32 %v14067_v49, %v14045_v4 }
 0x826   : > { %v14069_v31 = vpop.f32.mrf.mxu1 }
 0x827   : > { %12301 = vst [vmem:[%s371_s7] sm:$0xff] %v12295_v29  ;;  %v14070_v24 = vadd.f32 %v14069_v31, %v14068_v51 }
 0x829   : > { %v12298_v11 = vadd.f32 %v14070_v24, %v14048_v62 }
 0x82b   : > { %12302 = vst [vmem:[%s371_s7 + $0x8] sm:$0xff] %v12298_v11 }
 0x82c PF: > { %s17854_s25 = sld [smem:[#allocation12_spill]]  ;;  %p15_p3 = scmp.ge.s32.totalorder %s15977_s26, 10  }
 0x82d   : > { %s17855_s23 = sld [smem:[#allocation13_spill]]  ;;  %s17856_s21 = smov %s15899_s22 }
 0x82e   : > { %s17858_s24 = smov %s15977_s26  ;;  %17 = sbr.rel (!%p15_p3) target bundleno = 6 (0x6), region = 113 }
 0x832   : > { %s17857_s22 = smov %s17854_s25 }
 0x833   :  { %12324 = vsyncpa [#allocation3], 1 }
 0x834   :  { %12326 = vsyncpa [#allocation3 + $0x1], 1 }
 0x835   :  { %12327 = vsyncpa [#allocation5], 1 }

</bundles_post_ra>
